<compile_context>
chip_gen: v7x
topology: tpu7x:2x2x1
jax: 0.10.0
libtpu: 0.0.40
codegen_flags: <defaults>
</compile_context>

<pallas_src>
import functools

import jax
import jax.numpy as jnp
from jax import lax
from jax.experimental import pallas as pl
from jax.experimental.pallas import tpu as pltpu


def _encoder_block_kernel(x_ref, w1_ref, g1_ref, bb1_ref,
                          w2_ref, g2_ref, bb2_ref,
                          o_ref, y1p_ref, *, N, H, W, C_IN, C_OUT, EPS):
    M = N * H * W                      # rows of the flattened conv matmuls
    inv_cnt = 1.0 / float(M)

    def conv3x3(window_fn, w_ref, cin):
        # 3x3 / stride-1 conv on a zero-padded input: 9 un-batched 2-D MXU
        # matmuls (one per tap), accumulated.  window_fn(ky,kx) -> (N,H,W,cin).
        acc = None
        for k in range(9):
            ky, kx = divmod(k, 3)
            win = window_fn(ky, kx).reshape(M, cin)          # (M, cin)
            part = jnp.dot(win, w_ref[k],                    # (cin, C_OUT)
                           preferred_element_type=jnp.float32)
            acc = part if acc is None else acc + part
        return acc                                           # (M, C_OUT)

    def bn_relu(y, gamma, beta):
        # Training-mode BatchNorm2d (biased stats over N,H,W) fused with ReLU.
        # One pass producing per-channel sum and sum-of-squares, then a single
        # per-channel scale/shift applied to y.
        s = jnp.sum(y, axis=0, keepdims=True)                # (1, C)
        ss = jnp.sum(y * y, axis=0, keepdims=True)           # (1, C)
        mean = s * inv_cnt
        var = ss * inv_cnt - mean * mean
        scale = gamma * lax.rsqrt(var + EPS)                 # (1, C)
        shift = beta - mean * scale
        return jnp.maximum(y * scale + shift, 0.0)

    # ---- conv1 -> BN1 -> ReLU ----
    def win1(ky, kx):
        return x_ref[:, ky:ky + H, kx:kx + W, :]             # (N, H, W, C_IN)

    y1 = bn_relu(conv3x3(win1, w1_ref, C_IN), g1_ref[...], bb1_ref[...])

    # Stash zero-padded intermediate in VMEM scratch for the second conv.
    # Only the 1-pixel halo is zeroed (interior is fully overwritten).
    zrow = jnp.zeros((N, 1, W + 2, C_OUT), jnp.float32)
    zcol = jnp.zeros((N, H + 2, 1, C_OUT), jnp.float32)
    y1p_ref[:, 0:1, :, :] = zrow
    y1p_ref[:, H + 1:H + 2, :, :] = zrow
    y1p_ref[:, :, 0:1, :] = zcol
    y1p_ref[:, :, W + 1:W + 2, :] = zcol
    y1p_ref[:, 1:H + 1, 1:W + 1, :] = y1.reshape(N, H, W, C_OUT)

    # ---- conv2 -> BN2 -> ReLU ----
    def win2(ky, kx):
        return y1p_ref[:, ky:ky + H, kx:kx + W, :]           # (N, H, W, C_OUT)

    y2 = bn_relu(conv3x3(win2, w2_ref, C_OUT), g2_ref[...], bb2_ref[...])

    o_ref[...] = y2.reshape(N, H, W, C_OUT)


def encoder_block(x_nchw, params, eps=1e-5):
    """Pallas implementation of _EncoderBlock.forward. Input/output are NCHW."""
    (w1, b1, g1, bb1, w2, b2, g2, bb2) = params
    # Conv bias added immediately before training-mode BN is cancelled exactly
    # by the mean subtraction -> not passed to the kernel.
    del b1, b2
    n, c_in, h, w = x_nchw.shape
    c_out = w1.shape[-1]

    x = jnp.transpose(x_nchw, (0, 2, 3, 1)).astype(jnp.float32)   # NHWC
    x_pad = jnp.pad(x, ((0, 0), (1, 1), (1, 1), (0, 0)))          # pad H/W by 1

    def chan(v):  # per-channel params -> (1, C) for (M, C) broadcasting
        return v.reshape(1, -1).astype(jnp.float32)

    kernel = functools.partial(_encoder_block_kernel, N=n, H=h, W=w,
                               C_IN=c_in, C_OUT=c_out, EPS=eps)

    vmem = pl.BlockSpec(memory_space=pltpu.MemorySpace.VMEM)
    out_nhwc = pl.pallas_call(
        kernel,
        out_shape=jax.ShapeDtypeStruct((n, h, w, c_out), jnp.float32),
        in_specs=[vmem] * 7,
        out_specs=vmem,
        scratch_shapes=[pltpu.VMEM((n, h + 2, w + 2, c_out), jnp.float32)],
        compiler_params=pltpu.CompilerParams(vmem_limit_bytes=32 * 1024 * 1024),
    )(x_pad,
      w1.reshape(9, c_in, c_out).astype(jnp.float32),   # HWIO -> (9, cin, cout)
      chan(g1), chan(bb1),
      w2.reshape(9, c_out, c_out).astype(jnp.float32),
      chan(g2), chan(bb2))

    return jnp.transpose(out_nhwc, (0, 3, 1, 2))                  # back to NCHW


def encoder_block_reference(x_nchw, params, eps=1e-5):
    """Pure-JAX reference with identical semantics (for a numeric check)."""
    (w1, b1, g1, bb1, w2, b2, g2, bb2) = params
    x = jnp.transpose(x_nchw, (0, 2, 3, 1)).astype(jnp.float32)

    def conv(x, wgt, b):
        y = lax.conv_general_dilated(
            x, wgt, window_strides=(1, 1), padding=((1, 1), (1, 1)),
            dimension_numbers=("NHWC", "HWIO", "NHWC"))
        return y + b

    def bn_relu(y, g, bb):
        mean = jnp.mean(y, axis=(0, 1, 2), keepdims=True)
        var = jnp.mean((y - mean) ** 2, axis=(0, 1, 2), keepdims=True)
        return jnp.maximum((y - mean) / jnp.sqrt(var + eps) * g + bb, 0.0)

    y = bn_relu(conv(x, w1, b1), g1, bb1)
    y = bn_relu(conv(y, w2, b2), g2, bb2)
    return jnp.transpose(y, (0, 3, 1, 2))


if __name__ == "__main__":
    key = jax.random.PRNGKey(0)
    ks = jax.random.split(key, 9)
    N, C_IN, C_OUT, H, W = 2, 4, 8, 16, 16

    # NCHW input, like the PyTorch module.
    x = jax.random.normal(ks[0], (N, C_IN, H, W), jnp.float32)

    # Deterministic synthetic parameters (conv weights stored HWIO; same
    # cross-correlation semantics as PyTorch's OIHW storage).
    w1 = 0.2 * jax.random.normal(ks[1], (3, 3, C_IN, C_OUT), jnp.float32)
    b1 = 0.1 * jax.random.normal(ks[2], (C_OUT,), jnp.float32)
    g1 = 1.0 + 0.1 * jax.random.normal(ks[3], (C_OUT,), jnp.float32)
    bb1 = 0.1 * jax.random.normal(ks[4], (C_OUT,), jnp.float32)
    w2 = 0.2 * jax.random.normal(ks[5], (3, 3, C_OUT, C_OUT), jnp.float32)
    b2 = 0.1 * jax.random.normal(ks[6], (C_OUT,), jnp.float32)
    g2 = 1.0 + 0.1 * jax.random.normal(ks[7], (C_OUT,), jnp.float32)
    bb2 = 0.1 * jax.random.normal(ks[8], (C_OUT,), jnp.float32)
    params = (w1, b1, g1, bb1, w2, b2, g2, bb2)

    out = jax.block_until_ready(encoder_block(x, params))
    assert out.shape == (N, C_OUT, H, W), out.shape

    ref = jax.block_until_ready(encoder_block_reference(x, params))
    max_err = float(jnp.max(jnp.abs(out - ref)))
    assert max_err < 5e-2, f"max abs error vs reference: {max_err}"

    print("KERNEL_OK")
</pallas_src>

<mosaic_0001>
module attributes {stable_mosaic.version = 11 : i64} {
  func.func @_encoder_block_kernel(%arg0: memref<2x18x18x4xf32, #tpu.memory_space<vmem>>, %arg1: memref<9x4x8xf32, #tpu.memory_space<vmem>>, %arg2: memref<1x8xf32, #tpu.memory_space<vmem>>, %arg3: memref<1x8xf32, #tpu.memory_space<vmem>>, %arg4: memref<9x8x8xf32, #tpu.memory_space<vmem>>, %arg5: memref<1x8xf32, #tpu.memory_space<vmem>>, %arg6: memref<1x8xf32, #tpu.memory_space<vmem>>, %arg7: memref<2x16x16x8xf32, #tpu.memory_space<vmem>>, %arg8: memref<2x18x18x8xf32, #tpu.memory_space<vmem>>) attributes {dimension_semantics = [], scalar_prefetch = 0 : i64, scratch_operands = 1 : i64, tpu.core_type = #tpu.core_type<tc>} {
    %c0 = arith.constant 0 : index
    %c0_0 = arith.constant 0 : index
    %c0_1 = arith.constant 0 : index
    %c0_2 = arith.constant 0 : index
    %0 = vector.load %arg0[%c0, %c0_0, %c0_1, %c0_2] : memref<2x18x18x4xf32, #tpu.memory_space<vmem>>, vector<2x16x16x4xf32>
    %1 = vector.shape_cast %0 : vector<2x16x16x4xf32> to vector<512x4xf32>
    %c0_3 = arith.constant 0 : index
    %c0_4 = arith.constant 0 : index
    %c0_5 = arith.constant 0 : index
    %2 = vector.load %arg1[%c0_3, %c0_4, %c0_5] : memref<9x4x8xf32, #tpu.memory_space<vmem>>, vector<1x4x8xf32>
    %3 = vector.shape_cast %2 : vector<1x4x8xf32> to vector<4x8xf32>
    %cst = arith.constant dense<0.000000e+00> : vector<512x8xf32>
    %4 = tpu.matmul %1, %3, %cst {dimension_numbers = #tpu.dot_dimension_numbers<[1], [0], [0], [1], [0, 0, 1, 1], [], []>} : vector<512x4xf32>, vector<4x8xf32>, vector<512x8xf32> -> vector<512x8xf32>
    %c0_6 = arith.constant 0 : index
    %c0_7 = arith.constant 0 : index
    %c1 = arith.constant 1 : index
    %c0_8 = arith.constant 0 : index
    %5 = vector.load %arg0[%c0_6, %c0_7, %c1, %c0_8] : memref<2x18x18x4xf32, #tpu.memory_space<vmem>>, vector<2x16x16x4xf32>
    %6 = vector.shape_cast %5 : vector<2x16x16x4xf32> to vector<512x4xf32>
    %c1_9 = arith.constant 1 : index
    %c0_10 = arith.constant 0 : index
    %c0_11 = arith.constant 0 : index
    %7 = vector.load %arg1[%c1_9, %c0_10, %c0_11] : memref<9x4x8xf32, #tpu.memory_space<vmem>>, vector<1x4x8xf32>
    %8 = vector.shape_cast %7 : vector<1x4x8xf32> to vector<4x8xf32>
    %cst_12 = arith.constant dense<0.000000e+00> : vector<512x8xf32>
    %9 = tpu.matmul %6, %8, %cst_12 {dimension_numbers = #tpu.dot_dimension_numbers<[1], [0], [0], [1], [0, 0, 1, 1], [], []>} : vector<512x4xf32>, vector<4x8xf32>, vector<512x8xf32> -> vector<512x8xf32>
    %10 = arith.addf %4, %9 : vector<512x8xf32>
    %c0_13 = arith.constant 0 : index
    %c0_14 = arith.constant 0 : index
    %c2 = arith.constant 2 : index
    %c0_15 = arith.constant 0 : index
    %11 = vector.load %arg0[%c0_13, %c0_14, %c2, %c0_15] : memref<2x18x18x4xf32, #tpu.memory_space<vmem>>, vector<2x16x16x4xf32>
    %12 = vector.shape_cast %11 : vector<2x16x16x4xf32> to vector<512x4xf32>
    %c2_16 = arith.constant 2 : index
    %c0_17 = arith.constant 0 : index
    %c0_18 = arith.constant 0 : index
    %13 = vector.load %arg1[%c2_16, %c0_17, %c0_18] : memref<9x4x8xf32, #tpu.memory_space<vmem>>, vector<1x4x8xf32>
    %14 = vector.shape_cast %13 : vector<1x4x8xf32> to vector<4x8xf32>
    %cst_19 = arith.constant dense<0.000000e+00> : vector<512x8xf32>
    %15 = tpu.matmul %12, %14, %cst_19 {dimension_numbers = #tpu.dot_dimension_numbers<[1], [0], [0], [1], [0, 0, 1, 1], [], []>} : vector<512x4xf32>, vector<4x8xf32>, vector<512x8xf32> -> vector<512x8xf32>
    %16 = arith.addf %10, %15 : vector<512x8xf32>
    %c0_20 = arith.constant 0 : index
    %c1_21 = arith.constant 1 : index
    %c0_22 = arith.constant 0 : index
    %c0_23 = arith.constant 0 : index
    %17 = vector.load %arg0[%c0_20, %c1_21, %c0_22, %c0_23] : memref<2x18x18x4xf32, #tpu.memory_space<vmem>>, vector<2x16x16x4xf32>
    %18 = vector.shape_cast %17 : vector<2x16x16x4xf32> to vector<512x4xf32>
    %c3 = arith.constant 3 : index
    %c0_24 = arith.constant 0 : index
    %c0_25 = arith.constant 0 : index
    %19 = vector.load %arg1[%c3, %c0_24, %c0_25] : memref<9x4x8xf32, #tpu.memory_space<vmem>>, vector<1x4x8xf32>
    %20 = vector.shape_cast %19 : vector<1x4x8xf32> to vector<4x8xf32>
    %cst_26 = arith.constant dense<0.000000e+00> : vector<512x8xf32>
    %21 = tpu.matmul %18, %20, %cst_26 {dimension_numbers = #tpu.dot_dimension_numbers<[1], [0], [0], [1], [0, 0, 1, 1], [], []>} : vector<512x4xf32>, vector<4x8xf32>, vector<512x8xf32> -> vector<512x8xf32>
    %22 = arith.addf %16, %21 : vector<512x8xf32>
    %c0_27 = arith.constant 0 : index
    %c1_28 = arith.constant 1 : index
    %c1_29 = arith.constant 1 : index
    %c0_30 = arith.constant 0 : index
    %23 = vector.load %arg0[%c0_27, %c1_28, %c1_29, %c0_30] : memref<2x18x18x4xf32, #tpu.memory_space<vmem>>, vector<2x16x16x4xf32>
    %24 = vector.shape_cast %23 : vector<2x16x16x4xf32> to vector<512x4xf32>
    %c4 = arith.constant 4 : index
    %c0_31 = arith.constant 0 : index
    %c0_32 = arith.constant 0 : index
    %25 = vector.load %arg1[%c4, %c0_31, %c0_32] : memref<9x4x8xf32, #tpu.memory_space<vmem>>, vector<1x4x8xf32>
    %26 = vector.shape_cast %25 : vector<1x4x8xf32> to vector<4x8xf32>
    %cst_33 = arith.constant dense<0.000000e+00> : vector<512x8xf32>
    %27 = tpu.matmul %24, %26, %cst_33 {dimension_numbers = #tpu.dot_dimension_numbers<[1], [0], [0], [1], [0, 0, 1, 1], [], []>} : vector<512x4xf32>, vector<4x8xf32>, vector<512x8xf32> -> vector<512x8xf32>
    %28 = arith.addf %22, %27 : vector<512x8xf32>
    %c0_34 = arith.constant 0 : index
    %c1_35 = arith.constant 1 : index
    %c2_36 = arith.constant 2 : index
    %c0_37 = arith.constant 0 : index
    %29 = vector.load %arg0[%c0_34, %c1_35, %c2_36, %c0_37] : memref<2x18x18x4xf32, #tpu.memory_space<vmem>>, vector<2x16x16x4xf32>
    %30 = vector.shape_cast %29 : vector<2x16x16x4xf32> to vector<512x4xf32>
    %c5 = arith.constant 5 : index
    %c0_38 = arith.constant 0 : index
    %c0_39 = arith.constant 0 : index
    %31 = vector.load %arg1[%c5, %c0_38, %c0_39] : memref<9x4x8xf32, #tpu.memory_space<vmem>>, vector<1x4x8xf32>
    %32 = vector.shape_cast %31 : vector<1x4x8xf32> to vector<4x8xf32>
    %cst_40 = arith.constant dense<0.000000e+00> : vector<512x8xf32>
    %33 = tpu.matmul %30, %32, %cst_40 {dimension_numbers = #tpu.dot_dimension_numbers<[1], [0], [0], [1], [0, 0, 1, 1], [], []>} : vector<512x4xf32>, vector<4x8xf32>, vector<512x8xf32> -> vector<512x8xf32>
    %34 = arith.addf %28, %33 : vector<512x8xf32>
    %c0_41 = arith.constant 0 : index
    %c2_42 = arith.constant 2 : index
    %c0_43 = arith.constant 0 : index
    %c0_44 = arith.constant 0 : index
    %35 = vector.load %arg0[%c0_41, %c2_42, %c0_43, %c0_44] : memref<2x18x18x4xf32, #tpu.memory_space<vmem>>, vector<2x16x16x4xf32>
    %36 = vector.shape_cast %35 : vector<2x16x16x4xf32> to vector<512x4xf32>
    %c6 = arith.constant 6 : index
    %c0_45 = arith.constant 0 : index
    %c0_46 = arith.constant 0 : index
    %37 = vector.load %arg1[%c6, %c0_45, %c0_46] : memref<9x4x8xf32, #tpu.memory_space<vmem>>, vector<1x4x8xf32>
    %38 = vector.shape_cast %37 : vector<1x4x8xf32> to vector<4x8xf32>
    %cst_47 = arith.constant dense<0.000000e+00> : vector<512x8xf32>
    %39 = tpu.matmul %36, %38, %cst_47 {dimension_numbers = #tpu.dot_dimension_numbers<[1], [0], [0], [1], [0, 0, 1, 1], [], []>} : vector<512x4xf32>, vector<4x8xf32>, vector<512x8xf32> -> vector<512x8xf32>
    %40 = arith.addf %34, %39 : vector<512x8xf32>
    %c0_48 = arith.constant 0 : index
    %c2_49 = arith.constant 2 : index
    %c1_50 = arith.constant 1 : index
    %c0_51 = arith.constant 0 : index
    %41 = vector.load %arg0[%c0_48, %c2_49, %c1_50, %c0_51] : memref<2x18x18x4xf32, #tpu.memory_space<vmem>>, vector<2x16x16x4xf32>
    %42 = vector.shape_cast %41 : vector<2x16x16x4xf32> to vector<512x4xf32>
    %c7 = arith.constant 7 : index
    %c0_52 = arith.constant 0 : index
    %c0_53 = arith.constant 0 : index
    %43 = vector.load %arg1[%c7, %c0_52, %c0_53] : memref<9x4x8xf32, #tpu.memory_space<vmem>>, vector<1x4x8xf32>
    %44 = vector.shape_cast %43 : vector<1x4x8xf32> to vector<4x8xf32>
    %cst_54 = arith.constant dense<0.000000e+00> : vector<512x8xf32>
    %45 = tpu.matmul %42, %44, %cst_54 {dimension_numbers = #tpu.dot_dimension_numbers<[1], [0], [0], [1], [0, 0, 1, 1], [], []>} : vector<512x4xf32>, vector<4x8xf32>, vector<512x8xf32> -> vector<512x8xf32>
    %46 = arith.addf %40, %45 : vector<512x8xf32>
    %c0_55 = arith.constant 0 : index
    %c2_56 = arith.constant 2 : index
    %c2_57 = arith.constant 2 : index
    %c0_58 = arith.constant 0 : index
    %47 = vector.load %arg0[%c0_55, %c2_56, %c2_57, %c0_58] : memref<2x18x18x4xf32, #tpu.memory_space<vmem>>, vector<2x16x16x4xf32>
    %48 = vector.shape_cast %47 : vector<2x16x16x4xf32> to vector<512x4xf32>
    %c8 = arith.constant 8 : index
    %c0_59 = arith.constant 0 : index
    %c0_60 = arith.constant 0 : index
    %49 = vector.load %arg1[%c8, %c0_59, %c0_60] : memref<9x4x8xf32, #tpu.memory_space<vmem>>, vector<1x4x8xf32>
    %50 = vector.shape_cast %49 : vector<1x4x8xf32> to vector<4x8xf32>
    %cst_61 = arith.constant dense<0.000000e+00> : vector<512x8xf32>
    %51 = tpu.matmul %48, %50, %cst_61 {dimension_numbers = #tpu.dot_dimension_numbers<[1], [0], [0], [1], [0, 0, 1, 1], [], []>} : vector<512x4xf32>, vector<4x8xf32>, vector<512x8xf32> -> vector<512x8xf32>
    %52 = arith.addf %46, %51 : vector<512x8xf32>
    %c0_62 = arith.constant 0 : index
    %c0_63 = arith.constant 0 : index
    %53 = vector.load %arg2[%c0_62, %c0_63] : memref<1x8xf32, #tpu.memory_space<vmem>>, vector<1x8xf32>
    %c0_64 = arith.constant 0 : index
    %c0_65 = arith.constant 0 : index
    %54 = vector.load %arg3[%c0_64, %c0_65] : memref<1x8xf32, #tpu.memory_space<vmem>>, vector<1x8xf32>
    %cst_66 = arith.constant dense<0.000000e+00> : vector<8xf32>
    %55 = vector.multi_reduction <add>, %52, %cst_66 [0] : vector<512x8xf32> to vector<8xf32>
    %56 = vector.shape_cast %55 : vector<8xf32> to vector<1x8xf32>
    %57 = arith.mulf %52, %52 : vector<512x8xf32>
    %cst_67 = arith.constant dense<0.000000e+00> : vector<8xf32>
    %58 = vector.multi_reduction <add>, %57, %cst_67 [0] : vector<512x8xf32> to vector<8xf32>
    %59 = vector.shape_cast %58 : vector<8xf32> to vector<1x8xf32>
    %cst_68 = arith.constant 0.001953125 : f32
    %60 = vector.broadcast %cst_68 : f32 to vector<1x8xf32>
    %61 = arith.mulf %56, %60 : vector<1x8xf32>
    %cst_69 = arith.constant 0.001953125 : f32
    %62 = vector.broadcast %cst_69 : f32 to vector<1x8xf32>
    %63 = arith.mulf %59, %62 : vector<1x8xf32>
    %64 = arith.mulf %61, %61 : vector<1x8xf32>
    %65 = arith.subf %63, %64 : vector<1x8xf32>
    %cst_70 = arith.constant 9.99999974E-6 : f32
    %66 = vector.broadcast %cst_70 : f32 to vector<1x8xf32>
    %67 = arith.addf %65, %66 : vector<1x8xf32>
    %68 = math.rsqrt %67 : vector<1x8xf32>
    %69 = arith.mulf %53, %68 : vector<1x8xf32>
    %70 = arith.mulf %61, %69 : vector<1x8xf32>
    %71 = arith.subf %54, %70 : vector<1x8xf32>
    %72 = vector.broadcast %69 : vector<1x8xf32> to vector<512x8xf32>
    %73 = arith.mulf %52, %72 : vector<512x8xf32>
    %74 = vector.broadcast %71 : vector<1x8xf32> to vector<512x8xf32>
    %75 = arith.addf %73, %74 : vector<512x8xf32>
    %cst_71 = arith.constant 0.000000e+00 : f32
    %76 = vector.broadcast %cst_71 : f32 to vector<512x8xf32>
    %77 = arith.maximumf %75, %76 : vector<512x8xf32>
    %cst_72 = arith.constant 0.000000e+00 : f32
    %78 = vector.broadcast %cst_72 : f32 to vector<2x1x18x8xf32>
    %cst_73 = arith.constant 0.000000e+00 : f32
    %79 = vector.broadcast %cst_73 : f32 to vector<2x18x1x8xf32>
    %c0_74 = arith.constant 0 : index
    %c0_75 = arith.constant 0 : index
    %c0_76 = arith.constant 0 : index
    %c0_77 = arith.constant 0 : index
    %80 = vector.load %arg8[%c0_74, %c0_75, %c0_76, %c0_77] : memref<2x18x18x8xf32, #tpu.memory_space<vmem>>, vector<2x1x18x8xf32>
    tpu.vector_store %arg8[%c0_74, %c0_75, %c0_76, %c0_77], %78 {strides = array<i32>} : memref<2x18x18x8xf32, #tpu.memory_space<vmem>>, vector<2x1x18x8xf32>,
    %c0_78 = arith.constant 0 : index
    %c17 = arith.constant 17 : index
    %c0_79 = arith.constant 0 : index
    %c0_80 = arith.constant 0 : index
    %81 = vector.load %arg8[%c0_78, %c17, %c0_79, %c0_80] : memref<2x18x18x8xf32, #tpu.memory_space<vmem>>, vector<2x1x18x8xf32>
    tpu.vector_store %arg8[%c0_78, %c17, %c0_79, %c0_80], %78 {strides = array<i32>} : memref<2x18x18x8xf32, #tpu.memory_space<vmem>>, vector<2x1x18x8xf32>,
    %c0_81 = arith.constant 0 : index
    %c0_82 = arith.constant 0 : index
    %c0_83 = arith.constant 0 : index
    %c0_84 = arith.constant 0 : index
    %82 = vector.load %arg8[%c0_81, %c0_82, %c0_83, %c0_84] : memref<2x18x18x8xf32, #tpu.memory_space<vmem>>, vector<2x18x1x8xf32>
    tpu.vector_store %arg8[%c0_81, %c0_82, %c0_83, %c0_84], %79 {strides = array<i32>} : memref<2x18x18x8xf32, #tpu.memory_space<vmem>>, vector<2x18x1x8xf32>,
    %c0_85 = arith.constant 0 : index
    %c0_86 = arith.constant 0 : index
    %c17_87 = arith.constant 17 : index
    %c0_88 = arith.constant 0 : index
    %83 = vector.load %arg8[%c0_85, %c0_86, %c17_87, %c0_88] : memref<2x18x18x8xf32, #tpu.memory_space<vmem>>, vector<2x18x1x8xf32>
    tpu.vector_store %arg8[%c0_85, %c0_86, %c17_87, %c0_88], %79 {strides = array<i32>} : memref<2x18x18x8xf32, #tpu.memory_space<vmem>>, vector<2x18x1x8xf32>,
    %84 = vector.shape_cast %77 : vector<512x8xf32> to vector<2x16x16x8xf32>
    %c0_89 = arith.constant 0 : index
    %c1_90 = arith.constant 1 : index
    %c1_91 = arith.constant 1 : index
    %c0_92 = arith.constant 0 : index
    %85 = vector.load %arg8[%c0_89, %c1_90, %c1_91, %c0_92] : memref<2x18x18x8xf32, #tpu.memory_space<vmem>>, vector<2x16x16x8xf32>
    tpu.vector_store %arg8[%c0_89, %c1_90, %c1_91, %c0_92], %84 {strides = array<i32>} : memref<2x18x18x8xf32, #tpu.memory_space<vmem>>, vector<2x16x16x8xf32>,
    %c0_93 = arith.constant 0 : index
    %c0_94 = arith.constant 0 : index
    %c0_95 = arith.constant 0 : index
    %c0_96 = arith.constant 0 : index
    %86 = vector.load %arg8[%c0_93, %c0_94, %c0_95, %c0_96] : memref<2x18x18x8xf32, #tpu.memory_space<vmem>>, vector<2x16x16x8xf32>
    %87 = vector.shape_cast %86 : vector<2x16x16x8xf32> to vector<512x8xf32>
    %c0_97 = arith.constant 0 : index
    %c0_98 = arith.constant 0 : index
    %c0_99 = arith.constant 0 : index
    %88 = vector.load %arg4[%c0_97, %c0_98, %c0_99] : memref<9x8x8xf32, #tpu.memory_space<vmem>>, vector<1x8x8xf32>
    %89 = vector.shape_cast %88 : vector<1x8x8xf32> to vector<8x8xf32>
    %cst_100 = arith.constant dense<0.000000e+00> : vector<512x8xf32>
    %90 = tpu.matmul %87, %89, %cst_100 {dimension_numbers = #tpu.dot_dimension_numbers<[1], [0], [0], [1], [0, 0, 1, 1], [], []>} : vector<512x8xf32>, vector<8x8xf32>, vector<512x8xf32> -> vector<512x8xf32>
    %c0_101 = arith.constant 0 : index
    %c0_102 = arith.constant 0 : index
    %c1_103 = arith.constant 1 : index
    %c0_104 = arith.constant 0 : index
    %91 = vector.load %arg8[%c0_101, %c0_102, %c1_103, %c0_104] : memref<2x18x18x8xf32, #tpu.memory_space<vmem>>, vector<2x16x16x8xf32>
    %92 = vector.shape_cast %91 : vector<2x16x16x8xf32> to vector<512x8xf32>
    %c1_105 = arith.constant 1 : index
    %c0_106 = arith.constant 0 : index
    %c0_107 = arith.constant 0 : index
    %93 = vector.load %arg4[%c1_105, %c0_106, %c0_107] : memref<9x8x8xf32, #tpu.memory_space<vmem>>, vector<1x8x8xf32>
    %94 = vector.shape_cast %93 : vector<1x8x8xf32> to vector<8x8xf32>
    %cst_108 = arith.constant dense<0.000000e+00> : vector<512x8xf32>
    %95 = tpu.matmul %92, %94, %cst_108 {dimension_numbers = #tpu.dot_dimension_numbers<[1], [0], [0], [1], [0, 0, 1, 1], [], []>} : vector<512x8xf32>, vector<8x8xf32>, vector<512x8xf32> -> vector<512x8xf32>
    %96 = arith.addf %90, %95 : vector<512x8xf32>
    %c0_109 = arith.constant 0 : index
    %c0_110 = arith.constant 0 : index
    %c2_111 = arith.constant 2 : index
    %c0_112 = arith.constant 0 : index
    %97 = vector.load %arg8[%c0_109, %c0_110, %c2_111, %c0_112] : memref<2x18x18x8xf32, #tpu.memory_space<vmem>>, vector<2x16x16x8xf32>
    %98 = vector.shape_cast %97 : vector<2x16x16x8xf32> to vector<512x8xf32>
    %c2_113 = arith.constant 2 : index
    %c0_114 = arith.constant 0 : index
    %c0_115 = arith.constant 0 : index
    %99 = vector.load %arg4[%c2_113, %c0_114, %c0_115] : memref<9x8x8xf32, #tpu.memory_space<vmem>>, vector<1x8x8xf32>
    %100 = vector.shape_cast %99 : vector<1x8x8xf32> to vector<8x8xf32>
    %cst_116 = arith.constant dense<0.000000e+00> : vector<512x8xf32>
    %101 = tpu.matmul %98, %100, %cst_116 {dimension_numbers = #tpu.dot_dimension_numbers<[1], [0], [0], [1], [0, 0, 1, 1], [], []>} : vector<512x8xf32>, vector<8x8xf32>, vector<512x8xf32> -> vector<512x8xf32>
    %102 = arith.addf %96, %101 : vector<512x8xf32>
    %c0_117 = arith.constant 0 : index
    %c1_118 = arith.constant 1 : index
    %c0_119 = arith.constant 0 : index
    %c0_120 = arith.constant 0 : index
    %103 = vector.load %arg8[%c0_117, %c1_118, %c0_119, %c0_120] : memref<2x18x18x8xf32, #tpu.memory_space<vmem>>, vector<2x16x16x8xf32>
    %104 = vector.shape_cast %103 : vector<2x16x16x8xf32> to vector<512x8xf32>
    %c3_121 = arith.constant 3 : index
    %c0_122 = arith.constant 0 : index
    %c0_123 = arith.constant 0 : index
    %105 = vector.load %arg4[%c3_121, %c0_122, %c0_123] : memref<9x8x8xf32, #tpu.memory_space<vmem>>, vector<1x8x8xf32>
    %106 = vector.shape_cast %105 : vector<1x8x8xf32> to vector<8x8xf32>
    %cst_124 = arith.constant dense<0.000000e+00> : vector<512x8xf32>
    %107 = tpu.matmul %104, %106, %cst_124 {dimension_numbers = #tpu.dot_dimension_numbers<[1], [0], [0], [1], [0, 0, 1, 1], [], []>} : vector<512x8xf32>, vector<8x8xf32>, vector<512x8xf32> -> vector<512x8xf32>
    %108 = arith.addf %102, %107 : vector<512x8xf32>
    %c0_125 = arith.constant 0 : index
    %c1_126 = arith.constant 1 : index
    %c1_127 = arith.constant 1 : index
    %c0_128 = arith.constant 0 : index
    %109 = vector.load %arg8[%c0_125, %c1_126, %c1_127, %c0_128] : memref<2x18x18x8xf32, #tpu.memory_space<vmem>>, vector<2x16x16x8xf32>
    %110 = vector.shape_cast %109 : vector<2x16x16x8xf32> to vector<512x8xf32>
    %c4_129 = arith.constant 4 : index
    %c0_130 = arith.constant 0 : index
    %c0_131 = arith.constant 0 : index
    %111 = vector.load %arg4[%c4_129, %c0_130, %c0_131] : memref<9x8x8xf32, #tpu.memory_space<vmem>>, vector<1x8x8xf32>
    %112 = vector.shape_cast %111 : vector<1x8x8xf32> to vector<8x8xf32>
    %cst_132 = arith.constant dense<0.000000e+00> : vector<512x8xf32>
    %113 = tpu.matmul %110, %112, %cst_132 {dimension_numbers = #tpu.dot_dimension_numbers<[1], [0], [0], [1], [0, 0, 1, 1], [], []>} : vector<512x8xf32>, vector<8x8xf32>, vector<512x8xf32> -> vector<512x8xf32>
    %114 = arith.addf %108, %113 : vector<512x8xf32>
    %c0_133 = arith.constant 0 : index
    %c1_134 = arith.constant 1 : index
    %c2_135 = arith.constant 2 : index
    %c0_136 = arith.constant 0 : index
    %115 = vector.load %arg8[%c0_133, %c1_134, %c2_135, %c0_136] : memref<2x18x18x8xf32, #tpu.memory_space<vmem>>, vector<2x16x16x8xf32>
    %116 = vector.shape_cast %115 : vector<2x16x16x8xf32> to vector<512x8xf32>
    %c5_137 = arith.constant 5 : index
    %c0_138 = arith.constant 0 : index
    %c0_139 = arith.constant 0 : index
    %117 = vector.load %arg4[%c5_137, %c0_138, %c0_139] : memref<9x8x8xf32, #tpu.memory_space<vmem>>, vector<1x8x8xf32>
    %118 = vector.shape_cast %117 : vector<1x8x8xf32> to vector<8x8xf32>
    %cst_140 = arith.constant dense<0.000000e+00> : vector<512x8xf32>
    %119 = tpu.matmul %116, %118, %cst_140 {dimension_numbers = #tpu.dot_dimension_numbers<[1], [0], [0], [1], [0, 0, 1, 1], [], []>} : vector<512x8xf32>, vector<8x8xf32>, vector<512x8xf32> -> vector<512x8xf32>
    %120 = arith.addf %114, %119 : vector<512x8xf32>
    %c0_141 = arith.constant 0 : index
    %c2_142 = arith.constant 2 : index
    %c0_143 = arith.constant 0 : index
    %c0_144 = arith.constant 0 : index
    %121 = vector.load %arg8[%c0_141, %c2_142, %c0_143, %c0_144] : memref<2x18x18x8xf32, #tpu.memory_space<vmem>>, vector<2x16x16x8xf32>
    %122 = vector.shape_cast %121 : vector<2x16x16x8xf32> to vector<512x8xf32>
    %c6_145 = arith.constant 6 : index
    %c0_146 = arith.constant 0 : index
    %c0_147 = arith.constant 0 : index
    %123 = vector.load %arg4[%c6_145, %c0_146, %c0_147] : memref<9x8x8xf32, #tpu.memory_space<vmem>>, vector<1x8x8xf32>
    %124 = vector.shape_cast %123 : vector<1x8x8xf32> to vector<8x8xf32>
    %cst_148 = arith.constant dense<0.000000e+00> : vector<512x8xf32>
    %125 = tpu.matmul %122, %124, %cst_148 {dimension_numbers = #tpu.dot_dimension_numbers<[1], [0], [0], [1], [0, 0, 1, 1], [], []>} : vector<512x8xf32>, vector<8x8xf32>, vector<512x8xf32> -> vector<512x8xf32>
    %126 = arith.addf %120, %125 : vector<512x8xf32>
    %c0_149 = arith.constant 0 : index
    %c2_150 = arith.constant 2 : index
    %c1_151 = arith.constant 1 : index
    %c0_152 = arith.constant 0 : index
    %127 = vector.load %arg8[%c0_149, %c2_150, %c1_151, %c0_152] : memref<2x18x18x8xf32, #tpu.memory_space<vmem>>, vector<2x16x16x8xf32>
    %128 = vector.shape_cast %127 : vector<2x16x16x8xf32> to vector<512x8xf32>
    %c7_153 = arith.constant 7 : index
    %c0_154 = arith.constant 0 : index
    %c0_155 = arith.constant 0 : index
    %129 = vector.load %arg4[%c7_153, %c0_154, %c0_155] : memref<9x8x8xf32, #tpu.memory_space<vmem>>, vector<1x8x8xf32>
    %130 = vector.shape_cast %129 : vector<1x8x8xf32> to vector<8x8xf32>
    %cst_156 = arith.constant dense<0.000000e+00> : vector<512x8xf32>
    %131 = tpu.matmul %128, %130, %cst_156 {dimension_numbers = #tpu.dot_dimension_numbers<[1], [0], [0], [1], [0, 0, 1, 1], [], []>} : vector<512x8xf32>, vector<8x8xf32>, vector<512x8xf32> -> vector<512x8xf32>
    %132 = arith.addf %126, %131 : vector<512x8xf32>
    %c0_157 = arith.constant 0 : index
    %c2_158 = arith.constant 2 : index
    %c2_159 = arith.constant 2 : index
    %c0_160 = arith.constant 0 : index
    %133 = vector.load %arg8[%c0_157, %c2_158, %c2_159, %c0_160] : memref<2x18x18x8xf32, #tpu.memory_space<vmem>>, vector<2x16x16x8xf32>
    %134 = vector.shape_cast %133 : vector<2x16x16x8xf32> to vector<512x8xf32>
    %c8_161 = arith.constant 8 : index
    %c0_162 = arith.constant 0 : index
    %c0_163 = arith.constant 0 : index
    %135 = vector.load %arg4[%c8_161, %c0_162, %c0_163] : memref<9x8x8xf32, #tpu.memory_space<vmem>>, vector<1x8x8xf32>
    %136 = vector.shape_cast %135 : vector<1x8x8xf32> to vector<8x8xf32>
    %cst_164 = arith.constant dense<0.000000e+00> : vector<512x8xf32>
    %137 = tpu.matmul %134, %136, %cst_164 {dimension_numbers = #tpu.dot_dimension_numbers<[1], [0], [0], [1], [0, 0, 1, 1], [], []>} : vector<512x8xf32>, vector<8x8xf32>, vector<512x8xf32> -> vector<512x8xf32>
    %138 = arith.addf %132, %137 : vector<512x8xf32>
    %c0_165 = arith.constant 0 : index
    %c0_166 = arith.constant 0 : index
    %139 = vector.load %arg5[%c0_165, %c0_166] : memref<1x8xf32, #tpu.memory_space<vmem>>, vector<1x8xf32>
    %c0_167 = arith.constant 0 : index
    %c0_168 = arith.constant 0 : index
    %140 = vector.load %arg6[%c0_167, %c0_168] : memref<1x8xf32, #tpu.memory_space<vmem>>, vector<1x8xf32>
    %cst_169 = arith.constant dense<0.000000e+00> : vector<8xf32>
    %141 = vector.multi_reduction <add>, %138, %cst_169 [0] : vector<512x8xf32> to vector<8xf32>
    %142 = vector.shape_cast %141 : vector<8xf32> to vector<1x8xf32>
    %143 = arith.mulf %138, %138 : vector<512x8xf32>
    %cst_170 = arith.constant dense<0.000000e+00> : vector<8xf32>
    %144 = vector.multi_reduction <add>, %143, %cst_170 [0] : vector<512x8xf32> to vector<8xf32>
    %145 = vector.shape_cast %144 : vector<8xf32> to vector<1x8xf32>
    %cst_171 = arith.constant 0.001953125 : f32
    %146 = vector.broadcast %cst_171 : f32 to vector<1x8xf32>
    %147 = arith.mulf %142, %146 : vector<1x8xf32>
    %cst_172 = arith.constant 0.001953125 : f32
    %148 = vector.broadcast %cst_172 : f32 to vector<1x8xf32>
    %149 = arith.mulf %145, %148 : vector<1x8xf32>
    %150 = arith.mulf %147, %147 : vector<1x8xf32>
    %151 = arith.subf %149, %150 : vector<1x8xf32>
    %cst_173 = arith.constant 9.99999974E-6 : f32
    %152 = vector.broadcast %cst_173 : f32 to vector<1x8xf32>
    %153 = arith.addf %151, %152 : vector<1x8xf32>
    %154 = math.rsqrt %153 : vector<1x8xf32>
    %155 = arith.mulf %139, %154 : vector<1x8xf32>
    %156 = arith.mulf %147, %155 : vector<1x8xf32>
    %157 = arith.subf %140, %156 : vector<1x8xf32>
    %158 = vector.broadcast %155 : vector<1x8xf32> to vector<512x8xf32>
    %159 = arith.mulf %138, %158 : vector<512x8xf32>
    %160 = vector.broadcast %157 : vector<1x8xf32> to vector<512x8xf32>
    %161 = arith.addf %159, %160 : vector<512x8xf32>
    %cst_174 = arith.constant 0.000000e+00 : f32
    %162 = vector.broadcast %cst_174 : f32 to vector<512x8xf32>
    %163 = arith.maximumf %161, %162 : vector<512x8xf32>
    %164 = vector.shape_cast %163 : vector<512x8xf32> to vector<2x16x16x8xf32>
    %c0_175 = arith.constant 0 : index
    %c0_176 = arith.constant 0 : index
    %c0_177 = arith.constant 0 : index
    %c0_178 = arith.constant 0 : index
    %165 = vector.load %arg7[%c0_175, %c0_176, %c0_177, %c0_178] : memref<2x16x16x8xf32, #tpu.memory_space<vmem>>, vector<2x16x16x8xf32>
    tpu.vector_store %arg7[%c0_175, %c0_176, %c0_177, %c0_178], %164 {strides = array<i32>} : memref<2x16x16x8xf32, #tpu.memory_space<vmem>>, vector<2x16x16x8xf32>,
    return
  }
}

</mosaic_0001>

<bundles_post_ra>
// kernel: tpu_custom_call.1
= control target key start
LH: loop header
LB: loop body
LE: loop exit
PB: predicated region body
PF: predicated region fallthrough
CT: control target
= control target key end

     0   :  { %vm350_vm0 = vcmask 1043456   ;;  %vm157_vm1 = vcmask 31744   ;;  %vm6293_vm2 = vcmask 64512   ;;  %vm6839_vm3 = vcmask 58368   ;;  %s25924_s1 = inlined_call_operand.vmem [shape: f32[9,4,8], index: 1, kind: input, shape index: {}]   ;;  %s25925_s0 = inlined_call_operand.vmem [shape: f32[2,18,18,4], index: 0, kind: input, shape index: {}]   ;;  %s25926_s4 = inlined_call_operand.vmem [shape: f32[9,8,8], index: 4, kind: input, shape index: {}]   ;;  %s25927_s2 = inlined_call_operand.vmem [shape: f32[1,8], index: 2, kind: input, shape index: {}]   ;;  %s25928_s3 = inlined_call_operand.vmem [shape: f32[1,8], index: 3, kind: input, shape index: {}]   ;;  %s25929_s5 = inlined_call_operand.vmem [shape: f32[1,8], index: 5, kind: input, shape index: {}]   ;;  %s25930_s6 = inlined_call_operand.vmem [shape: f32[1,8], index: 6, kind: input, shape index: {}]   ;;  %s25931_s7 = inlined_call_operand.vmem [shape: f32[2,16,16,8], index: 7, kind: output, shape index: {}]  }
   0x1   :  { %v13837_v0 = vld [vmem:[%s25924_s1 + $0x4] sm:$0xf]  ;;  %v92_v2 = vld [vmem:[%s25925_s0 + $0x9] sm:$0xff]  ;;  %v90_v3 = vld [vmem:[%s25924_s1] sm:$0xf]  ;;  %vm6851_vm4 = vcmask 57344  }
   0x2   :  { %v91_v1 = vld [vmem:[%s25925_s0 + $0x1] sm:$0xff]  ;;  %16568 = vmatprep.subr.msk.mxu0 %vm350_vm0, %v13837_v0  ;;  %v93_v4 = vld [vmem:[%s25925_s0 + $0x19] sm:$0xff]  ;;  %v95_v6 = vld [vmem:[%s25925_s0 + $0x31] sm:$0xff] }
   0x3   :  { %16570 = vmatprep.mubr.msk.f32.mxu0 %vm157_vm1, %v91_v1  ;;  %16569 = vmatpush3.msk.msra.mxu0 %vm350_vm0, %v13837_v0  ;;  %v94_v5 = vld [vmem:[%s25925_s0 + $0x21] sm:$0xff]  ;;  %v96_v7 = vld [vmem:[%s25925_s0 + $0x39] sm:$0xff]  ;;  %v97_v8 = vld [vmem:[%s25925_s0 + $0x49] sm:$0xff] }
   0x4   :  { %16571 = vmatmul.mubr.msk.f32.vlgmr.msra.gmra.mrb[0].mxu0 %vm157_vm1, %v92_v2  ;;  %16666 = vmatprep.subr.msk.mxu0 %vm350_vm0, %v90_v3  ;;  %v98_v9 = vld [vmem:[%s25925_s0 + $0x51] sm:$0xff]  ;;  %v99_v10 = vld [vmem:[%s25925_s0 + $0x61] sm:$0xff]  ;;  %v100_v11 = vld [vmem:[%s25925_s0 + $0x69] sm:$0xff] }
   0x5   :  { %16667 = vmatpush3.msk.msra.mxu0 %vm350_vm0, %v90_v3  ;;  %16573 = vmatprep.mubr.msk.f32.mxu0 %vm157_vm1, %v93_v4  ;;  %v101_v12 = vld [vmem:[%s25925_s0 + $0x79] sm:$0xff]  ;;  %v102_v13 = vld [vmem:[%s25925_s0 + $0x81] sm:$0xff]  ;;  %v103_v14 = vld [vmem:[%s25925_s0 + $0x91] sm:$0xff] }
   0x6   :  { %v19465_v15 = vld [vmem:[%s25924_s1 + $0x8] sm:$0xf]  ;;  %v104_v16 = vld [vmem:[%s25925_s0 + $0x99] sm:$0xff]  ;;  %v106_v18 = vld [vmem:[%s25925_s0 + $0xb1] sm:$0xff] }
   0x7   :  { %16764 = vmatprep.subr.msk.mxu0 %vm350_vm0, %v19465_v15  ;;  %v105_v17 = vld [vmem:[%s25925_s0 + $0xa9] sm:$0xff]  ;;  %v107_v19 = vld [vmem:[%s25925_s0 + $0xc1] sm:$0xff]  ;;  %v109_v21 = vld [vmem:[%s25925_s0 + $0xd9] sm:$0xff] }
   0x8   :  { %16574 = vmatmul.mubr.msk.f32.gmra.mrb[2].mxu0 %vm157_vm1, %v94_v5  ;;  %v108_v20 = vld [vmem:[%s25925_s0 + $0xc9] sm:$0xff]  ;;  %v110_v22 = vld [vmem:[%s25925_s0 + $0xe1] sm:$0xff]  ;;  %v111_v23 = vld [vmem:[%s25925_s0 + $0xf1] sm:$0xff] }
   0x9   :  { %16576 = vmatprep.mubr.msk.f32.mxu0 %vm157_vm1, %v95_v6  ;;  %v112_v24 = vld [vmem:[%s25925_s0 + $0xf9] sm:$0xff]  ;;  %v113_v25 = vld [vmem:[%s25925_s0 + $0x109] sm:$0xff]  ;;  %v114_v26 = vld [vmem:[%s25925_s0 + $0x111] sm:$0xff] }
   0xa   :  { %v115_v27 = vld [vmem:[%s25925_s0 + $0x121] sm:$0xff]  ;;  %v116_v28 = vld [vmem:[%s25925_s0 + $0x129] sm:$0xff]  ;;  %v117_v29 = vld [vmem:[%s25925_s0 + $0x139] sm:$0xff] }
   0xb   :  { %v118_v30 = vld [vmem:[%s25925_s0 + $0x141] sm:$0xff]  ;;  %v119_v31 = vld [vmem:[%s25925_s0 + $0x151] sm:$0xff]  ;;  %v120_v32 = vld [vmem:[%s25925_s0 + $0x159] sm:$0xff] }
   0xc   :  { %16577 = vmatmul.mubr.msk.f32.gmra.mrb[4].mxu0 %vm157_vm1, %v96_v7  ;;  %v121_v33 = vld [vmem:[%s25925_s0 + $0x169] sm:$0xff]  ;;  %v122_v34 = vld [vmem:[%s25925_s0 + $0x171] sm:$0xff]  ;;  %v124_v36 = vld [vmem:[%s25925_s0 + $0x1b9] sm:$0xff] }
   0xd   :  { %16579 = vmatprep.mubr.msk.f32.mxu0 %vm157_vm1, %v97_v8  ;;  %v123_v35 = vld [vmem:[%s25925_s0 + $0x1b1] sm:$0xff]  ;;  %v125_v37 = vld [vmem:[%s25925_s0 + $0x1c9] sm:$0xff]  ;;  %v127_v39 = vld [vmem:[%s25925_s0 + $0x1e1] sm:$0xff] }
   0xe   :  { %v126_v38 = vld [vmem:[%s25925_s0 + $0x1d1] sm:$0xff]  ;;  %v128_v40 = vld [vmem:[%s25925_s0 + $0x1e9] sm:$0xff]  ;;  %v129_v41 = vld [vmem:[%s25925_s0 + $0x1f9] sm:$0xff] }
   0xf   :  { %v130_v42 = vld [vmem:[%s25925_s0 + $0x201] sm:$0xff]  ;;  %v131_v43 = vld [vmem:[%s25925_s0 + $0x211] sm:$0xff]  ;;  %v132_v44 = vld [vmem:[%s25925_s0 + $0x219] sm:$0xff] }
  0x10   :  { %16580 = vmatmul.mubr.msk.f32.gmra.mrb[6].mxu0 %vm157_vm1, %v98_v9  ;;  %v133_v45 = vld [vmem:[%s25925_s0 + $0x229] sm:$0xff]  ;;  %v134_v46 = vld [vmem:[%s25925_s0 + $0x231] sm:$0xff]  ;;  %v135_v47 = vld [vmem:[%s25925_s0 + $0x241] sm:$0xff] }
  0x11   :  { %16582 = vmatprep.mubr.msk.f32.mxu0 %vm157_vm1, %v99_v10  ;;  %v136_v48 = vld [vmem:[%s25925_s0 + $0x249] sm:$0xff]  ;;  %v137_v49 = vld [vmem:[%s25925_s0 + $0x259] sm:$0xff]  ;;  %v138_v50 = vld [vmem:[%s25925_s0 + $0x261] sm:$0xff] }
  0x12   :  { %v139_v51 = vld [vmem:[%s25925_s0 + $0x271] sm:$0xff]  ;;  %v140_v52 = vld [vmem:[%s25925_s0 + $0x279] sm:$0xff]  ;;  %v141_v53 = vld [vmem:[%s25925_s0 + $0x289] sm:$0xff] }
  0x13   :  { %v142_v54 = vld [vmem:[%s25925_s0 + $0x291] sm:$0xff]  ;;  %v143_v55 = vld [vmem:[%s25925_s0 + $0x2a1] sm:$0xff]  ;;  %v144_v56 = vld [vmem:[%s25925_s0 + $0x2a9] sm:$0xff] }
  0x14   :  { %16583 = vmatmul.mubr.msk.f32.gmra.mrb[8].mxu0 %vm157_vm1, %v100_v11  ;;  %v145_v57 = vld [vmem:[%s25925_s0 + $0x2b9] sm:$0xff]  ;;  %v146_v58 = vld [vmem:[%s25925_s0 + $0x2c1] sm:$0xff]  ;;  %v147_v59 = vld [vmem:[%s25925_s0 + $0x2d1] sm:$0xff] }
  0x15   :  { %16585 = vmatprep.mubr.msk.f32.mxu0 %vm157_vm1, %v101_v12  ;;  %v148_v60 = vld [vmem:[%s25925_s0 + $0x2d9] sm:$0xff]  ;;  %v149_v61 = vld [vmem:[%s25925_s0 + $0x2e9] sm:$0xff]  ;;  %v150_v62 = vld [vmem:[%s25925_s0 + $0x2f1] sm:$0xff] }
  0x16   :  { %v151_v63 = vld [vmem:[%s25925_s0 + $0x301] sm:$0xff]  ;;  %v152_v0 = vld [vmem:[%s25925_s0 + $0x309] sm:$0xff]  ;;  %v153_v1 = vld [vmem:[%s25925_s0 + $0x319] sm:$0xff] }
  0x17   :  { %v154_v2 = vld [vmem:[%s25925_s0 + $0x321] sm:$0xff]  ;;  %v19685_v5 = vld [vmem:[%s25925_s0 + $0x18] sm:$0xff]  ;;  %v19691_v6 = vld [vmem:[%s25924_s1 + $0xc] sm:$0xf] }
  0x18   :  { %16586 = vmatmul.mubr.msk.f32.gmra.mrb[10].mxu0 %vm157_vm1, %v102_v13  ;;  %v26_v3 = vld [vmem:[%s25925_s0] sm:$0xff]  ;;  %v27_v4 = vld [vmem:[%s25925_s0 + $0x8] sm:$0xff]  ;;  %v19705_v8 = vld [vmem:[%s25925_s0 + $0x30] sm:$0xff] }
  0x19   :  { %16588 = vmatprep.mubr.msk.f32.mxu0 %vm157_vm1, %v103_v14  ;;  %v19700_v7 = vld [vmem:[%s25925_s0 + $0x20] sm:$0xff]  ;;  %v19716_v9 = vld [vmem:[%s25925_s0 + $0x38] sm:$0xff]  ;;  %v19721_v10 = vld [vmem:[%s25925_s0 + $0x48] sm:$0xff] }
  0x1a   :  { %v19730_v11 = vld [vmem:[%s25925_s0 + $0x50] sm:$0xff]  ;;  %v19735_v12 = vld [vmem:[%s25925_s0 + $0x60] sm:$0xff]  ;;  %v19744_v13 = vld [vmem:[%s25925_s0 + $0x68] sm:$0xff] }
  0x1b   :  { %v19749_v14 = vld [vmem:[%s25925_s0 + $0x78] sm:$0xff] }
  0x1c   :  { %16589 = vmatmul.mubr.msk.f32.gmra.mrb[12].mxu0 %vm157_vm1, %v104_v16  ;;  %v19763_v16 = vld [vmem:[%s25925_s0 + $0x90] sm:$0xff] }
  0x1d   :  { %16591 = vmatprep.mubr.msk.f32.mxu0 %vm157_vm1, %v105_v17  ;;  %v19772_v17 = vld [vmem:[%s25925_s0 + $0x98] sm:$0xff] }
  0x20   :  { %16592 = vmatmul.mubr.msk.f32.gmra.mrb[14].mxu0 %vm157_vm1, %v106_v18  ;;  %v19777_v18 = vld [vmem:[%s25925_s0 + $0xa8] sm:$0xff] }
  0x21   :  { %16594 = vmatprep.mubr.msk.f32.mxu0 %vm157_vm1, %v107_v19  ;;  %v19786_v19 = vld [vmem:[%s25925_s0 + $0xb0] sm:$0xff] }
  0x24   :  { %16595 = vmatmul.mubr.msk.f32.gmra.mrb[16].mxu0 %vm157_vm1, %v108_v20  ;;  %v19791_v20 = vld [vmem:[%s25925_s0 + $0xc0] sm:$0xff] }
  0x25   :  { %16597 = vmatprep.mubr.msk.f32.mxu0 %vm157_vm1, %v109_v21  ;;  %v19800_v21 = vld [vmem:[%s25925_s0 + $0xc8] sm:$0xff] }
  0x28   :  { %16598 = vmatmul.mubr.msk.f32.gmra.mrb[18].mxu0 %vm157_vm1, %v110_v22  ;;  %v19805_v22 = vld [vmem:[%s25925_s0 + $0xd8] sm:$0xff] }
  0x29   :  { %16600 = vmatprep.mubr.msk.f32.mxu0 %vm157_vm1, %v111_v23  ;;  %v19814_v23 = vld [vmem:[%s25925_s0 + $0xe0] sm:$0xff] }
  0x2c   :  { %16601 = vmatmul.mubr.msk.f32.gmra.mrb[20].mxu0 %vm157_vm1, %v112_v24  ;;  %v19819_v24 = vld [vmem:[%s25925_s0 + $0xf0] sm:$0xff] }
  0x2d   :  { %16603 = vmatprep.mubr.msk.f32.mxu0 %vm157_vm1, %v113_v25  ;;  %v19828_v25 = vld [vmem:[%s25925_s0 + $0xf8] sm:$0xff] }
  0x30   :  { %16604 = vmatmul.mubr.msk.f32.gmra.mrb[22].mxu0 %vm157_vm1, %v114_v26  ;;  %v19833_v26 = vld [vmem:[%s25925_s0 + $0x108] sm:$0xff] }
  0x31   :  { %16606 = vmatprep.mubr.msk.f32.mxu0 %vm157_vm1, %v115_v27  ;;  %v19842_v27 = vld [vmem:[%s25925_s0 + $0x110] sm:$0xff] }
  0x34   :  { %16607 = vmatmul.mubr.msk.f32.gmra.mrb[24].mxu0 %vm157_vm1, %v116_v28  ;;  %v19847_v28 = vld [vmem:[%s25925_s0 + $0x120] sm:$0xff] }
  0x35   :  { %16609 = vmatprep.mubr.msk.f32.mxu0 %vm157_vm1, %v117_v29  ;;  %v19856_v29 = vld [vmem:[%s25925_s0 + $0x128] sm:$0xff] }
  0x38   :  { %16610 = vmatmul.mubr.msk.f32.gmra.mrb[26].mxu0 %vm157_vm1, %v118_v30  ;;  %v19861_v30 = vld [vmem:[%s25925_s0 + $0x138] sm:$0xff] }
  0x39   :  { %16612 = vmatprep.mubr.msk.f32.mxu0 %vm157_vm1, %v119_v31  ;;  %v19870_v31 = vld [vmem:[%s25925_s0 + $0x140] sm:$0xff] }
  0x3c   :  { %16613 = vmatmul.mubr.msk.f32.gmra.mrb[28].mxu0 %vm157_vm1, %v120_v32  ;;  %v19875_v32 = vld [vmem:[%s25925_s0 + $0x150] sm:$0xff] }
  0x3d   :  { %16615 = vmatprep.mubr.msk.f32.mxu0 %vm157_vm1, %v121_v33  ;;  %v19884_v33 = vld [vmem:[%s25925_s0 + $0x158] sm:$0xff] }
  0x40   :  { %16616 = vmatmul.mubr.msk.f32.gmra.mrb[30].mxu0 %vm157_vm1, %v122_v34  ;;  %v19889_v34 = vld [vmem:[%s25925_s0 + $0x168] sm:$0xff] }
  0x41   :  { %16618 = vmatprep.mubr.msk.f32.mxu0 %vm157_vm1, %v123_v35  ;;  %v19898_v35 = vld [vmem:[%s25925_s0 + $0x170] sm:$0xff] }
  0x44   :  { %16619 = vmatmul.mubr.msk.f32.gmra.mrb[32].mxu0 %vm157_vm1, %v124_v36  ;;  %v58_v36 = vld [vmem:[%s25925_s0 + $0x1b0] sm:$0xff] }
  0x45   :  { %16621 = vmatprep.mubr.msk.f32.mxu0 %vm157_vm1, %v125_v37  ;;  %v59_v37 = vld [vmem:[%s25925_s0 + $0x1b8] sm:$0xff] }
  0x48   :  { %16622 = vmatmul.mubr.msk.f32.gmra.mrb[34].mxu0 %vm157_vm1, %v126_v38  ;;  %v19912_v38 = vld [vmem:[%s25925_s0 + $0x1c8] sm:$0xff] }
  0x49   :  { %16624 = vmatprep.mubr.msk.f32.mxu0 %vm157_vm1, %v127_v39  ;;  %v19920_v39 = vld [vmem:[%s25925_s0 + $0x1d0] sm:$0xff] }
  0x4c   :  { %16625 = vmatmul.mubr.msk.f32.gmra.mrb[36].mxu0 %vm157_vm1, %v128_v40  ;;  %v19925_v40 = vld [vmem:[%s25925_s0 + $0x1e0] sm:$0xff] }
  0x4d   :  { %16627 = vmatprep.mubr.msk.f32.mxu0 %vm157_vm1, %v129_v41  ;;  %v19934_v41 = vld [vmem:[%s25925_s0 + $0x1e8] sm:$0xff] }
  0x50   :  { %16628 = vmatmul.mubr.msk.f32.gmra.mrb[38].mxu0 %vm157_vm1, %v130_v42  ;;  %v19939_v42 = vld [vmem:[%s25925_s0 + $0x1f8] sm:$0xff] }
  0x51   :  { %16630 = vmatprep.mubr.msk.f32.mxu0 %vm157_vm1, %v131_v43  ;;  %v19948_v43 = vld [vmem:[%s25925_s0 + $0x200] sm:$0xff] }
  0x54   :  { %16631 = vmatmul.mubr.msk.f32.gmra.mrb[40].mxu0 %vm157_vm1, %v132_v44  ;;  %v19953_v44 = vld [vmem:[%s25925_s0 + $0x210] sm:$0xff] }
  0x55   :  { %16633 = vmatprep.mubr.msk.f32.mxu0 %vm157_vm1, %v133_v45  ;;  %v19962_v45 = vld [vmem:[%s25925_s0 + $0x218] sm:$0xff] }
  0x58   :  { %16634 = vmatmul.mubr.msk.f32.gmra.mrb[42].mxu0 %vm157_vm1, %v134_v46  ;;  %v19967_v46 = vld [vmem:[%s25925_s0 + $0x228] sm:$0xff] }
  0x59   :  { %16636 = vmatprep.mubr.msk.f32.mxu0 %vm157_vm1, %v135_v47  ;;  %v19976_v47 = vld [vmem:[%s25925_s0 + $0x230] sm:$0xff] }
  0x5c   :  { %16637 = vmatmul.mubr.msk.f32.gmra.mrb[44].mxu0 %vm157_vm1, %v136_v48  ;;  %v19981_v48 = vld [vmem:[%s25925_s0 + $0x240] sm:$0xff] }
  0x5d   :  { %16639 = vmatprep.mubr.msk.f32.mxu0 %vm157_vm1, %v137_v49  ;;  %v19990_v49 = vld [vmem:[%s25925_s0 + $0x248] sm:$0xff] }
  0x60   :  { %16640 = vmatmul.mubr.msk.f32.gmra.mrb[46].mxu0 %vm157_vm1, %v138_v50  ;;  %v19995_v50 = vld [vmem:[%s25925_s0 + $0x258] sm:$0xff] }
  0x61   :  { %16642 = vmatprep.mubr.msk.f32.mxu0 %vm157_vm1, %v139_v51  ;;  %v20004_v51 = vld [vmem:[%s25925_s0 + $0x260] sm:$0xff] }
  0x64   :  { %16643 = vmatmul.mubr.msk.f32.gmra.mrb[48].mxu0 %vm157_vm1, %v140_v52  ;;  %v20009_v52 = vld [vmem:[%s25925_s0 + $0x270] sm:$0xff] }
  0x65   :  { %16645 = vmatprep.mubr.msk.f32.mxu0 %vm157_vm1, %v141_v53  ;;  %v20018_v53 = vld [vmem:[%s25925_s0 + $0x278] sm:$0xff] }
  0x68   :  { %16646 = vmatmul.mubr.msk.f32.gmra.mrb[50].mxu0 %vm157_vm1, %v142_v54  ;;  %v20023_v54 = vld [vmem:[%s25925_s0 + $0x288] sm:$0xff] }
  0x69   :  { %16648 = vmatprep.mubr.msk.f32.mxu0 %vm157_vm1, %v143_v55  ;;  %v20032_v55 = vld [vmem:[%s25925_s0 + $0x290] sm:$0xff] }
  0x6c   :  { %16649 = vmatmul.mubr.msk.f32.gmra.mrb[52].mxu0 %vm157_vm1, %v144_v56  ;;  %v20037_v56 = vld [vmem:[%s25925_s0 + $0x2a0] sm:$0xff] }
  0x6d   :  { %16651 = vmatprep.mubr.msk.f32.mxu0 %vm157_vm1, %v145_v57  ;;  %v20046_v57 = vld [vmem:[%s25925_s0 + $0x2a8] sm:$0xff] }
  0x70   :  { %16652 = vmatmul.mubr.msk.f32.gmra.mrb[54].mxu0 %vm157_vm1, %v146_v58  ;;  %v20051_v58 = vld [vmem:[%s25925_s0 + $0x2b8] sm:$0xff] }
  0x71   :  { %16654 = vmatprep.mubr.msk.f32.mxu0 %vm157_vm1, %v147_v59  ;;  %v20060_v59 = vld [vmem:[%s25925_s0 + $0x2c0] sm:$0xff] }
  0x74   :  { %16655 = vmatmul.mubr.msk.f32.gmra.mrb[56].mxu0 %vm157_vm1, %v148_v60  ;;  %v20065_v60 = vld [vmem:[%s25925_s0 + $0x2d0] sm:$0xff] }
  0x75   :  { %16657 = vmatprep.mubr.msk.f32.mxu0 %vm157_vm1, %v149_v61  ;;  %v20074_v61 = vld [vmem:[%s25925_s0 + $0x2d8] sm:$0xff] }
  0x78   :  { %16658 = vmatmul.mubr.msk.f32.gmra.mrb[58].mxu0 %vm157_vm1, %v150_v62  ;;  %v20079_v62 = vld [vmem:[%s25925_s0 + $0x2e8] sm:$0xff] }
  0x79   :  { %16660 = vmatprep.mubr.msk.f32.mxu0 %vm157_vm1, %v151_v63  ;;  %v20088_v63 = vld [vmem:[%s25925_s0 + $0x2f0] sm:$0xff] }
  0x7c   :  { %16661 = vmatmul.mubr.msk.f32.gmra.mrb[60].mxu0 %vm157_vm1, %v152_v0  ;;  %v20093_v0 = vld [vmem:[%s25925_s0 + $0x300] sm:$0xff] }
  0x7d   :  { %16663 = vmatprep.mubr.msk.f32.mxu0 %vm157_vm1, %v153_v1  ;;  %v20102_v1 = vld [vmem:[%s25925_s0 + $0x308] sm:$0xff] }
  0x80   :  { %16664 = vmatmul.mubr.msk.f32.gmra.mrb[62].mxu0 %vm157_vm1, %v154_v2  ;;  %v20107_v2 = vld [vmem:[%s25925_s0 + $0x318] sm:$0xff] }
  0x81   :  { %16668 = vmatprep.mubr.msk.f32.mxu0 %vm157_vm1, %v26_v3  ;;  %26127 = vst [vmem:[#allocation3_spill] sm:$0xff] %v20107_v2  ;;  %v20116_v3 = vld [vmem:[%s25925_s0 + $0x320] sm:$0xff] }
  0x84   :  { %16669 = vmatmul.mubr.msk.f32.vlgmr.msra.gmra.mrb[0].mxu0 %vm157_vm1, %v27_v4  ;;  %v1319_v4 = vld [vmem:[%s25925_s0 + $0x2] sm:$0xff] }
  0x85   :  { %16765 = vmatpush3.msk.msra.mxu0 %vm350_vm0, %v19465_v15  ;;  %16671 = vmatprep.mubr.msk.f32.mxu0 %vm157_vm1, %v19685_v5  ;;  %v19758_v15 = vld [vmem:[%s25925_s0 + $0x80] sm:$0xff] }
  0x86   :  { %16862 = vmatprep.subr.msk.mxu0 %vm350_vm0, %v19691_v6 }
  0x88   :  { %16672 = vmatmul.mubr.msk.f32.gmra.mrb[2].mxu0 %vm157_vm1, %v19700_v7 }
  0x89   :  { %16674 = vmatprep.mubr.msk.f32.mxu0 %vm157_vm1, %v19705_v8 }
  0x8c   :  { %16675 = vmatmul.mubr.msk.f32.gmra.mrb[4].mxu0 %vm157_vm1, %v19716_v9 }
  0x8d   :  { %16677 = vmatprep.mubr.msk.f32.mxu0 %vm157_vm1, %v19721_v10 }
  0x90   :  { %16678 = vmatmul.mubr.msk.f32.gmra.mrb[6].mxu0 %vm157_vm1, %v19730_v11 }
  0x91   :  { %16680 = vmatprep.mubr.msk.f32.mxu0 %vm157_vm1, %v19735_v12 }
  0x94   :  { %16681 = vmatmul.mubr.msk.f32.gmra.mrb[8].mxu0 %vm157_vm1, %v19744_v13 }
  0x95   :  { %16683 = vmatprep.mubr.msk.f32.mxu0 %vm157_vm1, %v19749_v14 }
  0x98   :  { %16684 = vmatmul.mubr.msk.f32.gmra.mrb[10].mxu0 %vm157_vm1, %v19758_v15 }
  0x99   :  { %16686 = vmatprep.mubr.msk.f32.mxu0 %vm157_vm1, %v19763_v16 }
  0x9c   :  { %16687 = vmatmul.mubr.msk.f32.gmra.mrb[12].mxu0 %vm157_vm1, %v19772_v17 }
  0x9d   :  { %16689 = vmatprep.mubr.msk.f32.mxu0 %vm157_vm1, %v19777_v18 }
  0xa0   :  { %16690 = vmatmul.mubr.msk.f32.gmra.mrb[14].mxu0 %vm157_vm1, %v19786_v19 }
  0xa1   :  { %16692 = vmatprep.mubr.msk.f32.mxu0 %vm157_vm1, %v19791_v20 }
  0xa4   :  { %16693 = vmatmul.mubr.msk.f32.gmra.mrb[16].mxu0 %vm157_vm1, %v19800_v21 }
  0xa5   :  { %16695 = vmatprep.mubr.msk.f32.mxu0 %vm157_vm1, %v19805_v22 }
  0xa8   :  { %16696 = vmatmul.mubr.msk.f32.gmra.mrb[18].mxu0 %vm157_vm1, %v19814_v23 }
  0xa9   :  { %16698 = vmatprep.mubr.msk.f32.mxu0 %vm157_vm1, %v19819_v24 }
  0xac   :  { %16699 = vmatmul.mubr.msk.f32.gmra.mrb[20].mxu0 %vm157_vm1, %v19828_v25 }
  0xad   :  { %16701 = vmatprep.mubr.msk.f32.mxu0 %vm157_vm1, %v19833_v26 }
  0xb0   :  { %16702 = vmatmul.mubr.msk.f32.gmra.mrb[22].mxu0 %vm157_vm1, %v19842_v27 }
  0xb1   :  { %16704 = vmatprep.mubr.msk.f32.mxu0 %vm157_vm1, %v19847_v28 }
  0xb4   :  { %16705 = vmatmul.mubr.msk.f32.gmra.mrb[24].mxu0 %vm157_vm1, %v19856_v29 }
  0xb5   :  { %16707 = vmatprep.mubr.msk.f32.mxu0 %vm157_vm1, %v19861_v30 }
  0xb8   :  { %16708 = vmatmul.mubr.msk.f32.gmra.mrb[26].mxu0 %vm157_vm1, %v19870_v31 }
  0xb9   :  { %16710 = vmatprep.mubr.msk.f32.mxu0 %vm157_vm1, %v19875_v32 }
  0xbc   :  { %16711 = vmatmul.mubr.msk.f32.gmra.mrb[28].mxu0 %vm157_vm1, %v19884_v33 }
  0xbd   :  { %16713 = vmatprep.mubr.msk.f32.mxu0 %vm157_vm1, %v19889_v34 }
  0xc0   :  { %16714 = vmatmul.mubr.msk.f32.gmra.mrb[30].mxu0 %vm157_vm1, %v19898_v35 }
  0xc1   :  { %16716 = vmatprep.mubr.msk.f32.mxu0 %vm157_vm1, %v58_v36  ;;  %v1320_v36 = vld [vmem:[%s25925_s0 + $0xa] sm:$0xff] }
  0xc4   :  { %16717 = vmatmul.mubr.msk.f32.gmra.mrb[32].mxu0 %vm157_vm1, %v59_v37  ;;  %v20130_v37 = vld [vmem:[%s25925_s0 + $0x1a] sm:$0xff] }
  0xc5   :  { %16719 = vmatprep.mubr.msk.f32.mxu0 %vm157_vm1, %v19912_v38  ;;  %26128 = vst [vmem:[#allocation4_spill] sm:$0xff] %v20130_v37 }
  0xc8   :  { %16720 = vmatmul.mubr.msk.f32.gmra.mrb[34].mxu0 %vm157_vm1, %v19920_v39 }
  0xc9   :  { %16722 = vmatprep.mubr.msk.f32.mxu0 %vm157_vm1, %v19925_v40 }
  0xcc   :  { %16723 = vmatmul.mubr.msk.f32.gmra.mrb[36].mxu0 %vm157_vm1, %v19934_v41 }
  0xcd   :  { %16725 = vmatprep.mubr.msk.f32.mxu0 %vm157_vm1, %v19939_v42 }
  0xd0   :  { %16726 = vmatmul.mubr.msk.f32.gmra.mrb[38].mxu0 %vm157_vm1, %v19948_v43 }
  0xd1   :  { %16728 = vmatprep.mubr.msk.f32.mxu0 %vm157_vm1, %v19953_v44 }
  0xd4   :  { %16729 = vmatmul.mubr.msk.f32.gmra.mrb[40].mxu0 %vm157_vm1, %v19962_v45 }
  0xd5   :  { %16731 = vmatprep.mubr.msk.f32.mxu0 %vm157_vm1, %v19967_v46 }
  0xd8   :  { %16732 = vmatmul.mubr.msk.f32.gmra.mrb[42].mxu0 %vm157_vm1, %v19976_v47 }
  0xd9   :  { %16734 = vmatprep.mubr.msk.f32.mxu0 %vm157_vm1, %v19981_v48 }
  0xdc   :  { %16735 = vmatmul.mubr.msk.f32.gmra.mrb[44].mxu0 %vm157_vm1, %v19990_v49 }
  0xdd   :  { %16737 = vmatprep.mubr.msk.f32.mxu0 %vm157_vm1, %v19995_v50 }
  0xe0   :  { %16738 = vmatmul.mubr.msk.f32.gmra.mrb[46].mxu0 %vm157_vm1, %v20004_v51 }
  0xe1   :  { %16740 = vmatprep.mubr.msk.f32.mxu0 %vm157_vm1, %v20009_v52 }
  0xe4   :  { %16741 = vmatmul.mubr.msk.f32.gmra.mrb[48].mxu0 %vm157_vm1, %v20018_v53 }
  0xe5   :  { %16743 = vmatprep.mubr.msk.f32.mxu0 %vm157_vm1, %v20023_v54 }
  0xe8   :  { %16744 = vmatmul.mubr.msk.f32.gmra.mrb[50].mxu0 %vm157_vm1, %v20032_v55 }
  0xe9   :  { %16746 = vmatprep.mubr.msk.f32.mxu0 %vm157_vm1, %v20037_v56 }
  0xec   :  { %16747 = vmatmul.mubr.msk.f32.gmra.mrb[52].mxu0 %vm157_vm1, %v20046_v57 }
  0xed   :  { %16749 = vmatprep.mubr.msk.f32.mxu0 %vm157_vm1, %v20051_v58 }
  0xf0   :  { %16750 = vmatmul.mubr.msk.f32.gmra.mrb[54].mxu0 %vm157_vm1, %v20060_v59 }
  0xf1   :  { %16752 = vmatprep.mubr.msk.f32.mxu0 %vm157_vm1, %v20065_v60 }
  0xf4   :  { %16753 = vmatmul.mubr.msk.f32.gmra.mrb[56].mxu0 %vm157_vm1, %v20074_v61 }
  0xf5   :  { %16755 = vmatprep.mubr.msk.f32.mxu0 %vm157_vm1, %v20079_v62 }
  0xf8   :  { %16756 = vmatmul.mubr.msk.f32.gmra.mrb[58].mxu0 %vm157_vm1, %v20088_v63 }
  0xf9   :  { %16758 = vmatprep.mubr.msk.f32.mxu0 %vm157_vm1, %v20093_v0 }
  0xfc   :  { %16759 = vmatmul.mubr.msk.f32.gmra.mrb[60].mxu0 %vm157_vm1, %v20102_v1 }
  0xfd   :  { %16761 = vmatprep.mubr.msk.f32.mxu0 %vm157_vm1, %v20107_v2  ;;  %v20136_v2 = vld [vmem:[%s25924_s1 + $0x10] sm:$0xf] }
 0x100   :  { %16762 = vmatmul.mubr.msk.f32.gmra.mrb[62].mxu0 %vm157_vm1, %v20116_v3 }
 0x101   :  { %16766 = vmatprep.mubr.msk.f32.mxu0 %vm157_vm1, %v1319_v4  ;;  %v20145_v4 = vld [vmem:[%s25925_s0 + $0x22] sm:$0xff] }
 0x102   :  { %26129 = vst [vmem:[#allocation5_spill] sm:$0xff] %v20145_v4 }
 0x104   :  { %16767 = vmatmul.mubr.msk.f32.vlgmr.msra.gmra.mrb[0].mxu0 %vm157_vm1, %v1320_v36  ;;  %v20150_v36 = vld [vmem:[%s25925_s0 + $0x32] sm:$0xff] }
 0x105   :  { %16863 = vmatpush3.msk.msra.mxu0 %vm350_vm0, %v19691_v6  ;;  %16769 = vmatprep.mubr.msk.f32.mxu0 %vm157_vm1, %v20130_v37  ;;  %26130 = vst [vmem:[#allocation6_spill] sm:$0xff] %v20150_v36  ;;  %v20161_v6 = vld [vmem:[%s25925_s0 + $0x3a] sm:$0xff]  ;;  %v20166_v37 = vld [vmem:[%s25925_s0 + $0x4a] sm:$0xff] }
 0x106   :  { %16960 = vmatprep.subr.msk.mxu0 %vm350_vm0, %v20136_v2  ;;  %26131 = vst [vmem:[#allocation7_spill] sm:$0xff] %v20161_v6  ;;  %26132 = vst [vmem:[#allocation8_spill] sm:$0xff] %v20166_v37 }
 0x108   :  { %16770 = vmatmul.mubr.msk.f32.gmra.mrb[2].mxu0 %vm157_vm1, %v20145_v4  ;;  %v20180_v4 = vld [vmem:[%s25925_s0 + $0x62] sm:$0xff] }
 0x109   :  { %16772 = vmatprep.mubr.msk.f32.mxu0 %vm157_vm1, %v20150_v36  ;;  %v20175_v36 = vld [vmem:[%s25925_s0 + $0x52] sm:$0xff]  ;;  %26134 = vst [vmem:[#allocation10_spill] sm:$0xff] %v20180_v4 }
 0x10a   :  { %26133 = vst [vmem:[#allocation9_spill] sm:$0xff] %v20175_v36 }
 0x10c   :  { %16773 = vmatmul.mubr.msk.f32.gmra.mrb[4].mxu0 %vm157_vm1, %v20161_v6  ;;  %v20194_v6 = vld [vmem:[%s25925_s0 + $0x7a] sm:$0xff] }
 0x10d   :  { %16775 = vmatprep.mubr.msk.f32.mxu0 %vm157_vm1, %v20166_v37  ;;  %v20189_v37 = vld [vmem:[%s25925_s0 + $0x6a] sm:$0xff]  ;;  %26136 = vst [vmem:[#allocation12_spill] sm:$0xff] %v20194_v6 }
 0x10e   :  { %26135 = vst [vmem:[#allocation11_spill] sm:$0xff] %v20189_v37 }
 0x110   :  { %16776 = vmatmul.mubr.msk.f32.gmra.mrb[6].mxu0 %vm157_vm1, %v20175_v36  ;;  %v20208_v36 = vld [vmem:[%s25925_s0 + $0x92] sm:$0xff] }
 0x111   :  { %16778 = vmatprep.mubr.msk.f32.mxu0 %vm157_vm1, %v20180_v4  ;;  %v20203_v4 = vld [vmem:[%s25925_s0 + $0x82] sm:$0xff]  ;;  %26138 = vst [vmem:[#allocation14_spill] sm:$0xff] %v20208_v36 }
 0x112   :  { %26137 = vst [vmem:[#allocation13_spill] sm:$0xff] %v20203_v4 }
 0x114   :  { %16779 = vmatmul.mubr.msk.f32.gmra.mrb[8].mxu0 %vm157_vm1, %v20189_v37  ;;  %v20222_v37 = vld [vmem:[%s25925_s0 + $0xaa] sm:$0xff] }
 0x115   :  { %16781 = vmatprep.mubr.msk.f32.mxu0 %vm157_vm1, %v20194_v6  ;;  %v20217_v6 = vld [vmem:[%s25925_s0 + $0x9a] sm:$0xff]  ;;  %26140 = vst [vmem:[#allocation16_spill] sm:$0xff] %v20222_v37 }
 0x116   :  { %26139 = vst [vmem:[#allocation15_spill] sm:$0xff] %v20217_v6 }
 0x118   :  { %16782 = vmatmul.mubr.msk.f32.gmra.mrb[10].mxu0 %vm157_vm1, %v20203_v4  ;;  %v20236_v4 = vld [vmem:[%s25925_s0 + $0xc2] sm:$0xff] }
 0x119   :  { %16784 = vmatprep.mubr.msk.f32.mxu0 %vm157_vm1, %v20208_v36  ;;  %v20231_v36 = vld [vmem:[%s25925_s0 + $0xb2] sm:$0xff]  ;;  %26142 = vst [vmem:[#allocation18_spill] sm:$0xff] %v20236_v4 }
 0x11a   :  { %26141 = vst [vmem:[#allocation17_spill] sm:$0xff] %v20231_v36 }
 0x11c   :  { %16785 = vmatmul.mubr.msk.f32.gmra.mrb[12].mxu0 %vm157_vm1, %v20217_v6  ;;  %v20250_v6 = vld [vmem:[%s25925_s0 + $0xda] sm:$0xff] }
 0x11d   :  { %16787 = vmatprep.mubr.msk.f32.mxu0 %vm157_vm1, %v20222_v37  ;;  %v20245_v37 = vld [vmem:[%s25925_s0 + $0xca] sm:$0xff]  ;;  %26144 = vst [vmem:[#allocation20_spill] sm:$0xff] %v20250_v6 }
 0x11e   :  { %26143 = vst [vmem:[#allocation19_spill] sm:$0xff] %v20245_v37 }
 0x120   :  { %16788 = vmatmul.mubr.msk.f32.gmra.mrb[14].mxu0 %vm157_vm1, %v20231_v36  ;;  %v20264_v36 = vld [vmem:[%s25925_s0 + $0xf2] sm:$0xff] }
 0x121   :  { %16790 = vmatprep.mubr.msk.f32.mxu0 %vm157_vm1, %v20236_v4  ;;  %v20259_v4 = vld [vmem:[%s25925_s0 + $0xe2] sm:$0xff]  ;;  %26146 = vst [vmem:[#allocation22_spill] sm:$0xff] %v20264_v36 }
 0x122   :  { %26145 = vst [vmem:[#allocation21_spill] sm:$0xff] %v20259_v4 }
 0x124   :  { %16791 = vmatmul.mubr.msk.f32.gmra.mrb[16].mxu0 %vm157_vm1, %v20245_v37  ;;  %v20278_v37 = vld [vmem:[%s25925_s0 + $0x10a] sm:$0xff] }
 0x125   :  { %16793 = vmatprep.mubr.msk.f32.mxu0 %vm157_vm1, %v20250_v6  ;;  %v20273_v6 = vld [vmem:[%s25925_s0 + $0xfa] sm:$0xff]  ;;  %26148 = vst [vmem:[#allocation24_spill] sm:$0xff] %v20278_v37 }
 0x126   :  { %26147 = vst [vmem:[#allocation23_spill] sm:$0xff] %v20273_v6 }
 0x128   :  { %16794 = vmatmul.mubr.msk.f32.gmra.mrb[18].mxu0 %vm157_vm1, %v20259_v4  ;;  %v20292_v4 = vld [vmem:[%s25925_s0 + $0x122] sm:$0xff] }
 0x129   :  { %16796 = vmatprep.mubr.msk.f32.mxu0 %vm157_vm1, %v20264_v36  ;;  %v20287_v36 = vld [vmem:[%s25925_s0 + $0x112] sm:$0xff]  ;;  %26150 = vst [vmem:[#allocation26_spill] sm:$0xff] %v20292_v4 }
 0x12a   :  { %26149 = vst [vmem:[#allocation25_spill] sm:$0xff] %v20287_v36 }
 0x12c   :  { %16797 = vmatmul.mubr.msk.f32.gmra.mrb[20].mxu0 %vm157_vm1, %v20273_v6  ;;  %v20306_v6 = vld [vmem:[%s25925_s0 + $0x13a] sm:$0xff] }
 0x12d   :  { %16799 = vmatprep.mubr.msk.f32.mxu0 %vm157_vm1, %v20278_v37  ;;  %v20301_v37 = vld [vmem:[%s25925_s0 + $0x12a] sm:$0xff]  ;;  %26152 = vst [vmem:[#allocation28_spill] sm:$0xff] %v20306_v6 }
 0x12e   :  { %26151 = vst [vmem:[#allocation27_spill] sm:$0xff] %v20301_v37 }
 0x130   :  { %16800 = vmatmul.mubr.msk.f32.gmra.mrb[22].mxu0 %vm157_vm1, %v20287_v36  ;;  %v20320_v36 = vld [vmem:[%s25925_s0 + $0x152] sm:$0xff] }
 0x131   :  { %16802 = vmatprep.mubr.msk.f32.mxu0 %vm157_vm1, %v20292_v4  ;;  %v20315_v4 = vld [vmem:[%s25925_s0 + $0x142] sm:$0xff]  ;;  %26154 = vst [vmem:[#allocation30_spill] sm:$0xff] %v20320_v36 }
 0x132   :  { %26153 = vst [vmem:[#allocation29_spill] sm:$0xff] %v20315_v4 }
 0x134   :  { %16803 = vmatmul.mubr.msk.f32.gmra.mrb[24].mxu0 %vm157_vm1, %v20301_v37  ;;  %v20334_v37 = vld [vmem:[%s25925_s0 + $0x16a] sm:$0xff] }
 0x135   :  { %16805 = vmatprep.mubr.msk.f32.mxu0 %vm157_vm1, %v20306_v6  ;;  %v20329_v6 = vld [vmem:[%s25925_s0 + $0x15a] sm:$0xff]  ;;  %26156 = vst [vmem:[#allocation32_spill] sm:$0xff] %v20334_v37 }
 0x136   :  { %26155 = vst [vmem:[#allocation31_spill] sm:$0xff] %v20329_v6 }
 0x138   :  { %16806 = vmatmul.mubr.msk.f32.gmra.mrb[26].mxu0 %vm157_vm1, %v20315_v4  ;;  %v1351_v4 = vld [vmem:[%s25925_s0 + $0x1b2] sm:$0xff] }
 0x139   :  { %16808 = vmatprep.mubr.msk.f32.mxu0 %vm157_vm1, %v20320_v36  ;;  %v20343_v36 = vld [vmem:[%s25925_s0 + $0x172] sm:$0xff] }
 0x13a   :  { %26157 = vst [vmem:[#allocation33_spill] sm:$0xff] %v20343_v36 }
 0x13c   :  { %16809 = vmatmul.mubr.msk.f32.gmra.mrb[28].mxu0 %vm157_vm1, %v20329_v6  ;;  %v1352_v6 = vld [vmem:[%s25925_s0 + $0x1ba] sm:$0xff] }
 0x13d   :  { %16811 = vmatprep.mubr.msk.f32.mxu0 %vm157_vm1, %v20334_v37  ;;  %v20357_v37 = vld [vmem:[%s25925_s0 + $0x1ca] sm:$0xff] }
 0x13e   :  { %26158 = vst [vmem:[#allocation34_spill] sm:$0xff] %v20357_v37 }
 0x140   :  { %16812 = vmatmul.mubr.msk.f32.gmra.mrb[30].mxu0 %vm157_vm1, %v20343_v36  ;;  %v20365_v36 = vld [vmem:[%s25925_s0 + $0x1d2] sm:$0xff] }
 0x141   :  { %16814 = vmatprep.mubr.msk.f32.mxu0 %vm157_vm1, %v1351_v4  ;;  %26159 = vst [vmem:[#allocation35_spill] sm:$0xff] %v20365_v36  ;;  %v20370_v4 = vld [vmem:[%s25925_s0 + $0x1e2] sm:$0xff] }
 0x142   :  { %26160 = vst [vmem:[#allocation36_spill] sm:$0xff] %v20370_v4 }
 0x144   :  { %16815 = vmatmul.mubr.msk.f32.gmra.mrb[32].mxu0 %vm157_vm1, %v1352_v6  ;;  %v20379_v6 = vld [vmem:[%s25925_s0 + $0x1ea] sm:$0xff] }
 0x145   :  { %16817 = vmatprep.mubr.msk.f32.mxu0 %vm157_vm1, %v20357_v37  ;;  %26161 = vst [vmem:[#allocation37_spill] sm:$0xff] %v20379_v6  ;;  %v20384_v37 = vld [vmem:[%s25925_s0 + $0x1fa] sm:$0xff] }
 0x146   :  { %26162 = vst [vmem:[#allocation38_spill] sm:$0xff] %v20384_v37 }
 0x148   :  { %16818 = vmatmul.mubr.msk.f32.gmra.mrb[34].mxu0 %vm157_vm1, %v20365_v36  ;;  %v20398_v36 = vld [vmem:[%s25925_s0 + $0x212] sm:$0xff] }
 0x149   :  { %16820 = vmatprep.mubr.msk.f32.mxu0 %vm157_vm1, %v20370_v4  ;;  %v20393_v4 = vld [vmem:[%s25925_s0 + $0x202] sm:$0xff]  ;;  %26164 = vst [vmem:[#allocation40_spill] sm:$0xff] %v20398_v36 }
 0x14a   :  { %26163 = vst [vmem:[#allocation39_spill] sm:$0xff] %v20393_v4 }
 0x14c   :  { %16821 = vmatmul.mubr.msk.f32.gmra.mrb[36].mxu0 %vm157_vm1, %v20379_v6  ;;  %v20412_v6 = vld [vmem:[%s25925_s0 + $0x22a] sm:$0xff] }
 0x14d   :  { %16823 = vmatprep.mubr.msk.f32.mxu0 %vm157_vm1, %v20384_v37  ;;  %v20407_v37 = vld [vmem:[%s25925_s0 + $0x21a] sm:$0xff]  ;;  %26166 = vst [vmem:[#allocation42_spill] sm:$0xff] %v20412_v6 }
 0x14e   :  { %26165 = vst [vmem:[#allocation41_spill] sm:$0xff] %v20407_v37 }
 0x150   :  { %16824 = vmatmul.mubr.msk.f32.gmra.mrb[38].mxu0 %vm157_vm1, %v20393_v4  ;;  %v20426_v4 = vld [vmem:[%s25925_s0 + $0x242] sm:$0xff] }
 0x151   :  { %16826 = vmatprep.mubr.msk.f32.mxu0 %vm157_vm1, %v20398_v36  ;;  %v20421_v36 = vld [vmem:[%s25925_s0 + $0x232] sm:$0xff]  ;;  %26168 = vst [vmem:[#allocation44_spill] sm:$0xff] %v20426_v4 }
 0x152   :  { %26167 = vst [vmem:[#allocation43_spill] sm:$0xff] %v20421_v36 }
 0x154   :  { %16827 = vmatmul.mubr.msk.f32.gmra.mrb[40].mxu0 %vm157_vm1, %v20407_v37  ;;  %v20440_v37 = vld [vmem:[%s25925_s0 + $0x25a] sm:$0xff] }
 0x155   :  { %16829 = vmatprep.mubr.msk.f32.mxu0 %vm157_vm1, %v20412_v6  ;;  %v20435_v6 = vld [vmem:[%s25925_s0 + $0x24a] sm:$0xff]  ;;  %26170 = vst [vmem:[#allocation46_spill] sm:$0xff] %v20440_v37 }
 0x156   :  { %26169 = vst [vmem:[#allocation45_spill] sm:$0xff] %v20435_v6 }
 0x158   :  { %16830 = vmatmul.mubr.msk.f32.gmra.mrb[42].mxu0 %vm157_vm1, %v20421_v36  ;;  %v20454_v36 = vld [vmem:[%s25925_s0 + $0x272] sm:$0xff] }
 0x159   :  { %16832 = vmatprep.mubr.msk.f32.mxu0 %vm157_vm1, %v20426_v4  ;;  %v20449_v4 = vld [vmem:[%s25925_s0 + $0x262] sm:$0xff]  ;;  %26172 = vst [vmem:[#allocation48_spill] sm:$0xff] %v20454_v36 }
 0x15a   :  { %26171 = vst [vmem:[#allocation47_spill] sm:$0xff] %v20449_v4 }
 0x15c   :  { %16833 = vmatmul.mubr.msk.f32.gmra.mrb[44].mxu0 %vm157_vm1, %v20435_v6  ;;  %v20468_v6 = vld [vmem:[%s25925_s0 + $0x28a] sm:$0xff] }
 0x15d   :  { %16835 = vmatprep.mubr.msk.f32.mxu0 %vm157_vm1, %v20440_v37  ;;  %v20463_v37 = vld [vmem:[%s25925_s0 + $0x27a] sm:$0xff]  ;;  %26174 = vst [vmem:[#allocation50_spill] sm:$0xff] %v20468_v6 }
 0x15e   :  { %26173 = vst [vmem:[#allocation49_spill] sm:$0xff] %v20463_v37 }
 0x160   :  { %16836 = vmatmul.mubr.msk.f32.gmra.mrb[46].mxu0 %vm157_vm1, %v20449_v4  ;;  %v20482_v4 = vld [vmem:[%s25925_s0 + $0x2a2] sm:$0xff] }
 0x161   :  { %16838 = vmatprep.mubr.msk.f32.mxu0 %vm157_vm1, %v20454_v36  ;;  %v20477_v36 = vld [vmem:[%s25925_s0 + $0x292] sm:$0xff]  ;;  %26176 = vst [vmem:[#allocation52_spill] sm:$0xff] %v20482_v4 }
 0x162   :  { %26175 = vst [vmem:[#allocation51_spill] sm:$0xff] %v20477_v36 }
 0x164   :  { %16839 = vmatmul.mubr.msk.f32.gmra.mrb[48].mxu0 %vm157_vm1, %v20463_v37  ;;  %v20496_v37 = vld [vmem:[%s25925_s0 + $0x2ba] sm:$0xff] }
 0x165   :  { %16841 = vmatprep.mubr.msk.f32.mxu0 %vm157_vm1, %v20468_v6  ;;  %v20491_v6 = vld [vmem:[%s25925_s0 + $0x2aa] sm:$0xff]  ;;  %26178 = vst [vmem:[#allocation54_spill] sm:$0xff] %v20496_v37 }
 0x166   :  { %26177 = vst [vmem:[#allocation53_spill] sm:$0xff] %v20491_v6 }
 0x168   :  { %16842 = vmatmul.mubr.msk.f32.gmra.mrb[50].mxu0 %vm157_vm1, %v20477_v36  ;;  %v20510_v36 = vld [vmem:[%s25925_s0 + $0x2d2] sm:$0xff] }
 0x169   :  { %16844 = vmatprep.mubr.msk.f32.mxu0 %vm157_vm1, %v20482_v4  ;;  %v20505_v4 = vld [vmem:[%s25925_s0 + $0x2c2] sm:$0xff]  ;;  %26180 = vst [vmem:[#allocation56_spill] sm:$0xff] %v20510_v36 }
 0x16a   :  { %26179 = vst [vmem:[#allocation55_spill] sm:$0xff] %v20505_v4 }
 0x16c   :  { %16845 = vmatmul.mubr.msk.f32.gmra.mrb[52].mxu0 %vm157_vm1, %v20491_v6  ;;  %v20524_v6 = vld [vmem:[%s25925_s0 + $0x2ea] sm:$0xff] }
 0x16d   :  { %16847 = vmatprep.mubr.msk.f32.mxu0 %vm157_vm1, %v20496_v37  ;;  %v20519_v37 = vld [vmem:[%s25925_s0 + $0x2da] sm:$0xff]  ;;  %26182 = vst [vmem:[#allocation58_spill] sm:$0xff] %v20524_v6 }
 0x16e   :  { %26181 = vst [vmem:[#allocation57_spill] sm:$0xff] %v20519_v37 }
 0x170   :  { %16848 = vmatmul.mubr.msk.f32.gmra.mrb[54].mxu0 %vm157_vm1, %v20505_v4  ;;  %v20538_v4 = vld [vmem:[%s25925_s0 + $0x302] sm:$0xff] }
 0x171   :  { %16850 = vmatprep.mubr.msk.f32.mxu0 %vm157_vm1, %v20510_v36  ;;  %v20533_v36 = vld [vmem:[%s25925_s0 + $0x2f2] sm:$0xff]  ;;  %26183 = vst [vmem:[#allocation59_spill] sm:$0xff] %v20538_v4 }
 0x174   :  { %16851 = vmatmul.mubr.msk.f32.gmra.mrb[56].mxu0 %vm157_vm1, %v20519_v37  ;;  %v20552_v37 = vld [vmem:[%s25925_s0 + $0x31a] sm:$0xff] }
 0x175   :  { %16853 = vmatprep.mubr.msk.f32.mxu0 %vm157_vm1, %v20524_v6  ;;  %v20547_v6 = vld [vmem:[%s25925_s0 + $0x30a] sm:$0xff] }
 0x176   :  { %26184 = vst [vmem:[#allocation60_spill] sm:$0xff] %v20547_v6 }
 0x178   :  { %16854 = vmatmul.mubr.msk.f32.gmra.mrb[58].mxu0 %vm157_vm1, %v20533_v36 }
 0x179   :  { %16856 = vmatprep.mubr.msk.f32.mxu0 %vm157_vm1, %v20538_v4  ;;  %v20561_v4 = vld [vmem:[%s25925_s0 + $0x322] sm:$0xff] }
 0x17c   :  { %16857 = vmatmul.mubr.msk.f32.gmra.mrb[60].mxu0 %vm157_vm1, %v20547_v6  ;;  %v20572_v6 = vld [vmem:[%s25924_s1 + $0x14] sm:$0xf] }
 0x17d   :  { %16859 = vmatprep.mubr.msk.f32.mxu0 %vm157_vm1, %v20552_v37 }
 0x180   :  { %16860 = vmatmul.mubr.msk.f32.gmra.mrb[62].mxu0 %vm157_vm1, %v20561_v4 }
 0x181   :  { %16864 = vmatprep.mubr.msk.f32.mxu0 %vm157_vm1, %v19685_v5  ;;  %v20635_v5 = vld [vmem:[%s25925_s0 + $0x180] sm:$0xff] }
 0x184   :  { %16865 = vmatmul.mubr.msk.f32.vlgmr.msra.gmra.mrb[0].mxu0 %vm157_vm1, %v19700_v7  ;;  %v20644_v7 = vld [vmem:[%s25925_s0 + $0x188] sm:$0xff] }
 0x185   :  { %16961 = vmatpush3.msk.msra.mxu0 %vm350_vm0, %v20136_v2  ;;  %16867 = vmatprep.mubr.msk.f32.mxu0 %vm157_vm1, %v19705_v8  ;;  %v26185_v8 = vld [vmem:[#allocation3_spill] sm:$0xff] }
 0x186   :  { %17058 = vmatprep.subr.msk.mxu0 %vm350_vm0, %v20572_v6  ;;  %v21084_v2 = vld [vmem:[%s25925_s0 + $0x2b9] sm:$0xff] }
 0x187   :  { %26186 = vst [vmem:[#allocation3_spill] sm:$0xff] %v21084_v2 }
 0x188   :  { %16868 = vmatmul.mubr.msk.f32.gmra.mrb[2].mxu0 %vm157_vm1, %v19716_v9  ;;  %v20709_v9 = vld [vmem:[%s25925_s0 + $0x330] sm:$0xff] }
 0x189   :  { %16870 = vmatprep.mubr.msk.f32.mxu0 %vm157_vm1, %v19721_v10  ;;  %v20718_v10 = vld [vmem:[%s25925_s0 + $0x338] sm:$0xff] }
 0x18c   :  { %16871 = vmatmul.mubr.msk.f32.gmra.mrb[4].mxu0 %vm157_vm1, %v19730_v11  ;;  %v14164_v11 = vld [vmem:[%s25925_s0 + $0x19] sm:$0xff] }
 0x18d   :  { %16873 = vmatprep.mubr.msk.f32.mxu0 %vm157_vm1, %v19735_v12  ;;  %v14165_v12 = vld [vmem:[%s25925_s0 + $0x21] sm:$0xff] }
 0x190   :  { %16874 = vmatmul.mubr.msk.f32.gmra.mrb[6].mxu0 %vm157_vm1, %v19744_v13  ;;  %v20732_v13 = vld [vmem:[%s25925_s0 + $0x31] sm:$0xff] }
 0x191   :  { %16876 = vmatprep.mubr.msk.f32.mxu0 %vm157_vm1, %v19749_v14  ;;  %v20738_v14 = vld [vmem:[%s25924_s1 + $0x18] sm:$0xf] }
 0x194   :  { %16877 = vmatmul.mubr.msk.f32.gmra.mrb[8].mxu0 %vm157_vm1, %v19758_v15  ;;  %v20747_v15 = vld [vmem:[%s25925_s0 + $0x39] sm:$0xff] }
 0x195   :  { %16879 = vmatprep.mubr.msk.f32.mxu0 %vm157_vm1, %v19763_v16  ;;  %v20752_v16 = vld [vmem:[%s25925_s0 + $0x49] sm:$0xff] }
 0x198   :  { %16880 = vmatmul.mubr.msk.f32.gmra.mrb[10].mxu0 %vm157_vm1, %v19772_v17  ;;  %v20763_v17 = vld [vmem:[%s25925_s0 + $0x51] sm:$0xff] }
 0x199   :  { %16882 = vmatprep.mubr.msk.f32.mxu0 %vm157_vm1, %v19777_v18  ;;  %v20768_v18 = vld [vmem:[%s25925_s0 + $0x61] sm:$0xff] }
 0x19c   :  { %16883 = vmatmul.mubr.msk.f32.gmra.mrb[12].mxu0 %vm157_vm1, %v19786_v19  ;;  %v20777_v19 = vld [vmem:[%s25925_s0 + $0x69] sm:$0xff] }
 0x19d   :  { %16885 = vmatprep.mubr.msk.f32.mxu0 %vm157_vm1, %v19791_v20  ;;  %v20782_v20 = vld [vmem:[%s25925_s0 + $0x79] sm:$0xff] }
 0x1a0   :  { %16886 = vmatmul.mubr.msk.f32.gmra.mrb[14].mxu0 %vm157_vm1, %v19800_v21  ;;  %v20791_v21 = vld [vmem:[%s25925_s0 + $0x81] sm:$0xff] }
 0x1a1   :  { %16888 = vmatprep.mubr.msk.f32.mxu0 %vm157_vm1, %v19805_v22  ;;  %v20796_v22 = vld [vmem:[%s25925_s0 + $0x91] sm:$0xff] }
 0x1a4   :  { %16889 = vmatmul.mubr.msk.f32.gmra.mrb[16].mxu0 %vm157_vm1, %v19814_v23  ;;  %v20805_v23 = vld [vmem:[%s25925_s0 + $0x99] sm:$0xff] }
 0x1a5   :  { %16891 = vmatprep.mubr.msk.f32.mxu0 %vm157_vm1, %v19819_v24  ;;  %v20810_v24 = vld [vmem:[%s25925_s0 + $0xa9] sm:$0xff] }
 0x1a8   :  { %16892 = vmatmul.mubr.msk.f32.gmra.mrb[18].mxu0 %vm157_vm1, %v19828_v25  ;;  %v20819_v25 = vld [vmem:[%s25925_s0 + $0xb1] sm:$0xff] }
 0x1a9   :  { %16894 = vmatprep.mubr.msk.f32.mxu0 %vm157_vm1, %v19833_v26  ;;  %v20824_v26 = vld [vmem:[%s25925_s0 + $0xc1] sm:$0xff] }
 0x1ac   :  { %16895 = vmatmul.mubr.msk.f32.gmra.mrb[20].mxu0 %vm157_vm1, %v19842_v27  ;;  %v20833_v27 = vld [vmem:[%s25925_s0 + $0xc9] sm:$0xff] }
 0x1ad   :  { %16897 = vmatprep.mubr.msk.f32.mxu0 %vm157_vm1, %v19847_v28  ;;  %v20838_v28 = vld [vmem:[%s25925_s0 + $0xd9] sm:$0xff] }
 0x1b0   :  { %16898 = vmatmul.mubr.msk.f32.gmra.mrb[22].mxu0 %vm157_vm1, %v19856_v29  ;;  %v20847_v29 = vld [vmem:[%s25925_s0 + $0xe1] sm:$0xff] }
 0x1b1   :  { %16900 = vmatprep.mubr.msk.f32.mxu0 %vm157_vm1, %v19861_v30  ;;  %v20852_v30 = vld [vmem:[%s25925_s0 + $0xf1] sm:$0xff] }
 0x1b4   :  { %16901 = vmatmul.mubr.msk.f32.gmra.mrb[24].mxu0 %vm157_vm1, %v19870_v31  ;;  %v20861_v31 = vld [vmem:[%s25925_s0 + $0xf9] sm:$0xff] }
 0x1b5   :  { %16903 = vmatprep.mubr.msk.f32.mxu0 %vm157_vm1, %v19875_v32  ;;  %v20866_v32 = vld [vmem:[%s25925_s0 + $0x109] sm:$0xff] }
 0x1b8   :  { %16904 = vmatmul.mubr.msk.f32.gmra.mrb[26].mxu0 %vm157_vm1, %v19884_v33  ;;  %v20875_v33 = vld [vmem:[%s25925_s0 + $0x111] sm:$0xff] }
 0x1b9   :  { %16906 = vmatprep.mubr.msk.f32.mxu0 %vm157_vm1, %v19889_v34  ;;  %v20880_v34 = vld [vmem:[%s25925_s0 + $0x121] sm:$0xff] }
 0x1bc   :  { %16907 = vmatmul.mubr.msk.f32.gmra.mrb[28].mxu0 %vm157_vm1, %v19898_v35  ;;  %v20889_v35 = vld [vmem:[%s25925_s0 + $0x129] sm:$0xff] }
 0x1bd   :  { %16909 = vmatprep.mubr.msk.f32.mxu0 %vm157_vm1, %v20635_v5 }
 0x1c0   :  { %16910 = vmatmul.mubr.msk.f32.gmra.mrb[30].mxu0 %vm157_vm1, %v20644_v7 }
 0x1c1   :  { %16912 = vmatprep.mubr.msk.f32.mxu0 %vm157_vm1, %v19912_v38  ;;  %v20894_v38 = vld [vmem:[%s25925_s0 + $0x139] sm:$0xff] }
 0x1c4   :  { %16913 = vmatmul.mubr.msk.f32.gmra.mrb[32].mxu0 %vm157_vm1, %v19920_v39  ;;  %v20903_v39 = vld [vmem:[%s25925_s0 + $0x141] sm:$0xff] }
 0x1c5   :  { %16915 = vmatprep.mubr.msk.f32.mxu0 %vm157_vm1, %v19925_v40  ;;  %v20908_v40 = vld [vmem:[%s25925_s0 + $0x151] sm:$0xff] }
 0x1c8   :  { %16916 = vmatmul.mubr.msk.f32.gmra.mrb[34].mxu0 %vm157_vm1, %v19934_v41  ;;  %v20917_v41 = vld [vmem:[%s25925_s0 + $0x159] sm:$0xff] }
 0x1c9   :  { %16918 = vmatprep.mubr.msk.f32.mxu0 %vm157_vm1, %v19939_v42  ;;  %v20922_v42 = vld [vmem:[%s25925_s0 + $0x169] sm:$0xff] }
 0x1cc   :  { %16919 = vmatmul.mubr.msk.f32.gmra.mrb[36].mxu0 %vm157_vm1, %v19948_v43  ;;  %v20931_v43 = vld [vmem:[%s25925_s0 + $0x171] sm:$0xff] }
 0x1cd   :  { %16921 = vmatprep.mubr.msk.f32.mxu0 %vm157_vm1, %v19953_v44  ;;  %v20936_v44 = vld [vmem:[%s25925_s0 + $0x181] sm:$0xff] }
 0x1d0   :  { %16922 = vmatmul.mubr.msk.f32.gmra.mrb[38].mxu0 %vm157_vm1, %v19962_v45  ;;  %v20945_v45 = vld [vmem:[%s25925_s0 + $0x189] sm:$0xff] }
 0x1d1   :  { %16924 = vmatprep.mubr.msk.f32.mxu0 %vm157_vm1, %v19967_v46  ;;  %v14196_v46 = vld [vmem:[%s25925_s0 + $0x1c9] sm:$0xff] }
 0x1d4   :  { %16925 = vmatmul.mubr.msk.f32.gmra.mrb[40].mxu0 %vm157_vm1, %v19976_v47  ;;  %v14197_v47 = vld [vmem:[%s25925_s0 + $0x1d1] sm:$0xff] }
 0x1d5   :  { %16927 = vmatprep.mubr.msk.f32.mxu0 %vm157_vm1, %v19981_v48  ;;  %v20959_v48 = vld [vmem:[%s25925_s0 + $0x1e1] sm:$0xff] }
 0x1d8   :  { %16928 = vmatmul.mubr.msk.f32.gmra.mrb[42].mxu0 %vm157_vm1, %v19990_v49  ;;  %v20967_v49 = vld [vmem:[%s25925_s0 + $0x1e9] sm:$0xff] }
 0x1d9   :  { %16930 = vmatprep.mubr.msk.f32.mxu0 %vm157_vm1, %v19995_v50  ;;  %v20972_v50 = vld [vmem:[%s25925_s0 + $0x1f9] sm:$0xff] }
 0x1dc   :  { %16931 = vmatmul.mubr.msk.f32.gmra.mrb[44].mxu0 %vm157_vm1, %v20004_v51  ;;  %v20981_v51 = vld [vmem:[%s25925_s0 + $0x201] sm:$0xff] }
 0x1dd   :  { %16933 = vmatprep.mubr.msk.f32.mxu0 %vm157_vm1, %v20009_v52  ;;  %v20986_v52 = vld [vmem:[%s25925_s0 + $0x211] sm:$0xff] }
 0x1e0   :  { %16934 = vmatmul.mubr.msk.f32.gmra.mrb[46].mxu0 %vm157_vm1, %v20018_v53  ;;  %v20995_v53 = vld [vmem:[%s25925_s0 + $0x219] sm:$0xff] }
 0x1e1   :  { %16936 = vmatprep.mubr.msk.f32.mxu0 %vm157_vm1, %v20023_v54  ;;  %v21000_v54 = vld [vmem:[%s25925_s0 + $0x229] sm:$0xff] }
 0x1e4   :  { %16937 = vmatmul.mubr.msk.f32.gmra.mrb[48].mxu0 %vm157_vm1, %v20032_v55  ;;  %v21009_v55 = vld [vmem:[%s25925_s0 + $0x231] sm:$0xff] }
 0x1e5   :  { %16939 = vmatprep.mubr.msk.f32.mxu0 %vm157_vm1, %v20037_v56  ;;  %v21014_v56 = vld [vmem:[%s25925_s0 + $0x241] sm:$0xff] }
 0x1e8   :  { %16940 = vmatmul.mubr.msk.f32.gmra.mrb[50].mxu0 %vm157_vm1, %v20046_v57  ;;  %v21023_v57 = vld [vmem:[%s25925_s0 + $0x249] sm:$0xff] }
 0x1e9   :  { %16942 = vmatprep.mubr.msk.f32.mxu0 %vm157_vm1, %v20051_v58  ;;  %v21028_v58 = vld [vmem:[%s25925_s0 + $0x259] sm:$0xff] }
 0x1ec   :  { %16943 = vmatmul.mubr.msk.f32.gmra.mrb[52].mxu0 %vm157_vm1, %v20060_v59  ;;  %v21037_v59 = vld [vmem:[%s25925_s0 + $0x261] sm:$0xff] }
 0x1ed   :  { %16945 = vmatprep.mubr.msk.f32.mxu0 %vm157_vm1, %v20065_v60  ;;  %v21042_v60 = vld [vmem:[%s25925_s0 + $0x271] sm:$0xff] }
 0x1f0   :  { %16946 = vmatmul.mubr.msk.f32.gmra.mrb[54].mxu0 %vm157_vm1, %v20074_v61  ;;  %v21051_v61 = vld [vmem:[%s25925_s0 + $0x279] sm:$0xff] }
 0x1f1   :  { %16948 = vmatprep.mubr.msk.f32.mxu0 %vm157_vm1, %v20079_v62  ;;  %v21056_v62 = vld [vmem:[%s25925_s0 + $0x289] sm:$0xff] }
 0x1f4   :  { %16949 = vmatmul.mubr.msk.f32.gmra.mrb[56].mxu0 %vm157_vm1, %v20088_v63  ;;  %v21065_v63 = vld [vmem:[%s25925_s0 + $0x291] sm:$0xff] }
 0x1f5   :  { %16951 = vmatprep.mubr.msk.f32.mxu0 %vm157_vm1, %v20093_v0  ;;  %v21070_v0 = vld [vmem:[%s25925_s0 + $0x2a1] sm:$0xff] }
 0x1f8   :  { %16952 = vmatmul.mubr.msk.f32.gmra.mrb[58].mxu0 %vm157_vm1, %v20102_v1  ;;  %v21079_v1 = vld [vmem:[%s25925_s0 + $0x2a9] sm:$0xff] }
 0x1f9   :  { %16954 = vmatprep.mubr.msk.f32.mxu0 %vm157_vm1, %v26185_v8  ;;  %v21107_v8 = vld [vmem:[%s25925_s0 + $0x2d9] sm:$0xff] }
 0x1fa   :  { %26189 = vst [vmem:[#allocation63_spill] sm:$0xff] %v21107_v8 }
 0x1fc   :  { %16955 = vmatmul.mubr.msk.f32.gmra.mrb[60].mxu0 %vm157_vm1, %v20116_v3  ;;  %v21093_v3 = vld [vmem:[%s25925_s0 + $0x2c1] sm:$0xff] }
 0x1fd   :  { %16957 = vmatprep.mubr.msk.f32.mxu0 %vm157_vm1, %v20709_v9  ;;  %26187 = vst [vmem:[#allocation61_spill] sm:$0xff] %v21093_v3 }
 0x200   :  { %16958 = vmatmul.mubr.msk.f32.gmra.mrb[62].mxu0 %vm157_vm1, %v20718_v10 }
 0x201   :  { %16962 = vmatprep.mubr.msk.f32.mxu0 %vm157_vm1, %v14164_v11  ;;  %v21112_v11 = vld [vmem:[%s25925_s0 + $0x2e9] sm:$0xff] }
 0x202   :  { %26190 = vst [vmem:[#allocation64_spill] sm:$0xff] %v21112_v11 }
 0x204   :  { %16963 = vmatmul.mubr.msk.f32.vlgmr.msra.gmra.mrb[0].mxu0 %vm157_vm1, %v14165_v12  ;;  %v21121_v12 = vld [vmem:[%s25925_s0 + $0x2f1] sm:$0xff] }
 0x205   :  { %17059 = vmatpush3.msk.msra.mxu0 %vm350_vm0, %v20572_v6  ;;  %16965 = vmatprep.mubr.msk.f32.mxu0 %vm157_vm1, %v20732_v13  ;;  %v21098_v6 = vld [vmem:[%s25925_s0 + $0x2d1] sm:$0xff]  ;;  %26191 = vst [vmem:[#allocation65_spill] sm:$0xff] %v21121_v12 }
 0x206   :  { %17156 = vmatprep.subr.msk.mxu0 %vm350_vm0, %v20738_v14  ;;  %26188 = vst [vmem:[#allocation62_spill] sm:$0xff] %v21098_v6 }
 0x208   :  { %16966 = vmatmul.mubr.msk.f32.gmra.mrb[2].mxu0 %vm157_vm1, %v20747_v15 }
 0x209   :  { %16968 = vmatprep.mubr.msk.f32.mxu0 %vm157_vm1, %v20752_v16 }
 0x20c   :  { %16969 = vmatmul.mubr.msk.f32.gmra.mrb[4].mxu0 %vm157_vm1, %v20763_v17 }
 0x20d   :  { %16971 = vmatprep.mubr.msk.f32.mxu0 %vm157_vm1, %v20768_v18 }
 0x210   :  { %16972 = vmatmul.mubr.msk.f32.gmra.mrb[6].mxu0 %vm157_vm1, %v20777_v19 }
 0x211   :  { %16974 = vmatprep.mubr.msk.f32.mxu0 %vm157_vm1, %v20782_v20 }
 0x214   :  { %16975 = vmatmul.mubr.msk.f32.gmra.mrb[8].mxu0 %vm157_vm1, %v20791_v21 }
 0x215   :  { %16977 = vmatprep.mubr.msk.f32.mxu0 %vm157_vm1, %v20796_v22 }
 0x218   :  { %16978 = vmatmul.mubr.msk.f32.gmra.mrb[10].mxu0 %vm157_vm1, %v20805_v23 }
 0x219   :  { %16980 = vmatprep.mubr.msk.f32.mxu0 %vm157_vm1, %v20810_v24 }
 0x21c   :  { %16981 = vmatmul.mubr.msk.f32.gmra.mrb[12].mxu0 %vm157_vm1, %v20819_v25 }
 0x21d   :  { %16983 = vmatprep.mubr.msk.f32.mxu0 %vm157_vm1, %v20824_v26 }
 0x220   :  { %16984 = vmatmul.mubr.msk.f32.gmra.mrb[14].mxu0 %vm157_vm1, %v20833_v27 }
 0x221   :  { %16986 = vmatprep.mubr.msk.f32.mxu0 %vm157_vm1, %v20838_v28 }
 0x224   :  { %16987 = vmatmul.mubr.msk.f32.gmra.mrb[16].mxu0 %vm157_vm1, %v20847_v29 }
 0x225   :  { %16989 = vmatprep.mubr.msk.f32.mxu0 %vm157_vm1, %v20852_v30 }
 0x228   :  { %16990 = vmatmul.mubr.msk.f32.gmra.mrb[18].mxu0 %vm157_vm1, %v20861_v31 }
 0x229   :  { %16992 = vmatprep.mubr.msk.f32.mxu0 %vm157_vm1, %v20866_v32 }
 0x22c   :  { %16993 = vmatmul.mubr.msk.f32.gmra.mrb[20].mxu0 %vm157_vm1, %v20875_v33 }
 0x22d   :  { %16995 = vmatprep.mubr.msk.f32.mxu0 %vm157_vm1, %v20880_v34 }
 0x230   :  { %16996 = vmatmul.mubr.msk.f32.gmra.mrb[22].mxu0 %vm157_vm1, %v20889_v35 }
 0x231   :  { %16998 = vmatprep.mubr.msk.f32.mxu0 %vm157_vm1, %v20894_v38 }
 0x234   :  { %16999 = vmatmul.mubr.msk.f32.gmra.mrb[24].mxu0 %vm157_vm1, %v20903_v39 }
 0x235   :  { %17001 = vmatprep.mubr.msk.f32.mxu0 %vm157_vm1, %v20908_v40 }
 0x238   :  { %17002 = vmatmul.mubr.msk.f32.gmra.mrb[26].mxu0 %vm157_vm1, %v20917_v41 }
 0x239   :  { %17004 = vmatprep.mubr.msk.f32.mxu0 %vm157_vm1, %v20922_v42 }
 0x23c   :  { %17005 = vmatmul.mubr.msk.f32.gmra.mrb[28].mxu0 %vm157_vm1, %v20931_v43 }
 0x23d   :  { %17007 = vmatprep.mubr.msk.f32.mxu0 %vm157_vm1, %v20936_v44 }
 0x240   :  { %17008 = vmatmul.mubr.msk.f32.gmra.mrb[30].mxu0 %vm157_vm1, %v20945_v45 }
 0x241   :  { %17010 = vmatprep.mubr.msk.f32.mxu0 %vm157_vm1, %v14196_v46  ;;  %v21126_v46 = vld [vmem:[%s25925_s0 + $0x301] sm:$0xff] }
 0x242   :  { %26192 = vst [vmem:[#allocation66_spill] sm:$0xff] %v21126_v46 }
 0x244   :  { %17011 = vmatmul.mubr.msk.f32.gmra.mrb[32].mxu0 %vm157_vm1, %v14197_v47  ;;  %v21135_v47 = vld [vmem:[%s25925_s0 + $0x309] sm:$0xff] }
 0x245   :  { %17013 = vmatprep.mubr.msk.f32.mxu0 %vm157_vm1, %v20959_v48  ;;  %26193 = vst [vmem:[#allocation67_spill] sm:$0xff] %v21135_v47 }
 0x248   :  { %17014 = vmatmul.mubr.msk.f32.gmra.mrb[34].mxu0 %vm157_vm1, %v20967_v49 }
 0x249   :  { %17016 = vmatprep.mubr.msk.f32.mxu0 %vm157_vm1, %v20972_v50 }
 0x24c   :  { %17017 = vmatmul.mubr.msk.f32.gmra.mrb[36].mxu0 %vm157_vm1, %v20981_v51 }
 0x24d   :  { %17019 = vmatprep.mubr.msk.f32.mxu0 %vm157_vm1, %v20986_v52 }
 0x250   :  { %17020 = vmatmul.mubr.msk.f32.gmra.mrb[38].mxu0 %vm157_vm1, %v20995_v53 }
 0x251   :  { %17022 = vmatprep.mubr.msk.f32.mxu0 %vm157_vm1, %v21000_v54 }
 0x254   :  { %17023 = vmatmul.mubr.msk.f32.gmra.mrb[40].mxu0 %vm157_vm1, %v21009_v55 }
 0x255   :  { %17025 = vmatprep.mubr.msk.f32.mxu0 %vm157_vm1, %v21014_v56 }
 0x258   :  { %17026 = vmatmul.mubr.msk.f32.gmra.mrb[42].mxu0 %vm157_vm1, %v21023_v57 }
 0x259   :  { %17028 = vmatprep.mubr.msk.f32.mxu0 %vm157_vm1, %v21028_v58 }
 0x25c   :  { %17029 = vmatmul.mubr.msk.f32.gmra.mrb[44].mxu0 %vm157_vm1, %v21037_v59 }
 0x25d   :  { %17031 = vmatprep.mubr.msk.f32.mxu0 %vm157_vm1, %v21042_v60 }
 0x260   :  { %17032 = vmatmul.mubr.msk.f32.gmra.mrb[46].mxu0 %vm157_vm1, %v21051_v61 }
 0x261   :  { %17034 = vmatprep.mubr.msk.f32.mxu0 %vm157_vm1, %v21056_v62 }
 0x264   :  { %17035 = vmatmul.mubr.msk.f32.gmra.mrb[48].mxu0 %vm157_vm1, %v21065_v63 }
 0x265   :  { %17037 = vmatprep.mubr.msk.f32.mxu0 %vm157_vm1, %v21070_v0 }
 0x268   :  { %17038 = vmatmul.mubr.msk.f32.gmra.mrb[50].mxu0 %vm157_vm1, %v21079_v1 }
 0x269   :  { %17040 = vmatprep.mubr.msk.f32.mxu0 %vm157_vm1, %v21084_v2  ;;  %v26208_v2 = vld [vmem:[#allocation14_spill] sm:$0xff] }
 0x26c   :  { %17041 = vmatmul.mubr.msk.f32.gmra.mrb[52].mxu0 %vm157_vm1, %v21093_v3  ;;  %v26205_v3 = vld [vmem:[#allocation11_spill] sm:$0xff] }
 0x26d   :  { %17043 = vmatprep.mubr.msk.f32.mxu0 %vm157_vm1, %v21098_v6  ;;  %v26204_v6 = vld [vmem:[#allocation10_spill] sm:$0xff] }
 0x270   :  { %17044 = vmatmul.mubr.msk.f32.gmra.mrb[54].mxu0 %vm157_vm1, %v21107_v8  ;;  %v26199_v8 = vld [vmem:[#allocation5_spill] sm:$0xff] }
 0x271   :  { %17046 = vmatprep.mubr.msk.f32.mxu0 %vm157_vm1, %v21112_v11  ;;  %v21140_v11 = vld [vmem:[%s25925_s0 + $0x319] sm:$0xff] }
 0x272   :  { %26194 = vst [vmem:[#allocation68_spill] sm:$0xff] %v21140_v11 }
 0x274   :  { %17047 = vmatmul.mubr.msk.f32.gmra.mrb[56].mxu0 %vm157_vm1, %v21121_v12  ;;  %v21154_v12 = vld [vmem:[%s25925_s0 + $0x331] sm:$0xff] }
 0x275   :  { %17049 = vmatprep.mubr.msk.f32.mxu0 %vm157_vm1, %v21126_v46  ;;  %v21149_v46 = vld [vmem:[%s25925_s0 + $0x321] sm:$0xff]  ;;  %26196 = vst [vmem:[#allocation70_spill] sm:$0xff] %v21154_v12 }
 0x276   :  { %26195 = vst [vmem:[#allocation69_spill] sm:$0xff] %v21149_v46 }
 0x278   :  { %17050 = vmatmul.mubr.msk.f32.gmra.mrb[58].mxu0 %vm157_vm1, %v21135_v47  ;;  %v26198_v47 = vld [vmem:[#allocation4_spill] sm:$0xff] }
 0x279   :  { %17052 = vmatprep.mubr.msk.f32.mxu0 %vm157_vm1, %v21140_v11  ;;  %v21163_v11 = vld [vmem:[%s25925_s0 + $0x339] sm:$0xff] }
 0x27a   :  { %26197 = vst [vmem:[#allocation71_spill] sm:$0xff] %v21163_v11 }
 0x27c   :  { %17053 = vmatmul.mubr.msk.f32.gmra.mrb[60].mxu0 %vm157_vm1, %v21149_v46  ;;  %v21174_v46 = vld [vmem:[%s25924_s1 + $0x1c] sm:$0xf] }
 0x27d   :  { %17055 = vmatprep.mubr.msk.f32.mxu0 %vm157_vm1, %v21154_v12  ;;  %v26200_v12 = vld [vmem:[#allocation6_spill] sm:$0xff] }
 0x280   :  { %17056 = vmatmul.mubr.msk.f32.gmra.mrb[62].mxu0 %vm157_vm1, %v21163_v11  ;;  %v26201_v11 = vld [vmem:[#allocation7_spill] sm:$0xff] }
 0x281   :  { %17060 = vmatprep.mubr.msk.f32.mxu0 %vm157_vm1, %v26198_v47  ;;  %v26202_v47 = vld [vmem:[#allocation8_spill] sm:$0xff] }
 0x284   :  { %17061 = vmatmul.mubr.msk.f32.vlgmr.msra.gmra.mrb[0].mxu0 %vm157_vm1, %v26199_v8  ;;  %v26203_v8 = vld [vmem:[#allocation9_spill] sm:$0xff] }
 0x285   :  { %17157 = vmatpush3.msk.msra.mxu0 %vm350_vm0, %v20738_v14  ;;  %17063 = vmatprep.mubr.msk.f32.mxu0 %vm157_vm1, %v26200_v12  ;;  %v26206_v14 = vld [vmem:[#allocation12_spill] sm:$0xff]  ;;  %v26207_v12 = vld [vmem:[#allocation13_spill] sm:$0xff] }
 0x286   :  { %17254 = vmatprep.subr.msk.mxu0 %vm350_vm0, %v21174_v46 }
 0x288   :  { %17064 = vmatmul.mubr.msk.f32.gmra.mrb[2].mxu0 %vm157_vm1, %v26201_v11  ;;  %v26209_v11 = vld [vmem:[#allocation15_spill] sm:$0xff] }
 0x289   :  { %17066 = vmatprep.mubr.msk.f32.mxu0 %vm157_vm1, %v26202_v47  ;;  %v26210_v47 = vld [vmem:[#allocation16_spill] sm:$0xff] }
 0x28c   :  { %17067 = vmatmul.mubr.msk.f32.gmra.mrb[4].mxu0 %vm157_vm1, %v26203_v8  ;;  %v26211_v8 = vld [vmem:[#allocation17_spill] sm:$0xff] }
 0x28d   :  { %17069 = vmatprep.mubr.msk.f32.mxu0 %vm157_vm1, %v26204_v6  ;;  %v26212_v6 = vld [vmem:[#allocation18_spill] sm:$0xff] }
 0x290   :  { %17070 = vmatmul.mubr.msk.f32.gmra.mrb[6].mxu0 %vm157_vm1, %v26205_v3  ;;  %v26213_v3 = vld [vmem:[#allocation19_spill] sm:$0xff] }
 0x291   :  { %17072 = vmatprep.mubr.msk.f32.mxu0 %vm157_vm1, %v26206_v14  ;;  %v26214_v14 = vld [vmem:[#allocation20_spill] sm:$0xff] }
 0x294   :  { %17073 = vmatmul.mubr.msk.f32.gmra.mrb[8].mxu0 %vm157_vm1, %v26207_v12  ;;  %v26215_v12 = vld [vmem:[#allocation21_spill] sm:$0xff] }
 0x295   :  { %17075 = vmatprep.mubr.msk.f32.mxu0 %vm157_vm1, %v26208_v2  ;;  %v26216_v2 = vld [vmem:[#allocation22_spill] sm:$0xff] }
 0x298   :  { %17076 = vmatmul.mubr.msk.f32.gmra.mrb[10].mxu0 %vm157_vm1, %v26209_v11  ;;  %v26217_v11 = vld [vmem:[#allocation23_spill] sm:$0xff] }
 0x299   :  { %17078 = vmatprep.mubr.msk.f32.mxu0 %vm157_vm1, %v26210_v47  ;;  %v26218_v47 = vld [vmem:[#allocation24_spill] sm:$0xff] }
 0x29c   :  { %17079 = vmatmul.mubr.msk.f32.gmra.mrb[12].mxu0 %vm157_vm1, %v26211_v8  ;;  %v26219_v8 = vld [vmem:[#allocation25_spill] sm:$0xff] }
 0x29d   :  { %17081 = vmatprep.mubr.msk.f32.mxu0 %vm157_vm1, %v26212_v6  ;;  %v26220_v6 = vld [vmem:[#allocation26_spill] sm:$0xff] }
 0x2a0   :  { %17082 = vmatmul.mubr.msk.f32.gmra.mrb[14].mxu0 %vm157_vm1, %v26213_v3  ;;  %v26221_v3 = vld [vmem:[#allocation27_spill] sm:$0xff] }
 0x2a1   :  { %17084 = vmatprep.mubr.msk.f32.mxu0 %vm157_vm1, %v26214_v14  ;;  %v26222_v14 = vld [vmem:[#allocation28_spill] sm:$0xff] }
 0x2a4   :  { %17085 = vmatmul.mubr.msk.f32.gmra.mrb[16].mxu0 %vm157_vm1, %v26215_v12  ;;  %v26223_v12 = vld [vmem:[#allocation29_spill] sm:$0xff] }
 0x2a5   :  { %17087 = vmatprep.mubr.msk.f32.mxu0 %vm157_vm1, %v26216_v2  ;;  %v26224_v2 = vld [vmem:[#allocation30_spill] sm:$0xff] }
 0x2a8   :  { %17088 = vmatmul.mubr.msk.f32.gmra.mrb[18].mxu0 %vm157_vm1, %v26217_v11  ;;  %v26225_v11 = vld [vmem:[#allocation31_spill] sm:$0xff] }
 0x2a9   :  { %17090 = vmatprep.mubr.msk.f32.mxu0 %vm157_vm1, %v26218_v47  ;;  %v26226_v47 = vld [vmem:[#allocation32_spill] sm:$0xff] }
 0x2ac   :  { %17091 = vmatmul.mubr.msk.f32.gmra.mrb[20].mxu0 %vm157_vm1, %v26219_v8  ;;  %v21237_v8 = vld [vmem:[%s25925_s0 + $0x182] sm:$0xff] }
 0x2ad   :  { %17093 = vmatprep.mubr.msk.f32.mxu0 %vm157_vm1, %v26220_v6  ;;  %26227 = vst [vmem:[#allocation4_spill] sm:$0xff] %v21237_v8  ;;  %v26228_v6 = vld [vmem:[#allocation33_spill] sm:$0xff] }
 0x2b0   :  { %17094 = vmatmul.mubr.msk.f32.gmra.mrb[22].mxu0 %vm157_vm1, %v26221_v3  ;;  %v21246_v3 = vld [vmem:[%s25925_s0 + $0x18a] sm:$0xff] }
 0x2b1   :  { %17096 = vmatprep.mubr.msk.f32.mxu0 %vm157_vm1, %v26222_v14  ;;  %26229 = vst [vmem:[#allocation5_spill] sm:$0xff] %v21246_v3  ;;  %v26230_v14 = vld [vmem:[#allocation34_spill] sm:$0xff] }
 0x2b4   :  { %17097 = vmatmul.mubr.msk.f32.gmra.mrb[24].mxu0 %vm157_vm1, %v26223_v12  ;;  %v26231_v12 = vld [vmem:[#allocation35_spill] sm:$0xff] }
 0x2b5   :  { %17099 = vmatprep.mubr.msk.f32.mxu0 %vm157_vm1, %v26224_v2  ;;  %v26232_v2 = vld [vmem:[#allocation36_spill] sm:$0xff] }
 0x2b8   :  { %17100 = vmatmul.mubr.msk.f32.gmra.mrb[26].mxu0 %vm157_vm1, %v26225_v11  ;;  %v26233_v11 = vld [vmem:[#allocation37_spill] sm:$0xff] }
 0x2b9   :  { %17102 = vmatprep.mubr.msk.f32.mxu0 %vm157_vm1, %v26226_v47  ;;  %v26234_v47 = vld [vmem:[#allocation38_spill] sm:$0xff] }
 0x2bc   :  { %17103 = vmatmul.mubr.msk.f32.gmra.mrb[28].mxu0 %vm157_vm1, %v26228_v6  ;;  %v26235_v6 = vld [vmem:[#allocation39_spill] sm:$0xff] }
 0x2bd   :  { %17105 = vmatprep.mubr.msk.f32.mxu0 %vm157_vm1, %v21237_v8  ;;  %v26236_v8 = vld [vmem:[#allocation40_spill] sm:$0xff] }
 0x2c0   :  { %17106 = vmatmul.mubr.msk.f32.gmra.mrb[30].mxu0 %vm157_vm1, %v21246_v3  ;;  %v26237_v3 = vld [vmem:[#allocation41_spill] sm:$0xff] }
 0x2c1   :  { %17108 = vmatprep.mubr.msk.f32.mxu0 %vm157_vm1, %v26230_v14  ;;  %v26238_v14 = vld [vmem:[#allocation42_spill] sm:$0xff] }
 0x2c4   :  { %17109 = vmatmul.mubr.msk.f32.gmra.mrb[32].mxu0 %vm157_vm1, %v26231_v12  ;;  %v26239_v12 = vld [vmem:[#allocation43_spill] sm:$0xff] }
 0x2c5   :  { %17111 = vmatprep.mubr.msk.f32.mxu0 %vm157_vm1, %v26232_v2  ;;  %v26240_v2 = vld [vmem:[#allocation44_spill] sm:$0xff] }
 0x2c8   :  { %17112 = vmatmul.mubr.msk.f32.gmra.mrb[34].mxu0 %vm157_vm1, %v26233_v11  ;;  %v26241_v11 = vld [vmem:[#allocation45_spill] sm:$0xff] }
 0x2c9   :  { %17114 = vmatprep.mubr.msk.f32.mxu0 %vm157_vm1, %v26234_v47  ;;  %v26242_v47 = vld [vmem:[#allocation46_spill] sm:$0xff] }
 0x2cc   :  { %17115 = vmatmul.mubr.msk.f32.gmra.mrb[36].mxu0 %vm157_vm1, %v26235_v6  ;;  %v26243_v6 = vld [vmem:[#allocation47_spill] sm:$0xff] }
 0x2cd   :  { %17117 = vmatprep.mubr.msk.f32.mxu0 %vm157_vm1, %v26236_v8  ;;  %v26244_v8 = vld [vmem:[#allocation48_spill] sm:$0xff] }
 0x2d0   :  { %17118 = vmatmul.mubr.msk.f32.gmra.mrb[38].mxu0 %vm157_vm1, %v26237_v3  ;;  %v26245_v3 = vld [vmem:[#allocation49_spill] sm:$0xff] }
 0x2d1   :  { %17120 = vmatprep.mubr.msk.f32.mxu0 %vm157_vm1, %v26238_v14  ;;  %v26246_v14 = vld [vmem:[#allocation50_spill] sm:$0xff] }
 0x2d4   :  { %17121 = vmatmul.mubr.msk.f32.gmra.mrb[40].mxu0 %vm157_vm1, %v26239_v12  ;;  %v26247_v12 = vld [vmem:[#allocation51_spill] sm:$0xff] }
 0x2d5   :  { %17123 = vmatprep.mubr.msk.f32.mxu0 %vm157_vm1, %v26240_v2  ;;  %v26248_v2 = vld [vmem:[#allocation52_spill] sm:$0xff] }
 0x2d8   :  { %17124 = vmatmul.mubr.msk.f32.gmra.mrb[42].mxu0 %vm157_vm1, %v26241_v11  ;;  %v26249_v11 = vld [vmem:[#allocation53_spill] sm:$0xff] }
 0x2d9   :  { %17126 = vmatprep.mubr.msk.f32.mxu0 %vm157_vm1, %v26242_v47  ;;  %v26250_v47 = vld [vmem:[#allocation54_spill] sm:$0xff] }
 0x2dc   :  { %17127 = vmatmul.mubr.msk.f32.gmra.mrb[44].mxu0 %vm157_vm1, %v26243_v6  ;;  %v26251_v6 = vld [vmem:[#allocation55_spill] sm:$0xff] }
 0x2dd   :  { %17129 = vmatprep.mubr.msk.f32.mxu0 %vm157_vm1, %v26244_v8  ;;  %v26252_v8 = vld [vmem:[#allocation56_spill] sm:$0xff] }
 0x2e0   :  { %17130 = vmatmul.mubr.msk.f32.gmra.mrb[46].mxu0 %vm157_vm1, %v26245_v3  ;;  %v26253_v3 = vld [vmem:[#allocation57_spill] sm:$0xff] }
 0x2e1   :  { %17132 = vmatprep.mubr.msk.f32.mxu0 %vm157_vm1, %v26246_v14  ;;  %v26254_v14 = vld [vmem:[#allocation58_spill] sm:$0xff] }
 0x2e4   :  { %17133 = vmatmul.mubr.msk.f32.gmra.mrb[48].mxu0 %vm157_vm1, %v26247_v12  ;;  %v26255_v12 = vld [vmem:[#allocation59_spill] sm:$0xff] }
 0x2e5   :  { %17135 = vmatprep.mubr.msk.f32.mxu0 %vm157_vm1, %v26248_v2  ;;  %v26256_v2 = vld [vmem:[#allocation60_spill] sm:$0xff] }
 0x2e8   :  { %17136 = vmatmul.mubr.msk.f32.gmra.mrb[50].mxu0 %vm157_vm1, %v26249_v11  ;;  %v21311_v11 = vld [vmem:[%s25925_s0 + $0x332] sm:$0xff] }
 0x2e9   :  { %17138 = vmatprep.mubr.msk.f32.mxu0 %vm157_vm1, %v26250_v47  ;;  %v14426_v47 = vld [vmem:[%s25925_s0 + $0x48] sm:$0xff] }
 0x2ec   :  { %17139 = vmatmul.mubr.msk.f32.gmra.mrb[52].mxu0 %vm157_vm1, %v26251_v6  ;;  %v21338_v6 = vld [vmem:[%s25924_s1 + $0x20] sm:$0xf] }
 0x2ed   :  { %17141 = vmatprep.mubr.msk.f32.mxu0 %vm157_vm1, %v26252_v8  ;;  %v14427_v8 = vld [vmem:[%s25925_s0 + $0x50] sm:$0xff] }
 0x2f0   :  { %17142 = vmatmul.mubr.msk.f32.gmra.mrb[54].mxu0 %vm157_vm1, %v26253_v3  ;;  %v14428_v3 = vld [vmem:[%s25925_s0 + $0x60] sm:$0xff] }
 0x2f1   :  { %17144 = vmatprep.mubr.msk.f32.mxu0 %vm157_vm1, %v26254_v14  ;;  %v14430_v14 = vld [vmem:[%s25925_s0 + $0x78] sm:$0xff] }
 0x2f4   :  { %17145 = vmatmul.mubr.msk.f32.gmra.mrb[56].mxu0 %vm157_vm1, %v20533_v36  ;;  %v21320_v36 = vld [vmem:[%s25925_s0 + $0x33a] sm:$0xff] }
 0x2f5   :  { %17147 = vmatprep.mubr.msk.f32.mxu0 %vm157_vm1, %v26255_v12  ;;  %v14431_v12 = vld [vmem:[%s25925_s0 + $0x80] sm:$0xff] }
 0x2f8   :  { %17148 = vmatmul.mubr.msk.f32.gmra.mrb[58].mxu0 %vm157_vm1, %v26256_v2  ;;  %v14432_v2 = vld [vmem:[%s25925_s0 + $0x90] sm:$0xff] }
 0x2f9   :  { %17150 = vmatprep.mubr.msk.f32.mxu0 %vm157_vm1, %v20552_v37  ;;  %v14424_v37 = vld [vmem:[%s25925_s0 + $0x30] sm:$0xff] }
 0x2fc   :  { %17151 = vmatmul.mubr.msk.f32.gmra.mrb[60].mxu0 %vm157_vm1, %v20561_v4  ;;  %v14425_v4 = vld [vmem:[%s25925_s0 + $0x38] sm:$0xff] }
 0x2fd   :  { %17153 = vmatprep.mubr.msk.f32.mxu0 %vm157_vm1, %v21311_v11 }
 0x300   :  { %17154 = vmatmul.mubr.msk.f32.gmra.mrb[62].mxu0 %vm157_vm1, %v21320_v36 }
 0x301   :  { %17158 = vmatprep.mubr.msk.f32.mxu0 %vm157_vm1, %v14424_v37  ;;  %v14433_v37 = vld [vmem:[%s25925_s0 + $0x98] sm:$0xff] }
 0x304   :  { %17159 = vmatmul.mubr.msk.f32.vlgmr.msra.gmra.mrb[0].mxu0 %vm157_vm1, %v14425_v4  ;;  %v14434_v4 = vld [vmem:[%s25925_s0 + $0xa8] sm:$0xff] }
 0x305   :  { %17255 = vmatpush3.msk.msra.mxu0 %vm350_vm0, %v21174_v46  ;;  %17161 = vmatprep.mubr.msk.f32.mxu0 %vm157_vm1, %v14426_v47  ;;  %v14429_v46 = vld [vmem:[%s25925_s0 + $0x68] sm:$0xff]  ;;  %v14435_v47 = vld [vmem:[%s25925_s0 + $0xb0] sm:$0xff] }
 0x306   :  { %17352 = vmatprep.subr.msk.mxu0 %vm350_vm0, %v21338_v6 }
 0x308   :  { %17162 = vmatmul.mubr.msk.f32.gmra.mrb[2].mxu0 %vm157_vm1, %v14427_v8  ;;  %v14436_v8 = vld [vmem:[%s25925_s0 + $0xc0] sm:$0xff] }
 0x309   :  { %17164 = vmatprep.mubr.msk.f32.mxu0 %vm157_vm1, %v14428_v3  ;;  %v14437_v3 = vld [vmem:[%s25925_s0 + $0xc8] sm:$0xff] }
 0x30c   :  { %17165 = vmatmul.mubr.msk.f32.gmra.mrb[4].mxu0 %vm157_vm1, %v14429_v46  ;;  %v14438_v46 = vld [vmem:[%s25925_s0 + $0xd8] sm:$0xff] }
 0x30d   :  { %17167 = vmatprep.mubr.msk.f32.mxu0 %vm157_vm1, %v14430_v14  ;;  %v14439_v14 = vld [vmem:[%s25925_s0 + $0xe0] sm:$0xff] }
 0x310   :  { %17168 = vmatmul.mubr.msk.f32.gmra.mrb[6].mxu0 %vm157_vm1, %v14431_v12  ;;  %v14440_v12 = vld [vmem:[%s25925_s0 + $0xf0] sm:$0xff] }
 0x311   :  { %17170 = vmatprep.mubr.msk.f32.mxu0 %vm157_vm1, %v14432_v2  ;;  %v14441_v2 = vld [vmem:[%s25925_s0 + $0xf8] sm:$0xff] }
 0x314   :  { %17171 = vmatmul.mubr.msk.f32.gmra.mrb[8].mxu0 %vm157_vm1, %v14433_v37  ;;  %v14442_v37 = vld [vmem:[%s25925_s0 + $0x108] sm:$0xff] }
 0x315   :  { %17173 = vmatprep.mubr.msk.f32.mxu0 %vm157_vm1, %v14434_v4  ;;  %v14443_v4 = vld [vmem:[%s25925_s0 + $0x110] sm:$0xff] }
 0x318   :  { %17174 = vmatmul.mubr.msk.f32.gmra.mrb[10].mxu0 %vm157_vm1, %v14435_v47  ;;  %v14444_v47 = vld [vmem:[%s25925_s0 + $0x120] sm:$0xff] }
 0x319   :  { %17176 = vmatprep.mubr.msk.f32.mxu0 %vm157_vm1, %v14436_v8  ;;  %v14445_v8 = vld [vmem:[%s25925_s0 + $0x128] sm:$0xff] }
 0x31c   :  { %17177 = vmatmul.mubr.msk.f32.gmra.mrb[12].mxu0 %vm157_vm1, %v14437_v3  ;;  %v14446_v3 = vld [vmem:[%s25925_s0 + $0x138] sm:$0xff] }
 0x31d   :  { %17179 = vmatprep.mubr.msk.f32.mxu0 %vm157_vm1, %v14438_v46  ;;  %v14447_v46 = vld [vmem:[%s25925_s0 + $0x140] sm:$0xff] }
 0x320   :  { %17180 = vmatmul.mubr.msk.f32.gmra.mrb[14].mxu0 %vm157_vm1, %v14439_v14  ;;  %v14448_v14 = vld [vmem:[%s25925_s0 + $0x150] sm:$0xff] }
 0x321   :  { %17182 = vmatprep.mubr.msk.f32.mxu0 %vm157_vm1, %v14440_v12  ;;  %v14449_v12 = vld [vmem:[%s25925_s0 + $0x158] sm:$0xff] }
 0x324   :  { %17183 = vmatmul.mubr.msk.f32.gmra.mrb[16].mxu0 %vm157_vm1, %v14441_v2  ;;  %v14450_v2 = vld [vmem:[%s25925_s0 + $0x168] sm:$0xff] }
 0x325   :  { %17185 = vmatprep.mubr.msk.f32.mxu0 %vm157_vm1, %v14442_v37  ;;  %v14451_v37 = vld [vmem:[%s25925_s0 + $0x170] sm:$0xff] }
 0x328   :  { %17186 = vmatmul.mubr.msk.f32.gmra.mrb[18].mxu0 %vm157_vm1, %v14443_v4  ;;  %v14454_v4 = vld [vmem:[%s25925_s0 + $0x198] sm:$0xff] }
 0x329   :  { %17188 = vmatprep.mubr.msk.f32.mxu0 %vm157_vm1, %v14444_v47  ;;  %v14455_v47 = vld [vmem:[%s25925_s0 + $0x1a0] sm:$0xff] }
 0x32c   :  { %17189 = vmatmul.mubr.msk.f32.gmra.mrb[20].mxu0 %vm157_vm1, %v14445_v8  ;;  %v14456_v8 = vld [vmem:[%s25925_s0 + $0x1e0] sm:$0xff] }
 0x32d   :  { %17191 = vmatprep.mubr.msk.f32.mxu0 %vm157_vm1, %v14446_v3  ;;  %v14459_v3 = vld [vmem:[%s25925_s0 + $0x200] sm:$0xff] }
 0x330   :  { %17192 = vmatmul.mubr.msk.f32.gmra.mrb[22].mxu0 %vm157_vm1, %v14447_v46  ;;  %v14460_v46 = vld [vmem:[%s25925_s0 + $0x210] sm:$0xff] }
 0x331   :  { %17194 = vmatprep.mubr.msk.f32.mxu0 %vm157_vm1, %v14448_v14  ;;  %v14461_v14 = vld [vmem:[%s25925_s0 + $0x218] sm:$0xff] }
 0x334   :  { %17195 = vmatmul.mubr.msk.f32.gmra.mrb[24].mxu0 %vm157_vm1, %v14449_v12  ;;  %v14462_v12 = vld [vmem:[%s25925_s0 + $0x228] sm:$0xff] }
 0x335   :  { %17197 = vmatprep.mubr.msk.f32.mxu0 %vm157_vm1, %v14450_v2  ;;  %v14463_v2 = vld [vmem:[%s25925_s0 + $0x230] sm:$0xff] }
 0x338   :  { %17198 = vmatmul.mubr.msk.f32.gmra.mrb[26].mxu0 %vm157_vm1, %v14451_v37  ;;  %v14464_v37 = vld [vmem:[%s25925_s0 + $0x240] sm:$0xff] }
 0x339   :  { %17200 = vmatprep.mubr.msk.f32.mxu0 %vm157_vm1, %v20635_v5  ;;  %v14457_v5 = vld [vmem:[%s25925_s0 + $0x1e8] sm:$0xff] }
 0x33c   :  { %17201 = vmatmul.mubr.msk.f32.gmra.mrb[28].mxu0 %vm157_vm1, %v20644_v7  ;;  %v14458_v7 = vld [vmem:[%s25925_s0 + $0x1f8] sm:$0xff] }
 0x33d   :  { %17203 = vmatprep.mubr.msk.f32.mxu0 %vm157_vm1, %v14454_v4  ;;  %v14465_v4 = vld [vmem:[%s25925_s0 + $0x248] sm:$0xff] }
 0x340   :  { %17204 = vmatmul.mubr.msk.f32.gmra.mrb[30].mxu0 %vm157_vm1, %v14455_v47  ;;  %v14466_v47 = vld [vmem:[%s25925_s0 + $0x258] sm:$0xff] }
 0x341   :  { %17206 = vmatprep.mubr.msk.f32.mxu0 %vm157_vm1, %v14456_v8  ;;  %v14467_v8 = vld [vmem:[%s25925_s0 + $0x260] sm:$0xff] }
 0x344   :  { %17207 = vmatmul.mubr.msk.f32.gmra.mrb[32].mxu0 %vm157_vm1, %v14457_v5  ;;  %v14468_v5 = vld [vmem:[%s25925_s0 + $0x270] sm:$0xff] }
 0x345   :  { %17209 = vmatprep.mubr.msk.f32.mxu0 %vm157_vm1, %v14458_v7  ;;  %v14469_v7 = vld [vmem:[%s25925_s0 + $0x278] sm:$0xff] }
 0x348   :  { %17210 = vmatmul.mubr.msk.f32.gmra.mrb[34].mxu0 %vm157_vm1, %v14459_v3  ;;  %v14470_v3 = vld [vmem:[%s25925_s0 + $0x288] sm:$0xff] }
 0x349   :  { %17212 = vmatprep.mubr.msk.f32.mxu0 %vm157_vm1, %v14460_v46  ;;  %v14471_v46 = vld [vmem:[%s25925_s0 + $0x290] sm:$0xff] }
 0x34c   :  { %17213 = vmatmul.mubr.msk.f32.gmra.mrb[36].mxu0 %vm157_vm1, %v14461_v14  ;;  %v14472_v14 = vld [vmem:[%s25925_s0 + $0x2a0] sm:$0xff] }
 0x34d   :  { %17215 = vmatprep.mubr.msk.f32.mxu0 %vm157_vm1, %v14462_v12  ;;  %v14473_v12 = vld [vmem:[%s25925_s0 + $0x2a8] sm:$0xff] }
 0x350   :  { %17216 = vmatmul.mubr.msk.f32.gmra.mrb[38].mxu0 %vm157_vm1, %v14463_v2  ;;  %v14474_v2 = vld [vmem:[%s25925_s0 + $0x2b8] sm:$0xff] }
 0x351   :  { %17218 = vmatprep.mubr.msk.f32.mxu0 %vm157_vm1, %v14464_v37  ;;  %v14475_v37 = vld [vmem:[%s25925_s0 + $0x2c0] sm:$0xff] }
 0x354   :  { %17219 = vmatmul.mubr.msk.f32.gmra.mrb[40].mxu0 %vm157_vm1, %v14465_v4  ;;  %v14476_v4 = vld [vmem:[%s25925_s0 + $0x2d0] sm:$0xff] }
 0x355   :  { %17221 = vmatprep.mubr.msk.f32.mxu0 %vm157_vm1, %v14466_v47  ;;  %v14477_v47 = vld [vmem:[%s25925_s0 + $0x2d8] sm:$0xff] }
 0x358   :  { %17222 = vmatmul.mubr.msk.f32.gmra.mrb[42].mxu0 %vm157_vm1, %v14467_v8  ;;  %v14478_v8 = vld [vmem:[%s25925_s0 + $0x2e8] sm:$0xff] }
 0x359   :  { %17224 = vmatprep.mubr.msk.f32.mxu0 %vm157_vm1, %v14468_v5  ;;  %v14479_v5 = vld [vmem:[%s25925_s0 + $0x2f0] sm:$0xff] }
 0x35c   :  { %17225 = vmatmul.mubr.msk.f32.gmra.mrb[44].mxu0 %vm157_vm1, %v14469_v7  ;;  %v14480_v7 = vld [vmem:[%s25925_s0 + $0x300] sm:$0xff] }
 0x35d   :  { %17227 = vmatprep.mubr.msk.f32.mxu0 %vm157_vm1, %v14470_v3  ;;  %v14481_v3 = vld [vmem:[%s25925_s0 + $0x308] sm:$0xff] }
 0x360   :  { %17228 = vmatmul.mubr.msk.f32.gmra.mrb[46].mxu0 %vm157_vm1, %v14471_v46  ;;  %v14482_v46 = vld [vmem:[%s25925_s0 + $0x318] sm:$0xff] }
 0x361   :  { %17230 = vmatprep.mubr.msk.f32.mxu0 %vm157_vm1, %v14472_v14  ;;  %v14483_v14 = vld [vmem:[%s25925_s0 + $0x320] sm:$0xff] }
 0x364   :  { %17231 = vmatmul.mubr.msk.f32.gmra.mrb[48].mxu0 %vm157_vm1, %v14473_v12  ;;  %v14486_v12 = vld [vmem:[%s25925_s0 + $0x348] sm:$0xff] }
 0x365   :  { %17233 = vmatprep.mubr.msk.f32.mxu0 %vm157_vm1, %v14474_v2  ;;  %v14487_v2 = vld [vmem:[%s25925_s0 + $0x350] sm:$0xff] }
 0x368   :  { %17234 = vmatmul.mubr.msk.f32.gmra.mrb[50].mxu0 %vm157_vm1, %v14475_v37  ;;  %v14719_v37 = vld [vmem:[%s25925_s0 + $0x202] sm:$0xff] }
 0x369   :  { %17236 = vmatprep.mubr.msk.f32.mxu0 %vm157_vm1, %v14476_v4  ;;  %v14720_v4 = vld [vmem:[%s25925_s0 + $0x212] sm:$0xff] }
 0x36c   :  { %17237 = vmatmul.mubr.msk.f32.gmra.mrb[52].mxu0 %vm157_vm1, %v14477_v47  ;;  %v14721_v47 = vld [vmem:[%s25925_s0 + $0x21a] sm:$0xff] }
 0x36d   :  { %17239 = vmatprep.mubr.msk.f32.mxu0 %vm157_vm1, %v14478_v8  ;;  %v14722_v8 = vld [vmem:[%s25925_s0 + $0x22a] sm:$0xff] }
 0x370   :  { %17240 = vmatmul.mubr.msk.f32.gmra.mrb[54].mxu0 %vm157_vm1, %v14479_v5  ;;  %v14723_v5 = vld [vmem:[%s25925_s0 + $0x232] sm:$0xff] }
 0x371   :  { %17242 = vmatprep.mubr.msk.f32.mxu0 %vm157_vm1, %v14480_v7  ;;  %v14724_v7 = vld [vmem:[%s25925_s0 + $0x242] sm:$0xff] }
 0x374   :  { %17243 = vmatmul.mubr.msk.f32.gmra.mrb[56].mxu0 %vm157_vm1, %v14481_v3  ;;  %v14725_v3 = vld [vmem:[%s25925_s0 + $0x24a] sm:$0xff] }
 0x375   :  { %17245 = vmatprep.mubr.msk.f32.mxu0 %vm157_vm1, %v14482_v46  ;;  %v14726_v46 = vld [vmem:[%s25925_s0 + $0x25a] sm:$0xff] }
 0x378   :  { %17246 = vmatmul.mubr.msk.f32.gmra.mrb[58].mxu0 %vm157_vm1, %v14483_v14  ;;  %v14727_v14 = vld [vmem:[%s25925_s0 + $0x262] sm:$0xff] }
 0x379   :  { %17248 = vmatprep.mubr.msk.f32.mxu0 %vm157_vm1, %v20709_v9  ;;  %v14584_v9 = vld [vmem:[%s25925_s0 + $0x199] sm:$0xff] }
 0x37c   :  { %17249 = vmatmul.mubr.msk.f32.gmra.mrb[60].mxu0 %vm157_vm1, %v20718_v10  ;;  %v14585_v10 = vld [vmem:[%s25925_s0 + $0x1a1] sm:$0xff] }
 0x37d   :  { %17251 = vmatprep.mubr.msk.f32.mxu0 %vm157_vm1, %v14486_v12  ;;  %v14728_v12 = vld [vmem:[%s25925_s0 + $0x272] sm:$0xff] }
 0x380   :  { %17252 = vmatmul.mubr.msk.f32.gmra.mrb[62].mxu0 %vm157_vm1, %v14487_v2  ;;  %v14729_v2 = vld [vmem:[%s25925_s0 + $0x27a] sm:$0xff] }
 0x381   :  { %17256 = vmatprep.mubr.msk.f32.mxu0 %vm157_vm1, %v20732_v13  ;;  %v26257_v13 = vld [vmem:[#allocation3_spill] sm:$0xff] }
 0x384   :  { %17257 = vmatmul.mubr.msk.f32.vlgmr.msra.gmra.mrb[0].mxu0 %vm157_vm1, %v20747_v15  ;;  %v26258_v15 = vld [vmem:[#allocation61_spill] sm:$0xff] }
 0x385   :  { %17353 = vmatpush3.msk.msra.mxu0 %vm350_vm0, %v21338_v6  ;;  %17259 = vmatprep.mubr.msk.f32.mxu0 %vm157_vm1, %v20752_v16  ;;  %v26259_v16 = vld [vmem:[#allocation62_spill] sm:$0xff] }
 0x386   :  { %v14718_v6 = vld [vmem:[%s25925_s0 + $0x1fa] sm:$0xff] }
 0x388   :  { %17260 = vmatmul.mubr.msk.f32.gmra.mrb[2].mxu0 %vm157_vm1, %v20763_v17  ;;  %v26260_v17 = vld [vmem:[#allocation63_spill] sm:$0xff] }
 0x389   :  { %17262 = vmatprep.mubr.msk.f32.mxu0 %vm157_vm1, %v20768_v18  ;;  %v26261_v18 = vld [vmem:[#allocation64_spill] sm:$0xff] }
 0x38c   :  { %17263 = vmatmul.mubr.msk.f32.gmra.mrb[4].mxu0 %vm157_vm1, %v20777_v19  ;;  %v26262_v19 = vld [vmem:[#allocation65_spill] sm:$0xff] }
 0x38d   :  { %17265 = vmatprep.mubr.msk.f32.mxu0 %vm157_vm1, %v20782_v20  ;;  %v26263_v20 = vld [vmem:[#allocation66_spill] sm:$0xff] }
 0x390   :  { %17266 = vmatmul.mubr.msk.f32.gmra.mrb[6].mxu0 %vm157_vm1, %v20791_v21  ;;  %v26264_v21 = vld [vmem:[#allocation67_spill] sm:$0xff] }
 0x391   :  { %17268 = vmatprep.mubr.msk.f32.mxu0 %vm157_vm1, %v20796_v22  ;;  %v26265_v22 = vld [vmem:[#allocation68_spill] sm:$0xff] }
 0x394   :  { %17269 = vmatmul.mubr.msk.f32.gmra.mrb[8].mxu0 %vm157_vm1, %v20805_v23  ;;  %v26266_v23 = vld [vmem:[#allocation69_spill] sm:$0xff] }
 0x395   :  { %17271 = vmatprep.mubr.msk.f32.mxu0 %vm157_vm1, %v20810_v24  ;;  %v26267_v24 = vld [vmem:[#allocation70_spill] sm:$0xff] }
 0x398   :  { %17272 = vmatmul.mubr.msk.f32.gmra.mrb[10].mxu0 %vm157_vm1, %v20819_v25  ;;  %v14616_v25 = vld [vmem:[%s25925_s0 + $0x349] sm:$0xff] }
 0x399   :  { %17274 = vmatprep.mubr.msk.f32.mxu0 %vm157_vm1, %v20824_v26  ;;  %v26268_v26 = vld [vmem:[#allocation71_spill] sm:$0xff] }
 0x39c   :  { %17275 = vmatmul.mubr.msk.f32.gmra.mrb[12].mxu0 %vm157_vm1, %v20833_v27  ;;  %v14617_v27 = vld [vmem:[%s25925_s0 + $0x351] sm:$0xff] }
 0x39d   :  { %17277 = vmatprep.mubr.msk.f32.mxu0 %vm157_vm1, %v20838_v28  ;;  %v14684_v28 = vld [vmem:[%s25925_s0 + $0x32] sm:$0xff] }
 0x3a0   :  { %17278 = vmatmul.mubr.msk.f32.gmra.mrb[14].mxu0 %vm157_vm1, %v20847_v29  ;;  %v14685_v29 = vld [vmem:[%s25925_s0 + $0x3a] sm:$0xff] }
 0x3a1   :  { %17280 = vmatprep.mubr.msk.f32.mxu0 %vm157_vm1, %v20852_v30  ;;  %v14686_v30 = vld [vmem:[%s25925_s0 + $0x4a] sm:$0xff] }
 0x3a4   :  { %17281 = vmatmul.mubr.msk.f32.gmra.mrb[16].mxu0 %vm157_vm1, %v20861_v31  ;;  %v14687_v31 = vld [vmem:[%s25925_s0 + $0x52] sm:$0xff] }
 0x3a5   :  { %17283 = vmatprep.mubr.msk.f32.mxu0 %vm157_vm1, %v20866_v32  ;;  %v14688_v32 = vld [vmem:[%s25925_s0 + $0x62] sm:$0xff] }
 0x3a8   :  { %17284 = vmatmul.mubr.msk.f32.gmra.mrb[18].mxu0 %vm157_vm1, %v20875_v33  ;;  %v14689_v33 = vld [vmem:[%s25925_s0 + $0x6a] sm:$0xff] }
 0x3a9   :  { %17286 = vmatprep.mubr.msk.f32.mxu0 %vm157_vm1, %v20880_v34  ;;  %v14690_v34 = vld [vmem:[%s25925_s0 + $0x7a] sm:$0xff] }
 0x3ac   :  { %17287 = vmatmul.mubr.msk.f32.gmra.mrb[20].mxu0 %vm157_vm1, %v20889_v35  ;;  %v14691_v35 = vld [vmem:[%s25925_s0 + $0x82] sm:$0xff] }
 0x3ad   :  { %17289 = vmatprep.mubr.msk.f32.mxu0 %vm157_vm1, %v20894_v38  ;;  %v14692_v38 = vld [vmem:[%s25925_s0 + $0x92] sm:$0xff] }
 0x3b0   :  { %17290 = vmatmul.mubr.msk.f32.gmra.mrb[22].mxu0 %vm157_vm1, %v20903_v39  ;;  %v14693_v39 = vld [vmem:[%s25925_s0 + $0x9a] sm:$0xff] }
 0x3b1   :  { %17292 = vmatprep.mubr.msk.f32.mxu0 %vm157_vm1, %v20908_v40  ;;  %v14694_v40 = vld [vmem:[%s25925_s0 + $0xaa] sm:$0xff] }
 0x3b4   :  { %17293 = vmatmul.mubr.msk.f32.gmra.mrb[24].mxu0 %vm157_vm1, %v20917_v41  ;;  %v14695_v41 = vld [vmem:[%s25925_s0 + $0xb2] sm:$0xff] }
 0x3b5   :  { %17295 = vmatprep.mubr.msk.f32.mxu0 %vm157_vm1, %v20922_v42  ;;  %v14696_v42 = vld [vmem:[%s25925_s0 + $0xc2] sm:$0xff] }
 0x3b8   :  { %17296 = vmatmul.mubr.msk.f32.gmra.mrb[26].mxu0 %vm157_vm1, %v20931_v43  ;;  %v14697_v43 = vld [vmem:[%s25925_s0 + $0xca] sm:$0xff] }
 0x3b9   :  { %17298 = vmatprep.mubr.msk.f32.mxu0 %vm157_vm1, %v20936_v44  ;;  %v14698_v44 = vld [vmem:[%s25925_s0 + $0xda] sm:$0xff] }
 0x3bc   :  { %17299 = vmatmul.mubr.msk.f32.gmra.mrb[28].mxu0 %vm157_vm1, %v20945_v45  ;;  %v14699_v45 = vld [vmem:[%s25925_s0 + $0xe2] sm:$0xff] }
 0x3bd   :  { %17301 = vmatprep.mubr.msk.f32.mxu0 %vm157_vm1, %v14584_v9  ;;  %v14730_v9 = vld [vmem:[%s25925_s0 + $0x28a] sm:$0xff] }
 0x3c0   :  { %17302 = vmatmul.mubr.msk.f32.gmra.mrb[30].mxu0 %vm157_vm1, %v14585_v10  ;;  %v14731_v10 = vld [vmem:[%s25925_s0 + $0x292] sm:$0xff] }
 0x3c1   :  { %17304 = vmatprep.mubr.msk.f32.mxu0 %vm157_vm1, %v20959_v48  ;;  %v14700_v48 = vld [vmem:[%s25925_s0 + $0xf2] sm:$0xff] }
 0x3c4   :  { %17305 = vmatmul.mubr.msk.f32.gmra.mrb[32].mxu0 %vm157_vm1, %v20967_v49  ;;  %v14701_v49 = vld [vmem:[%s25925_s0 + $0xfa] sm:$0xff] }
 0x3c5   :  { %17307 = vmatprep.mubr.msk.f32.mxu0 %vm157_vm1, %v20972_v50  ;;  %v14702_v50 = vld [vmem:[%s25925_s0 + $0x10a] sm:$0xff] }
 0x3c8   :  { %17308 = vmatmul.mubr.msk.f32.gmra.mrb[34].mxu0 %vm157_vm1, %v20981_v51  ;;  %v14703_v51 = vld [vmem:[%s25925_s0 + $0x112] sm:$0xff] }
 0x3c9   :  { %17310 = vmatprep.mubr.msk.f32.mxu0 %vm157_vm1, %v20986_v52  ;;  %v14704_v52 = vld [vmem:[%s25925_s0 + $0x122] sm:$0xff] }
 0x3cc   :  { %17311 = vmatmul.mubr.msk.f32.gmra.mrb[36].mxu0 %vm157_vm1, %v20995_v53  ;;  %v14705_v53 = vld [vmem:[%s25925_s0 + $0x12a] sm:$0xff] }
 0x3cd   :  { %17313 = vmatprep.mubr.msk.f32.mxu0 %vm157_vm1, %v21000_v54  ;;  %v14706_v54 = vld [vmem:[%s25925_s0 + $0x13a] sm:$0xff] }
 0x3d0   :  { %17314 = vmatmul.mubr.msk.f32.gmra.mrb[38].mxu0 %vm157_vm1, %v21009_v55  ;;  %v14707_v55 = vld [vmem:[%s25925_s0 + $0x142] sm:$0xff] }
 0x3d1   :  { %17316 = vmatprep.mubr.msk.f32.mxu0 %vm157_vm1, %v21014_v56  ;;  %v14708_v56 = vld [vmem:[%s25925_s0 + $0x152] sm:$0xff] }
 0x3d4   :  { %17317 = vmatmul.mubr.msk.f32.gmra.mrb[40].mxu0 %vm157_vm1, %v21023_v57  ;;  %v14709_v57 = vld [vmem:[%s25925_s0 + $0x15a] sm:$0xff] }
 0x3d5   :  { %17319 = vmatprep.mubr.msk.f32.mxu0 %vm157_vm1, %v21028_v58  ;;  %v14710_v58 = vld [vmem:[%s25925_s0 + $0x16a] sm:$0xff] }
 0x3d8   :  { %17320 = vmatmul.mubr.msk.f32.gmra.mrb[42].mxu0 %vm157_vm1, %v21037_v59  ;;  %v14711_v59 = vld [vmem:[%s25925_s0 + $0x172] sm:$0xff] }
 0x3d9   :  { %17322 = vmatprep.mubr.msk.f32.mxu0 %vm157_vm1, %v21042_v60  ;;  %v26269_v60 = vld [vmem:[#allocation4_spill] sm:$0xff] }
 0x3dc   :  { %17323 = vmatmul.mubr.msk.f32.gmra.mrb[44].mxu0 %vm157_vm1, %v21051_v61  ;;  %v14714_v61 = vld [vmem:[%s25925_s0 + $0x19a] sm:$0xff] }
 0x3dd   :  { %17325 = vmatprep.mubr.msk.f32.mxu0 %vm157_vm1, %v21056_v62  ;;  %v26270_v62 = vld [vmem:[#allocation5_spill] sm:$0xff] }
 0x3e0   :  { %17326 = vmatmul.mubr.msk.f32.gmra.mrb[46].mxu0 %vm157_vm1, %v21065_v63  ;;  %v14715_v63 = vld [vmem:[%s25925_s0 + $0x1a2] sm:$0xff] }
 0x3e1   :  { %17328 = vmatprep.mubr.msk.f32.mxu0 %vm157_vm1, %v21070_v0  ;;  %v14716_v0 = vld [vmem:[%s25925_s0 + $0x1e2] sm:$0xff] }
 0x3e4   :  { %17329 = vmatmul.mubr.msk.f32.gmra.mrb[48].mxu0 %vm157_vm1, %v21079_v1  ;;  %v14717_v1 = vld [vmem:[%s25925_s0 + $0x1ea] sm:$0xff] }
 0x3e5   :  { %17331 = vmatprep.mubr.msk.f32.mxu0 %vm157_vm1, %v26257_v13  ;;  %v14732_v13 = vld [vmem:[%s25925_s0 + $0x2a2] sm:$0xff] }
 0x3e8   :  { %17332 = vmatmul.mubr.msk.f32.gmra.mrb[50].mxu0 %vm157_vm1, %v26258_v15  ;;  %v14733_v15 = vld [vmem:[%s25925_s0 + $0x2aa] sm:$0xff] }
 0x3e9   :  { %17334 = vmatprep.mubr.msk.f32.mxu0 %vm157_vm1, %v26259_v16  ;;  %v14734_v16 = vld [vmem:[%s25925_s0 + $0x2ba] sm:$0xff] }
 0x3ec   :  { %17335 = vmatmul.mubr.msk.f32.gmra.mrb[52].mxu0 %vm157_vm1, %v26260_v17  ;;  %v14735_v17 = vld [vmem:[%s25925_s0 + $0x2c2] sm:$0xff] }
 0x3ed   :  { %17337 = vmatprep.mubr.msk.f32.mxu0 %vm157_vm1, %v26261_v18  ;;  %v14736_v18 = vld [vmem:[%s25925_s0 + $0x2d2] sm:$0xff] }
 0x3f0   :  { %17338 = vmatmul.mubr.msk.f32.gmra.mrb[54].mxu0 %vm157_vm1, %v26262_v19  ;;  %v14737_v19 = vld [vmem:[%s25925_s0 + $0x2da] sm:$0xff] }
 0x3f1   :  { %17340 = vmatprep.mubr.msk.f32.mxu0 %vm157_vm1, %v26263_v20  ;;  %v14738_v20 = vld [vmem:[%s25925_s0 + $0x2ea] sm:$0xff] }
 0x3f4   :  { %17341 = vmatmul.mubr.msk.f32.gmra.mrb[56].mxu0 %vm157_vm1, %v26264_v21  ;;  %v14739_v21 = vld [vmem:[%s25925_s0 + $0x2f2] sm:$0xff] }
 0x3f5   :  { %17343 = vmatprep.mubr.msk.f32.mxu0 %vm157_vm1, %v26265_v22  ;;  %v14740_v22 = vld [vmem:[%s25925_s0 + $0x302] sm:$0xff] }
 0x3f8   :  { %17344 = vmatmul.mubr.msk.f32.gmra.mrb[58].mxu0 %vm157_vm1, %v26266_v23  ;;  %v14741_v23 = vld [vmem:[%s25925_s0 + $0x30a] sm:$0xff] }
 0x3f9   :  { %17346 = vmatprep.mubr.msk.f32.mxu0 %vm157_vm1, %v26267_v24  ;;  %v14742_v24 = vld [vmem:[%s25925_s0 + $0x31a] sm:$0xff] }
 0x3fc   :  { %17347 = vmatmul.mubr.msk.f32.gmra.mrb[60].mxu0 %vm157_vm1, %v26268_v26  ;;  %v14746_v26 = vld [vmem:[%s25925_s0 + $0x34a] sm:$0xff] }
 0x3fd   :  { %17349 = vmatprep.mubr.msk.f32.mxu0 %vm157_vm1, %v14616_v25  ;;  %v14743_v25 = vld [vmem:[%s25925_s0 + $0x322] sm:$0xff] }
 0x400   :  { %17350 = vmatmul.mubr.msk.f32.gmra.mrb[62].mxu0 %vm157_vm1, %v14617_v27  ;;  %v14747_v27 = vld [vmem:[%s25925_s0 + $0x352] sm:$0xff] }
 0x401   :  { %17354 = vmatprep.mubr.msk.f32.mxu0 %vm157_vm1, %v14684_v28 }
 0x404   :  { %17355 = vmatmul.mubr.msk.f32.vlgmr.msra.gmra.mrb[0].mxu0 %vm157_vm1, %v14685_v29 }
 0x405   :  { %17357 = vmatprep.mubr.msk.f32.mxu0 %vm157_vm1, %v14686_v30 }
 0x408   :  { %17358 = vmatmul.mubr.msk.f32.gmra.mrb[2].mxu0 %vm157_vm1, %v14687_v31 }
 0x409   :  { %17360 = vmatprep.mubr.msk.f32.mxu0 %vm157_vm1, %v14688_v32 }
 0x40c   :  { %17361 = vmatmul.mubr.msk.f32.gmra.mrb[4].mxu0 %vm157_vm1, %v14689_v33 }
 0x40d   :  { %17363 = vmatprep.mubr.msk.f32.mxu0 %vm157_vm1, %v14690_v34 }
 0x410   :  { %17364 = vmatmul.mubr.msk.f32.gmra.mrb[6].mxu0 %vm157_vm1, %v14691_v35 }
 0x411   :  { %17366 = vmatprep.mubr.msk.f32.mxu0 %vm157_vm1, %v14692_v38 }
 0x414   :  { %17367 = vmatmul.mubr.msk.f32.gmra.mrb[8].mxu0 %vm157_vm1, %v14693_v39 }
 0x415   :  { %17369 = vmatprep.mubr.msk.f32.mxu0 %vm157_vm1, %v14694_v40 }
 0x418   :  { %17370 = vmatmul.mubr.msk.f32.gmra.mrb[10].mxu0 %vm157_vm1, %v14695_v41 }
 0x419   :  { %17372 = vmatprep.mubr.msk.f32.mxu0 %vm157_vm1, %v14696_v42 }
 0x41c   :  { %17373 = vmatmul.mubr.msk.f32.gmra.mrb[12].mxu0 %vm157_vm1, %v14697_v43 }
 0x41d   :  { %17375 = vmatprep.mubr.msk.f32.mxu0 %vm157_vm1, %v14698_v44 }
 0x420   :  { %17376 = vmatmul.mubr.msk.f32.gmra.mrb[14].mxu0 %vm157_vm1, %v14699_v45 }
 0x421   :  { %17378 = vmatprep.mubr.msk.f32.mxu0 %vm157_vm1, %v14700_v48 }
 0x424   :  { %17379 = vmatmul.mubr.msk.f32.gmra.mrb[16].mxu0 %vm157_vm1, %v14701_v49 }
 0x425   :  { %17381 = vmatprep.mubr.msk.f32.mxu0 %vm157_vm1, %v14702_v50 }
 0x428   :  { %17382 = vmatmul.mubr.msk.f32.gmra.mrb[18].mxu0 %vm157_vm1, %v14703_v51 }
 0x429   :  { %17384 = vmatprep.mubr.msk.f32.mxu0 %vm157_vm1, %v14704_v52 }
 0x42c   :  { %17385 = vmatmul.mubr.msk.f32.gmra.mrb[20].mxu0 %vm157_vm1, %v14705_v53 }
 0x42d   :  { %17387 = vmatprep.mubr.msk.f32.mxu0 %vm157_vm1, %v14706_v54 }
 0x430   :  { %17388 = vmatmul.mubr.msk.f32.gmra.mrb[22].mxu0 %vm157_vm1, %v14707_v55 }
 0x431   :  { %17390 = vmatprep.mubr.msk.f32.mxu0 %vm157_vm1, %v14708_v56 }
 0x434   :  { %17391 = vmatmul.mubr.msk.f32.gmra.mrb[24].mxu0 %vm157_vm1, %v14709_v57 }
 0x435   :  { %17393 = vmatprep.mubr.msk.f32.mxu0 %vm157_vm1, %v14710_v58 }
 0x438   :  { %17394 = vmatmul.mubr.msk.f32.gmra.mrb[26].mxu0 %vm157_vm1, %v14711_v59 }
 0x439   :  { %17396 = vmatprep.mubr.msk.f32.mxu0 %vm157_vm1, %v26269_v60 }
 0x43c   :  { %17397 = vmatmul.mubr.msk.f32.gmra.mrb[28].mxu0 %vm157_vm1, %v26270_v62 }
 0x43d   :  { %17399 = vmatprep.mubr.msk.f32.mxu0 %vm157_vm1, %v14714_v61 }
 0x440   :  { %17400 = vmatmul.mubr.msk.f32.gmra.mrb[30].mxu0 %vm157_vm1, %v14715_v63 }
 0x441   :  { %17402 = vmatprep.mubr.msk.f32.mxu0 %vm157_vm1, %v14716_v0 }
 0x444   :  { %17403 = vmatmul.mubr.msk.f32.gmra.mrb[32].mxu0 %vm157_vm1, %v14717_v1 }
 0x445   :  { %17405 = vmatprep.mubr.msk.f32.mxu0 %vm157_vm1, %v14718_v6 }
 0x448   :  { %17406 = vmatmul.mubr.msk.f32.gmra.mrb[34].mxu0 %vm157_vm1, %v14719_v37 }
 0x449   :  { %17408 = vmatprep.mubr.msk.f32.mxu0 %vm157_vm1, %v14720_v4 }
 0x44c   :  { %17409 = vmatmul.mubr.msk.f32.gmra.mrb[36].mxu0 %vm157_vm1, %v14721_v47 }
 0x44d   :  { %17411 = vmatprep.mubr.msk.f32.mxu0 %vm157_vm1, %v14722_v8 }
 0x450   :  { %17412 = vmatmul.mubr.msk.f32.gmra.mrb[38].mxu0 %vm157_vm1, %v14723_v5 }
 0x451   :  { %17414 = vmatprep.mubr.msk.f32.mxu0 %vm157_vm1, %v14724_v7 }
 0x454   :  { %17415 = vmatmul.mubr.msk.f32.gmra.mrb[40].mxu0 %vm157_vm1, %v14725_v3 }
 0x455   :  { %17417 = vmatprep.mubr.msk.f32.mxu0 %vm157_vm1, %v14726_v46 }
 0x458   :  { %17418 = vmatmul.mubr.msk.f32.gmra.mrb[42].mxu0 %vm157_vm1, %v14727_v14 }
 0x459   :  { %17420 = vmatprep.mubr.msk.f32.mxu0 %vm157_vm1, %v14728_v12 }
 0x45c   :  { %17421 = vmatmul.mubr.msk.f32.gmra.mrb[44].mxu0 %vm157_vm1, %v14729_v2 }
 0x45d   :  { %17423 = vmatprep.mubr.msk.f32.mxu0 %vm157_vm1, %v14730_v9 }
 0x460   :  { %17424 = vmatmul.mubr.msk.f32.gmra.mrb[46].mxu0 %vm157_vm1, %v14731_v10 }
 0x461   :  { %17426 = vmatprep.mubr.msk.f32.mxu0 %vm157_vm1, %v14732_v13 }
 0x464   :  { %17427 = vmatmul.mubr.msk.f32.gmra.mrb[48].mxu0 %vm157_vm1, %v14733_v15 }
 0x465   :  { %17429 = vmatprep.mubr.msk.f32.mxu0 %vm157_vm1, %v14734_v16 }
 0x468   :  { %17430 = vmatmul.mubr.msk.f32.gmra.mrb[50].mxu0 %vm157_vm1, %v14735_v17 }
 0x469   :  { %17432 = vmatprep.mubr.msk.f32.mxu0 %vm157_vm1, %v14736_v18 }
 0x46c   :  { %17433 = vmatmul.mubr.msk.f32.gmra.mrb[52].mxu0 %vm157_vm1, %v14737_v19 }
 0x46d   :  { %17435 = vmatprep.mubr.msk.f32.mxu0 %vm157_vm1, %v14738_v20 }
 0x470   :  { %17436 = vmatmul.mubr.msk.f32.gmra.mrb[54].mxu0 %vm157_vm1, %v14739_v21 }
 0x471   :  { %17438 = vmatprep.mubr.msk.f32.mxu0 %vm157_vm1, %v14740_v22 }
 0x474   :  { %17439 = vmatmul.mubr.msk.f32.gmra.mrb[56].mxu0 %vm157_vm1, %v14741_v23 }
 0x475   :  { %17441 = vmatprep.mubr.msk.f32.mxu0 %vm157_vm1, %v14742_v24 }
 0x478   :  { %17442 = vmatmul.mubr.msk.f32.gmra.mrb[58].mxu0 %vm157_vm1, %v14743_v25 }
 0x479   :  { %17444 = vmatprep.mubr.msk.f32.mxu0 %vm157_vm1, %v21311_v11 }
 0x47c   :  { %17445 = vmatmul.mubr.msk.f32.gmra.mrb[60].mxu0 %vm157_vm1, %v21320_v36 }
 0x47d   :  { %17447 = vmatprep.mubr.msk.f32.mxu0 %vm157_vm1, %v14746_v26 }
 0x480   :  { %17448 = vmatmul.mubr.msk.f32.gmra.mrb[62].mxu0 %vm157_vm1, %v14747_v27 }
 0x4d7   :  { %v21967_v28 = vpop.f32.mrb[0].mxu0 }
 0x4d8   :  { %v6295_v11 = vsel %vm6293_vm2, %v21967_v28, 0.0  ;;  %v6428_v29 = vmul.f32 %v21967_v28, %v21967_v28  ;;  %v21973_v30 = vpop.f32.mrb[1].mxu0 }
 0x4d9   :  { %v6294_v36 = vsel %vm6293_vm2, %v21973_v30, 0.0  ;;  %v6427_v31 = vmul.f32 %v21973_v30, %v21973_v30 }
 0x4da   :  { %v6492_v32 = vsel %vm6293_vm2, %v6428_v29, 0.0  ;;  %v6296_v33 = vadd.f32 %v6295_v11, %v6294_v36 }
 0x4db   :  { %v6491_v34 = vsel %vm6293_vm2, %v6427_v31, 0.0  ;;  %v21981_v35 = vpop.f32.mrb[2].mxu0 }
 0x4dc   :  { %v6493_v38 = vadd.f32 %v6492_v32, %v6491_v34  ;;  %v21983_v39 = vpop.f32.mrb[3].mxu0  ;;  %v6430_v40 = vmul.f32 %v21981_v35, %v21981_v35  ;;  %v6299_v44 = vsel %vm6293_vm2, %v21981_v35, 0.0 }
 0x4dd   :  { %v6297_v41 = vsel %vm6293_vm2, %v21983_v39, 0.0  ;;  %v6429_v42 = vmul.f32 %v21983_v39, %v21983_v39 }
 0x4de   :  { %v6298_v43 = vadd.f32 %v6297_v41, %v6296_v33  ;;  %v6496_v52 = vsel %vm6293_vm2, %v6430_v40, 0.0 }
 0x4df   :  { %v6494_v45 = vsel %vm6293_vm2, %v6429_v42, 0.0  ;;  %v21994_v48 = vpop.f32.mrb[4].mxu0 }
 0x4e0   :  { %v6300_v49 = vadd.f32 %v6299_v44, %v6298_v43  ;;  %v6495_v50 = vadd.f32 %v6494_v45, %v6493_v38  ;;  %v21996_v51 = vpop.f32.mrb[5].mxu0  ;;  %v6432_v53 = vmul.f32 %v21994_v48, %v21994_v48  ;;  %v6303_v58 = vsel %vm6293_vm2, %v21994_v48, 0.0 }
 0x4e1   :  { %v6301_v54 = vsel %vm6293_vm2, %v21996_v51, 0.0  ;;  %v6431_v55 = vmul.f32 %v21996_v51, %v21996_v51 }
 0x4e2   :  { %v6497_v56 = vadd.f32 %v6496_v52, %v6495_v50  ;;  %v6302_v57 = vadd.f32 %v6301_v54, %v6300_v49  ;;  %v6500_v0 = vsel %vm6293_vm2, %v6432_v53, 0.0 }
 0x4e3   :  { %v6498_v59 = vsel %vm6293_vm2, %v6431_v55, 0.0  ;;  %v22008_v60 = vpop.f32.mrb[6].mxu0 }
 0x4e4   :  { %v6499_v61 = vadd.f32 %v6498_v59, %v6497_v56  ;;  %v22010_v62 = vpop.f32.mrb[7].mxu0  ;;  %v6304_v63 = vadd.f32 %v6303_v58, %v6302_v57  ;;  %v6434_v1 = vmul.f32 %v22008_v60, %v22008_v60  ;;  %v6307_v8 = vsel %vm6293_vm2, %v22008_v60, 0.0 }
 0x4e5   :  { %v6305_v6 = vsel %vm6293_vm2, %v22010_v62, 0.0  ;;  %v6433_v37 = vmul.f32 %v22010_v62, %v22010_v62 }
 0x4e6   :  { %v6306_v4 = vadd.f32 %v6305_v6, %v6304_v63  ;;  %v6501_v47 = vadd.f32 %v6500_v0, %v6499_v61  ;;  %v6504_v12 = vsel %vm6293_vm2, %v6434_v1, 0.0 }
 0x4e7   :  { %v6502_v5 = vsel %vm6293_vm2, %v6433_v37, 0.0  ;;  %v22022_v7 = vpop.f32.mrb[8].mxu0 }
 0x4e8   :  { %v6503_v3 = vadd.f32 %v6502_v5, %v6501_v47  ;;  %v22024_v46 = vpop.f32.mrb[9].mxu0  ;;  %v6308_v14 = vadd.f32 %v6307_v8, %v6306_v4  ;;  %v6436_v2 = vmul.f32 %v22022_v7, %v22022_v7  ;;  %v6311_v16 = vsel %vm6293_vm2, %v22022_v7, 0.0 }
 0x4e9   :  { %v6309_v9 = vsel %vm6293_vm2, %v22024_v46, 0.0  ;;  %v6435_v10 = vmul.f32 %v22024_v46, %v22024_v46 }
 0x4ea   :  { %v6310_v13 = vadd.f32 %v6309_v9, %v6308_v14  ;;  %v6505_v15 = vadd.f32 %v6504_v12, %v6503_v3  ;;  %v6508_v22 = vsel %vm6293_vm2, %v6436_v2, 0.0 }
 0x4eb   :  { %v6506_v17 = vsel %vm6293_vm2, %v6435_v10, 0.0  ;;  %v22036_v18 = vpop.f32.mrb[10].mxu0 }
 0x4ec   :  { %v6507_v19 = vadd.f32 %v6506_v17, %v6505_v15  ;;  %v22038_v20 = vpop.f32.mrb[11].mxu0  ;;  %v6312_v21 = vadd.f32 %v6311_v16, %v6310_v13  ;;  %v6438_v23 = vmul.f32 %v22036_v18, %v22036_v18  ;;  %v6315_v11 = vsel %vm6293_vm2, %v22036_v18, 0.0 }
 0x4ed   :  { %v6313_v24 = vsel %vm6293_vm2, %v22038_v20, 0.0  ;;  %v6437_v25 = vmul.f32 %v22038_v20, %v22038_v20 }
 0x4ee   :  { %v6314_v26 = vadd.f32 %v6313_v24, %v6312_v21  ;;  %v6509_v27 = vadd.f32 %v6508_v22, %v6507_v19  ;;  %v6512_v34 = vsel %vm6293_vm2, %v6438_v23, 0.0 }
 0x4ef   :  { %v6510_v29 = vsel %vm6293_vm2, %v6437_v25, 0.0  ;;  %v22050_v36 = vpop.f32.mrb[12].mxu0 }
 0x4f0   :  { %v6511_v31 = vadd.f32 %v6510_v29, %v6509_v27  ;;  %v22052_v32 = vpop.f32.mrb[13].mxu0  ;;  %v6316_v33 = vadd.f32 %v6315_v11, %v6314_v26  ;;  %v6440_v38 = vmul.f32 %v22050_v36, %v22050_v36  ;;  %v6319_v44 = vsel %vm6293_vm2, %v22050_v36, 0.0 }
 0x4f1   :  { %v6317_v40 = vsel %vm6293_vm2, %v22052_v32, 0.0  ;;  %v6439_v41 = vmul.f32 %v22052_v32, %v22052_v32 }
 0x4f2   :  { %v6318_v42 = vadd.f32 %v6317_v40, %v6316_v33  ;;  %v6513_v43 = vadd.f32 %v6512_v34, %v6511_v31  ;;  %v6516_v54 = vsel %vm6293_vm2, %v6440_v38, 0.0 }
 0x4f3   :  { %v6514_v45 = vsel %vm6293_vm2, %v6439_v41, 0.0  ;;  %v22064_v49 = vpop.f32.mrb[14].mxu0 }
 0x4f4   :  { %v6515_v50 = vadd.f32 %v6514_v45, %v6513_v43  ;;  %v22066_v52 = vpop.f32.mrb[15].mxu0  ;;  %v6320_v53 = vadd.f32 %v6319_v44, %v6318_v42  ;;  %v6442_v55 = vmul.f32 %v22064_v49, %v22064_v49  ;;  %v6323_v61 = vsel %vm6293_vm2, %v22064_v49, 0.0 }
 0x4f5   :  { %v6321_v56 = vsel %vm6293_vm2, %v22066_v52, 0.0  ;;  %v6441_v57 = vmul.f32 %v22066_v52, %v22066_v52 }
 0x4f6   :  { %v6322_v58 = vadd.f32 %v6321_v56, %v6320_v53  ;;  %v6517_v59 = vadd.f32 %v6516_v54, %v6515_v50  ;;  %v6520_v4 = vsel %vm6293_vm2, %v6442_v55, 0.0 }
 0x4f7   :  { %v6518_v63 = vsel %vm6293_vm2, %v6441_v57, 0.0  ;;  %v22078_v0 = vpop.f32.mrb[16].mxu0 }
 0x4f8   :  { %v6519_v1 = vadd.f32 %v6518_v63, %v6517_v59  ;;  %v22080_v6 = vpop.f32.mrb[17].mxu0  ;;  %v6324_v37 = vadd.f32 %v6323_v61, %v6322_v58  ;;  %v6444_v47 = vmul.f32 %v22078_v0, %v22078_v0  ;;  %v6327_v12 = vsel %vm6293_vm2, %v22078_v0, 0.0 }
 0x4f9   :  { %v6325_v8 = vsel %vm6293_vm2, %v22080_v6, 0.0  ;;  %v6443_v5 = vmul.f32 %v22080_v6, %v22080_v6 }
 0x4fa   :  { %v6326_v3 = vadd.f32 %v6325_v8, %v6324_v37  ;;  %v6521_v14 = vadd.f32 %v6520_v4, %v6519_v1  ;;  %v6524_v16 = vsel %vm6293_vm2, %v6444_v47, 0.0 }
 0x4fb   :  { %v6522_v2 = vsel %vm6293_vm2, %v6443_v5, 0.0  ;;  %v22092_v9 = vpop.f32.mrb[18].mxu0 }
 0x4fc   :  { %v6523_v10 = vadd.f32 %v6522_v2, %v6521_v14  ;;  %v22094_v13 = vpop.f32.mrb[19].mxu0  ;;  %v6328_v15 = vadd.f32 %v6327_v12, %v6326_v3  ;;  %v6446_v17 = vmul.f32 %v22092_v9, %v22092_v9  ;;  %v6331_v24 = vsel %vm6293_vm2, %v22092_v9, 0.0 }
 0x4fd   :  { %v6329_v19 = vsel %vm6293_vm2, %v22094_v13, 0.0  ;;  %v6445_v21 = vmul.f32 %v22094_v13, %v22094_v13 }
 0x4fe   :  { %v6330_v22 = vadd.f32 %v6329_v19, %v6328_v15  ;;  %v6525_v23 = vadd.f32 %v6524_v16, %v6523_v10  ;;  %v6528_v31 = vsel %vm6293_vm2, %v6446_v17, 0.0 }
 0x4ff   :  { %v6526_v25 = vsel %vm6293_vm2, %v6445_v21, 0.0  ;;  %v22106_v26 = vpop.f32.mrb[20].mxu0 }
 0x500   :  { %v6527_v27 = vadd.f32 %v6526_v25, %v6525_v23  ;;  %v22108_v11 = vpop.f32.mrb[21].mxu0  ;;  %v6332_v29 = vadd.f32 %v6331_v24, %v6330_v22  ;;  %v6448_v33 = vmul.f32 %v22106_v26, %v22106_v26  ;;  %v6335_v42 = vsel %vm6293_vm2, %v22106_v26, 0.0 }
 0x501   :  { %v6333_v34 = vsel %vm6293_vm2, %v22108_v11, 0.0  ;;  %v6447_v38 = vmul.f32 %v22108_v11, %v22108_v11 }
 0x502   :  { %v6334_v40 = vadd.f32 %v6333_v34, %v6332_v29  ;;  %v6529_v41 = vadd.f32 %v6528_v31, %v6527_v27  ;;  %v6532_v54 = vsel %vm6293_vm2, %v6448_v33, 0.0 }
 0x503   :  { %v6530_v43 = vsel %vm6293_vm2, %v6447_v38, 0.0  ;;  %v22120_v44 = vpop.f32.mrb[22].mxu0 }
 0x504   :  { %v6531_v45 = vadd.f32 %v6530_v43, %v6529_v41  ;;  %v22122_v50 = vpop.f32.mrb[23].mxu0  ;;  %v6336_v53 = vadd.f32 %v6335_v42, %v6334_v40  ;;  %v6450_v55 = vmul.f32 %v22120_v44, %v22120_v44  ;;  %v6339_v61 = vsel %vm6293_vm2, %v22120_v44, 0.0 }
 0x505   :  { %v6337_v56 = vsel %vm6293_vm2, %v22122_v50, 0.0  ;;  %v6449_v57 = vmul.f32 %v22122_v50, %v22122_v50 }
 0x506   :  { %v6338_v58 = vadd.f32 %v6337_v56, %v6336_v53  ;;  %v6533_v59 = vadd.f32 %v6532_v54, %v6531_v45  ;;  %v6536_v8 = vsel %vm6293_vm2, %v6450_v55, 0.0 }
 0x507   :  { %v6534_v63 = vsel %vm6293_vm2, %v6449_v57, 0.0  ;;  %v22134_v1 = vpop.f32.mrb[24].mxu0 }
 0x508   :  { %v6535_v37 = vadd.f32 %v6534_v63, %v6533_v59  ;;  %v22136_v4 = vpop.f32.mrb[25].mxu0  ;;  %v6340_v47 = vadd.f32 %v6339_v61, %v6338_v58  ;;  %v6452_v5 = vmul.f32 %v22134_v1, %v22134_v1  ;;  %v6343_v10 = vsel %vm6293_vm2, %v22134_v1, 0.0 }
 0x509   :  { %v6341_v3 = vsel %vm6293_vm2, %v22136_v4, 0.0  ;;  %v6451_v14 = vmul.f32 %v22136_v4, %v22136_v4 }
 0x50a   :  { %v6342_v12 = vadd.f32 %v6341_v3, %v6340_v47  ;;  %v6537_v2 = vadd.f32 %v6536_v8, %v6535_v37  ;;  %v6540_v22 = vsel %vm6293_vm2, %v6452_v5, 0.0 }
 0x50b   :  { %v6538_v15 = vsel %vm6293_vm2, %v6451_v14, 0.0  ;;  %v22148_v16 = vpop.f32.mrb[26].mxu0 }
 0x50c   :  { %v6539_v17 = vadd.f32 %v6538_v15, %v6537_v2  ;;  %v22150_v19 = vpop.f32.mrb[27].mxu0  ;;  %v6344_v21 = vadd.f32 %v6343_v10, %v6342_v12  ;;  %v6454_v23 = vmul.f32 %v22148_v16, %v22148_v16  ;;  %v6347_v31 = vsel %vm6293_vm2, %v22148_v16, 0.0 }
 0x50d   :  { %v6345_v24 = vsel %vm6293_vm2, %v22150_v19, 0.0  ;;  %v6453_v25 = vmul.f32 %v22150_v19, %v22150_v19 }
 0x50e   :  { %v6346_v27 = vadd.f32 %v6345_v24, %v6344_v21  ;;  %v6541_v29 = vadd.f32 %v6540_v22, %v6539_v17  ;;  %v6544_v42 = vsel %vm6293_vm2, %v6454_v23, 0.0 }
 0x50f   :  { %v6542_v33 = vsel %vm6293_vm2, %v6453_v25, 0.0  ;;  %v22162_v34 = vpop.f32.mrb[28].mxu0 }
 0x510   :  { %v6543_v38 = vadd.f32 %v6542_v33, %v6541_v29  ;;  %v22164_v40 = vpop.f32.mrb[29].mxu0  ;;  %v6348_v41 = vadd.f32 %v6347_v31, %v6346_v27  ;;  %v6456_v43 = vmul.f32 %v22162_v34, %v22162_v34  ;;  %v6351_v56 = vsel %vm6293_vm2, %v22162_v34, 0.0 }
 0x511   :  { %v6349_v45 = vsel %vm6293_vm2, %v22164_v40, 0.0  ;;  %v6455_v53 = vmul.f32 %v22164_v40, %v22164_v40 }
 0x512   :  { %v6350_v54 = vadd.f32 %v6349_v45, %v6348_v41  ;;  %v6545_v55 = vadd.f32 %v6544_v42, %v6543_v38  ;;  %v6548_v37 = vsel %vm6293_vm2, %v6456_v43, 0.0 }
 0x513   :  { %v6546_v57 = vsel %vm6293_vm2, %v6455_v53, 0.0  ;;  %v22176_v58 = vpop.f32.mrb[30].mxu0 }
 0x514   :  { %v6547_v59 = vadd.f32 %v6546_v57, %v6545_v55  ;;  %v22178_v61 = vpop.f32.mrb[31].mxu0  ;;  %v6352_v63 = vadd.f32 %v6351_v56, %v6350_v54  ;;  %v6458_v47 = vmul.f32 %v22176_v58, %v22176_v58  ;;  %v6355_v12 = vsel %vm6293_vm2, %v22176_v58, 0.0 }
 0x515   :  { %v6353_v8 = vsel %vm6293_vm2, %v22178_v61, 0.0  ;;  %v6457_v5 = vmul.f32 %v22178_v61, %v22178_v61 }
 0x516   :  { %v6354_v3 = vadd.f32 %v6353_v8, %v6352_v63  ;;  %v6549_v14 = vadd.f32 %v6548_v37, %v6547_v59  ;;  %v6552_v22 = vsel %vm6293_vm2, %v6458_v47, 0.0 }
 0x517   :  { %v6550_v2 = vsel %vm6293_vm2, %v6457_v5, 0.0  ;;  %v22190_v10 = vpop.f32.mrb[32].mxu0 }
 0x518   :  { %v6551_v15 = vadd.f32 %v6550_v2, %v6549_v14  ;;  %v22192_v17 = vpop.f32.mrb[33].mxu0  ;;  %v6356_v21 = vadd.f32 %v6355_v12, %v6354_v3  ;;  %v6460_v23 = vmul.f32 %v22190_v10, %v22190_v10  ;;  %v6359_v31 = vsel %vm6293_vm2, %v22190_v10, 0.0 }
 0x519   :  { %v6357_v24 = vsel %vm6293_vm2, %v22192_v17, 0.0  ;;  %v6459_v25 = vmul.f32 %v22192_v17, %v22192_v17 }
 0x51a   :  { %v6358_v27 = vadd.f32 %v6357_v24, %v6356_v21  ;;  %v6553_v29 = vadd.f32 %v6552_v22, %v6551_v15  ;;  %v6556_v45 = vsel %vm6293_vm2, %v6460_v23, 0.0 }
 0x51b   :  { %v6554_v33 = vsel %vm6293_vm2, %v6459_v25, 0.0  ;;  %v22204_v38 = vpop.f32.mrb[34].mxu0 }
 0x51c   :  { %v6555_v41 = vadd.f32 %v6554_v33, %v6553_v29  ;;  %v22206_v42 = vpop.f32.mrb[35].mxu0  ;;  %v6360_v43 = vadd.f32 %v6359_v31, %v6358_v27  ;;  %v6462_v53 = vmul.f32 %v22204_v38, %v22204_v38  ;;  %v6363_v59 = vsel %vm6293_vm2, %v22204_v38, 0.0 }
 0x51d   :  { %v6361_v54 = vsel %vm6293_vm2, %v22206_v42, 0.0  ;;  %v6461_v55 = vmul.f32 %v22206_v42, %v22206_v42 }
 0x51e   :  { %v6362_v56 = vadd.f32 %v6361_v54, %v6360_v43  ;;  %v6557_v57 = vadd.f32 %v6556_v45, %v6555_v41  ;;  %v6560_v3 = vsel %vm6293_vm2, %v6462_v53, 0.0 }
 0x51f   :  { %v6558_v63 = vsel %vm6293_vm2, %v6461_v55, 0.0  ;;  %v22218_v37 = vpop.f32.mrb[36].mxu0 }
 0x520   :  { %v6559_v47 = vadd.f32 %v6558_v63, %v6557_v57  ;;  %v22220_v8 = vpop.f32.mrb[37].mxu0  ;;  %v6364_v5 = vadd.f32 %v6363_v59, %v6362_v56  ;;  %v6464_v14 = vmul.f32 %v22218_v37, %v22218_v37  ;;  %v6367_v22 = vsel %vm6293_vm2, %v22218_v37, 0.0 }
 0x521   :  { %v6365_v12 = vsel %vm6293_vm2, %v22220_v8, 0.0  ;;  %v6463_v2 = vmul.f32 %v22220_v8, %v22220_v8 }
 0x522   :  { %v6366_v15 = vadd.f32 %v6365_v12, %v6364_v5  ;;  %v6561_v21 = vadd.f32 %v6560_v3, %v6559_v47  ;;  %v6564_v31 = vsel %vm6293_vm2, %v6464_v14, 0.0 }
 0x523   :  { %v6562_v23 = vsel %vm6293_vm2, %v6463_v2, 0.0  ;;  %v22232_v24 = vpop.f32.mrb[38].mxu0 }
 0x524   :  { %26271 = vst [vmem:[#allocation6_spill] sm:$0xff] %v22232_v24  ;;  %v6563_v25 = vadd.f32 %v6562_v23, %v6561_v21  ;;  %v22234_v27 = vpop.f32.mrb[39].mxu0  ;;  %v6368_v29 = vadd.f32 %v6367_v22, %v6366_v15  ;;  %v6466_v33 = vmul.f32 %v22232_v24, %v22232_v24  ;;  %v6371_v54 = vsel %vm6293_vm2, %v22232_v24, 0.0 }
 0x525   :  { %v6369_v41 = vsel %vm6293_vm2, %v22234_v27, 0.0  ;;  %v6465_v43 = vmul.f32 %v22234_v27, %v22234_v27  ;;  %v19361_v23 = vmov 0.0  }
 0x526   :  { %v6370_v45 = vadd.f32 %v6369_v41, %v6368_v29  ;;  %v6565_v53 = vadd.f32 %v6564_v31, %v6563_v25  ;;  %v6568_v47 = vsel %vm6293_vm2, %v6466_v33, 0.0  ;;  %6837 = vst.msk [vmem:[#allocation2] sm:$0xff] %vm6293_vm2, %v19361_v23  ;;  %6838 = vst.msk [vmem:[#allocation2 + $0x8] sm:$0xff] %vm6293_vm2, %v19361_v23 }
 0x527   :  { %v6566_v55 = vsel %vm6293_vm2, %v6465_v43, 0.0  ;;  %v22246_v56 = vpop.f32.mrb[40].mxu0  ;;  %6841 = vst.msk [vmem:[#allocation2 + $0x1b0] sm:$0xff] %vm6293_vm2, %v19361_v23  ;;  %6842 = vst.msk [vmem:[#allocation2 + $0x1b8] sm:$0xff] %vm6293_vm2, %v19361_v23 }
 0x528   :  { %26272 = vst [vmem:[#allocation7_spill] sm:$0xff] %v22246_v56  ;;  %v6567_v57 = vadd.f32 %v6566_v55, %v6565_v53  ;;  %v22248_v59 = vpop.f32.mrb[41].mxu0  ;;  %v6372_v63 = vadd.f32 %v6371_v54, %v6370_v45  ;;  %v6468_v5 = vmul.f32 %v22246_v56, %v22246_v56  ;;  %v6375_v15 = vsel %vm6293_vm2, %v22246_v56, 0.0  ;;  %6845 = vst.msk [vmem:[#allocation2 + $0x198] sm:$0xff] %vm6293_vm2, %v19361_v23 }
 0x529   :  { %26273 = vst [vmem:[#allocation8_spill] sm:$0xff] %v22248_v59  ;;  %v6373_v3 = vsel %vm6293_vm2, %v22248_v59, 0.0  ;;  %v6467_v14 = vmul.f32 %v22248_v59, %v22248_v59  ;;  %6846 = vst.msk [vmem:[#allocation2 + $0x1a0] sm:$0xff] %vm6293_vm2, %v19361_v23 }
 0x52a   :  { %v6374_v12 = vadd.f32 %v6373_v3, %v6372_v63  ;;  %v6569_v2 = vadd.f32 %v6568_v47, %v6567_v57  ;;  %6848 = vst.msk [vmem:[#allocation2 + $0x348] sm:$0xff] %vm6293_vm2, %v19361_v23  ;;  %6849 = vst.msk [vmem:[#allocation2 + $0x350] sm:$0xff] %vm6293_vm2, %v19361_v23  ;;  %v6572_v33 = vsel %vm6293_vm2, %v6468_v5, 0.0  ;;  %v22309_v47 = vld [vmem:[%s25926_s4 + $0x8] sm:$0xff]  ;;  %v7053_v5 = vld [vmem:[%s25926_s4] sm:$0xff] }
 0x52b   :  { %v6570_v21 = vsel %vm6293_vm2, %v6467_v14, 0.0  ;;  %v22260_v22 = vpop.f32.mrb[42].mxu0  ;;  %6840 = vst.msk [vmem:[#allocation2 + $0x10] sm:$0x3] %vm6839_vm3, %v19361_v23  ;;  %6843 = vst.msk [vmem:[#allocation2 + $0x1c0] sm:$0x3] %vm6839_vm3, %v19361_v23  ;;  %17450 = vmatprep.subr.mxu1 %v22309_v47 }
 0x52c   :  { %26274 = vst [vmem:[#allocation9_spill] sm:$0xff] %v22260_v22  ;;  %v6571_v25 = vadd.f32 %v6570_v21, %v6569_v2  ;;  %v22278_v29 = vpop.f32.mrb[43].mxu0  ;;  %v6376_v31 = vadd.f32 %v6375_v15, %v6374_v12  ;;  %6847 = vst.msk [vmem:[#allocation2 + $0x1a8] sm:$0x3] %vm6839_vm3, %v19361_v23  ;;  %v22287_v41 = vmul.f32 %v22260_v22, %v22260_v22  ;;  %v22299_v55 = vsel %vm6293_vm2, %v22260_v22, 0.0 }
 0x52d   :  { %26275 = vst [vmem:[#allocation10_spill] sm:$0xff] %v22278_v29  ;;  %6850 = vst.msk [vmem:[#allocation2 + $0x358] sm:$0x3] %vm6839_vm3, %v19361_v23  ;;  %v6377_v43 = vsel %vm6293_vm2, %v22278_v29, 0.0  ;;  %v6469_v45 = vmul.f32 %v22278_v29, %v22278_v29  ;;  %17451 = vmatpush3.msra.mxu1 %v22309_v47 }
 0x52e   :  { %v22293_v53 = vadd.f32 %v6377_v43, %v6376_v31  ;;  %v22295_v54 = vadd.f32 %v6572_v33, %v6571_v25  ;;  %6888 = vst.msk [vmem:[#allocation2 + $0x11] sm:$0x1] %vm6851_vm4, %v19361_v23  ;;  %6852 = vst.msk [vmem:[#allocation2] sm:$0x1] %vm6851_vm4, %v19361_v23  ;;  %v6576_v2 = vsel %vm6293_vm2, %v22287_v41, 0.0  ;;  %v7054_v33 = vld [vmem:[#allocation2 + $0x1] sm:$0xff]  ;;  %17548 = vmatprep.subr.mxu1 %v7053_v5 }
 0x52f   :  { %v22302_v57 = vsel %vm6293_vm2, %v6469_v45, 0.0  ;;  %v22304_v63 = vpop.f32.mrb[44].mxu0  ;;  %6853 = vst.msk [vmem:[#allocation2 + $0x18] sm:$0x1] %vm6851_vm4, %v19361_v23  ;;  %6854 = vst.msk [vmem:[#allocation2 + $0x30] sm:$0x1] %vm6851_vm4, %v19361_v23  ;;  %17452 = vmatprep.mubr.msk.f32.mxu1 %vm6293_vm2, %v7054_v33 }
 0x530   :  { %26276 = vst [vmem:[#allocation11_spill] sm:$0xff] %v22304_v63  ;;  %6855 = vst.msk [vmem:[#allocation2 + $0x48] sm:$0x1] %vm6851_vm4, %v19361_v23  ;;  %v6575_v3 = vadd.f32 %v22302_v57, %v22295_v54  ;;  %v22460_v14 = vpop.f32.mrb[45].mxu0  ;;  %v6380_v12 = vadd.f32 %v22299_v55, %v22293_v53  ;;  %v6472_v15 = vmul.f32 %v22304_v63, %v22304_v63  ;;  %v6383_v43 = vsel %vm6293_vm2, %v22304_v63, 0.0 }
 0x531   :  { %6856 = vst.msk [vmem:[#allocation2 + $0x60] sm:$0x1] %vm6851_vm4, %v19361_v23  ;;  %6857 = vst.msk [vmem:[#allocation2 + $0x78] sm:$0x1] %vm6851_vm4, %v19361_v23  ;;  %v6381_v21 = vsel %vm6293_vm2, %v22460_v14, 0.0 }
 0x532   :  { %6858 = vst.msk [vmem:[#allocation2 + $0x90] sm:$0x1] %vm6851_vm4, %v19361_v23  ;;  %6859 = vst.msk [vmem:[#allocation2 + $0xa8] sm:$0x1] %vm6851_vm4, %v19361_v23  ;;  %v6382_v25 = vadd.f32 %v6381_v21, %v6380_v12  ;;  %v6577_v31 = vadd.f32 %v6576_v2, %v6575_v3  ;;  %v7055_v53 = vld [vmem:[#allocation2 + $0x9] sm:$0xff]  ;;  %v6580_v47 = vsel %vm6293_vm2, %v6472_v15, 0.0 }
 0x533   :  { %6860 = vst.msk [vmem:[#allocation2 + $0xc0] sm:$0x1] %vm6851_vm4, %v19361_v23  ;;  %6861 = vst.msk [vmem:[#allocation2 + $0xd8] sm:$0x1] %vm6851_vm4, %v19361_v23  ;;  %v22477_v45 = vpop.f32.mrb[46].mxu0  ;;  %17453 = vmatmul.mubr.msk.f32.vlgmr.msra.gmra.mrb[0].mxu1 %vm6293_vm2, %v7055_v53 }
 0x534   :  { %6862 = vst.msk [vmem:[#allocation2 + $0xf0] sm:$0x1] %vm6851_vm4, %v19361_v23  ;;  %6863 = vst.msk [vmem:[#allocation2 + $0x108] sm:$0x1] %vm6851_vm4, %v19361_v23  ;;  %v22480_v55 = vpop.f32.mrb[47].mxu0  ;;  %v6384_v57 = vadd.f32 %v6383_v43, %v6382_v25  ;;  %v6474_v3 = vmul.f32 %v22477_v45, %v22477_v45  ;;  %17549 = vmatpush3.msra.mxu1 %v7053_v5 }
 0x535   :  { %6864 = vst.msk [vmem:[#allocation2 + $0x120] sm:$0x1] %vm6851_vm4, %v19361_v23  ;;  %6865 = vst.msk [vmem:[#allocation2 + $0x138] sm:$0x1] %vm6851_vm4, %v19361_v23  ;;  %v6385_v12 = vsel %vm6293_vm2, %v22480_v55, 0.0  ;;  %v6473_v2 = vmul.f32 %v22480_v55, %v22480_v55 }
 0x536   :  { %6866 = vst.msk [vmem:[#allocation2 + $0x150] sm:$0x1] %vm6851_vm4, %v19361_v23  ;;  %6867 = vst.msk [vmem:[#allocation2 + $0x168] sm:$0x1] %vm6851_vm4, %v19361_v23  ;;  %v6386_v21 = vadd.f32 %v6385_v12, %v6384_v57  ;;  %v6584_v53 = vsel %vm6293_vm2, %v6474_v3, 0.0 }
 0x537   :  { %6868 = vst.msk [vmem:[#allocation2 + $0x180] sm:$0x1] %vm6851_vm4, %v19361_v23  ;;  %6869 = vst.msk [vmem:[#allocation2 + $0x198] sm:$0x1] %vm6851_vm4, %v19361_v23  ;;  %v6582_v25 = vsel %vm6293_vm2, %v6473_v2, 0.0  ;;  %v22493_v33 = vpop.f32.mrb[48].mxu0 }
 0x538   :  { %6870 = vst.msk [vmem:[#allocation2 + $0x1b0] sm:$0x1] %vm6851_vm4, %v19361_v23  ;;  %6871 = vst.msk [vmem:[#allocation2 + $0x1c8] sm:$0x1] %vm6851_vm4, %v19361_v23  ;;  %v22495_v43 = vpop.f32.mrb[49].mxu0  ;;  %v6476_v63 = vmul.f32 %v22493_v33, %v22493_v33  ;;  %v6391_v12 = vsel %vm6293_vm2, %v22493_v33, 0.0 }
 0x539   :  { %6872 = vst.msk [vmem:[#allocation2 + $0x1e0] sm:$0x1] %vm6851_vm4, %v19361_v23  ;;  %6873 = vst.msk [vmem:[#allocation2 + $0x1f8] sm:$0x1] %vm6851_vm4, %v19361_v23  ;;  %v6389_v5 = vsel %vm6293_vm2, %v22495_v43, 0.0 }
 0x53a   :  { %6874 = vst.msk [vmem:[#allocation2 + $0x210] sm:$0x1] %vm6851_vm4, %v19361_v23  ;;  %6875 = vst.msk [vmem:[#allocation2 + $0x228] sm:$0x1] %vm6851_vm4, %v19361_v23 }
 0x53b   :  { %6876 = vst.msk [vmem:[#allocation2 + $0x240] sm:$0x1] %vm6851_vm4, %v19361_v23  ;;  %6877 = vst.msk [vmem:[#allocation2 + $0x258] sm:$0x1] %vm6851_vm4, %v19361_v23 }
 0x53c   :  { %6878 = vst.msk [vmem:[#allocation2 + $0x270] sm:$0x1] %vm6851_vm4, %v19361_v23  ;;  %6879 = vst.msk [vmem:[#allocation2 + $0x288] sm:$0x1] %vm6851_vm4, %v19361_v23 }
 0x53d   :  { %6880 = vst.msk [vmem:[#allocation2 + $0x2a0] sm:$0x1] %vm6851_vm4, %v19361_v23  ;;  %6881 = vst.msk [vmem:[#allocation2 + $0x2b8] sm:$0x1] %vm6851_vm4, %v19361_v23 }
 0x53e   :  { %6882 = vst.msk [vmem:[#allocation2 + $0x2d0] sm:$0x1] %vm6851_vm4, %v19361_v23  ;;  %6883 = vst.msk [vmem:[#allocation2 + $0x2e8] sm:$0x1] %vm6851_vm4, %v19361_v23 }
 0x53f   :  { %6884 = vst.msk [vmem:[#allocation2 + $0x300] sm:$0x1] %vm6851_vm4, %v19361_v23  ;;  %6885 = vst.msk [vmem:[#allocation2 + $0x318] sm:$0x1] %vm6851_vm4, %v19361_v23 }
 0x540   :  { %6886 = vst.msk [vmem:[#allocation2 + $0x330] sm:$0x1] %vm6851_vm4, %v19361_v23  ;;  %6887 = vst.msk [vmem:[#allocation2 + $0x348] sm:$0x1] %vm6851_vm4, %v19361_v23 }
 0x541   :  { %6889 = vst.msk [vmem:[#allocation2 + $0x29] sm:$0x1] %vm6851_vm4, %v19361_v23  ;;  %6890 = vst.msk [vmem:[#allocation2 + $0x41] sm:$0x1] %vm6851_vm4, %v19361_v23 }
 0x542   :  { %6891 = vst.msk [vmem:[#allocation2 + $0x59] sm:$0x1] %vm6851_vm4, %v19361_v23  ;;  %6892 = vst.msk [vmem:[#allocation2 + $0x71] sm:$0x1] %vm6851_vm4, %v19361_v23 }
 0x543   :  { %6893 = vst.msk [vmem:[#allocation2 + $0x89] sm:$0x1] %vm6851_vm4, %v19361_v23  ;;  %6894 = vst.msk [vmem:[#allocation2 + $0xa1] sm:$0x1] %vm6851_vm4, %v19361_v23 }
 0x544   :  { %6895 = vst.msk [vmem:[#allocation2 + $0xb9] sm:$0x1] %vm6851_vm4, %v19361_v23  ;;  %6896 = vst.msk [vmem:[#allocation2 + $0xd1] sm:$0x1] %vm6851_vm4, %v19361_v23 }
 0x545   :  { %6897 = vst.msk [vmem:[#allocation2 + $0xe9] sm:$0x1] %vm6851_vm4, %v19361_v23  ;;  %6898 = vst.msk [vmem:[#allocation2 + $0x101] sm:$0x1] %vm6851_vm4, %v19361_v23 }
 0x546   :  { %6899 = vst.msk [vmem:[#allocation2 + $0x119] sm:$0x1] %vm6851_vm4, %v19361_v23  ;;  %6900 = vst.msk [vmem:[#allocation2 + $0x131] sm:$0x1] %vm6851_vm4, %v19361_v23 }
 0x547   :  { %6901 = vst.msk [vmem:[#allocation2 + $0x149] sm:$0x1] %vm6851_vm4, %v19361_v23  ;;  %6902 = vst.msk [vmem:[#allocation2 + $0x161] sm:$0x1] %vm6851_vm4, %v19361_v23 }
 0x548   :  { %6903 = vst.msk [vmem:[#allocation2 + $0x179] sm:$0x1] %vm6851_vm4, %v19361_v23  ;;  %6904 = vst.msk [vmem:[#allocation2 + $0x191] sm:$0x1] %vm6851_vm4, %v19361_v23 }
 0x549   :  { %6907 = vst.msk [vmem:[#allocation2 + $0x1d9] sm:$0x1] %vm6851_vm4, %v19361_v23  ;;  %6908 = vst.msk [vmem:[#allocation2 + $0x1f1] sm:$0x1] %vm6851_vm4, %v19361_v23 }
 0x54a   :  { %6909 = vst.msk [vmem:[#allocation2 + $0x209] sm:$0x1] %vm6851_vm4, %v19361_v23  ;;  %6910 = vst.msk [vmem:[#allocation2 + $0x221] sm:$0x1] %vm6851_vm4, %v19361_v23 }
 0x54b   :  { %6911 = vst.msk [vmem:[#allocation2 + $0x239] sm:$0x1] %vm6851_vm4, %v19361_v23  ;;  %6912 = vst.msk [vmem:[#allocation2 + $0x251] sm:$0x1] %vm6851_vm4, %v19361_v23 }
 0x54c   :  { %6913 = vst.msk [vmem:[#allocation2 + $0x269] sm:$0x1] %vm6851_vm4, %v19361_v23  ;;  %6914 = vst.msk [vmem:[#allocation2 + $0x281] sm:$0x1] %vm6851_vm4, %v19361_v23 }
 0x54d   :  { %6915 = vst.msk [vmem:[#allocation2 + $0x299] sm:$0x1] %vm6851_vm4, %v19361_v23  ;;  %6916 = vst.msk [vmem:[#allocation2 + $0x2b1] sm:$0x1] %vm6851_vm4, %v19361_v23 }
 0x54e   :  { %6917 = vst.msk [vmem:[#allocation2 + $0x2c9] sm:$0x1] %vm6851_vm4, %v19361_v23  ;;  %6918 = vst.msk [vmem:[#allocation2 + $0x2e1] sm:$0x1] %vm6851_vm4, %v19361_v23 }
 0x54f   :  { %6919 = vst.msk [vmem:[#allocation2 + $0x2f9] sm:$0x1] %vm6851_vm4, %v19361_v23  ;;  %6920 = vst.msk [vmem:[#allocation2 + $0x311] sm:$0x1] %vm6851_vm4, %v19361_v23 }
 0x550   :  { %6921 = vst.msk [vmem:[#allocation2 + $0x329] sm:$0x1] %vm6851_vm4, %v19361_v23  ;;  %6922 = vst.msk [vmem:[#allocation2 + $0x341] sm:$0x1] %vm6851_vm4, %v19361_v23 }
 0x551   :  { %6905 = vst.msk [vmem:[#allocation2 + $0x1a9] sm:$0x1] %vm6851_vm4, %v19361_v23  ;;  %6906 = vst.msk [vmem:[#allocation2 + $0x1c1] sm:$0x1] %vm6851_vm4, %v19361_v23 }
 0x552   :  { %6923 = vst.msk [vmem:[#allocation2 + $0x359] sm:$0x1] %vm6851_vm4, %v19361_v23  ;;  %26277 = vst [vmem:[#allocation12_spill] sm:$0xff] %v22460_v14  ;;  %v6471_v23 = vmul.f32 %v22460_v14, %v22460_v14 }
 0x553   :  { %26278 = vst [vmem:[#allocation13_spill] sm:$0xff] %v22477_v45  ;;  %26279 = vst [vmem:[#allocation14_spill] sm:$0xff] %v22480_v55 }
 0x554   :  { %v6578_v41 = vsel %vm6293_vm2, %v6471_v23, 0.0  ;;  %26280 = vst [vmem:[#allocation15_spill] sm:$0xff] %v22493_v33  ;;  %26281 = vst [vmem:[#allocation16_spill] sm:$0xff] %v22495_v43 }
 0x555   :  { %v6579_v54 = vadd.f32 %v6578_v41, %v6577_v31  ;;  %v6387_v31 = vsel %vm6293_vm2, %v22477_v45, 0.0 }
 0x556   :  { %v6388_v41 = vadd.f32 %v6387_v31, %v6386_v21 }
 0x557   :  { %v6581_v23 = vadd.f32 %v6580_v47, %v6579_v54  ;;  %v6475_v54 = vmul.f32 %v22495_v43, %v22495_v43 }
 0x558   :  { %v6390_v57 = vadd.f32 %v6389_v5, %v6388_v41 }
 0x559   :  { %v6583_v15 = vadd.f32 %v6582_v25, %v6581_v23  ;;  %v6586_v2 = vsel %vm6293_vm2, %v6475_v54, 0.0  ;;  %v22507_v23 = vpop.f32.mrb[50].mxu0  ;;  %v6588_v25 = vsel %vm6293_vm2, %v6476_v63, 0.0 }
 0x55a   :  { %26282 = vst [vmem:[#allocation17_spill] sm:$0xff] %v22507_v23  ;;  %v22509_v3 = vpop.f32.mrb[51].mxu0  ;;  %v6392_v31 = vadd.f32 %v6391_v12, %v6390_v57  ;;  %v6478_v45 = vmul.f32 %v22507_v23, %v22507_v23  ;;  %v6395_v54 = vsel %vm6293_vm2, %v22507_v23, 0.0 }
 0x55b   :  { %v6585_v47 = vadd.f32 %v6584_v53, %v6583_v15  ;;  %26283 = vst [vmem:[#allocation18_spill] sm:$0xff] %v22509_v3  ;;  %v6393_v41 = vsel %vm6293_vm2, %v22509_v3, 0.0  ;;  %v6477_v15 = vmul.f32 %v22509_v3, %v22509_v3 }
 0x55c   :  { %v6394_v53 = vadd.f32 %v6393_v41, %v6392_v31  ;;  %v6592_v33 = vsel %vm6293_vm2, %v6478_v45, 0.0 }
 0x55d   :  { %v6587_v21 = vadd.f32 %v6586_v2, %v6585_v47  ;;  %v6590_v47 = vsel %vm6293_vm2, %v6477_v15, 0.0  ;;  %v22521_v2 = vpop.f32.mrb[52].mxu0 }
 0x55e   :  { %26284 = vst [vmem:[#allocation19_spill] sm:$0xff] %v22521_v2  ;;  %v22523_v63 = vpop.f32.mrb[53].mxu0  ;;  %v6396_v12 = vadd.f32 %v6395_v54, %v6394_v53  ;;  %v6480_v43 = vmul.f32 %v22521_v2, %v22521_v2  ;;  %v6399_v15 = vsel %vm6293_vm2, %v22521_v2, 0.0 }
 0x55f   :  { %v6589_v5 = vadd.f32 %v6588_v25, %v6587_v21  ;;  %26285 = vst [vmem:[#allocation20_spill] sm:$0xff] %v22523_v63  ;;  %v6397_v31 = vsel %vm6293_vm2, %v22523_v63, 0.0  ;;  %v6479_v21 = vmul.f32 %v22523_v63, %v22523_v63 }
 0x560   :  { %v6398_v25 = vadd.f32 %v6397_v31, %v6396_v12  ;;  %v6596_v23 = vsel %vm6293_vm2, %v6480_v43, 0.0 }
 0x561   :  { %v6591_v57 = vadd.f32 %v6590_v47, %v6589_v5  ;;  %v6594_v5 = vsel %vm6293_vm2, %v6479_v21, 0.0  ;;  %v22535_v47 = vpop.f32.mrb[54].mxu0 }
 0x562   :  { %26286 = vst [vmem:[#allocation21_spill] sm:$0xff] %v22535_v47  ;;  %v22537_v45 = vpop.f32.mrb[55].mxu0  ;;  %v6400_v54 = vadd.f32 %v6399_v15, %v6398_v25  ;;  %v6482_v3 = vmul.f32 %v22535_v47, %v22535_v47  ;;  %v6403_v21 = vsel %vm6293_vm2, %v22535_v47, 0.0 }
 0x563   :  { %v6593_v41 = vadd.f32 %v6592_v33, %v6591_v57  ;;  %26287 = vst [vmem:[#allocation22_spill] sm:$0xff] %v22537_v45  ;;  %v6401_v12 = vsel %vm6293_vm2, %v22537_v45, 0.0  ;;  %v6481_v33 = vmul.f32 %v22537_v45, %v22537_v45 }
 0x564   :  { %v6402_v57 = vadd.f32 %v6401_v12, %v6400_v54  ;;  %v6600_v2 = vsel %vm6293_vm2, %v6482_v3, 0.0 }
 0x565   :  { %v6595_v53 = vadd.f32 %v6594_v5, %v6593_v41  ;;  %v6598_v41 = vsel %vm6293_vm2, %v6481_v33, 0.0  ;;  %v22549_v5 = vpop.f32.mrb[56].mxu0 }
 0x566   :  { %26288 = vst [vmem:[#allocation23_spill] sm:$0xff] %v22549_v5  ;;  %v22551_v43 = vpop.f32.mrb[57].mxu0  ;;  %v6404_v15 = vadd.f32 %v6403_v21, %v6402_v57  ;;  %v6484_v63 = vmul.f32 %v22549_v5, %v22549_v5  ;;  %v6407_v33 = vsel %vm6293_vm2, %v22549_v5, 0.0 }
 0x567   :  { %v6597_v31 = vadd.f32 %v6596_v23, %v6595_v53  ;;  %26289 = vst [vmem:[#allocation24_spill] sm:$0xff] %v22551_v43  ;;  %v6405_v54 = vsel %vm6293_vm2, %v22551_v43, 0.0  ;;  %v6483_v23 = vmul.f32 %v22551_v43, %v22551_v43 }
 0x568   :  { %v6406_v53 = vadd.f32 %v6405_v54, %v6404_v15  ;;  %v6604_v47 = vsel %vm6293_vm2, %v6484_v63, 0.0 }
 0x569   :  { %v6599_v25 = vadd.f32 %v6598_v41, %v6597_v31  ;;  %v6602_v31 = vsel %vm6293_vm2, %v6483_v23, 0.0  ;;  %v22563_v41 = vpop.f32.mrb[58].mxu0 }
 0x56a   :  { %26290 = vst [vmem:[#allocation25_spill] sm:$0xff] %v22563_v41  ;;  %v22565_v3 = vpop.f32.mrb[59].mxu0  ;;  %v6408_v21 = vadd.f32 %v6407_v33, %v6406_v53  ;;  %v6486_v45 = vmul.f32 %v22563_v41, %v22563_v41  ;;  %v6411_v23 = vsel %vm6293_vm2, %v22563_v41, 0.0 }
 0x56b   :  { %v6601_v12 = vadd.f32 %v6600_v2, %v6599_v25  ;;  %26291 = vst [vmem:[#allocation26_spill] sm:$0xff] %v22565_v3  ;;  %v6409_v15 = vsel %vm6293_vm2, %v22565_v3, 0.0  ;;  %v6485_v2 = vmul.f32 %v22565_v3, %v22565_v3 }
 0x56c   :  { %v6410_v25 = vadd.f32 %v6409_v15, %v6408_v21  ;;  %v6608_v5 = vsel %vm6293_vm2, %v6486_v45, 0.0 }
 0x56d   :  { %v6603_v57 = vadd.f32 %v6602_v31, %v6601_v12  ;;  %v6606_v12 = vsel %vm6293_vm2, %v6485_v2, 0.0  ;;  %v22577_v31 = vpop.f32.mrb[60].mxu0 }
 0x56e   :  { %26292 = vst [vmem:[#allocation27_spill] sm:$0xff] %v22577_v31  ;;  %v22579_v63 = vpop.f32.mrb[61].mxu0  ;;  %v6412_v33 = vadd.f32 %v6411_v23, %v6410_v25  ;;  %v6488_v43 = vmul.f32 %v22577_v31, %v22577_v31  ;;  %v6415_v2 = vsel %vm6293_vm2, %v22577_v31, 0.0 }
 0x56f   :  { %v6605_v54 = vadd.f32 %v6604_v47, %v6603_v57  ;;  %26293 = vst [vmem:[#allocation28_spill] sm:$0xff] %v22579_v63  ;;  %v6413_v21 = vsel %vm6293_vm2, %v22579_v63, 0.0  ;;  %v6487_v47 = vmul.f32 %v22579_v63, %v22579_v63 }
 0x570   :  { %v6414_v57 = vadd.f32 %v6413_v21, %v6412_v33  ;;  %v6612_v41 = vsel %vm6293_vm2, %v6488_v43, 0.0 }
 0x571   :  { %v6607_v53 = vadd.f32 %v6606_v12, %v6605_v54  ;;  %v6610_v54 = vsel %vm6293_vm2, %v6487_v47, 0.0  ;;  %v22591_v12 = vpop.f32.mrb[62].mxu0 }
 0x572   :  { %26294 = vst [vmem:[#allocation29_spill] sm:$0xff] %v22591_v12  ;;  %v6218_v45 = vpop.f32.mrb[63].mxu0  ;;  %v6416_v23 = vadd.f32 %v6415_v2, %v6414_v57  ;;  %v6490_v3 = vmul.f32 %v22591_v12, %v22591_v12 }
 0x573   :  { %v6609_v15 = vadd.f32 %v6608_v5, %v6607_v53  ;;  %v6417_v55 = vsel %vm6293_vm2, %v6218_v45, 0.0  ;;  %v6489_v63 = vmul.f32 %v6218_v45, %v6218_v45  ;;  %v6419_v53 = vsel %vm6293_vm2, %v22591_v12, 0.0 }
 0x574   :  { %v6418_v33 = vadd.f32 %v6417_v55, %v6416_v23 }
 0x575   :  { %v6611_v25 = vadd.f32 %v6610_v54, %v6609_v15  ;;  %v6614_v21 = vsel %vm6293_vm2, %v6489_v63, 0.0  ;;  %v6616_v15 = vsel %vm6293_vm2, %v6490_v3, 0.0  ;;  %v6634_v3 = vlaneseq }
 0x576   :  { %v6420_v47 = vadd.f32 %v6419_v53, %v6418_v33 }
 0x577   :  { %v6613_v5 = vadd.f32 %v6612_v41, %v6611_v25  ;;  %v6635_v53 = vshrl.u32 %v6634_v3, 7 }
 0x578   :  { %v6421_v57 = vrot.slane %v6420_v47, 4 }
 0x579   :  { %v6615_v31 = vadd.f32 %v6614_v21, %v6613_v5  ;;  %v22604_v21 = vsub.s32 0, %v6635_v53  ;;  %v26302_v53 = vld [vmem:[#allocation11_spill] sm:$0xff] }
 0x57a   :  { %v6422_v43 = vadd.f32 %v6421_v57, %v6420_v47 }
 0x57b   :  { %v6617_v2 = vadd.f32 %v6616_v15, %v6615_v31  ;;  %v6291_v31 = vld [vmem:[%s25927_s2] sm:$0x1]  ;;  %26295 = vst [vmem:[#allocation30_spill] sm:$0xff] %v22604_v21 }
 0x57c   :  { %v6423_v14 = vrot.slane %v6422_v43, 2 }
 0x57d   :  { %v6618_v54 = vrot.slane %v6617_v2, 4 }
 0x57e   :  { %v6424_v29 = vadd.f32 %v6423_v14, %v6422_v43 }
 0x57f   :  { %v6619_v22 = vadd.f32 %v6618_v54, %v6617_v2 }
 0x580   :  { %v6425_v59 = vrot.slane %v6424_v29, 1 }
 0x581   :  { %v6620_v56 = vrot.slane %v6619_v22, 2 }
 0x582   :  { %v6426_v41 = vadd.f32 %v6425_v59, %v6424_v29 }
 0x583   :  { %v6621_v55 = vadd.f32 %v6620_v56, %v6619_v22  ;;  %v6292_v56 = vld [vmem:[%s25928_s3] sm:$0x1] }
 0x584   :  { %v6624_v12 = vmul.f32 0.001953125, %v6426_v41  ;;  %v26296_v41 = vld [vmem:[#allocation6_spill] sm:$0xff] }
 0x585   :  { %v6622_v25 = vrot.slane %v6621_v55, 1 }
 0x586   :  { %v6626_v63 = vmul.f32 %v6624_v12, %v6624_v12 }
 0x587   :  { %v6623_v23 = vadd.f32 %v6622_v25, %v6621_v55  ;;  %v26297_v25 = vld [vmem:[#allocation8_spill] sm:$0xff] }
 0x589   :  { %v6625_v24 = vmul.f32 0.001953125, %v6623_v23  ;;  %v26298_v23 = vld [vmem:[#allocation7_spill] sm:$0xff] }
 0x58b   :  { %v6627_v33 = vsub.f32 %v6625_v24, %v6626_v63  ;;  %v26299_v63 = vld [vmem:[#allocation10_spill] sm:$0xff] }
 0x58d   :  { %v6628_v5 = vadd.f32 1e-05, %v6627_v33  ;;  %v26300_v33 = vld [vmem:[#allocation9_spill] sm:$0xff] }
 0x58f   :  { %19357 = vrsqrt.f32 %v6628_v5  ;;  %v26301_v5 = vld [vmem:[#allocation12_spill] sm:$0xff] }
 0x599   :  { %v19358_v14 = vpop.eup %19357 }
 0x59a   :  { %v6630_v47 = vmul.f32 %v19358_v14, %v6291_v31  ;;  %v26303_v14 = vld [vmem:[#allocation14_spill] sm:$0xff] }
 0x59c   :  { %v6631_v59 = vmul.f32 %v6630_v47, %v6624_v12  ;;  %v22610_v22 = vrot.slane %v6630_v47, %v22604_v21 }
 0x59e   :  { %v6632_v24 = vsub.f32 %v6292_v56, %v6631_v59  ;;  %v6701_v29 = vmul.f32 %v22610_v22, %v6218_v45  ;;  %v22615_v15 = vmul.f32 %v22610_v22, %v21973_v30  ;;  %v22619_v57 = vmul.f32 %v21967_v28, %v22610_v22  ;;  %v26304_v56 = vld [vmem:[#allocation13_spill] sm:$0xff] }
 0x59f   :  { %v22623_v2 = vmul.f32 %v22610_v22, %v21983_v39  ;;  %v22627_v12 = vmul.f32 %v21981_v35, %v22610_v22  ;;  %v22631_v43 = vmul.f32 %v22610_v22, %v21996_v51  ;;  %v22635_v30 = vmul.f32 %v21994_v48, %v22610_v22 }
 0x5a0   :  { %v22638_v45 = vrot.slane %v6632_v24, %v22604_v21  ;;  %v22642_v28 = vmul.f32 %v22610_v22, %v22010_v62  ;;  %v22646_v39 = vmul.f32 %v22008_v60, %v22610_v22  ;;  %v22650_v35 = vmul.f32 %v22610_v22, %v22024_v46  ;;  %v26305_v24 = vld [vmem:[#allocation16_spill] sm:$0xff] }
 0x5a1   :  { %v22654_v51 = vmul.f32 %v22022_v7, %v22610_v22  ;;  %v22658_v48 = vmul.f32 %v22610_v22, %v22038_v20  ;;  %v22662_v62 = vmul.f32 %v22036_v18, %v22610_v22  ;;  %v22666_v60 = vmul.f32 %v22610_v22, %v22052_v32  ;;  %v26318_v21 = vld [vmem:[#allocation24_spill] sm:$0xff] }
 0x5a2   :  { %v6771_v54 = vadd.f32 %v22638_v45, %v6701_v29  ;;  %v22671_v46 = vmul.f32 %v22050_v36, %v22610_v22  ;;  %v22675_v7 = vmul.f32 %v22610_v22, %v22066_v52  ;;  %v22679_v20 = vmul.f32 %v22064_v49, %v22610_v22 }
 0x5a3   :  { %v22683_v18 = vmul.f32 %v22610_v22, %v22080_v6  ;;  %v22687_v32 = vmul.f32 %v22078_v0, %v22610_v22  ;;  %v22691_v36 = vmul.f32 %v22610_v22, %v22094_v13  ;;  %v22695_v52 = vmul.f32 %v22092_v9, %v22610_v22 }
 0x5a4   :  { %v6835_v55 = vmax.f32 %v6771_v54, 0.0  ;;  %v22699_v49 = vmul.f32 %v22610_v22, %v22108_v11  ;;  %v22703_v6 = vmul.f32 %v22106_v26, %v22610_v22  ;;  %v22707_v0 = vmul.f32 %v22610_v22, %v22122_v50  ;;  %v26306_v54 = vld [vmem:[#allocation15_spill] sm:$0xff] }
 0x5a5   :  { %v22711_v13 = vmul.f32 %v22120_v44, %v22610_v22  ;;  %v22715_v9 = vmul.f32 %v22610_v22, %v22136_v4  ;;  %v22719_v11 = vmul.f32 %v22134_v1, %v22610_v22  ;;  %v22723_v26 = vmul.f32 %v22610_v22, %v22150_v19 }
 0x5a6   :  { %6987 = vst.msk [vmem:[#allocation2 + $0x331] sm:$0xff] %vm6293_vm2, %v6835_v55  ;;  %v22728_v50 = vmul.f32 %v22148_v16, %v22610_v22  ;;  %v22732_v44 = vmul.f32 %v22610_v22, %v22164_v40  ;;  %v22736_v4 = vmul.f32 %v22162_v34, %v22610_v22  ;;  %v22740_v1 = vmul.f32 %v22610_v22, %v22178_v61 }
 0x5a7   :  { %v22744_v19 = vmul.f32 %v22176_v58, %v22610_v22  ;;  %v22748_v16 = vmul.f32 %v22610_v22, %v22192_v17  ;;  %v22752_v40 = vmul.f32 %v22190_v10, %v22610_v22  ;;  %v22756_v34 = vmul.f32 %v22610_v22, %v22206_v42 }
 0x5a8   :  { %v22760_v61 = vmul.f32 %v22204_v38, %v22610_v22  ;;  %v22764_v58 = vmul.f32 %v22610_v22, %v22220_v8  ;;  %v22768_v17 = vmul.f32 %v22218_v37, %v22610_v22  ;;  %v22772_v10 = vmul.f32 %v22610_v22, %v22234_v27 }
 0x5a9   :  { %v22776_v42 = vmul.f32 %v26296_v41, %v22610_v22  ;;  %v22780_v38 = vmul.f32 %v22610_v22, %v26297_v25  ;;  %v22784_v8 = vmul.f32 %v26298_v23, %v22610_v22  ;;  %v22788_v37 = vmul.f32 %v22610_v22, %v26299_v63  ;;  %v26307_v41 = vld [vmem:[#allocation18_spill] sm:$0xff]  ;;  %v26308_v23 = vld [vmem:[#allocation17_spill] sm:$0xff] }
 0x5aa   :  { %v22792_v27 = vmul.f32 %v26300_v33, %v22610_v22  ;;  %v22796_v3 = vmul.f32 %v22610_v22, %v26301_v5  ;;  %v22800_v31 = vmul.f32 %v26302_v53, %v22610_v22  ;;  %v22804_v47 = vmul.f32 %v22610_v22, %v26303_v14  ;;  %v26310_v33 = vld [vmem:[#allocation20_spill] sm:$0xff]  ;;  %v26312_v53 = vld [vmem:[#allocation19_spill] sm:$0xff] }
 0x5ab   :  { %v22808_v59 = vmul.f32 %v26304_v56, %v22610_v22  ;;  %v22812_v29 = vmul.f32 %v22610_v22, %v26305_v24  ;;  %v22816_v55 = vmul.f32 %v26306_v54, %v22610_v22  ;;  %v22820_v25 = vmul.f32 %v22610_v22, %v26307_v41  ;;  %v26314_v56 = vld [vmem:[#allocation22_spill] sm:$0xff]  ;;  %v26316_v54 = vld [vmem:[#allocation21_spill] sm:$0xff] }
 0x5ac   :  { %v22824_v63 = vmul.f32 %v26308_v23, %v22610_v22  ;;  %v22828_v5 = vmul.f32 %v22610_v22, %v26310_v33  ;;  %v22832_v14 = vmul.f32 %v26312_v53, %v22610_v22  ;;  %v22836_v24 = vmul.f32 %v22610_v22, %v26314_v56 }
 0x5ad   :  { %v22840_v41 = vmul.f32 %v26316_v54, %v22610_v22  ;;  %v22844_v23 = vmul.f32 %v22610_v22, %v26318_v21 }
 0x5ae   :  { %26309 = vst [vmem:[#allocation31_spill] sm:$0xff] %v22824_v63  ;;  %26311 = vst [vmem:[#allocation32_spill] sm:$0xff] %v22828_v5  ;;  %v26320_v63 = vld [vmem:[#allocation23_spill] sm:$0xff]  ;;  %v26321_v5 = vld [vmem:[#allocation26_spill] sm:$0xff] }
 0x5af   :  { %26313 = vst [vmem:[#allocation33_spill] sm:$0xff] %v22832_v14  ;;  %26315 = vst [vmem:[#allocation34_spill] sm:$0xff] %v22836_v24  ;;  %v22848_v33 = vmul.f32 %v26320_v63, %v22610_v22  ;;  %v22852_v53 = vmul.f32 %v22610_v22, %v26321_v5  ;;  %v26322_v14 = vld [vmem:[#allocation25_spill] sm:$0xff]  ;;  %v26323_v24 = vld [vmem:[#allocation28_spill] sm:$0xff]  ;;  %v22872_v5 = vadd.f32 %v22638_v45, %v22615_v15 }
 0x5b0   :  { %26317 = vst [vmem:[#allocation35_spill] sm:$0xff] %v22840_v41  ;;  %26319 = vst [vmem:[#allocation36_spill] sm:$0xff] %v22844_v23  ;;  %v22856_v56 = vmul.f32 %v26322_v14, %v22610_v22  ;;  %v22860_v54 = vmul.f32 %v22610_v22, %v26323_v24  ;;  %v26324_v41 = vld [vmem:[#allocation27_spill] sm:$0xff]  ;;  %v26325_v23 = vld [vmem:[#allocation29_spill] sm:$0xff]  ;;  %v22876_v14 = vadd.f32 %v22638_v45, %v22619_v57 }
 0x5b1   :  { %v22864_v21 = vmul.f32 %v26324_v41, %v22610_v22  ;;  %v22868_v63 = vmul.f32 %v26325_v23, %v22610_v22  ;;  %v22880_v24 = vadd.f32 %v22638_v45, %v22623_v2  ;;  %v22884_v41 = vadd.f32 %v22638_v45, %v22627_v12 }
 0x5b2   :  { %v22888_v22 = vadd.f32 %v22638_v45, %v22631_v43  ;;  %v22892_v15 = vadd.f32 %v22638_v45, %v22635_v30  ;;  %v22896_v57 = vadd.f32 %v22638_v45, %v22642_v28  ;;  %v22900_v2 = vadd.f32 %v22638_v45, %v22646_v39 }
 0x5b3   :  { %v22904_v12 = vadd.f32 %v22638_v45, %v22650_v35  ;;  %v22908_v43 = vadd.f32 %v22638_v45, %v22654_v51  ;;  %v22912_v30 = vadd.f32 %v22638_v45, %v22658_v48  ;;  %v22916_v28 = vadd.f32 %v22638_v45, %v22662_v62 }
 0x5b4   :  { %v22920_v39 = vadd.f32 %v22638_v45, %v22666_v60  ;;  %v22924_v35 = vadd.f32 %v22638_v45, %v22671_v46  ;;  %v22928_v51 = vadd.f32 %v22638_v45, %v22675_v7  ;;  %v22932_v48 = vadd.f32 %v22638_v45, %v22679_v20 }
 0x5b5   :  { %v22936_v62 = vadd.f32 %v22638_v45, %v22683_v18  ;;  %v22940_v60 = vadd.f32 %v22638_v45, %v22687_v32  ;;  %v22944_v46 = vadd.f32 %v22638_v45, %v22691_v36  ;;  %v22948_v7 = vadd.f32 %v22638_v45, %v22695_v52  ;;  %v26331_v23 = vld [vmem:[#allocation31_spill] sm:$0xff] }
 0x5b6   :  { %v22952_v20 = vadd.f32 %v22638_v45, %v22699_v49  ;;  %v22956_v18 = vadd.f32 %v22638_v45, %v22703_v6  ;;  %v22960_v32 = vadd.f32 %v22638_v45, %v22707_v0  ;;  %v22964_v36 = vadd.f32 %v22638_v45, %v22711_v13 }
 0x5b7   :  { %v22968_v52 = vadd.f32 %v22638_v45, %v22715_v9  ;;  %v22972_v49 = vadd.f32 %v22638_v45, %v22719_v11  ;;  %v22976_v6 = vadd.f32 %v22638_v45, %v22723_v26  ;;  %v22980_v0 = vadd.f32 %v22638_v45, %v22728_v50 }
 0x5b8   :  { %v22984_v13 = vadd.f32 %v22638_v45, %v22732_v44  ;;  %v22988_v9 = vadd.f32 %v22638_v45, %v22736_v4  ;;  %v22992_v11 = vadd.f32 %v22638_v45, %v22740_v1  ;;  %v22996_v26 = vadd.f32 %v22638_v45, %v22744_v19 }
 0x5b9   :  { %v23000_v50 = vadd.f32 %v22638_v45, %v22748_v16  ;;  %v23004_v44 = vadd.f32 %v22638_v45, %v22752_v40  ;;  %v23008_v4 = vadd.f32 %v22638_v45, %v22756_v34  ;;  %v23012_v1 = vadd.f32 %v22638_v45, %v22760_v61 }
 0x5ba   :  { %v23016_v19 = vadd.f32 %v22638_v45, %v22764_v58  ;;  %v23020_v16 = vadd.f32 %v22638_v45, %v22768_v17  ;;  %v23024_v40 = vadd.f32 %v22638_v45, %v22772_v10  ;;  %v23028_v34 = vadd.f32 %v22638_v45, %v22776_v42 }
 0x5bb   :  { %v23032_v61 = vadd.f32 %v22638_v45, %v22780_v38  ;;  %v23036_v58 = vadd.f32 %v22638_v45, %v22784_v8  ;;  %v23040_v17 = vadd.f32 %v22638_v45, %v22788_v37  ;;  %v23044_v10 = vadd.f32 %v22638_v45, %v22792_v27 }
 0x5bc   :  { %v23048_v42 = vadd.f32 %v22638_v45, %v22796_v3  ;;  %v23052_v38 = vadd.f32 %v22638_v45, %v22800_v31  ;;  %v23056_v8 = vadd.f32 %v22638_v45, %v22804_v47  ;;  %v23060_v37 = vadd.f32 %v22638_v45, %v22808_v59 }
 0x5bd   :  { %v23064_v27 = vadd.f32 %v22638_v45, %v22812_v29  ;;  %v23068_v3 = vadd.f32 %v22638_v45, %v22816_v55  ;;  %v23072_v31 = vadd.f32 %v22638_v45, %v22820_v25  ;;  %v23076_v47 = vadd.f32 %v22638_v45, %v26331_v23 }
 0x5be   :  { %26326 = vst [vmem:[#allocation37_spill] sm:$0xff] %v23056_v8  ;;  %26327 = vst [vmem:[#allocation38_spill] sm:$0xff] %v23060_v37  ;;  %v26332_v8 = vld [vmem:[#allocation32_spill] sm:$0xff]  ;;  %v26333_v37 = vld [vmem:[#allocation33_spill] sm:$0xff] }
 0x5bf   :  { %26328 = vst [vmem:[#allocation39_spill] sm:$0xff] %v23064_v27  ;;  %26329 = vst [vmem:[#allocation40_spill] sm:$0xff] %v23068_v3  ;;  %v23080_v59 = vadd.f32 %v22638_v45, %v26332_v8  ;;  %v23084_v29 = vadd.f32 %v22638_v45, %v26333_v37  ;;  %v26334_v27 = vld [vmem:[#allocation34_spill] sm:$0xff]  ;;  %v26335_v3 = vld [vmem:[#allocation35_spill] sm:$0xff]  ;;  %v23100_v8 = vadd.f32 %v22638_v45, %v22848_v33 }
 0x5c0   :  { %26330 = vst [vmem:[#allocation41_spill] sm:$0xff] %v23072_v31  ;;  %v23088_v55 = vadd.f32 %v22638_v45, %v26334_v27  ;;  %v23092_v25 = vadd.f32 %v22638_v45, %v26335_v3  ;;  %v26336_v31 = vld [vmem:[#allocation36_spill] sm:$0xff]  ;;  %v23104_v37 = vadd.f32 %v22638_v45, %v22852_v53  ;;  %v23108_v27 = vadd.f32 %v22638_v45, %v22856_v56 }
 0x5c1   :  { %v23096_v23 = vadd.f32 %v22638_v45, %v26336_v31  ;;  %26337 = vst [vmem:[#allocation42_spill] sm:$0xff] %v23100_v8  ;;  %v23112_v3 = vadd.f32 %v22638_v45, %v22860_v54  ;;  %v23116_v31 = vadd.f32 %v22638_v45, %v22864_v21  ;;  %v23120_v33 = vadd.f32 %v22638_v45, %v22868_v63 }
 0x5c2   :  { %26338 = vst [vmem:[#allocation43_spill] sm:$0xff] %v23104_v37  ;;  %26339 = vst [vmem:[#allocation44_spill] sm:$0xff] %v23108_v27  ;;  %v6773_v8 = vmax.f32 %v22872_v5, 0.0  ;;  %v6774_v53 = vmax.f32 %v22876_v14, 0.0  ;;  %v6775_v37 = vmax.f32 %v22880_v24, 0.0  ;;  %v6776_v56 = vmax.f32 %v22884_v41, 0.0 }
 0x5c3   :  { %26340 = vst [vmem:[#allocation45_spill] sm:$0xff] %v23112_v3  ;;  %26341 = vst [vmem:[#allocation46_spill] sm:$0xff] %v23116_v31  ;;  %v6777_v27 = vmax.f32 %v22888_v22, 0.0  ;;  %v6778_v54 = vmax.f32 %v22892_v15, 0.0  ;;  %v6779_v3 = vmax.f32 %v22896_v57, 0.0  ;;  %v6780_v21 = vmax.f32 %v22900_v2, 0.0 }
 0x5c4   :  { %v6781_v31 = vmax.f32 %v22904_v12, 0.0  ;;  %6925 = vst.msk [vmem:[#allocation2 + $0x19] sm:$0xff] %vm6293_vm2, %v6773_v8  ;;  %v6782_v45 = vmax.f32 %v22908_v43, 0.0  ;;  %v6783_v63 = vmax.f32 %v22912_v30, 0.0  ;;  %v6784_v5 = vmax.f32 %v22916_v28, 0.0  ;;  %6926 = vst.msk [vmem:[#allocation2 + $0x21] sm:$0xff] %vm6293_vm2, %v6774_v53 }
 0x5c5   :  { %v6785_v14 = vmax.f32 %v22920_v39, 0.0  ;;  %6927 = vst.msk [vmem:[#allocation2 + $0x31] sm:$0xff] %vm6293_vm2, %v6775_v37  ;;  %6928 = vst.msk [vmem:[#allocation2 + $0x39] sm:$0xff] %vm6293_vm2, %v6776_v56  ;;  %v6786_v24 = vmax.f32 %v22924_v35, 0.0  ;;  %v6787_v41 = vmax.f32 %v22928_v51, 0.0  ;;  %v6788_v22 = vmax.f32 %v22932_v48, 0.0 }
 0x5c6   :  { %6929 = vst.msk [vmem:[#allocation2 + $0x49] sm:$0xff] %vm6293_vm2, %v6777_v27  ;;  %v6789_v15 = vmax.f32 %v22936_v62, 0.0  ;;  %6930 = vst.msk [vmem:[#allocation2 + $0x51] sm:$0xff] %vm6293_vm2, %v6778_v54  ;;  %v6790_v57 = vmax.f32 %v22940_v60, 0.0  ;;  %v6791_v2 = vmax.f32 %v22944_v46, 0.0  ;;  %v6792_v12 = vmax.f32 %v22948_v7, 0.0 }
 0x5c7   :  { %6931 = vst.msk [vmem:[#allocation2 + $0x61] sm:$0xff] %vm6293_vm2, %v6779_v3  ;;  %6932 = vst.msk [vmem:[#allocation2 + $0x69] sm:$0xff] %vm6293_vm2, %v6780_v21  ;;  %v6793_v43 = vmax.f32 %v22952_v20, 0.0  ;;  %v6794_v30 = vmax.f32 %v22956_v18, 0.0  ;;  %v6795_v28 = vmax.f32 %v22960_v32, 0.0  ;;  %v6796_v39 = vmax.f32 %v22964_v36, 0.0 }
 0x5c8   :  { %6933 = vst.msk [vmem:[#allocation2 + $0x79] sm:$0xff] %vm6293_vm2, %v6781_v31  ;;  %6934 = vst.msk [vmem:[#allocation2 + $0x81] sm:$0xff] %vm6293_vm2, %v6782_v45  ;;  %v6797_v35 = vmax.f32 %v22968_v52, 0.0  ;;  %v6798_v51 = vmax.f32 %v22972_v49, 0.0  ;;  %v6799_v48 = vmax.f32 %v22976_v6, 0.0  ;;  %v6800_v62 = vmax.f32 %v22980_v0, 0.0 }
 0x5c9   :  { %6935 = vst.msk [vmem:[#allocation2 + $0x91] sm:$0xff] %vm6293_vm2, %v6783_v63  ;;  %6936 = vst.msk [vmem:[#allocation2 + $0x99] sm:$0xff] %vm6293_vm2, %v6784_v5  ;;  %v6801_v60 = vmax.f32 %v22984_v13, 0.0  ;;  %v23175_v46 = vld [vmem:[%s25926_s4 + $0x10] sm:$0xff]  ;;  %v6802_v7 = vmax.f32 %v22988_v9, 0.0  ;;  %v6803_v20 = vmax.f32 %v22992_v11, 0.0 }
 0x5ca   :  { %6937 = vst.msk [vmem:[#allocation2 + $0xa9] sm:$0xff] %vm6293_vm2, %v6785_v14  ;;  %6938 = vst.msk [vmem:[#allocation2 + $0xb1] sm:$0xff] %vm6293_vm2, %v6786_v24  ;;  %v6804_v18 = vmax.f32 %v22996_v26, 0.0  ;;  %v6805_v32 = vmax.f32 %v23000_v50, 0.0  ;;  %17646 = vmatprep.subr.mxu1 %v23175_v46  ;;  %v6806_v36 = vmax.f32 %v23004_v44, 0.0  ;;  %v6807_v52 = vmax.f32 %v23008_v4, 0.0 }
 0x5cb   :  { %6939 = vst.msk [vmem:[#allocation2 + $0xc1] sm:$0xff] %vm6293_vm2, %v6787_v41  ;;  %6940 = vst.msk [vmem:[#allocation2 + $0xc9] sm:$0xff] %vm6293_vm2, %v6788_v22  ;;  %v6808_v49 = vmax.f32 %v23012_v1, 0.0  ;;  %v6809_v6 = vmax.f32 %v23016_v19, 0.0  ;;  %v7056_v0 = vld [vmem:[#allocation2 + $0x19] sm:$0xff]  ;;  %v6810_v13 = vmax.f32 %v23020_v16, 0.0 }
 0x5cc   :  { %6941 = vst.msk [vmem:[#allocation2 + $0xd9] sm:$0xff] %vm6293_vm2, %v6789_v15  ;;  %6942 = vst.msk [vmem:[#allocation2 + $0xe1] sm:$0xff] %vm6293_vm2, %v6790_v57  ;;  %v6811_v9 = vmax.f32 %v23024_v40, 0.0  ;;  %v6812_v11 = vmax.f32 %v23028_v34, 0.0  ;;  %v6813_v26 = vmax.f32 %v23032_v61, 0.0  ;;  %17455 = vmatprep.mubr.msk.f32.mxu1 %vm6293_vm2, %v7056_v0  ;;  %v7057_v50 = vld [vmem:[#allocation2 + $0x21] sm:$0xff] }
 0x5cd   :  { %6943 = vst.msk [vmem:[#allocation2 + $0xf1] sm:$0xff] %vm6293_vm2, %v6791_v2  ;;  %6944 = vst.msk [vmem:[#allocation2 + $0xf9] sm:$0xff] %vm6293_vm2, %v6792_v12  ;;  %v6814_v44 = vmax.f32 %v23036_v58, 0.0  ;;  %v6815_v4 = vmax.f32 %v23040_v17, 0.0  ;;  %v6816_v1 = vmax.f32 %v23044_v10, 0.0  ;;  %v6817_v19 = vmax.f32 %v23048_v42, 0.0  ;;  %17456 = vmatmul.mubr.msk.f32.gmra.mrb[2].mxu1 %vm6293_vm2, %v7057_v50 }
 0x5ce   :  { %6945 = vst.msk [vmem:[#allocation2 + $0x109] sm:$0xff] %vm6293_vm2, %v6793_v43  ;;  %6946 = vst.msk [vmem:[#allocation2 + $0x111] sm:$0xff] %vm6293_vm2, %v6794_v30  ;;  %v7058_v16 = vld [vmem:[#allocation2 + $0x31] sm:$0xff]  ;;  %v6818_v40 = vmax.f32 %v23052_v38, 0.0  ;;  %v26344_v10 = vld [vmem:[#allocation39_spill] sm:$0xff]  ;;  %v6824_v3 = vmax.f32 %v23076_v47, 0.0 }
 0x5cf   :  { %6947 = vst.msk [vmem:[#allocation2 + $0x121] sm:$0xff] %vm6293_vm2, %v6795_v28  ;;  %6948 = vst.msk [vmem:[#allocation2 + $0x129] sm:$0xff] %vm6293_vm2, %v6796_v39  ;;  %v26342_v34 = vld [vmem:[#allocation37_spill] sm:$0xff]  ;;  %v26343_v58 = vld [vmem:[#allocation38_spill] sm:$0xff]  ;;  %v6821_v8 = vmax.f32 %v26344_v10, 0.0  ;;  %17458 = vmatprep.mubr.msk.f32.mxu1 %vm6293_vm2, %v7058_v16  ;;  %v6825_v31 = vmax.f32 %v23080_v59, 0.0 }
 0x5d0   :  { %6949 = vst.msk [vmem:[#allocation2 + $0x139] sm:$0xff] %vm6293_vm2, %v6797_v35  ;;  %6950 = vst.msk [vmem:[#allocation2 + $0x141] sm:$0xff] %vm6293_vm2, %v6798_v51  ;;  %v6819_v61 = vmax.f32 %v26342_v34, 0.0  ;;  %v6820_v17 = vmax.f32 %v26343_v58, 0.0  ;;  %v26345_v42 = vld [vmem:[#allocation40_spill] sm:$0xff]  ;;  %v26346_v27 = vld [vmem:[#allocation41_spill] sm:$0xff] }
 0x5d1   :  { %6951 = vst.msk [vmem:[#allocation2 + $0x151] sm:$0xff] %vm6293_vm2, %v6799_v48  ;;  %6952 = vst.msk [vmem:[#allocation2 + $0x159] sm:$0xff] %vm6293_vm2, %v6800_v62  ;;  %v6822_v37 = vmax.f32 %v26345_v42, 0.0  ;;  %v6823_v38 = vmax.f32 %v26346_v27, 0.0  ;;  %v6826_v53 = vmax.f32 %v23084_v29, 0.0  ;;  %v6827_v56 = vmax.f32 %v23088_v55, 0.0 }
 0x5d2   :  { %6953 = vst.msk [vmem:[#allocation2 + $0x169] sm:$0xff] %vm6293_vm2, %v6801_v60  ;;  %6954 = vst.msk [vmem:[#allocation2 + $0x171] sm:$0xff] %vm6293_vm2, %v6802_v7  ;;  %v6828_v54 = vmax.f32 %v23092_v25, 0.0  ;;  %v6829_v21 = vmax.f32 %v23096_v23, 0.0  ;;  %v7059_v47 = vld [vmem:[#allocation2 + $0x39] sm:$0xff]  ;;  %v26349_v29 = vld [vmem:[#allocation44_spill] sm:$0xff] }
 0x5d3   :  { %6955 = vst.msk [vmem:[#allocation2 + $0x181] sm:$0xff] %vm6293_vm2, %v6803_v20  ;;  %6956 = vst.msk [vmem:[#allocation2 + $0x189] sm:$0xff] %vm6293_vm2, %v6804_v18  ;;  %v26347_v59 = vld [vmem:[#allocation42_spill] sm:$0xff]  ;;  %v26348_v63 = vld [vmem:[#allocation43_spill] sm:$0xff]  ;;  %v6832_v14 = vmax.f32 %v26349_v29, 0.0  ;;  %17459 = vmatmul.mubr.msk.f32.gmra.mrb[4].mxu1 %vm6293_vm2, %v7059_v47  ;;  %v6836_v22 = vmax.f32 %v23120_v33, 0.0 }
 0x5d4   :  { %6957 = vst.msk [vmem:[#allocation2 + $0x1c9] sm:$0xff] %vm6293_vm2, %v6805_v32  ;;  %6958 = vst.msk [vmem:[#allocation2 + $0x1d1] sm:$0xff] %vm6293_vm2, %v6806_v36  ;;  %v6830_v45 = vmax.f32 %v26347_v59, 0.0  ;;  %v6831_v5 = vmax.f32 %v26348_v63, 0.0  ;;  %v26350_v55 = vld [vmem:[#allocation45_spill] sm:$0xff]  ;;  %v26351_v23 = vld [vmem:[#allocation46_spill] sm:$0xff] }
 0x5d5   :  { %6959 = vst.msk [vmem:[#allocation2 + $0x1e1] sm:$0xff] %vm6293_vm2, %v6807_v52  ;;  %6960 = vst.msk [vmem:[#allocation2 + $0x1e9] sm:$0xff] %vm6293_vm2, %v6808_v49  ;;  %v6833_v24 = vmax.f32 %v26350_v55, 0.0  ;;  %v7060_v25 = vld [vmem:[#allocation2 + $0x49] sm:$0xff]  ;;  %v6834_v41 = vmax.f32 %v26351_v23, 0.0  ;;  %v7061_v33 = vld [vmem:[#allocation2 + $0x51] sm:$0xff] }
 0x5d6   :  { %6961 = vst.msk [vmem:[#allocation2 + $0x1f9] sm:$0xff] %vm6293_vm2, %v6809_v6  ;;  %6962 = vst.msk [vmem:[#allocation2 + $0x201] sm:$0xff] %vm6293_vm2, %v6810_v13  ;;  %17461 = vmatprep.mubr.msk.f32.mxu1 %vm6293_vm2, %v7060_v25  ;;  %v7062_v15 = vld [vmem:[#allocation2 + $0x61] sm:$0xff]  ;;  %v7063_v57 = vld [vmem:[#allocation2 + $0x69] sm:$0xff] }
 0x5d7   :  { %6963 = vst.msk [vmem:[#allocation2 + $0x211] sm:$0xff] %vm6293_vm2, %v6811_v9  ;;  %6964 = vst.msk [vmem:[#allocation2 + $0x219] sm:$0xff] %vm6293_vm2, %v6812_v11  ;;  %17462 = vmatmul.mubr.msk.f32.gmra.mrb[6].mxu1 %vm6293_vm2, %v7061_v33  ;;  %v7064_v2 = vld [vmem:[#allocation2 + $0x79] sm:$0xff]  ;;  %v7065_v12 = vld [vmem:[#allocation2 + $0x81] sm:$0xff] }
 0x5d8   :  { %6965 = vst.msk [vmem:[#allocation2 + $0x229] sm:$0xff] %vm6293_vm2, %v6813_v26  ;;  %6966 = vst.msk [vmem:[#allocation2 + $0x231] sm:$0xff] %vm6293_vm2, %v6814_v44  ;;  %17464 = vmatprep.mubr.msk.f32.mxu1 %vm6293_vm2, %v7062_v15  ;;  %v7066_v43 = vld [vmem:[#allocation2 + $0x91] sm:$0xff]  ;;  %v7067_v30 = vld [vmem:[#allocation2 + $0x99] sm:$0xff] }
 0x5d9   :  { %6967 = vst.msk [vmem:[#allocation2 + $0x241] sm:$0xff] %vm6293_vm2, %v6815_v4  ;;  %6968 = vst.msk [vmem:[#allocation2 + $0x249] sm:$0xff] %vm6293_vm2, %v6816_v1  ;;  %v7068_v28 = vld [vmem:[#allocation2 + $0xa9] sm:$0xff]  ;;  %v7069_v39 = vld [vmem:[#allocation2 + $0xb1] sm:$0xff] }
 0x5da   :  { %6969 = vst.msk [vmem:[#allocation2 + $0x259] sm:$0xff] %vm6293_vm2, %v6817_v19  ;;  %6970 = vst.msk [vmem:[#allocation2 + $0x261] sm:$0xff] %vm6293_vm2, %v6818_v40  ;;  %v7070_v35 = vld [vmem:[#allocation2 + $0xc1] sm:$0xff]  ;;  %v7071_v51 = vld [vmem:[#allocation2 + $0xc9] sm:$0xff] }
 0x5db   :  { %6971 = vst.msk [vmem:[#allocation2 + $0x271] sm:$0xff] %vm6293_vm2, %v6819_v61  ;;  %6972 = vst.msk [vmem:[#allocation2 + $0x279] sm:$0xff] %vm6293_vm2, %v6820_v17  ;;  %17465 = vmatmul.mubr.msk.f32.gmra.mrb[8].mxu1 %vm6293_vm2, %v7063_v57  ;;  %v7072_v48 = vld [vmem:[#allocation2 + $0xd9] sm:$0xff]  ;;  %v7073_v62 = vld [vmem:[#allocation2 + $0xe1] sm:$0xff] }
 0x5dc   :  { %6973 = vst.msk [vmem:[#allocation2 + $0x289] sm:$0xff] %vm6293_vm2, %v6821_v8  ;;  %6974 = vst.msk [vmem:[#allocation2 + $0x291] sm:$0xff] %vm6293_vm2, %v6822_v37  ;;  %17467 = vmatprep.mubr.msk.f32.mxu1 %vm6293_vm2, %v7064_v2  ;;  %v7074_v60 = vld [vmem:[#allocation2 + $0xf1] sm:$0xff]  ;;  %v7075_v7 = vld [vmem:[#allocation2 + $0xf9] sm:$0xff] }
 0x5dd   :  { %6975 = vst.msk [vmem:[#allocation2 + $0x2a1] sm:$0xff] %vm6293_vm2, %v6823_v38  ;;  %6976 = vst.msk [vmem:[#allocation2 + $0x2a9] sm:$0xff] %vm6293_vm2, %v6824_v3  ;;  %v7076_v20 = vld [vmem:[#allocation2 + $0x109] sm:$0xff]  ;;  %v7077_v18 = vld [vmem:[#allocation2 + $0x111] sm:$0xff] }
 0x5de   :  { %6977 = vst.msk [vmem:[#allocation2 + $0x2b9] sm:$0xff] %vm6293_vm2, %v6825_v31  ;;  %6978 = vst.msk [vmem:[#allocation2 + $0x2c1] sm:$0xff] %vm6293_vm2, %v6826_v53  ;;  %v7078_v32 = vld [vmem:[#allocation2 + $0x121] sm:$0xff]  ;;  %v7079_v36 = vld [vmem:[#allocation2 + $0x129] sm:$0xff] }
 0x5df   :  { %6979 = vst.msk [vmem:[#allocation2 + $0x2d1] sm:$0xff] %vm6293_vm2, %v6827_v56  ;;  %6980 = vst.msk [vmem:[#allocation2 + $0x2d9] sm:$0xff] %vm6293_vm2, %v6828_v54  ;;  %17468 = vmatmul.mubr.msk.f32.gmra.mrb[10].mxu1 %vm6293_vm2, %v7065_v12  ;;  %v7080_v52 = vld [vmem:[#allocation2 + $0x139] sm:$0xff]  ;;  %v7081_v49 = vld [vmem:[#allocation2 + $0x141] sm:$0xff] }
 0x5e0   :  { %6981 = vst.msk [vmem:[#allocation2 + $0x2e9] sm:$0xff] %vm6293_vm2, %v6829_v21  ;;  %6982 = vst.msk [vmem:[#allocation2 + $0x2f1] sm:$0xff] %vm6293_vm2, %v6830_v45  ;;  %17470 = vmatprep.mubr.msk.f32.mxu1 %vm6293_vm2, %v7066_v43  ;;  %v7082_v6 = vld [vmem:[#allocation2 + $0x151] sm:$0xff]  ;;  %v7083_v0 = vld [vmem:[#allocation2 + $0x159] sm:$0xff] }
 0x5e1   :  { %6983 = vst.msk [vmem:[#allocation2 + $0x301] sm:$0xff] %vm6293_vm2, %v6831_v5  ;;  %6984 = vst.msk [vmem:[#allocation2 + $0x309] sm:$0xff] %vm6293_vm2, %v6832_v14  ;;  %v7084_v13 = vld [vmem:[#allocation2 + $0x169] sm:$0xff]  ;;  %v7086_v9 = vld [vmem:[#allocation2 + $0x1b1] sm:$0xff] }
 0x5e2   :  { %6985 = vst.msk [vmem:[#allocation2 + $0x319] sm:$0xff] %vm6293_vm2, %v6833_v24  ;;  %6986 = vst.msk [vmem:[#allocation2 + $0x321] sm:$0xff] %vm6293_vm2, %v6834_v41  ;;  %v7085_v11 = vld [vmem:[#allocation2 + $0x171] sm:$0xff]  ;;  %v7087_v26 = vld [vmem:[#allocation2 + $0x1b9] sm:$0xff] }
 0x5e3   :  { %6988 = vst.msk [vmem:[#allocation2 + $0x339] sm:$0xff] %vm6293_vm2, %v6836_v22  ;;  %17471 = vmatmul.mubr.msk.f32.gmra.mrb[12].mxu1 %vm6293_vm2, %v7067_v30  ;;  %v7088_v50 = vld [vmem:[#allocation2 + $0x1c9] sm:$0xff]  ;;  %v7089_v44 = vld [vmem:[#allocation2 + $0x1d1] sm:$0xff]  ;;  %v7090_v4 = vld [vmem:[#allocation2 + $0x1e1] sm:$0xff] }
 0x5e4   :  { %17473 = vmatprep.mubr.msk.f32.mxu1 %vm6293_vm2, %v7068_v28  ;;  %v7091_v1 = vld [vmem:[#allocation2 + $0x1e9] sm:$0xff]  ;;  %v7092_v19 = vld [vmem:[#allocation2 + $0x1f9] sm:$0xff]  ;;  %v7093_v16 = vld [vmem:[#allocation2 + $0x201] sm:$0xff] }
 0x5e5   :  { %v7094_v40 = vld [vmem:[#allocation2 + $0x211] sm:$0xff]  ;;  %v7095_v34 = vld [vmem:[#allocation2 + $0x219] sm:$0xff]  ;;  %v7096_v61 = vld [vmem:[#allocation2 + $0x229] sm:$0xff] }
 0x5e6   :  { %v7097_v58 = vld [vmem:[#allocation2 + $0x231] sm:$0xff]  ;;  %v7098_v17 = vld [vmem:[#allocation2 + $0x241] sm:$0xff]  ;;  %v7099_v10 = vld [vmem:[#allocation2 + $0x249] sm:$0xff] }
 0x5e7   :  { %17474 = vmatmul.mubr.msk.f32.gmra.mrb[14].mxu1 %vm6293_vm2, %v7069_v39  ;;  %v7100_v8 = vld [vmem:[#allocation2 + $0x259] sm:$0xff]  ;;  %v7101_v42 = vld [vmem:[#allocation2 + $0x261] sm:$0xff]  ;;  %v7102_v37 = vld [vmem:[#allocation2 + $0x271] sm:$0xff] }
 0x5e8   :  { %17476 = vmatprep.mubr.msk.f32.mxu1 %vm6293_vm2, %v7070_v35  ;;  %v7103_v27 = vld [vmem:[#allocation2 + $0x279] sm:$0xff]  ;;  %v7104_v38 = vld [vmem:[#allocation2 + $0x289] sm:$0xff]  ;;  %v7105_v3 = vld [vmem:[#allocation2 + $0x291] sm:$0xff] }
 0x5e9   :  { %v7106_v31 = vld [vmem:[#allocation2 + $0x2a1] sm:$0xff]  ;;  %v7107_v53 = vld [vmem:[#allocation2 + $0x2a9] sm:$0xff]  ;;  %v7108_v56 = vld [vmem:[#allocation2 + $0x2b9] sm:$0xff] }
 0x5ea   :  { %v7109_v54 = vld [vmem:[#allocation2 + $0x2c1] sm:$0xff]  ;;  %v7110_v21 = vld [vmem:[#allocation2 + $0x2d1] sm:$0xff]  ;;  %v7111_v47 = vld [vmem:[#allocation2 + $0x2d9] sm:$0xff] }
 0x5eb   :  { %17477 = vmatmul.mubr.msk.f32.gmra.mrb[16].mxu1 %vm6293_vm2, %v7071_v51  ;;  %v7112_v59 = vld [vmem:[#allocation2 + $0x2e9] sm:$0xff]  ;;  %v7113_v45 = vld [vmem:[#allocation2 + $0x2f1] sm:$0xff]  ;;  %v7114_v63 = vld [vmem:[#allocation2 + $0x301] sm:$0xff] }
 0x5ec   :  { %17479 = vmatprep.mubr.msk.f32.mxu1 %vm6293_vm2, %v7072_v48  ;;  %v7115_v5 = vld [vmem:[#allocation2 + $0x309] sm:$0xff]  ;;  %v7116_v29 = vld [vmem:[#allocation2 + $0x319] sm:$0xff]  ;;  %v7117_v55 = vld [vmem:[#allocation2 + $0x321] sm:$0xff] }
 0x5ed   :  { %v6989_v14 = vld [vmem:[#allocation2] sm:$0xff]  ;;  %v6990_v24 = vld [vmem:[#allocation2 + $0x8] sm:$0xff]  ;;  %v23318_v25 = vld [vmem:[#allocation2 + $0x18] sm:$0xff] }
 0x5ee   :  { %v23323_v23 = vld [vmem:[%s25926_s4 + $0x18] sm:$0xff]  ;;  %v23329_v41 = vld [vmem:[#allocation2 + $0x20] sm:$0xff]  ;;  %v23333_v22 = vld [vmem:[#allocation2 + $0x30] sm:$0xff] }
 0x5ef   :  { %17480 = vmatmul.mubr.msk.f32.gmra.mrb[18].mxu1 %vm6293_vm2, %v7073_v62  ;;  %v23337_v33 = vld [vmem:[#allocation2 + $0x38] sm:$0xff]  ;;  %v23341_v15 = vld [vmem:[#allocation2 + $0x48] sm:$0xff]  ;;  %v23349_v57 = vld [vmem:[#allocation2 + $0x60] sm:$0xff] }
 0x5f0   :  { %17482 = vmatprep.mubr.msk.f32.mxu1 %vm6293_vm2, %v7074_v60  ;;  %v23353_v2 = vld [vmem:[#allocation2 + $0x68] sm:$0xff]  ;;  %v23357_v12 = vld [vmem:[#allocation2 + $0x78] sm:$0xff]  ;;  %v23361_v43 = vld [vmem:[#allocation2 + $0x80] sm:$0xff] }
 0x5f1   :  { %v23365_v30 = vld [vmem:[#allocation2 + $0x90] sm:$0xff]  ;;  %v23369_v28 = vld [vmem:[#allocation2 + $0x98] sm:$0xff]  ;;  %v23373_v39 = vld [vmem:[#allocation2 + $0xa8] sm:$0xff] }
 0x5f2   :  { %v23377_v35 = vld [vmem:[#allocation2 + $0xb0] sm:$0xff]  ;;  %v23381_v51 = vld [vmem:[#allocation2 + $0xc0] sm:$0xff]  ;;  %v23385_v48 = vld [vmem:[#allocation2 + $0xc8] sm:$0xff] }
 0x5f3   :  { %17483 = vmatmul.mubr.msk.f32.gmra.mrb[20].mxu1 %vm6293_vm2, %v7075_v7  ;;  %v23389_v62 = vld [vmem:[#allocation2 + $0xd8] sm:$0xff]  ;;  %v23393_v60 = vld [vmem:[#allocation2 + $0xe0] sm:$0xff]  ;;  %v23397_v7 = vld [vmem:[#allocation2 + $0xf0] sm:$0xff] }
 0x5f4   :  { %17485 = vmatprep.mubr.msk.f32.mxu1 %vm6293_vm2, %v7076_v20  ;;  %v23401_v20 = vld [vmem:[#allocation2 + $0xf8] sm:$0xff] }
 0x5f7   :  { %17486 = vmatmul.mubr.msk.f32.gmra.mrb[22].mxu1 %vm6293_vm2, %v7077_v18  ;;  %v23405_v18 = vld [vmem:[#allocation2 + $0x108] sm:$0xff] }
 0x5f8   :  { %17488 = vmatprep.mubr.msk.f32.mxu1 %vm6293_vm2, %v7078_v32  ;;  %v23409_v32 = vld [vmem:[#allocation2 + $0x110] sm:$0xff] }
 0x5fb   :  { %17489 = vmatmul.mubr.msk.f32.gmra.mrb[24].mxu1 %vm6293_vm2, %v7079_v36  ;;  %v23413_v36 = vld [vmem:[#allocation2 + $0x120] sm:$0xff] }
 0x5fc   :  { %17491 = vmatprep.mubr.msk.f32.mxu1 %vm6293_vm2, %v7080_v52  ;;  %v23417_v52 = vld [vmem:[#allocation2 + $0x128] sm:$0xff] }
 0x5ff   :  { %17492 = vmatmul.mubr.msk.f32.gmra.mrb[26].mxu1 %vm6293_vm2, %v7081_v49  ;;  %v23421_v49 = vld [vmem:[#allocation2 + $0x138] sm:$0xff] }
 0x600   :  { %17494 = vmatprep.mubr.msk.f32.mxu1 %vm6293_vm2, %v7082_v6  ;;  %v23425_v6 = vld [vmem:[#allocation2 + $0x140] sm:$0xff] }
 0x603   :  { %17495 = vmatmul.mubr.msk.f32.gmra.mrb[28].mxu1 %vm6293_vm2, %v7083_v0  ;;  %v23429_v0 = vld [vmem:[#allocation2 + $0x150] sm:$0xff] }
 0x604   :  { %17497 = vmatprep.mubr.msk.f32.mxu1 %vm6293_vm2, %v7084_v13  ;;  %v23433_v13 = vld [vmem:[#allocation2 + $0x158] sm:$0xff] }
 0x607   :  { %17498 = vmatmul.mubr.msk.f32.gmra.mrb[30].mxu1 %vm6293_vm2, %v7085_v11  ;;  %v7021_v11 = vld [vmem:[#allocation2 + $0x1b0] sm:$0xff] }
 0x608   :  { %17500 = vmatprep.mubr.msk.f32.mxu1 %vm6293_vm2, %v7086_v9  ;;  %v23437_v9 = vld [vmem:[#allocation2 + $0x168] sm:$0xff] }
 0x60b   :  { %17501 = vmatmul.mubr.msk.f32.gmra.mrb[32].mxu1 %vm6293_vm2, %v7087_v26  ;;  %v23441_v26 = vld [vmem:[#allocation2 + $0x170] sm:$0xff] }
 0x60c   :  { %17503 = vmatprep.mubr.msk.f32.mxu1 %vm6293_vm2, %v7088_v50  ;;  %v7022_v50 = vld [vmem:[#allocation2 + $0x1b8] sm:$0xff] }
 0x60f   :  { %17504 = vmatmul.mubr.msk.f32.gmra.mrb[34].mxu1 %vm6293_vm2, %v7089_v44  ;;  %v23447_v44 = vld [vmem:[#allocation2 + $0x1c8] sm:$0xff] }
 0x610   :  { %17506 = vmatprep.mubr.msk.f32.mxu1 %vm6293_vm2, %v7090_v4  ;;  %v23451_v4 = vld [vmem:[#allocation2 + $0x1d0] sm:$0xff] }
 0x613   :  { %17507 = vmatmul.mubr.msk.f32.gmra.mrb[36].mxu1 %vm6293_vm2, %v7091_v1  ;;  %v23455_v1 = vld [vmem:[#allocation2 + $0x1e0] sm:$0xff] }
 0x614   :  { %17509 = vmatprep.mubr.msk.f32.mxu1 %vm6293_vm2, %v7092_v19  ;;  %v23459_v19 = vld [vmem:[#allocation2 + $0x1e8] sm:$0xff] }
 0x617   :  { %17510 = vmatmul.mubr.msk.f32.gmra.mrb[38].mxu1 %vm6293_vm2, %v7093_v16  ;;  %v23463_v16 = vld [vmem:[#allocation2 + $0x1f8] sm:$0xff] }
 0x618   :  { %17512 = vmatprep.mubr.msk.f32.mxu1 %vm6293_vm2, %v7094_v40  ;;  %v23467_v40 = vld [vmem:[#allocation2 + $0x200] sm:$0xff] }
 0x61b   :  { %17513 = vmatmul.mubr.msk.f32.gmra.mrb[40].mxu1 %vm6293_vm2, %v7095_v34  ;;  %v23471_v34 = vld [vmem:[#allocation2 + $0x210] sm:$0xff] }
 0x61c   :  { %17515 = vmatprep.mubr.msk.f32.mxu1 %vm6293_vm2, %v7096_v61  ;;  %v23475_v61 = vld [vmem:[#allocation2 + $0x218] sm:$0xff] }
 0x61f   :  { %17516 = vmatmul.mubr.msk.f32.gmra.mrb[42].mxu1 %vm6293_vm2, %v7097_v58  ;;  %v23479_v58 = vld [vmem:[#allocation2 + $0x228] sm:$0xff] }
 0x620   :  { %17518 = vmatprep.mubr.msk.f32.mxu1 %vm6293_vm2, %v7098_v17  ;;  %v23483_v17 = vld [vmem:[#allocation2 + $0x230] sm:$0xff] }
 0x623   :  { %17519 = vmatmul.mubr.msk.f32.gmra.mrb[44].mxu1 %vm6293_vm2, %v7099_v10  ;;  %v23487_v10 = vld [vmem:[#allocation2 + $0x240] sm:$0xff] }
 0x624   :  { %17521 = vmatprep.mubr.msk.f32.mxu1 %vm6293_vm2, %v7100_v8  ;;  %v23491_v8 = vld [vmem:[#allocation2 + $0x248] sm:$0xff] }
 0x627   :  { %17522 = vmatmul.mubr.msk.f32.gmra.mrb[46].mxu1 %vm6293_vm2, %v7101_v42  ;;  %v23495_v42 = vld [vmem:[#allocation2 + $0x258] sm:$0xff] }
 0x628   :  { %17524 = vmatprep.mubr.msk.f32.mxu1 %vm6293_vm2, %v7102_v37  ;;  %v23499_v37 = vld [vmem:[#allocation2 + $0x260] sm:$0xff] }
 0x62b   :  { %17525 = vmatmul.mubr.msk.f32.gmra.mrb[48].mxu1 %vm6293_vm2, %v7103_v27  ;;  %v23503_v27 = vld [vmem:[#allocation2 + $0x270] sm:$0xff] }
 0x62c   :  { %17527 = vmatprep.mubr.msk.f32.mxu1 %vm6293_vm2, %v7104_v38  ;;  %v23507_v38 = vld [vmem:[#allocation2 + $0x278] sm:$0xff] }
 0x62f   :  { %17528 = vmatmul.mubr.msk.f32.gmra.mrb[50].mxu1 %vm6293_vm2, %v7105_v3  ;;  %v23511_v3 = vld [vmem:[#allocation2 + $0x288] sm:$0xff] }
 0x630   :  { %17530 = vmatprep.mubr.msk.f32.mxu1 %vm6293_vm2, %v7106_v31  ;;  %v23515_v31 = vld [vmem:[#allocation2 + $0x290] sm:$0xff] }
 0x633   :  { %17531 = vmatmul.mubr.msk.f32.gmra.mrb[52].mxu1 %vm6293_vm2, %v7107_v53  ;;  %v23519_v53 = vld [vmem:[#allocation2 + $0x2a0] sm:$0xff] }
 0x634   :  { %17533 = vmatprep.mubr.msk.f32.mxu1 %vm6293_vm2, %v7108_v56  ;;  %v23523_v56 = vld [vmem:[#allocation2 + $0x2a8] sm:$0xff] }
 0x637   :  { %17534 = vmatmul.mubr.msk.f32.gmra.mrb[54].mxu1 %vm6293_vm2, %v7109_v54  ;;  %v23527_v54 = vld [vmem:[#allocation2 + $0x2b8] sm:$0xff] }
 0x638   :  { %17536 = vmatprep.mubr.msk.f32.mxu1 %vm6293_vm2, %v7110_v21  ;;  %v23531_v21 = vld [vmem:[#allocation2 + $0x2c0] sm:$0xff] }
 0x63b   :  { %17537 = vmatmul.mubr.msk.f32.gmra.mrb[56].mxu1 %vm6293_vm2, %v7111_v47  ;;  %v23535_v47 = vld [vmem:[#allocation2 + $0x2d0] sm:$0xff] }
 0x63c   :  { %17539 = vmatprep.mubr.msk.f32.mxu1 %vm6293_vm2, %v7112_v59  ;;  %v23539_v59 = vld [vmem:[#allocation2 + $0x2d8] sm:$0xff] }
 0x63f   :  { %17540 = vmatmul.mubr.msk.f32.gmra.mrb[58].mxu1 %vm6293_vm2, %v7113_v45  ;;  %v23543_v45 = vld [vmem:[#allocation2 + $0x2e8] sm:$0xff] }
 0x640   :  { %17542 = vmatprep.mubr.msk.f32.mxu1 %vm6293_vm2, %v7114_v63  ;;  %v23547_v63 = vld [vmem:[#allocation2 + $0x2f0] sm:$0xff] }
 0x643   :  { %17543 = vmatmul.mubr.msk.f32.gmra.mrb[60].mxu1 %vm6293_vm2, %v7115_v5  ;;  %v23551_v5 = vld [vmem:[#allocation2 + $0x300] sm:$0xff] }
 0x644   :  { %17545 = vmatprep.mubr.msk.f32.mxu1 %vm6293_vm2, %v7116_v29  ;;  %v23555_v29 = vld [vmem:[#allocation2 + $0x308] sm:$0xff] }
 0x645   :  { %26352 = vst [vmem:[#allocation47_spill] sm:$0xff] %v23555_v29 }
 0x647   :  { %17546 = vmatmul.mubr.msk.f32.gmra.mrb[62].mxu1 %vm6293_vm2, %v7117_v55  ;;  %v8274_v55 = vld [vmem:[#allocation2 + $0x2] sm:$0xff] }
 0x648   :  { %17550 = vmatprep.mubr.msk.f32.mxu1 %vm6293_vm2, %v6989_v14  ;;  %v23559_v14 = vld [vmem:[#allocation2 + $0x318] sm:$0xff] }
 0x649   :  { %26353 = vst [vmem:[#allocation48_spill] sm:$0xff] %v23559_v14 }
 0x64b   :  { %17551 = vmatmul.mubr.msk.f32.vlgmr.msra.gmra.mrb[0].mxu1 %vm6293_vm2, %v6990_v24  ;;  %v23563_v24 = vld [vmem:[#allocation2 + $0x320] sm:$0xff] }
 0x64c   :  { %17553 = vmatprep.mubr.msk.f32.mxu1 %vm6293_vm2, %v23318_v25  ;;  %17647 = vmatpush3.msra.mxu1 %v23175_v46  ;;  %v23345_v46 = vld [vmem:[#allocation2 + $0x50] sm:$0xff]  ;;  %26354 = vst [vmem:[#allocation49_spill] sm:$0xff] %v23563_v24 }
 0x64d   :  { %17744 = vmatprep.subr.mxu1 %v23323_v23 }
 0x64f   :  { %17554 = vmatmul.mubr.msk.f32.gmra.mrb[2].mxu1 %vm6293_vm2, %v23329_v41 }
 0x650   :  { %17556 = vmatprep.mubr.msk.f32.mxu1 %vm6293_vm2, %v23333_v22 }
 0x653   :  { %17557 = vmatmul.mubr.msk.f32.gmra.mrb[4].mxu1 %vm6293_vm2, %v23337_v33 }
 0x654   :  { %17559 = vmatprep.mubr.msk.f32.mxu1 %vm6293_vm2, %v23341_v15 }
 0x657   :  { %17560 = vmatmul.mubr.msk.f32.gmra.mrb[6].mxu1 %vm6293_vm2, %v23345_v46 }
 0x658   :  { %17562 = vmatprep.mubr.msk.f32.mxu1 %vm6293_vm2, %v23349_v57 }
 0x65b   :  { %17563 = vmatmul.mubr.msk.f32.gmra.mrb[8].mxu1 %vm6293_vm2, %v23353_v2 }
 0x65c   :  { %17565 = vmatprep.mubr.msk.f32.mxu1 %vm6293_vm2, %v23357_v12 }
 0x65f   :  { %17566 = vmatmul.mubr.msk.f32.gmra.mrb[10].mxu1 %vm6293_vm2, %v23361_v43 }
 0x660   :  { %17568 = vmatprep.mubr.msk.f32.mxu1 %vm6293_vm2, %v23365_v30 }
 0x663   :  { %17569 = vmatmul.mubr.msk.f32.gmra.mrb[12].mxu1 %vm6293_vm2, %v23369_v28 }
 0x664   :  { %17571 = vmatprep.mubr.msk.f32.mxu1 %vm6293_vm2, %v23373_v39 }
 0x667   :  { %17572 = vmatmul.mubr.msk.f32.gmra.mrb[14].mxu1 %vm6293_vm2, %v23377_v35 }
 0x668   :  { %17574 = vmatprep.mubr.msk.f32.mxu1 %vm6293_vm2, %v23381_v51 }
 0x66b   :  { %17575 = vmatmul.mubr.msk.f32.gmra.mrb[16].mxu1 %vm6293_vm2, %v23385_v48 }
 0x66c   :  { %17577 = vmatprep.mubr.msk.f32.mxu1 %vm6293_vm2, %v23389_v62 }
 0x66f   :  { %17578 = vmatmul.mubr.msk.f32.gmra.mrb[18].mxu1 %vm6293_vm2, %v23393_v60 }
 0x670   :  { %17580 = vmatprep.mubr.msk.f32.mxu1 %vm6293_vm2, %v23397_v7 }
 0x673   :  { %17581 = vmatmul.mubr.msk.f32.gmra.mrb[20].mxu1 %vm6293_vm2, %v23401_v20 }
 0x674   :  { %17583 = vmatprep.mubr.msk.f32.mxu1 %vm6293_vm2, %v23405_v18 }
 0x677   :  { %17584 = vmatmul.mubr.msk.f32.gmra.mrb[22].mxu1 %vm6293_vm2, %v23409_v32 }
 0x678   :  { %17586 = vmatprep.mubr.msk.f32.mxu1 %vm6293_vm2, %v23413_v36 }
 0x67b   :  { %17587 = vmatmul.mubr.msk.f32.gmra.mrb[24].mxu1 %vm6293_vm2, %v23417_v52 }
 0x67c   :  { %17589 = vmatprep.mubr.msk.f32.mxu1 %vm6293_vm2, %v23421_v49 }
 0x67f   :  { %17590 = vmatmul.mubr.msk.f32.gmra.mrb[26].mxu1 %vm6293_vm2, %v23425_v6 }
 0x680   :  { %17592 = vmatprep.mubr.msk.f32.mxu1 %vm6293_vm2, %v23429_v0 }
 0x683   :  { %17593 = vmatmul.mubr.msk.f32.gmra.mrb[28].mxu1 %vm6293_vm2, %v23433_v13 }
 0x684   :  { %17595 = vmatprep.mubr.msk.f32.mxu1 %vm6293_vm2, %v23437_v9 }
 0x687   :  { %17596 = vmatmul.mubr.msk.f32.gmra.mrb[30].mxu1 %vm6293_vm2, %v23441_v26 }
 0x688   :  { %17598 = vmatprep.mubr.msk.f32.mxu1 %vm6293_vm2, %v7021_v11  ;;  %v8275_v11 = vld [vmem:[#allocation2 + $0xa] sm:$0xff] }
 0x68b   :  { %17599 = vmatmul.mubr.msk.f32.gmra.mrb[32].mxu1 %vm6293_vm2, %v7022_v50  ;;  %v23569_v50 = vld [vmem:[#allocation2 + $0x1a] sm:$0xff] }
 0x68c   :  { %17601 = vmatprep.mubr.msk.f32.mxu1 %vm6293_vm2, %v23447_v44  ;;  %26355 = vst [vmem:[#allocation50_spill] sm:$0xff] %v23569_v50 }
 0x68f   :  { %17602 = vmatmul.mubr.msk.f32.gmra.mrb[34].mxu1 %vm6293_vm2, %v23451_v4 }
 0x690   :  { %17604 = vmatprep.mubr.msk.f32.mxu1 %vm6293_vm2, %v23455_v1 }
 0x693   :  { %17605 = vmatmul.mubr.msk.f32.gmra.mrb[36].mxu1 %vm6293_vm2, %v23459_v19 }
 0x694   :  { %17607 = vmatprep.mubr.msk.f32.mxu1 %vm6293_vm2, %v23463_v16 }
 0x697   :  { %17608 = vmatmul.mubr.msk.f32.gmra.mrb[38].mxu1 %vm6293_vm2, %v23467_v40 }
 0x698   :  { %17610 = vmatprep.mubr.msk.f32.mxu1 %vm6293_vm2, %v23471_v34 }
 0x69b   :  { %17611 = vmatmul.mubr.msk.f32.gmra.mrb[40].mxu1 %vm6293_vm2, %v23475_v61 }
 0x69c   :  { %17613 = vmatprep.mubr.msk.f32.mxu1 %vm6293_vm2, %v23479_v58 }
 0x69f   :  { %17614 = vmatmul.mubr.msk.f32.gmra.mrb[42].mxu1 %vm6293_vm2, %v23483_v17 }
 0x6a0   :  { %17616 = vmatprep.mubr.msk.f32.mxu1 %vm6293_vm2, %v23487_v10 }
 0x6a3   :  { %17617 = vmatmul.mubr.msk.f32.gmra.mrb[44].mxu1 %vm6293_vm2, %v23491_v8 }
 0x6a4   :  { %17619 = vmatprep.mubr.msk.f32.mxu1 %vm6293_vm2, %v23495_v42 }
 0x6a7   :  { %17620 = vmatmul.mubr.msk.f32.gmra.mrb[46].mxu1 %vm6293_vm2, %v23499_v37 }
 0x6a8   :  { %17622 = vmatprep.mubr.msk.f32.mxu1 %vm6293_vm2, %v23503_v27 }
 0x6ab   :  { %17623 = vmatmul.mubr.msk.f32.gmra.mrb[48].mxu1 %vm6293_vm2, %v23507_v38 }
 0x6ac   :  { %17625 = vmatprep.mubr.msk.f32.mxu1 %vm6293_vm2, %v23511_v3 }
 0x6af   :  { %17626 = vmatmul.mubr.msk.f32.gmra.mrb[50].mxu1 %vm6293_vm2, %v23515_v31 }
 0x6b0   :  { %17628 = vmatprep.mubr.msk.f32.mxu1 %vm6293_vm2, %v23519_v53 }
 0x6b3   :  { %17629 = vmatmul.mubr.msk.f32.gmra.mrb[52].mxu1 %vm6293_vm2, %v23523_v56 }
 0x6b4   :  { %17631 = vmatprep.mubr.msk.f32.mxu1 %vm6293_vm2, %v23527_v54 }
 0x6b7   :  { %17632 = vmatmul.mubr.msk.f32.gmra.mrb[54].mxu1 %vm6293_vm2, %v23531_v21 }
 0x6b8   :  { %17634 = vmatprep.mubr.msk.f32.mxu1 %vm6293_vm2, %v23535_v47 }
 0x6bb   :  { %17635 = vmatmul.mubr.msk.f32.gmra.mrb[56].mxu1 %vm6293_vm2, %v23539_v59 }
 0x6bc   :  { %17637 = vmatprep.mubr.msk.f32.mxu1 %vm6293_vm2, %v23543_v45 }
 0x6bf   :  { %17638 = vmatmul.mubr.msk.f32.gmra.mrb[58].mxu1 %vm6293_vm2, %v23547_v63 }
 0x6c0   :  { %17640 = vmatprep.mubr.msk.f32.mxu1 %vm6293_vm2, %v23551_v5 }
 0x6c3   :  { %17641 = vmatmul.mubr.msk.f32.gmra.mrb[60].mxu1 %vm6293_vm2, %v23555_v29  ;;  %v23574_v29 = vld [vmem:[%s25926_s4 + $0x20] sm:$0xff] }
 0x6c4   :  { %17643 = vmatprep.mubr.msk.f32.mxu1 %vm6293_vm2, %v23559_v14  ;;  %v23692_v14 = vld [vmem:[#allocation2 + $0x172] sm:$0xff] }
 0x6c5   :  { %26384 = vst [vmem:[#allocation9_spill] sm:$0xff] %v23692_v14 }
 0x6c7   :  { %17644 = vmatmul.mubr.msk.f32.gmra.mrb[62].mxu1 %vm6293_vm2, %v23563_v24  ;;  %v23580_v24 = vld [vmem:[#allocation2 + $0x22] sm:$0xff] }
 0x6c8   :  { %17648 = vmatprep.mubr.msk.f32.mxu1 %vm6293_vm2, %v8274_v55  ;;  %26356 = vst [vmem:[#allocation51_spill] sm:$0xff] %v23580_v24  ;;  %v23584_v55 = vld [vmem:[#allocation2 + $0x32] sm:$0xff] }
 0x6c9   :  { %26357 = vst [vmem:[#allocation52_spill] sm:$0xff] %v23584_v55 }
 0x6cb   :  { %17649 = vmatmul.mubr.msk.f32.vlgmr.msra.gmra.mrb[0].mxu1 %vm6293_vm2, %v8275_v11  ;;  %v23588_v11 = vld [vmem:[#allocation2 + $0x3a] sm:$0xff] }
 0x6cc   :  { %17651 = vmatprep.mubr.msk.f32.mxu1 %vm6293_vm2, %v23569_v50  ;;  %17745 = vmatpush3.msra.mxu1 %v23323_v23  ;;  %26358 = vst [vmem:[#allocation53_spill] sm:$0xff] %v23588_v11  ;;  %v23592_v50 = vld [vmem:[#allocation2 + $0x4a] sm:$0xff]  ;;  %v23596_v23 = vld [vmem:[#allocation2 + $0x52] sm:$0xff] }
 0x6cd   :  { %17842 = vmatprep.subr.mxu1 %v23574_v29  ;;  %26359 = vst [vmem:[#allocation54_spill] sm:$0xff] %v23592_v50  ;;  %26360 = vst [vmem:[#allocation55_spill] sm:$0xff] %v23596_v23 }
 0x6cf   :  { %17652 = vmatmul.mubr.msk.f32.gmra.mrb[2].mxu1 %vm6293_vm2, %v23580_v24  ;;  %v23600_v24 = vld [vmem:[#allocation2 + $0x62] sm:$0xff] }
 0x6d0   :  { %17654 = vmatprep.mubr.msk.f32.mxu1 %vm6293_vm2, %v23584_v55  ;;  %26361 = vst [vmem:[#allocation56_spill] sm:$0xff] %v23600_v24  ;;  %v23604_v55 = vld [vmem:[#allocation2 + $0x6a] sm:$0xff] }
 0x6d1   :  { %26362 = vst [vmem:[#allocation57_spill] sm:$0xff] %v23604_v55 }
 0x6d3   :  { %17655 = vmatmul.mubr.msk.f32.gmra.mrb[4].mxu1 %vm6293_vm2, %v23588_v11  ;;  %v23608_v11 = vld [vmem:[#allocation2 + $0x7a] sm:$0xff] }
 0x6d4   :  { %17657 = vmatprep.mubr.msk.f32.mxu1 %vm6293_vm2, %v23592_v50  ;;  %26363 = vst [vmem:[#allocation58_spill] sm:$0xff] %v23608_v11  ;;  %v23612_v50 = vld [vmem:[#allocation2 + $0x82] sm:$0xff] }
 0x6d5   :  { %26364 = vst [vmem:[#allocation59_spill] sm:$0xff] %v23612_v50 }
 0x6d7   :  { %17658 = vmatmul.mubr.msk.f32.gmra.mrb[6].mxu1 %vm6293_vm2, %v23596_v23  ;;  %v23616_v23 = vld [vmem:[#allocation2 + $0x92] sm:$0xff] }
 0x6d8   :  { %17660 = vmatprep.mubr.msk.f32.mxu1 %vm6293_vm2, %v23600_v24  ;;  %26365 = vst [vmem:[#allocation60_spill] sm:$0xff] %v23616_v23  ;;  %v23620_v24 = vld [vmem:[#allocation2 + $0x9a] sm:$0xff] }
 0x6d9   :  { %26366 = vst [vmem:[#allocation3_spill] sm:$0xff] %v23620_v24 }
 0x6db   :  { %17661 = vmatmul.mubr.msk.f32.gmra.mrb[8].mxu1 %vm6293_vm2, %v23604_v55  ;;  %v23624_v55 = vld [vmem:[#allocation2 + $0xaa] sm:$0xff] }
 0x6dc   :  { %17663 = vmatprep.mubr.msk.f32.mxu1 %vm6293_vm2, %v23608_v11  ;;  %26367 = vst [vmem:[#allocation61_spill] sm:$0xff] %v23624_v55  ;;  %v23628_v11 = vld [vmem:[#allocation2 + $0xb2] sm:$0xff] }
 0x6dd   :  { %26368 = vst [vmem:[#allocation62_spill] sm:$0xff] %v23628_v11 }
 0x6df   :  { %17664 = vmatmul.mubr.msk.f32.gmra.mrb[10].mxu1 %vm6293_vm2, %v23612_v50  ;;  %v23632_v50 = vld [vmem:[#allocation2 + $0xc2] sm:$0xff] }
 0x6e0   :  { %17666 = vmatprep.mubr.msk.f32.mxu1 %vm6293_vm2, %v23616_v23  ;;  %26369 = vst [vmem:[#allocation63_spill] sm:$0xff] %v23632_v50  ;;  %v23636_v23 = vld [vmem:[#allocation2 + $0xca] sm:$0xff] }
 0x6e1   :  { %26370 = vst [vmem:[#allocation64_spill] sm:$0xff] %v23636_v23 }
 0x6e3   :  { %17667 = vmatmul.mubr.msk.f32.gmra.mrb[12].mxu1 %vm6293_vm2, %v23620_v24  ;;  %v23640_v24 = vld [vmem:[#allocation2 + $0xda] sm:$0xff] }
 0x6e4   :  { %17669 = vmatprep.mubr.msk.f32.mxu1 %vm6293_vm2, %v23624_v55  ;;  %26371 = vst [vmem:[#allocation65_spill] sm:$0xff] %v23640_v24  ;;  %v23644_v55 = vld [vmem:[#allocation2 + $0xe2] sm:$0xff] }
 0x6e5   :  { %26372 = vst [vmem:[#allocation66_spill] sm:$0xff] %v23644_v55 }
 0x6e7   :  { %17670 = vmatmul.mubr.msk.f32.gmra.mrb[14].mxu1 %vm6293_vm2, %v23628_v11  ;;  %v23648_v11 = vld [vmem:[#allocation2 + $0xf2] sm:$0xff] }
 0x6e8   :  { %17672 = vmatprep.mubr.msk.f32.mxu1 %vm6293_vm2, %v23632_v50  ;;  %26373 = vst [vmem:[#allocation67_spill] sm:$0xff] %v23648_v11  ;;  %v23652_v50 = vld [vmem:[#allocation2 + $0xfa] sm:$0xff] }
 0x6e9   :  { %26374 = vst [vmem:[#allocation68_spill] sm:$0xff] %v23652_v50 }
 0x6eb   :  { %17673 = vmatmul.mubr.msk.f32.gmra.mrb[16].mxu1 %vm6293_vm2, %v23636_v23  ;;  %v23656_v23 = vld [vmem:[#allocation2 + $0x10a] sm:$0xff] }
 0x6ec   :  { %17675 = vmatprep.mubr.msk.f32.mxu1 %vm6293_vm2, %v23640_v24  ;;  %26375 = vst [vmem:[#allocation69_spill] sm:$0xff] %v23656_v23  ;;  %v23660_v24 = vld [vmem:[#allocation2 + $0x112] sm:$0xff] }
 0x6ed   :  { %26376 = vst [vmem:[#allocation70_spill] sm:$0xff] %v23660_v24 }
 0x6ef   :  { %17676 = vmatmul.mubr.msk.f32.gmra.mrb[18].mxu1 %vm6293_vm2, %v23644_v55  ;;  %v23664_v55 = vld [vmem:[#allocation2 + $0x122] sm:$0xff] }
 0x6f0   :  { %17678 = vmatprep.mubr.msk.f32.mxu1 %vm6293_vm2, %v23648_v11  ;;  %26377 = vst [vmem:[#allocation71_spill] sm:$0xff] %v23664_v55  ;;  %v23668_v11 = vld [vmem:[#allocation2 + $0x12a] sm:$0xff] }
 0x6f1   :  { %26378 = vst [vmem:[#allocation4_spill] sm:$0xff] %v23668_v11 }
 0x6f3   :  { %17679 = vmatmul.mubr.msk.f32.gmra.mrb[20].mxu1 %vm6293_vm2, %v23652_v50  ;;  %v23672_v50 = vld [vmem:[#allocation2 + $0x13a] sm:$0xff] }
 0x6f4   :  { %17681 = vmatprep.mubr.msk.f32.mxu1 %vm6293_vm2, %v23656_v23  ;;  %26379 = vst [vmem:[#allocation5_spill] sm:$0xff] %v23672_v50  ;;  %v23676_v23 = vld [vmem:[#allocation2 + $0x142] sm:$0xff] }
 0x6f5   :  { %26380 = vst [vmem:[#allocation6_spill] sm:$0xff] %v23676_v23 }
 0x6f7   :  { %17682 = vmatmul.mubr.msk.f32.gmra.mrb[22].mxu1 %vm6293_vm2, %v23660_v24  ;;  %v23680_v24 = vld [vmem:[#allocation2 + $0x152] sm:$0xff] }
 0x6f8   :  { %17684 = vmatprep.mubr.msk.f32.mxu1 %vm6293_vm2, %v23664_v55  ;;  %26381 = vst [vmem:[#allocation8_spill] sm:$0xff] %v23680_v24  ;;  %v23684_v55 = vld [vmem:[#allocation2 + $0x15a] sm:$0xff] }
 0x6f9   :  { %26382 = vst [vmem:[#allocation7_spill] sm:$0xff] %v23684_v55 }
 0x6fb   :  { %17685 = vmatmul.mubr.msk.f32.gmra.mrb[24].mxu1 %vm6293_vm2, %v23668_v11  ;;  %v23688_v11 = vld [vmem:[#allocation2 + $0x16a] sm:$0xff] }
 0x6fc   :  { %17687 = vmatprep.mubr.msk.f32.mxu1 %vm6293_vm2, %v23672_v50  ;;  %26383 = vst [vmem:[#allocation10_spill] sm:$0xff] %v23688_v11  ;;  %v8306_v50 = vld [vmem:[#allocation2 + $0x1b2] sm:$0xff] }
 0x6ff   :  { %17688 = vmatmul.mubr.msk.f32.gmra.mrb[26].mxu1 %vm6293_vm2, %v23676_v23  ;;  %v8307_v23 = vld [vmem:[#allocation2 + $0x1ba] sm:$0xff] }
 0x700   :  { %17690 = vmatprep.mubr.msk.f32.mxu1 %vm6293_vm2, %v23680_v24  ;;  %v23698_v24 = vld [vmem:[#allocation2 + $0x1ca] sm:$0xff] }
 0x703   :  { %17691 = vmatmul.mubr.msk.f32.gmra.mrb[28].mxu1 %vm6293_vm2, %v23684_v55  ;;  %v23702_v55 = vld [vmem:[#allocation2 + $0x1d2] sm:$0xff] }
 0x704   :  { %17693 = vmatprep.mubr.msk.f32.mxu1 %vm6293_vm2, %v23688_v11  ;;  %26385 = vst [vmem:[#allocation12_spill] sm:$0xff] %v23702_v55  ;;  %v23706_v11 = vld [vmem:[#allocation2 + $0x1e2] sm:$0xff] }
 0x705   :  { %26386 = vst [vmem:[#allocation11_spill] sm:$0xff] %v23706_v11 }
 0x707   :  { %17694 = vmatmul.mubr.msk.f32.gmra.mrb[30].mxu1 %vm6293_vm2, %v23692_v14  ;;  %v23710_v14 = vld [vmem:[#allocation2 + $0x1ea] sm:$0xff] }
 0x708   :  { %17696 = vmatprep.mubr.msk.f32.mxu1 %vm6293_vm2, %v8306_v50  ;;  %26387 = vst [vmem:[#allocation14_spill] sm:$0xff] %v23710_v14  ;;  %v23714_v50 = vld [vmem:[#allocation2 + $0x1fa] sm:$0xff] }
 0x709   :  { %26388 = vst [vmem:[#allocation13_spill] sm:$0xff] %v23714_v50 }
 0x70b   :  { %17697 = vmatmul.mubr.msk.f32.gmra.mrb[32].mxu1 %vm6293_vm2, %v8307_v23  ;;  %v23718_v23 = vld [vmem:[#allocation2 + $0x202] sm:$0xff] }
 0x70c   :  { %17699 = vmatprep.mubr.msk.f32.mxu1 %vm6293_vm2, %v23698_v24  ;;  %26389 = vst [vmem:[#allocation16_spill] sm:$0xff] %v23718_v23 }
 0x70f   :  { %17700 = vmatmul.mubr.msk.f32.gmra.mrb[34].mxu1 %vm6293_vm2, %v23702_v55  ;;  %v23722_v55 = vld [vmem:[#allocation2 + $0x212] sm:$0xff] }
 0x710   :  { %17702 = vmatprep.mubr.msk.f32.mxu1 %vm6293_vm2, %v23706_v11  ;;  %26390 = vst [vmem:[#allocation15_spill] sm:$0xff] %v23722_v55  ;;  %v23726_v11 = vld [vmem:[#allocation2 + $0x21a] sm:$0xff] }
 0x711   :  { %26391 = vst [vmem:[#allocation18_spill] sm:$0xff] %v23726_v11 }
 0x713   :  { %17703 = vmatmul.mubr.msk.f32.gmra.mrb[36].mxu1 %vm6293_vm2, %v23710_v14  ;;  %v23730_v14 = vld [vmem:[#allocation2 + $0x22a] sm:$0xff] }
 0x714   :  { %17705 = vmatprep.mubr.msk.f32.mxu1 %vm6293_vm2, %v23714_v50  ;;  %26392 = vst [vmem:[#allocation17_spill] sm:$0xff] %v23730_v14  ;;  %v23734_v50 = vld [vmem:[#allocation2 + $0x232] sm:$0xff] }
 0x715   :  { %26393 = vst [vmem:[#allocation20_spill] sm:$0xff] %v23734_v50 }
 0x717   :  { %17706 = vmatmul.mubr.msk.f32.gmra.mrb[38].mxu1 %vm6293_vm2, %v23718_v23  ;;  %v23738_v23 = vld [vmem:[#allocation2 + $0x242] sm:$0xff] }
 0x718   :  { %17708 = vmatprep.mubr.msk.f32.mxu1 %vm6293_vm2, %v23722_v55  ;;  %26394 = vst [vmem:[#allocation19_spill] sm:$0xff] %v23738_v23  ;;  %v23742_v55 = vld [vmem:[#allocation2 + $0x24a] sm:$0xff] }
 0x719   :  { %26395 = vst [vmem:[#allocation22_spill] sm:$0xff] %v23742_v55 }
 0x71b   :  { %17709 = vmatmul.mubr.msk.f32.gmra.mrb[40].mxu1 %vm6293_vm2, %v23726_v11  ;;  %v23746_v11 = vld [vmem:[#allocation2 + $0x25a] sm:$0xff] }
 0x71c   :  { %17711 = vmatprep.mubr.msk.f32.mxu1 %vm6293_vm2, %v23730_v14  ;;  %26396 = vst [vmem:[#allocation21_spill] sm:$0xff] %v23746_v11  ;;  %v23750_v14 = vld [vmem:[#allocation2 + $0x262] sm:$0xff] }
 0x71d   :  { %26397 = vst [vmem:[#allocation24_spill] sm:$0xff] %v23750_v14 }
 0x71f   :  { %17712 = vmatmul.mubr.msk.f32.gmra.mrb[42].mxu1 %vm6293_vm2, %v23734_v50  ;;  %v23754_v50 = vld [vmem:[#allocation2 + $0x272] sm:$0xff] }
 0x720   :  { %17714 = vmatprep.mubr.msk.f32.mxu1 %vm6293_vm2, %v23738_v23  ;;  %26398 = vst [vmem:[#allocation23_spill] sm:$0xff] %v23754_v50  ;;  %v23758_v23 = vld [vmem:[#allocation2 + $0x27a] sm:$0xff] }
 0x721   :  { %26399 = vst [vmem:[#allocation26_spill] sm:$0xff] %v23758_v23 }
 0x723   :  { %17715 = vmatmul.mubr.msk.f32.gmra.mrb[44].mxu1 %vm6293_vm2, %v23742_v55  ;;  %v23762_v55 = vld [vmem:[#allocation2 + $0x28a] sm:$0xff] }
 0x724   :  { %17717 = vmatprep.mubr.msk.f32.mxu1 %vm6293_vm2, %v23746_v11  ;;  %26400 = vst [vmem:[#allocation25_spill] sm:$0xff] %v23762_v55  ;;  %v23766_v11 = vld [vmem:[#allocation2 + $0x292] sm:$0xff] }
 0x725   :  { %26401 = vst [vmem:[#allocation28_spill] sm:$0xff] %v23766_v11 }
 0x727   :  { %17718 = vmatmul.mubr.msk.f32.gmra.mrb[46].mxu1 %vm6293_vm2, %v23750_v14  ;;  %v23770_v14 = vld [vmem:[#allocation2 + $0x2a2] sm:$0xff] }
 0x728   :  { %17720 = vmatprep.mubr.msk.f32.mxu1 %vm6293_vm2, %v23754_v50  ;;  %26402 = vst [vmem:[#allocation27_spill] sm:$0xff] %v23770_v14  ;;  %v23774_v50 = vld [vmem:[#allocation2 + $0x2aa] sm:$0xff] }
 0x729   :  { %26403 = vst [vmem:[#allocation29_spill] sm:$0xff] %v23774_v50 }
 0x72b   :  { %17721 = vmatmul.mubr.msk.f32.gmra.mrb[48].mxu1 %vm6293_vm2, %v23758_v23  ;;  %v23778_v23 = vld [vmem:[#allocation2 + $0x2ba] sm:$0xff] }
 0x72c   :  { %17723 = vmatprep.mubr.msk.f32.mxu1 %vm6293_vm2, %v23762_v55  ;;  %26404 = vst [vmem:[#allocation31_spill] sm:$0xff] %v23778_v23  ;;  %v23782_v55 = vld [vmem:[#allocation2 + $0x2c2] sm:$0xff] }
 0x72d   :  { %26405 = vst [vmem:[#allocation32_spill] sm:$0xff] %v23782_v55 }
 0x72f   :  { %17724 = vmatmul.mubr.msk.f32.gmra.mrb[50].mxu1 %vm6293_vm2, %v23766_v11  ;;  %v23786_v11 = vld [vmem:[#allocation2 + $0x2d2] sm:$0xff] }
 0x730   :  { %17726 = vmatprep.mubr.msk.f32.mxu1 %vm6293_vm2, %v23770_v14  ;;  %26406 = vst [vmem:[#allocation33_spill] sm:$0xff] %v23786_v11  ;;  %v23790_v14 = vld [vmem:[#allocation2 + $0x2da] sm:$0xff] }
 0x731   :  { %26407 = vst [vmem:[#allocation34_spill] sm:$0xff] %v23790_v14 }
 0x733   :  { %17727 = vmatmul.mubr.msk.f32.gmra.mrb[52].mxu1 %vm6293_vm2, %v23774_v50  ;;  %v23794_v50 = vld [vmem:[#allocation2 + $0x2ea] sm:$0xff] }
 0x734   :  { %17729 = vmatprep.mubr.msk.f32.mxu1 %vm6293_vm2, %v23778_v23  ;;  %26408 = vst [vmem:[#allocation35_spill] sm:$0xff] %v23794_v50  ;;  %v23798_v23 = vld [vmem:[#allocation2 + $0x2f2] sm:$0xff] }
 0x737   :  { %17730 = vmatmul.mubr.msk.f32.gmra.mrb[54].mxu1 %vm6293_vm2, %v23782_v55  ;;  %v23802_v55 = vld [vmem:[#allocation2 + $0x302] sm:$0xff] }
 0x738   :  { %17732 = vmatprep.mubr.msk.f32.mxu1 %vm6293_vm2, %v23786_v11  ;;  %v23806_v11 = vld [vmem:[#allocation2 + $0x30a] sm:$0xff] }
 0x739   :  { %26409 = vst [vmem:[#allocation36_spill] sm:$0xff] %v23806_v11 }
 0x73b   :  { %17733 = vmatmul.mubr.msk.f32.gmra.mrb[56].mxu1 %vm6293_vm2, %v23790_v14  ;;  %v23810_v14 = vld [vmem:[#allocation2 + $0x31a] sm:$0xff] }
 0x73c   :  { %17735 = vmatprep.mubr.msk.f32.mxu1 %vm6293_vm2, %v23794_v50  ;;  %v23814_v50 = vld [vmem:[#allocation2 + $0x322] sm:$0xff] }
 0x73f   :  { %17736 = vmatmul.mubr.msk.f32.gmra.mrb[58].mxu1 %vm6293_vm2, %v23798_v23 }
 0x740   :  { %17738 = vmatprep.mubr.msk.f32.mxu1 %vm6293_vm2, %v23802_v55 }
 0x743   :  { %17739 = vmatmul.mubr.msk.f32.gmra.mrb[60].mxu1 %vm6293_vm2, %v23806_v11  ;;  %v23825_v11 = vld [vmem:[%s25926_s4 + $0x28] sm:$0xff] }
 0x744   :  { %17741 = vmatprep.mubr.msk.f32.mxu1 %vm6293_vm2, %v23810_v14 }
 0x747   :  { %17742 = vmatmul.mubr.msk.f32.gmra.mrb[62].mxu1 %vm6293_vm2, %v23814_v50 }
 0x748   :  { %17746 = vmatprep.mubr.msk.f32.mxu1 %vm6293_vm2, %v23318_v25  ;;  %v23885_v25 = vld [vmem:[#allocation2 + $0x180] sm:$0xff] }
 0x74b   :  { %17747 = vmatmul.mubr.msk.f32.vlgmr.msra.gmra.mrb[0].mxu1 %vm6293_vm2, %v23329_v41  ;;  %v23889_v41 = vld [vmem:[#allocation2 + $0x188] sm:$0xff] }
 0x74c   :  { %17749 = vmatprep.mubr.msk.f32.mxu1 %vm6293_vm2, %v23333_v22  ;;  %17843 = vmatpush3.msra.mxu1 %v23574_v29  ;;  %v26410_v22 = vld [vmem:[#allocation47_spill] sm:$0xff]  ;;  %v24152_v29 = vld [vmem:[#allocation2 + $0x291] sm:$0xff] }
 0x74d   :  { %17940 = vmatprep.subr.mxu1 %v23825_v11 }
 0x74f   :  { %17750 = vmatmul.mubr.msk.f32.gmra.mrb[2].mxu1 %vm6293_vm2, %v23337_v33  ;;  %v26411_v33 = vld [vmem:[#allocation48_spill] sm:$0xff] }
 0x750   :  { %17752 = vmatprep.mubr.msk.f32.mxu1 %vm6293_vm2, %v23341_v15  ;;  %v26412_v15 = vld [vmem:[#allocation49_spill] sm:$0xff] }
 0x753   :  { %17753 = vmatmul.mubr.msk.f32.gmra.mrb[4].mxu1 %vm6293_vm2, %v23345_v46  ;;  %v23953_v46 = vld [vmem:[#allocation2 + $0x330] sm:$0xff] }
 0x754   :  { %17755 = vmatprep.mubr.msk.f32.mxu1 %vm6293_vm2, %v23349_v57  ;;  %v23957_v57 = vld [vmem:[#allocation2 + $0x338] sm:$0xff] }
 0x757   :  { %17756 = vmatmul.mubr.msk.f32.gmra.mrb[6].mxu1 %vm6293_vm2, %v23353_v2  ;;  %v9688_v2 = vld [vmem:[#allocation2 + $0x19] sm:$0xff] }
 0x758   :  { %17758 = vmatprep.mubr.msk.f32.mxu1 %vm6293_vm2, %v23357_v12  ;;  %v9689_v12 = vld [vmem:[#allocation2 + $0x21] sm:$0xff] }
 0x75b   :  { %17759 = vmatmul.mubr.msk.f32.gmra.mrb[8].mxu1 %vm6293_vm2, %v23361_v43  ;;  %v23963_v43 = vld [vmem:[#allocation2 + $0x31] sm:$0xff] }
 0x75c   :  { %17761 = vmatprep.mubr.msk.f32.mxu1 %vm6293_vm2, %v23365_v30  ;;  %v23968_v30 = vld [vmem:[%s25926_s4 + $0x30] sm:$0xff] }
 0x75f   :  { %17762 = vmatmul.mubr.msk.f32.gmra.mrb[10].mxu1 %vm6293_vm2, %v23369_v28  ;;  %v23974_v28 = vld [vmem:[#allocation2 + $0x39] sm:$0xff] }
 0x760   :  { %17764 = vmatprep.mubr.msk.f32.mxu1 %vm6293_vm2, %v23373_v39  ;;  %v23978_v39 = vld [vmem:[#allocation2 + $0x49] sm:$0xff] }
 0x763   :  { %17765 = vmatmul.mubr.msk.f32.gmra.mrb[12].mxu1 %vm6293_vm2, %v23377_v35  ;;  %v23982_v35 = vld [vmem:[#allocation2 + $0x51] sm:$0xff] }
 0x764   :  { %17767 = vmatprep.mubr.msk.f32.mxu1 %vm6293_vm2, %v23381_v51  ;;  %v23986_v51 = vld [vmem:[#allocation2 + $0x61] sm:$0xff] }
 0x767   :  { %17768 = vmatmul.mubr.msk.f32.gmra.mrb[14].mxu1 %vm6293_vm2, %v23385_v48  ;;  %v23990_v48 = vld [vmem:[#allocation2 + $0x69] sm:$0xff] }
 0x768   :  { %17770 = vmatprep.mubr.msk.f32.mxu1 %vm6293_vm2, %v23389_v62  ;;  %v23994_v62 = vld [vmem:[#allocation2 + $0x79] sm:$0xff] }
 0x76b   :  { %17771 = vmatmul.mubr.msk.f32.gmra.mrb[16].mxu1 %vm6293_vm2, %v23393_v60  ;;  %v23998_v60 = vld [vmem:[#allocation2 + $0x81] sm:$0xff] }
 0x76c   :  { %17773 = vmatprep.mubr.msk.f32.mxu1 %vm6293_vm2, %v23397_v7  ;;  %v24002_v7 = vld [vmem:[#allocation2 + $0x91] sm:$0xff] }
 0x76f   :  { %17774 = vmatmul.mubr.msk.f32.gmra.mrb[18].mxu1 %vm6293_vm2, %v23401_v20  ;;  %v24006_v20 = vld [vmem:[#allocation2 + $0x99] sm:$0xff] }
 0x770   :  { %17776 = vmatprep.mubr.msk.f32.mxu1 %vm6293_vm2, %v23405_v18  ;;  %v24010_v18 = vld [vmem:[#allocation2 + $0xa9] sm:$0xff] }
 0x773   :  { %17777 = vmatmul.mubr.msk.f32.gmra.mrb[20].mxu1 %vm6293_vm2, %v23409_v32  ;;  %v24014_v32 = vld [vmem:[#allocation2 + $0xb1] sm:$0xff] }
 0x774   :  { %17779 = vmatprep.mubr.msk.f32.mxu1 %vm6293_vm2, %v23413_v36  ;;  %v24018_v36 = vld [vmem:[#allocation2 + $0xc1] sm:$0xff] }
 0x777   :  { %17780 = vmatmul.mubr.msk.f32.gmra.mrb[22].mxu1 %vm6293_vm2, %v23417_v52  ;;  %v24022_v52 = vld [vmem:[#allocation2 + $0xc9] sm:$0xff] }
 0x778   :  { %17782 = vmatprep.mubr.msk.f32.mxu1 %vm6293_vm2, %v23421_v49  ;;  %v24026_v49 = vld [vmem:[#allocation2 + $0xd9] sm:$0xff] }
 0x77b   :  { %17783 = vmatmul.mubr.msk.f32.gmra.mrb[24].mxu1 %vm6293_vm2, %v23425_v6  ;;  %v24030_v6 = vld [vmem:[#allocation2 + $0xe1] sm:$0xff] }
 0x77c   :  { %17785 = vmatprep.mubr.msk.f32.mxu1 %vm6293_vm2, %v23429_v0  ;;  %v24034_v0 = vld [vmem:[#allocation2 + $0xf1] sm:$0xff] }
 0x77f   :  { %17786 = vmatmul.mubr.msk.f32.gmra.mrb[26].mxu1 %vm6293_vm2, %v23433_v13  ;;  %v24038_v13 = vld [vmem:[#allocation2 + $0xf9] sm:$0xff] }
 0x780   :  { %17788 = vmatprep.mubr.msk.f32.mxu1 %vm6293_vm2, %v23437_v9  ;;  %v24042_v9 = vld [vmem:[#allocation2 + $0x109] sm:$0xff] }
 0x783   :  { %17789 = vmatmul.mubr.msk.f32.gmra.mrb[28].mxu1 %vm6293_vm2, %v23441_v26  ;;  %v24046_v26 = vld [vmem:[#allocation2 + $0x111] sm:$0xff] }
 0x784   :  { %17791 = vmatprep.mubr.msk.f32.mxu1 %vm6293_vm2, %v23885_v25 }
 0x787   :  { %17792 = vmatmul.mubr.msk.f32.gmra.mrb[30].mxu1 %vm6293_vm2, %v23889_v41 }
 0x788   :  { %17794 = vmatprep.mubr.msk.f32.mxu1 %vm6293_vm2, %v23447_v44  ;;  %v24050_v44 = vld [vmem:[#allocation2 + $0x121] sm:$0xff] }
 0x78b   :  { %17795 = vmatmul.mubr.msk.f32.gmra.mrb[32].mxu1 %vm6293_vm2, %v23451_v4  ;;  %v24054_v4 = vld [vmem:[#allocation2 + $0x129] sm:$0xff] }
 0x78c   :  { %17797 = vmatprep.mubr.msk.f32.mxu1 %vm6293_vm2, %v23455_v1  ;;  %v24058_v1 = vld [vmem:[#allocation2 + $0x139] sm:$0xff] }
 0x78f   :  { %17798 = vmatmul.mubr.msk.f32.gmra.mrb[34].mxu1 %vm6293_vm2, %v23459_v19  ;;  %v24062_v19 = vld [vmem:[#allocation2 + $0x141] sm:$0xff] }
 0x790   :  { %17800 = vmatprep.mubr.msk.f32.mxu1 %vm6293_vm2, %v23463_v16  ;;  %v24066_v16 = vld [vmem:[#allocation2 + $0x151] sm:$0xff] }
 0x793   :  { %17801 = vmatmul.mubr.msk.f32.gmra.mrb[36].mxu1 %vm6293_vm2, %v23467_v40  ;;  %v24070_v40 = vld [vmem:[#allocation2 + $0x159] sm:$0xff] }
 0x794   :  { %17803 = vmatprep.mubr.msk.f32.mxu1 %vm6293_vm2, %v23471_v34  ;;  %v24074_v34 = vld [vmem:[#allocation2 + $0x169] sm:$0xff] }
 0x797   :  { %17804 = vmatmul.mubr.msk.f32.gmra.mrb[38].mxu1 %vm6293_vm2, %v23475_v61  ;;  %v24078_v61 = vld [vmem:[#allocation2 + $0x171] sm:$0xff] }
 0x798   :  { %17806 = vmatprep.mubr.msk.f32.mxu1 %vm6293_vm2, %v23479_v58  ;;  %v24082_v58 = vld [vmem:[#allocation2 + $0x181] sm:$0xff] }
 0x79b   :  { %17807 = vmatmul.mubr.msk.f32.gmra.mrb[40].mxu1 %vm6293_vm2, %v23483_v17  ;;  %v24086_v17 = vld [vmem:[#allocation2 + $0x189] sm:$0xff] }
 0x79c   :  { %17809 = vmatprep.mubr.msk.f32.mxu1 %vm6293_vm2, %v23487_v10  ;;  %v9720_v10 = vld [vmem:[#allocation2 + $0x1c9] sm:$0xff] }
 0x79f   :  { %17810 = vmatmul.mubr.msk.f32.gmra.mrb[42].mxu1 %vm6293_vm2, %v23491_v8  ;;  %v9721_v8 = vld [vmem:[#allocation2 + $0x1d1] sm:$0xff] }
 0x7a0   :  { %17812 = vmatprep.mubr.msk.f32.mxu1 %vm6293_vm2, %v23495_v42  ;;  %v24092_v42 = vld [vmem:[#allocation2 + $0x1e1] sm:$0xff] }
 0x7a3   :  { %17813 = vmatmul.mubr.msk.f32.gmra.mrb[44].mxu1 %vm6293_vm2, %v23499_v37  ;;  %v24096_v37 = vld [vmem:[#allocation2 + $0x1e9] sm:$0xff] }
 0x7a4   :  { %17815 = vmatprep.mubr.msk.f32.mxu1 %vm6293_vm2, %v23503_v27  ;;  %v24100_v27 = vld [vmem:[#allocation2 + $0x1f9] sm:$0xff] }
 0x7a7   :  { %17816 = vmatmul.mubr.msk.f32.gmra.mrb[46].mxu1 %vm6293_vm2, %v23507_v38  ;;  %v24104_v38 = vld [vmem:[#allocation2 + $0x201] sm:$0xff] }
 0x7a8   :  { %17818 = vmatprep.mubr.msk.f32.mxu1 %vm6293_vm2, %v23511_v3  ;;  %v24108_v3 = vld [vmem:[#allocation2 + $0x211] sm:$0xff] }
 0x7ab   :  { %17819 = vmatmul.mubr.msk.f32.gmra.mrb[48].mxu1 %vm6293_vm2, %v23515_v31  ;;  %v24112_v31 = vld [vmem:[#allocation2 + $0x219] sm:$0xff] }
 0x7ac   :  { %17821 = vmatprep.mubr.msk.f32.mxu1 %vm6293_vm2, %v23519_v53  ;;  %v24116_v53 = vld [vmem:[#allocation2 + $0x229] sm:$0xff] }
 0x7af   :  { %17822 = vmatmul.mubr.msk.f32.gmra.mrb[50].mxu1 %vm6293_vm2, %v23523_v56  ;;  %v24120_v56 = vld [vmem:[#allocation2 + $0x231] sm:$0xff] }
 0x7b0   :  { %17824 = vmatprep.mubr.msk.f32.mxu1 %vm6293_vm2, %v23527_v54  ;;  %v24124_v54 = vld [vmem:[#allocation2 + $0x241] sm:$0xff] }
 0x7b3   :  { %17825 = vmatmul.mubr.msk.f32.gmra.mrb[52].mxu1 %vm6293_vm2, %v23531_v21  ;;  %v24128_v21 = vld [vmem:[#allocation2 + $0x249] sm:$0xff] }
 0x7b4   :  { %17827 = vmatprep.mubr.msk.f32.mxu1 %vm6293_vm2, %v23535_v47  ;;  %v24132_v47 = vld [vmem:[#allocation2 + $0x259] sm:$0xff] }
 0x7b7   :  { %17828 = vmatmul.mubr.msk.f32.gmra.mrb[54].mxu1 %vm6293_vm2, %v23539_v59  ;;  %v24136_v59 = vld [vmem:[#allocation2 + $0x261] sm:$0xff] }
 0x7b8   :  { %17830 = vmatprep.mubr.msk.f32.mxu1 %vm6293_vm2, %v23543_v45  ;;  %v24140_v45 = vld [vmem:[#allocation2 + $0x271] sm:$0xff] }
 0x7bb   :  { %17831 = vmatmul.mubr.msk.f32.gmra.mrb[56].mxu1 %vm6293_vm2, %v23547_v63  ;;  %v24144_v63 = vld [vmem:[#allocation2 + $0x279] sm:$0xff] }
 0x7bc   :  { %17833 = vmatprep.mubr.msk.f32.mxu1 %vm6293_vm2, %v23551_v5  ;;  %v24148_v5 = vld [vmem:[#allocation2 + $0x289] sm:$0xff] }
 0x7bf   :  { %17834 = vmatmul.mubr.msk.f32.gmra.mrb[58].mxu1 %vm6293_vm2, %v26410_v22  ;;  %v24160_v22 = vld [vmem:[#allocation2 + $0x2a9] sm:$0xff] }
 0x7c0   :  { %17836 = vmatprep.mubr.msk.f32.mxu1 %vm6293_vm2, %v26411_v33  ;;  %26414 = vst [vmem:[#allocation38_spill] sm:$0xff] %v24160_v22  ;;  %v24164_v33 = vld [vmem:[#allocation2 + $0x2b9] sm:$0xff] }
 0x7c1   :  { %26415 = vst [vmem:[#allocation39_spill] sm:$0xff] %v24164_v33 }
 0x7c3   :  { %17837 = vmatmul.mubr.msk.f32.gmra.mrb[60].mxu1 %vm6293_vm2, %v26412_v15  ;;  %v24168_v15 = vld [vmem:[#allocation2 + $0x2c1] sm:$0xff] }
 0x7c4   :  { %17839 = vmatprep.mubr.msk.f32.mxu1 %vm6293_vm2, %v23953_v46  ;;  %26416 = vst [vmem:[#allocation40_spill] sm:$0xff] %v24168_v15 }
 0x7c7   :  { %17840 = vmatmul.mubr.msk.f32.gmra.mrb[62].mxu1 %vm6293_vm2, %v23957_v57 }
 0x7c8   :  { %17844 = vmatprep.mubr.msk.f32.mxu1 %vm6293_vm2, %v9688_v2  ;;  %v24172_v2 = vld [vmem:[#allocation2 + $0x2d1] sm:$0xff] }
 0x7c9   :  { %26417 = vst [vmem:[#allocation41_spill] sm:$0xff] %v24172_v2 }
 0x7cb   :  { %17845 = vmatmul.mubr.msk.f32.vlgmr.msra.gmra.mrb[0].mxu1 %vm6293_vm2, %v9689_v12  ;;  %v24176_v12 = vld [vmem:[#allocation2 + $0x2d9] sm:$0xff] }
 0x7cc   :  { %17847 = vmatprep.mubr.msk.f32.mxu1 %vm6293_vm2, %v23963_v43  ;;  %17941 = vmatpush3.msra.mxu1 %v23825_v11  ;;  %v24156_v11 = vld [vmem:[#allocation2 + $0x2a1] sm:$0xff]  ;;  %26418 = vst [vmem:[#allocation42_spill] sm:$0xff] %v24176_v12 }
 0x7cd   :  { %18038 = vmatprep.subr.mxu1 %v23968_v30  ;;  %26413 = vst [vmem:[#allocation37_spill] sm:$0xff] %v24156_v11 }
 0x7cf   :  { %17848 = vmatmul.mubr.msk.f32.gmra.mrb[2].mxu1 %vm6293_vm2, %v23974_v28 }
 0x7d0   :  { %17850 = vmatprep.mubr.msk.f32.mxu1 %vm6293_vm2, %v23978_v39 }
 0x7d3   :  { %17851 = vmatmul.mubr.msk.f32.gmra.mrb[4].mxu1 %vm6293_vm2, %v23982_v35 }
 0x7d4   :  { %17853 = vmatprep.mubr.msk.f32.mxu1 %vm6293_vm2, %v23986_v51 }
 0x7d7   :  { %17854 = vmatmul.mubr.msk.f32.gmra.mrb[6].mxu1 %vm6293_vm2, %v23990_v48 }
 0x7d8   :  { %17856 = vmatprep.mubr.msk.f32.mxu1 %vm6293_vm2, %v23994_v62 }
 0x7db   :  { %17857 = vmatmul.mubr.msk.f32.gmra.mrb[8].mxu1 %vm6293_vm2, %v23998_v60 }
 0x7dc   :  { %17859 = vmatprep.mubr.msk.f32.mxu1 %vm6293_vm2, %v24002_v7 }
 0x7df   :  { %17860 = vmatmul.mubr.msk.f32.gmra.mrb[10].mxu1 %vm6293_vm2, %v24006_v20 }
 0x7e0   :  { %17862 = vmatprep.mubr.msk.f32.mxu1 %vm6293_vm2, %v24010_v18 }
 0x7e3   :  { %17863 = vmatmul.mubr.msk.f32.gmra.mrb[12].mxu1 %vm6293_vm2, %v24014_v32 }
 0x7e4   :  { %17865 = vmatprep.mubr.msk.f32.mxu1 %vm6293_vm2, %v24018_v36 }
 0x7e7   :  { %17866 = vmatmul.mubr.msk.f32.gmra.mrb[14].mxu1 %vm6293_vm2, %v24022_v52 }
 0x7e8   :  { %17868 = vmatprep.mubr.msk.f32.mxu1 %vm6293_vm2, %v24026_v49 }
 0x7eb   :  { %17869 = vmatmul.mubr.msk.f32.gmra.mrb[16].mxu1 %vm6293_vm2, %v24030_v6 }
 0x7ec   :  { %17871 = vmatprep.mubr.msk.f32.mxu1 %vm6293_vm2, %v24034_v0 }
 0x7ef   :  { %17872 = vmatmul.mubr.msk.f32.gmra.mrb[18].mxu1 %vm6293_vm2, %v24038_v13 }
 0x7f0   :  { %17874 = vmatprep.mubr.msk.f32.mxu1 %vm6293_vm2, %v24042_v9 }
 0x7f3   :  { %17875 = vmatmul.mubr.msk.f32.gmra.mrb[20].mxu1 %vm6293_vm2, %v24046_v26 }
 0x7f4   :  { %17877 = vmatprep.mubr.msk.f32.mxu1 %vm6293_vm2, %v24050_v44 }
 0x7f7   :  { %17878 = vmatmul.mubr.msk.f32.gmra.mrb[22].mxu1 %vm6293_vm2, %v24054_v4 }
 0x7f8   :  { %17880 = vmatprep.mubr.msk.f32.mxu1 %vm6293_vm2, %v24058_v1 }
 0x7fb   :  { %17881 = vmatmul.mubr.msk.f32.gmra.mrb[24].mxu1 %vm6293_vm2, %v24062_v19 }
 0x7fc   :  { %17883 = vmatprep.mubr.msk.f32.mxu1 %vm6293_vm2, %v24066_v16 }
 0x7ff   :  { %17884 = vmatmul.mubr.msk.f32.gmra.mrb[26].mxu1 %vm6293_vm2, %v24070_v40 }
 0x800   :  { %17886 = vmatprep.mubr.msk.f32.mxu1 %vm6293_vm2, %v24074_v34 }
 0x803   :  { %17887 = vmatmul.mubr.msk.f32.gmra.mrb[28].mxu1 %vm6293_vm2, %v24078_v61 }
 0x804   :  { %17889 = vmatprep.mubr.msk.f32.mxu1 %vm6293_vm2, %v24082_v58 }
 0x807   :  { %17890 = vmatmul.mubr.msk.f32.gmra.mrb[30].mxu1 %vm6293_vm2, %v24086_v17 }
 0x808   :  { %17892 = vmatprep.mubr.msk.f32.mxu1 %vm6293_vm2, %v9720_v10  ;;  %v24180_v10 = vld [vmem:[#allocation2 + $0x2e9] sm:$0xff] }
 0x809   :  { %26419 = vst [vmem:[#allocation43_spill] sm:$0xff] %v24180_v10 }
 0x80b   :  { %17893 = vmatmul.mubr.msk.f32.gmra.mrb[32].mxu1 %vm6293_vm2, %v9721_v8  ;;  %v24184_v8 = vld [vmem:[#allocation2 + $0x2f1] sm:$0xff] }
 0x80c   :  { %17895 = vmatprep.mubr.msk.f32.mxu1 %vm6293_vm2, %v24092_v42  ;;  %26420 = vst [vmem:[#allocation44_spill] sm:$0xff] %v24184_v8 }
 0x80f   :  { %17896 = vmatmul.mubr.msk.f32.gmra.mrb[34].mxu1 %vm6293_vm2, %v24096_v37 }
 0x810   :  { %17898 = vmatprep.mubr.msk.f32.mxu1 %vm6293_vm2, %v24100_v27 }
 0x813   :  { %17899 = vmatmul.mubr.msk.f32.gmra.mrb[36].mxu1 %vm6293_vm2, %v24104_v38 }
 0x814   :  { %17901 = vmatprep.mubr.msk.f32.mxu1 %vm6293_vm2, %v24108_v3 }
 0x817   :  { %17902 = vmatmul.mubr.msk.f32.gmra.mrb[38].mxu1 %vm6293_vm2, %v24112_v31 }
 0x818   :  { %17904 = vmatprep.mubr.msk.f32.mxu1 %vm6293_vm2, %v24116_v53 }
 0x81b   :  { %17905 = vmatmul.mubr.msk.f32.gmra.mrb[40].mxu1 %vm6293_vm2, %v24120_v56 }
 0x81c   :  { %17907 = vmatprep.mubr.msk.f32.mxu1 %vm6293_vm2, %v24124_v54 }
 0x81f   :  { %17908 = vmatmul.mubr.msk.f32.gmra.mrb[42].mxu1 %vm6293_vm2, %v24128_v21 }
 0x820   :  { %17910 = vmatprep.mubr.msk.f32.mxu1 %vm6293_vm2, %v24132_v47 }
 0x823   :  { %17911 = vmatmul.mubr.msk.f32.gmra.mrb[44].mxu1 %vm6293_vm2, %v24136_v59 }
 0x824   :  { %17913 = vmatprep.mubr.msk.f32.mxu1 %vm6293_vm2, %v24140_v45 }
 0x827   :  { %17914 = vmatmul.mubr.msk.f32.gmra.mrb[46].mxu1 %vm6293_vm2, %v24144_v63 }
 0x828   :  { %17916 = vmatprep.mubr.msk.f32.mxu1 %vm6293_vm2, %v24148_v5 }
 0x82b   :  { %17917 = vmatmul.mubr.msk.f32.gmra.mrb[48].mxu1 %vm6293_vm2, %v24152_v29 }
 0x82c   :  { %17919 = vmatprep.mubr.msk.f32.mxu1 %vm6293_vm2, %v24156_v11  ;;  %v26437_v11 = vld [vmem:[#allocation60_spill] sm:$0xff] }
 0x82f   :  { %17920 = vmatmul.mubr.msk.f32.gmra.mrb[50].mxu1 %vm6293_vm2, %v24160_v22  ;;  %v26434_v22 = vld [vmem:[#allocation57_spill] sm:$0xff] }
 0x830   :  { %17922 = vmatprep.mubr.msk.f32.mxu1 %vm6293_vm2, %v24164_v33  ;;  %v26428_v33 = vld [vmem:[#allocation51_spill] sm:$0xff] }
 0x833   :  { %17923 = vmatmul.mubr.msk.f32.gmra.mrb[52].mxu1 %vm6293_vm2, %v24168_v15  ;;  %v24188_v15 = vld [vmem:[#allocation2 + $0x301] sm:$0xff] }
 0x834   :  { %17925 = vmatprep.mubr.msk.f32.mxu1 %vm6293_vm2, %v24172_v2  ;;  %26421 = vst [vmem:[#allocation45_spill] sm:$0xff] %v24188_v15  ;;  %v24192_v2 = vld [vmem:[#allocation2 + $0x309] sm:$0xff] }
 0x835   :  { %26422 = vst [vmem:[#allocation46_spill] sm:$0xff] %v24192_v2 }
 0x837   :  { %17926 = vmatmul.mubr.msk.f32.gmra.mrb[54].mxu1 %vm6293_vm2, %v24176_v12  ;;  %v24196_v12 = vld [vmem:[#allocation2 + $0x319] sm:$0xff] }
 0x838   :  { %17928 = vmatprep.mubr.msk.f32.mxu1 %vm6293_vm2, %v24180_v10  ;;  %26423 = vst [vmem:[#allocation47_spill] sm:$0xff] %v24196_v12  ;;  %v24200_v10 = vld [vmem:[#allocation2 + $0x321] sm:$0xff] }
 0x839   :  { %26424 = vst [vmem:[#allocation48_spill] sm:$0xff] %v24200_v10 }
 0x83b   :  { %17929 = vmatmul.mubr.msk.f32.gmra.mrb[56].mxu1 %vm6293_vm2, %v24184_v8  ;;  %v24204_v8 = vld [vmem:[#allocation2 + $0x331] sm:$0xff] }
 0x83c   :  { %17931 = vmatprep.mubr.msk.f32.mxu1 %vm6293_vm2, %v24188_v15  ;;  %26425 = vst [vmem:[#allocation49_spill] sm:$0xff] %v24204_v8  ;;  %v24208_v15 = vld [vmem:[#allocation2 + $0x339] sm:$0xff] }
 0x83d   :  { %26426 = vst [vmem:[#allocation72_spill] sm:$0xff] %v24208_v15 }
 0x83f   :  { %17932 = vmatmul.mubr.msk.f32.gmra.mrb[58].mxu1 %vm6293_vm2, %v24192_v2  ;;  %v26427_v2 = vld [vmem:[#allocation50_spill] sm:$0xff] }
 0x840   :  { %17934 = vmatprep.mubr.msk.f32.mxu1 %vm6293_vm2, %v24196_v12  ;;  %v26429_v12 = vld [vmem:[#allocation52_spill] sm:$0xff] }
 0x843   :  { %17935 = vmatmul.mubr.msk.f32.gmra.mrb[60].mxu1 %vm6293_vm2, %v24200_v10  ;;  %v24219_v10 = vld [vmem:[%s25926_s4 + $0x38] sm:$0xff] }
 0x844   :  { %17937 = vmatprep.mubr.msk.f32.mxu1 %vm6293_vm2, %v24204_v8  ;;  %v26430_v8 = vld [vmem:[#allocation53_spill] sm:$0xff] }
 0x847   :  { %17938 = vmatmul.mubr.msk.f32.gmra.mrb[62].mxu1 %vm6293_vm2, %v24208_v15  ;;  %v26431_v15 = vld [vmem:[#allocation54_spill] sm:$0xff] }
 0x848   :  { %17942 = vmatprep.mubr.msk.f32.mxu1 %vm6293_vm2, %v26427_v2  ;;  %v26432_v2 = vld [vmem:[#allocation55_spill] sm:$0xff] }
 0x84b   :  { %17943 = vmatmul.mubr.msk.f32.vlgmr.msra.gmra.mrb[0].mxu1 %vm6293_vm2, %v26428_v33  ;;  %v26433_v33 = vld [vmem:[#allocation56_spill] sm:$0xff] }
 0x84c   :  { %17945 = vmatprep.mubr.msk.f32.mxu1 %vm6293_vm2, %v26429_v12  ;;  %18039 = vmatpush3.msra.mxu1 %v23968_v30  ;;  %v26435_v12 = vld [vmem:[#allocation58_spill] sm:$0xff]  ;;  %v26436_v30 = vld [vmem:[#allocation59_spill] sm:$0xff] }
 0x84d   :  { %18136 = vmatprep.subr.mxu1 %v24219_v10 }
 0x84f   :  { %17946 = vmatmul.mubr.msk.f32.gmra.mrb[2].mxu1 %vm6293_vm2, %v26430_v8  ;;  %v26438_v8 = vld [vmem:[#allocation3_spill] sm:$0xff] }
 0x850   :  { %17948 = vmatprep.mubr.msk.f32.mxu1 %vm6293_vm2, %v26431_v15  ;;  %v26439_v15 = vld [vmem:[#allocation61_spill] sm:$0xff] }
 0x853   :  { %17949 = vmatmul.mubr.msk.f32.gmra.mrb[4].mxu1 %vm6293_vm2, %v26432_v2  ;;  %v26440_v2 = vld [vmem:[#allocation62_spill] sm:$0xff] }
 0x854   :  { %17951 = vmatprep.mubr.msk.f32.mxu1 %vm6293_vm2, %v26433_v33  ;;  %v26441_v33 = vld [vmem:[#allocation63_spill] sm:$0xff] }
 0x857   :  { %17952 = vmatmul.mubr.msk.f32.gmra.mrb[6].mxu1 %vm6293_vm2, %v26434_v22  ;;  %v26442_v22 = vld [vmem:[#allocation64_spill] sm:$0xff] }
 0x858   :  { %17954 = vmatprep.mubr.msk.f32.mxu1 %vm6293_vm2, %v26435_v12  ;;  %v26443_v12 = vld [vmem:[#allocation65_spill] sm:$0xff] }
 0x85b   :  { %17955 = vmatmul.mubr.msk.f32.gmra.mrb[8].mxu1 %vm6293_vm2, %v26436_v30  ;;  %v26444_v30 = vld [vmem:[#allocation66_spill] sm:$0xff] }
 0x85c   :  { %17957 = vmatprep.mubr.msk.f32.mxu1 %vm6293_vm2, %v26437_v11  ;;  %v26445_v11 = vld [vmem:[#allocation67_spill] sm:$0xff] }
 0x85f   :  { %17958 = vmatmul.mubr.msk.f32.gmra.mrb[10].mxu1 %vm6293_vm2, %v26438_v8  ;;  %v26446_v8 = vld [vmem:[#allocation68_spill] sm:$0xff] }
 0x860   :  { %17960 = vmatprep.mubr.msk.f32.mxu1 %vm6293_vm2, %v26439_v15  ;;  %v26447_v15 = vld [vmem:[#allocation69_spill] sm:$0xff] }
 0x863   :  { %17961 = vmatmul.mubr.msk.f32.gmra.mrb[12].mxu1 %vm6293_vm2, %v26440_v2  ;;  %v26448_v2 = vld [vmem:[#allocation70_spill] sm:$0xff] }
 0x864   :  { %17963 = vmatprep.mubr.msk.f32.mxu1 %vm6293_vm2, %v26441_v33  ;;  %v26449_v33 = vld [vmem:[#allocation71_spill] sm:$0xff] }
 0x867   :  { %17964 = vmatmul.mubr.msk.f32.gmra.mrb[14].mxu1 %vm6293_vm2, %v26442_v22  ;;  %v26450_v22 = vld [vmem:[#allocation4_spill] sm:$0xff] }
 0x868   :  { %17966 = vmatprep.mubr.msk.f32.mxu1 %vm6293_vm2, %v26443_v12  ;;  %v26451_v12 = vld [vmem:[#allocation5_spill] sm:$0xff] }
 0x86b   :  { %17967 = vmatmul.mubr.msk.f32.gmra.mrb[16].mxu1 %vm6293_vm2, %v26444_v30  ;;  %v26452_v30 = vld [vmem:[#allocation6_spill] sm:$0xff] }
 0x86c   :  { %17969 = vmatprep.mubr.msk.f32.mxu1 %vm6293_vm2, %v26445_v11  ;;  %v26453_v11 = vld [vmem:[#allocation8_spill] sm:$0xff] }
 0x86f   :  { %17970 = vmatmul.mubr.msk.f32.gmra.mrb[18].mxu1 %vm6293_vm2, %v26446_v8  ;;  %v26454_v8 = vld [vmem:[#allocation7_spill] sm:$0xff] }
 0x870   :  { %17972 = vmatprep.mubr.msk.f32.mxu1 %vm6293_vm2, %v26447_v15  ;;  %v26455_v15 = vld [vmem:[#allocation10_spill] sm:$0xff] }
 0x873   :  { %17973 = vmatmul.mubr.msk.f32.gmra.mrb[20].mxu1 %vm6293_vm2, %v26448_v2  ;;  %v26456_v2 = vld [vmem:[#allocation9_spill] sm:$0xff] }
 0x874   :  { %17975 = vmatprep.mubr.msk.f32.mxu1 %vm6293_vm2, %v26449_v33  ;;  %v24279_v33 = vld [vmem:[#allocation2 + $0x182] sm:$0xff] }
 0x877   :  { %17976 = vmatmul.mubr.msk.f32.gmra.mrb[22].mxu1 %vm6293_vm2, %v26450_v22  ;;  %v24283_v22 = vld [vmem:[#allocation2 + $0x18a] sm:$0xff] }
 0x878   :  { %17978 = vmatprep.mubr.msk.f32.mxu1 %vm6293_vm2, %v26451_v12  ;;  %26457 = vst [vmem:[#allocation50_spill] sm:$0xff] %v24283_v22  ;;  %v26458_v12 = vld [vmem:[#allocation12_spill] sm:$0xff] }
 0x87b   :  { %17979 = vmatmul.mubr.msk.f32.gmra.mrb[24].mxu1 %vm6293_vm2, %v26452_v30  ;;  %v26459_v30 = vld [vmem:[#allocation11_spill] sm:$0xff] }
 0x87c   :  { %17981 = vmatprep.mubr.msk.f32.mxu1 %vm6293_vm2, %v26453_v11  ;;  %v26460_v11 = vld [vmem:[#allocation14_spill] sm:$0xff] }
 0x87f   :  { %17982 = vmatmul.mubr.msk.f32.gmra.mrb[26].mxu1 %vm6293_vm2, %v26454_v8  ;;  %v26461_v8 = vld [vmem:[#allocation13_spill] sm:$0xff] }
 0x880   :  { %17984 = vmatprep.mubr.msk.f32.mxu1 %vm6293_vm2, %v26455_v15  ;;  %v26462_v15 = vld [vmem:[#allocation16_spill] sm:$0xff] }
 0x883   :  { %17985 = vmatmul.mubr.msk.f32.gmra.mrb[28].mxu1 %vm6293_vm2, %v26456_v2  ;;  %v26463_v2 = vld [vmem:[#allocation15_spill] sm:$0xff] }
 0x884   :  { %17987 = vmatprep.mubr.msk.f32.mxu1 %vm6293_vm2, %v24279_v33 }
 0x887   :  { %17988 = vmatmul.mubr.msk.f32.gmra.mrb[30].mxu1 %vm6293_vm2, %v24283_v22  ;;  %v26464_v22 = vld [vmem:[#allocation18_spill] sm:$0xff] }
 0x888   :  { %17990 = vmatprep.mubr.msk.f32.mxu1 %vm6293_vm2, %v23698_v24  ;;  %v26465_v24 = vld [vmem:[#allocation17_spill] sm:$0xff] }
 0x88b   :  { %17991 = vmatmul.mubr.msk.f32.gmra.mrb[32].mxu1 %vm6293_vm2, %v26458_v12  ;;  %v26466_v12 = vld [vmem:[#allocation20_spill] sm:$0xff] }
 0x88c   :  { %17993 = vmatprep.mubr.msk.f32.mxu1 %vm6293_vm2, %v26459_v30  ;;  %v26467_v30 = vld [vmem:[#allocation19_spill] sm:$0xff] }
 0x88f   :  { %17994 = vmatmul.mubr.msk.f32.gmra.mrb[34].mxu1 %vm6293_vm2, %v26460_v11  ;;  %v26468_v11 = vld [vmem:[#allocation22_spill] sm:$0xff] }
 0x890   :  { %17996 = vmatprep.mubr.msk.f32.mxu1 %vm6293_vm2, %v26461_v8  ;;  %v26469_v8 = vld [vmem:[#allocation21_spill] sm:$0xff] }
 0x893   :  { %17997 = vmatmul.mubr.msk.f32.gmra.mrb[36].mxu1 %vm6293_vm2, %v26462_v15  ;;  %v26470_v15 = vld [vmem:[#allocation24_spill] sm:$0xff] }
 0x894   :  { %17999 = vmatprep.mubr.msk.f32.mxu1 %vm6293_vm2, %v26463_v2  ;;  %v26471_v2 = vld [vmem:[#allocation23_spill] sm:$0xff] }
 0x897   :  { %18000 = vmatmul.mubr.msk.f32.gmra.mrb[38].mxu1 %vm6293_vm2, %v26464_v22  ;;  %v26472_v22 = vld [vmem:[#allocation26_spill] sm:$0xff] }
 0x898   :  { %18002 = vmatprep.mubr.msk.f32.mxu1 %vm6293_vm2, %v26465_v24  ;;  %v26473_v24 = vld [vmem:[#allocation25_spill] sm:$0xff] }
 0x89b   :  { %18003 = vmatmul.mubr.msk.f32.gmra.mrb[40].mxu1 %vm6293_vm2, %v26466_v12  ;;  %v26474_v12 = vld [vmem:[#allocation28_spill] sm:$0xff] }
 0x89c   :  { %18005 = vmatprep.mubr.msk.f32.mxu1 %vm6293_vm2, %v26467_v30  ;;  %v26475_v30 = vld [vmem:[#allocation27_spill] sm:$0xff] }
 0x89f   :  { %18006 = vmatmul.mubr.msk.f32.gmra.mrb[42].mxu1 %vm6293_vm2, %v26468_v11  ;;  %v26476_v11 = vld [vmem:[#allocation29_spill] sm:$0xff] }
 0x8a0   :  { %18008 = vmatprep.mubr.msk.f32.mxu1 %vm6293_vm2, %v26469_v8  ;;  %v26477_v8 = vld [vmem:[#allocation31_spill] sm:$0xff] }
 0x8a3   :  { %18009 = vmatmul.mubr.msk.f32.gmra.mrb[44].mxu1 %vm6293_vm2, %v26470_v15  ;;  %v26478_v15 = vld [vmem:[#allocation32_spill] sm:$0xff] }
 0x8a4   :  { %18011 = vmatprep.mubr.msk.f32.mxu1 %vm6293_vm2, %v26471_v2  ;;  %v26479_v2 = vld [vmem:[#allocation33_spill] sm:$0xff] }
 0x8a7   :  { %18012 = vmatmul.mubr.msk.f32.gmra.mrb[46].mxu1 %vm6293_vm2, %v26472_v22  ;;  %v26480_v22 = vld [vmem:[#allocation34_spill] sm:$0xff] }
 0x8a8   :  { %18014 = vmatprep.mubr.msk.f32.mxu1 %vm6293_vm2, %v26473_v24  ;;  %v26481_v24 = vld [vmem:[#allocation35_spill] sm:$0xff] }
 0x8ab   :  { %18015 = vmatmul.mubr.msk.f32.gmra.mrb[48].mxu1 %vm6293_vm2, %v26474_v12  ;;  %v26482_v12 = vld [vmem:[#allocation36_spill] sm:$0xff] }
 0x8ac   :  { %18017 = vmatprep.mubr.msk.f32.mxu1 %vm6293_vm2, %v26475_v30  ;;  %v24347_v30 = vld [vmem:[#allocation2 + $0x332] sm:$0xff] }
 0x8af   :  { %18018 = vmatmul.mubr.msk.f32.gmra.mrb[50].mxu1 %vm6293_vm2, %v26476_v11  ;;  %v24351_v11 = vld [vmem:[#allocation2 + $0x33a] sm:$0xff] }
 0x8b0   :  { %18020 = vmatprep.mubr.msk.f32.mxu1 %vm6293_vm2, %v26477_v8  ;;  %v11106_v8 = vld [vmem:[#allocation2 + $0x50] sm:$0xff] }
 0x8b3   :  { %18021 = vmatmul.mubr.msk.f32.gmra.mrb[52].mxu1 %vm6293_vm2, %v26478_v15  ;;  %v11107_v15 = vld [vmem:[#allocation2 + $0x60] sm:$0xff] }
 0x8b4   :  { %18023 = vmatprep.mubr.msk.f32.mxu1 %vm6293_vm2, %v26479_v2  ;;  %v11108_v2 = vld [vmem:[#allocation2 + $0x68] sm:$0xff] }
 0x8b7   :  { %18024 = vmatmul.mubr.msk.f32.gmra.mrb[54].mxu1 %vm6293_vm2, %v26480_v22  ;;  %v11109_v22 = vld [vmem:[#allocation2 + $0x78] sm:$0xff] }
 0x8b8   :  { %18026 = vmatprep.mubr.msk.f32.mxu1 %vm6293_vm2, %v26481_v24  ;;  %v11110_v24 = vld [vmem:[#allocation2 + $0x80] sm:$0xff] }
 0x8bb   :  { %18027 = vmatmul.mubr.msk.f32.gmra.mrb[56].mxu1 %vm6293_vm2, %v23798_v23  ;;  %v11104_v23 = vld [vmem:[#allocation2 + $0x38] sm:$0xff] }
 0x8bc   :  { %18029 = vmatprep.mubr.msk.f32.mxu1 %vm6293_vm2, %v23802_v55  ;;  %v11103_v55 = vld [vmem:[#allocation2 + $0x30] sm:$0xff] }
 0x8bf   :  { %18030 = vmatmul.mubr.msk.f32.gmra.mrb[58].mxu1 %vm6293_vm2, %v26482_v12  ;;  %v11111_v12 = vld [vmem:[#allocation2 + $0x90] sm:$0xff] }
 0x8c0   :  { %18032 = vmatprep.mubr.msk.f32.mxu1 %vm6293_vm2, %v23810_v14  ;;  %v11105_v14 = vld [vmem:[#allocation2 + $0x48] sm:$0xff] }
 0x8c3   :  { %18033 = vmatmul.mubr.msk.f32.gmra.mrb[60].mxu1 %vm6293_vm2, %v23814_v50  ;;  %v24360_v50 = vld [vmem:[%s25926_s4 + $0x40] sm:$0xff] }
 0x8c4   :  { %18035 = vmatprep.mubr.msk.f32.mxu1 %vm6293_vm2, %v24347_v30 }
 0x8c7   :  { %18036 = vmatmul.mubr.msk.f32.gmra.mrb[62].mxu1 %vm6293_vm2, %v24351_v11 }
 0x8c8   :  { %18040 = vmatprep.mubr.msk.f32.mxu1 %vm6293_vm2, %v11103_v55  ;;  %v11113_v55 = vld [vmem:[#allocation2 + $0xa8] sm:$0xff] }
 0x8cb   :  { %18041 = vmatmul.mubr.msk.f32.vlgmr.msra.gmra.mrb[0].mxu1 %vm6293_vm2, %v11104_v23  ;;  %v11114_v23 = vld [vmem:[#allocation2 + $0xb0] sm:$0xff] }
 0x8cc   :  { %18043 = vmatprep.mubr.msk.f32.mxu1 %vm6293_vm2, %v11105_v14  ;;  %18137 = vmatpush3.msra.mxu1 %v24219_v10  ;;  %v11112_v10 = vld [vmem:[#allocation2 + $0x98] sm:$0xff]  ;;  %v11115_v14 = vld [vmem:[#allocation2 + $0xc0] sm:$0xff] }
 0x8cd   :  { %18234 = vmatprep.subr.mxu1 %v24360_v50 }
 0x8cf   :  { %18044 = vmatmul.mubr.msk.f32.gmra.mrb[2].mxu1 %vm6293_vm2, %v11106_v8  ;;  %v11116_v8 = vld [vmem:[#allocation2 + $0xc8] sm:$0xff] }
 0x8d0   :  { %18046 = vmatprep.mubr.msk.f32.mxu1 %vm6293_vm2, %v11107_v15  ;;  %v11117_v15 = vld [vmem:[#allocation2 + $0xd8] sm:$0xff] }
 0x8d3   :  { %18047 = vmatmul.mubr.msk.f32.gmra.mrb[4].mxu1 %vm6293_vm2, %v11108_v2  ;;  %v11118_v2 = vld [vmem:[#allocation2 + $0xe0] sm:$0xff] }
 0x8d4   :  { %18049 = vmatprep.mubr.msk.f32.mxu1 %vm6293_vm2, %v11109_v22  ;;  %v11119_v22 = vld [vmem:[#allocation2 + $0xf0] sm:$0xff] }
 0x8d7   :  { %18050 = vmatmul.mubr.msk.f32.gmra.mrb[6].mxu1 %vm6293_vm2, %v11110_v24  ;;  %v11120_v24 = vld [vmem:[#allocation2 + $0xf8] sm:$0xff] }
 0x8d8   :  { %18052 = vmatprep.mubr.msk.f32.mxu1 %vm6293_vm2, %v11111_v12  ;;  %v11121_v12 = vld [vmem:[#allocation2 + $0x108] sm:$0xff] }
 0x8db   :  { %18053 = vmatmul.mubr.msk.f32.gmra.mrb[8].mxu1 %vm6293_vm2, %v11112_v10  ;;  %v11122_v10 = vld [vmem:[#allocation2 + $0x110] sm:$0xff] }
 0x8dc   :  { %18055 = vmatprep.mubr.msk.f32.mxu1 %vm6293_vm2, %v11113_v55  ;;  %v11123_v55 = vld [vmem:[#allocation2 + $0x120] sm:$0xff] }
 0x8df   :  { %18056 = vmatmul.mubr.msk.f32.gmra.mrb[10].mxu1 %vm6293_vm2, %v11114_v23  ;;  %v11124_v23 = vld [vmem:[#allocation2 + $0x128] sm:$0xff] }
 0x8e0   :  { %18058 = vmatprep.mubr.msk.f32.mxu1 %vm6293_vm2, %v11115_v14  ;;  %v11125_v14 = vld [vmem:[#allocation2 + $0x138] sm:$0xff] }
 0x8e3   :  { %18059 = vmatmul.mubr.msk.f32.gmra.mrb[12].mxu1 %vm6293_vm2, %v11116_v8  ;;  %v11126_v8 = vld [vmem:[#allocation2 + $0x140] sm:$0xff] }
 0x8e4   :  { %18061 = vmatprep.mubr.msk.f32.mxu1 %vm6293_vm2, %v11117_v15  ;;  %v11127_v15 = vld [vmem:[#allocation2 + $0x150] sm:$0xff] }
 0x8e7   :  { %18062 = vmatmul.mubr.msk.f32.gmra.mrb[14].mxu1 %vm6293_vm2, %v11118_v2  ;;  %v11128_v2 = vld [vmem:[#allocation2 + $0x158] sm:$0xff] }
 0x8e8   :  { %18064 = vmatprep.mubr.msk.f32.mxu1 %vm6293_vm2, %v11119_v22  ;;  %v11129_v22 = vld [vmem:[#allocation2 + $0x168] sm:$0xff] }
 0x8eb   :  { %18065 = vmatmul.mubr.msk.f32.gmra.mrb[16].mxu1 %vm6293_vm2, %v11120_v24  ;;  %v11130_v24 = vld [vmem:[#allocation2 + $0x170] sm:$0xff] }
 0x8ec   :  { %18067 = vmatprep.mubr.msk.f32.mxu1 %vm6293_vm2, %v11121_v12  ;;  %v11133_v12 = vld [vmem:[#allocation2 + $0x198] sm:$0xff] }
 0x8ef   :  { %18068 = vmatmul.mubr.msk.f32.gmra.mrb[18].mxu1 %vm6293_vm2, %v11122_v10  ;;  %v11134_v10 = vld [vmem:[#allocation2 + $0x1a0] sm:$0xff] }
 0x8f0   :  { %18070 = vmatprep.mubr.msk.f32.mxu1 %vm6293_vm2, %v11123_v55  ;;  %v11135_v55 = vld [vmem:[#allocation2 + $0x1e0] sm:$0xff] }
 0x8f3   :  { %18071 = vmatmul.mubr.msk.f32.gmra.mrb[20].mxu1 %vm6293_vm2, %v11124_v23  ;;  %v11136_v23 = vld [vmem:[#allocation2 + $0x1e8] sm:$0xff] }
 0x8f4   :  { %18073 = vmatprep.mubr.msk.f32.mxu1 %vm6293_vm2, %v11125_v14  ;;  %v11137_v14 = vld [vmem:[#allocation2 + $0x1f8] sm:$0xff] }
 0x8f7   :  { %18074 = vmatmul.mubr.msk.f32.gmra.mrb[22].mxu1 %vm6293_vm2, %v11126_v8  ;;  %v11138_v8 = vld [vmem:[#allocation2 + $0x200] sm:$0xff] }
 0x8f8   :  { %18076 = vmatprep.mubr.msk.f32.mxu1 %vm6293_vm2, %v11127_v15  ;;  %v11141_v15 = vld [vmem:[#allocation2 + $0x228] sm:$0xff] }
 0x8fb   :  { %18077 = vmatmul.mubr.msk.f32.gmra.mrb[24].mxu1 %vm6293_vm2, %v11128_v2  ;;  %v11142_v2 = vld [vmem:[#allocation2 + $0x230] sm:$0xff] }
 0x8fc   :  { %18079 = vmatprep.mubr.msk.f32.mxu1 %vm6293_vm2, %v11129_v22  ;;  %v11143_v22 = vld [vmem:[#allocation2 + $0x240] sm:$0xff] }
 0x8ff   :  { %18080 = vmatmul.mubr.msk.f32.gmra.mrb[26].mxu1 %vm6293_vm2, %v11130_v24  ;;  %v11144_v24 = vld [vmem:[#allocation2 + $0x248] sm:$0xff] }
 0x900   :  { %18082 = vmatprep.mubr.msk.f32.mxu1 %vm6293_vm2, %v23885_v25  ;;  %v11139_v25 = vld [vmem:[#allocation2 + $0x210] sm:$0xff] }
 0x903   :  { %18083 = vmatmul.mubr.msk.f32.gmra.mrb[28].mxu1 %vm6293_vm2, %v23889_v41  ;;  %v11140_v41 = vld [vmem:[#allocation2 + $0x218] sm:$0xff] }
 0x904   :  { %18085 = vmatprep.mubr.msk.f32.mxu1 %vm6293_vm2, %v11133_v12  ;;  %v11145_v12 = vld [vmem:[#allocation2 + $0x258] sm:$0xff] }
 0x907   :  { %18086 = vmatmul.mubr.msk.f32.gmra.mrb[30].mxu1 %vm6293_vm2, %v11134_v10  ;;  %v11146_v10 = vld [vmem:[#allocation2 + $0x260] sm:$0xff] }
 0x908   :  { %18088 = vmatprep.mubr.msk.f32.mxu1 %vm6293_vm2, %v11135_v55  ;;  %v11147_v55 = vld [vmem:[#allocation2 + $0x270] sm:$0xff] }
 0x90b   :  { %18089 = vmatmul.mubr.msk.f32.gmra.mrb[32].mxu1 %vm6293_vm2, %v11136_v23  ;;  %v11148_v23 = vld [vmem:[#allocation2 + $0x278] sm:$0xff] }
 0x90c   :  { %18091 = vmatprep.mubr.msk.f32.mxu1 %vm6293_vm2, %v11137_v14  ;;  %v11149_v14 = vld [vmem:[#allocation2 + $0x288] sm:$0xff] }
 0x90f   :  { %18092 = vmatmul.mubr.msk.f32.gmra.mrb[34].mxu1 %vm6293_vm2, %v11138_v8  ;;  %v11150_v8 = vld [vmem:[#allocation2 + $0x290] sm:$0xff] }
 0x910   :  { %18094 = vmatprep.mubr.msk.f32.mxu1 %vm6293_vm2, %v11139_v25  ;;  %v11151_v25 = vld [vmem:[#allocation2 + $0x2a0] sm:$0xff] }
 0x913   :  { %18095 = vmatmul.mubr.msk.f32.gmra.mrb[36].mxu1 %vm6293_vm2, %v11140_v41  ;;  %v11152_v41 = vld [vmem:[#allocation2 + $0x2a8] sm:$0xff] }
 0x914   :  { %18097 = vmatprep.mubr.msk.f32.mxu1 %vm6293_vm2, %v11141_v15  ;;  %v11153_v15 = vld [vmem:[#allocation2 + $0x2b8] sm:$0xff] }
 0x917   :  { %18098 = vmatmul.mubr.msk.f32.gmra.mrb[38].mxu1 %vm6293_vm2, %v11142_v2  ;;  %v11154_v2 = vld [vmem:[#allocation2 + $0x2c0] sm:$0xff] }
 0x918   :  { %18100 = vmatprep.mubr.msk.f32.mxu1 %vm6293_vm2, %v11143_v22  ;;  %v11155_v22 = vld [vmem:[#allocation2 + $0x2d0] sm:$0xff] }
 0x91b   :  { %18101 = vmatmul.mubr.msk.f32.gmra.mrb[40].mxu1 %vm6293_vm2, %v11144_v24  ;;  %v11156_v24 = vld [vmem:[#allocation2 + $0x2d8] sm:$0xff] }
 0x91c   :  { %18103 = vmatprep.mubr.msk.f32.mxu1 %vm6293_vm2, %v11145_v12  ;;  %v11157_v12 = vld [vmem:[#allocation2 + $0x2e8] sm:$0xff] }
 0x91f   :  { %18104 = vmatmul.mubr.msk.f32.gmra.mrb[42].mxu1 %vm6293_vm2, %v11146_v10  ;;  %v11158_v10 = vld [vmem:[#allocation2 + $0x2f0] sm:$0xff] }
 0x920   :  { %18106 = vmatprep.mubr.msk.f32.mxu1 %vm6293_vm2, %v11147_v55  ;;  %v11159_v55 = vld [vmem:[#allocation2 + $0x300] sm:$0xff] }
 0x923   :  { %18107 = vmatmul.mubr.msk.f32.gmra.mrb[44].mxu1 %vm6293_vm2, %v11148_v23  ;;  %v11160_v23 = vld [vmem:[#allocation2 + $0x308] sm:$0xff] }
 0x924   :  { %18109 = vmatprep.mubr.msk.f32.mxu1 %vm6293_vm2, %v11149_v14  ;;  %v11161_v14 = vld [vmem:[#allocation2 + $0x318] sm:$0xff] }
 0x927   :  { %18110 = vmatmul.mubr.msk.f32.gmra.mrb[46].mxu1 %vm6293_vm2, %v11150_v8  ;;  %v11162_v8 = vld [vmem:[#allocation2 + $0x320] sm:$0xff] }
 0x928   :  { %18112 = vmatprep.mubr.msk.f32.mxu1 %vm6293_vm2, %v11151_v25  ;;  %v11165_v25 = vld [vmem:[#allocation2 + $0x348] sm:$0xff] }
 0x92b   :  { %18113 = vmatmul.mubr.msk.f32.gmra.mrb[48].mxu1 %vm6293_vm2, %v11152_v41  ;;  %v11166_v41 = vld [vmem:[#allocation2 + $0x350] sm:$0xff] }
 0x92c   :  { %18115 = vmatprep.mubr.msk.f32.mxu1 %vm6293_vm2, %v11153_v15  ;;  %v12549_v15 = vld [vmem:[#allocation2 + $0x1e2] sm:$0xff] }
 0x92f   :  { %18116 = vmatmul.mubr.msk.f32.gmra.mrb[50].mxu1 %vm6293_vm2, %v11154_v2  ;;  %v12550_v2 = vld [vmem:[#allocation2 + $0x1ea] sm:$0xff] }
 0x930   :  { %18118 = vmatprep.mubr.msk.f32.mxu1 %vm6293_vm2, %v11155_v22  ;;  %v12551_v22 = vld [vmem:[#allocation2 + $0x1fa] sm:$0xff] }
 0x933   :  { %18119 = vmatmul.mubr.msk.f32.gmra.mrb[52].mxu1 %vm6293_vm2, %v11156_v24  ;;  %v12552_v24 = vld [vmem:[#allocation2 + $0x202] sm:$0xff] }
 0x934   :  { %18121 = vmatprep.mubr.msk.f32.mxu1 %vm6293_vm2, %v11157_v12  ;;  %v12554_v12 = vld [vmem:[#allocation2 + $0x21a] sm:$0xff] }
 0x937   :  { %18122 = vmatmul.mubr.msk.f32.gmra.mrb[54].mxu1 %vm6293_vm2, %v11158_v10  ;;  %v12555_v10 = vld [vmem:[#allocation2 + $0x22a] sm:$0xff] }
 0x938   :  { %18124 = vmatprep.mubr.msk.f32.mxu1 %vm6293_vm2, %v11159_v55  ;;  %v12556_v55 = vld [vmem:[#allocation2 + $0x232] sm:$0xff] }
 0x93b   :  { %18125 = vmatmul.mubr.msk.f32.gmra.mrb[56].mxu1 %vm6293_vm2, %v11160_v23  ;;  %v12557_v23 = vld [vmem:[#allocation2 + $0x242] sm:$0xff] }
 0x93c   :  { %18127 = vmatprep.mubr.msk.f32.mxu1 %vm6293_vm2, %v11161_v14  ;;  %v12558_v14 = vld [vmem:[#allocation2 + $0x24a] sm:$0xff] }
 0x93f   :  { %18128 = vmatmul.mubr.msk.f32.gmra.mrb[58].mxu1 %vm6293_vm2, %v11162_v8  ;;  %v12559_v8 = vld [vmem:[#allocation2 + $0x25a] sm:$0xff] }
 0x940   :  { %18130 = vmatprep.mubr.msk.f32.mxu1 %vm6293_vm2, %v23953_v46  ;;  %v11840_v46 = vld [vmem:[#allocation2 + $0x199] sm:$0xff] }
 0x943   :  { %18131 = vmatmul.mubr.msk.f32.gmra.mrb[60].mxu1 %vm6293_vm2, %v23957_v57  ;;  %v11841_v57 = vld [vmem:[#allocation2 + $0x1a1] sm:$0xff] }
 0x944   :  { %18133 = vmatprep.mubr.msk.f32.mxu1 %vm6293_vm2, %v11165_v25  ;;  %v12560_v25 = vld [vmem:[#allocation2 + $0x262] sm:$0xff] }
 0x947   :  { %18134 = vmatmul.mubr.msk.f32.gmra.mrb[62].mxu1 %vm6293_vm2, %v11166_v41  ;;  %v12561_v41 = vld [vmem:[#allocation2 + $0x272] sm:$0xff] }
 0x948   :  { %18138 = vmatprep.mubr.msk.f32.mxu1 %vm6293_vm2, %v23963_v43  ;;  %v26483_v43 = vld [vmem:[#allocation37_spill] sm:$0xff] }
 0x94b   :  { %18139 = vmatmul.mubr.msk.f32.vlgmr.msra.gmra.mrb[0].mxu1 %vm6293_vm2, %v23974_v28  ;;  %v26484_v28 = vld [vmem:[#allocation38_spill] sm:$0xff] }
 0x94c   :  { %18141 = vmatprep.mubr.msk.f32.mxu1 %vm6293_vm2, %v23978_v39  ;;  %18235 = vmatpush3.msra.mxu1 %v24360_v50  ;;  %v26485_v39 = vld [vmem:[#allocation39_spill] sm:$0xff] }
 0x94d   :  { %v12548_v50 = vld [vmem:[#allocation2 + $0x1a2] sm:$0xff] }
 0x94f   :  { %18142 = vmatmul.mubr.msk.f32.gmra.mrb[2].mxu1 %vm6293_vm2, %v23982_v35  ;;  %v26486_v35 = vld [vmem:[#allocation40_spill] sm:$0xff] }
 0x950   :  { %18144 = vmatprep.mubr.msk.f32.mxu1 %vm6293_vm2, %v23986_v51  ;;  %v26487_v51 = vld [vmem:[#allocation41_spill] sm:$0xff] }
 0x953   :  { %18145 = vmatmul.mubr.msk.f32.gmra.mrb[4].mxu1 %vm6293_vm2, %v23990_v48  ;;  %v26488_v48 = vld [vmem:[#allocation42_spill] sm:$0xff] }
 0x954   :  { %18147 = vmatprep.mubr.msk.f32.mxu1 %vm6293_vm2, %v23994_v62  ;;  %v26489_v62 = vld [vmem:[#allocation43_spill] sm:$0xff] }
 0x957   :  { %18148 = vmatmul.mubr.msk.f32.gmra.mrb[6].mxu1 %vm6293_vm2, %v23998_v60  ;;  %v26490_v60 = vld [vmem:[#allocation44_spill] sm:$0xff] }
 0x958   :  { %18150 = vmatprep.mubr.msk.f32.mxu1 %vm6293_vm2, %v24002_v7  ;;  %v26491_v7 = vld [vmem:[#allocation45_spill] sm:$0xff] }
 0x95b   :  { %18151 = vmatmul.mubr.msk.f32.gmra.mrb[8].mxu1 %vm6293_vm2, %v24006_v20  ;;  %v26492_v20 = vld [vmem:[#allocation46_spill] sm:$0xff] }
 0x95c   :  { %18153 = vmatprep.mubr.msk.f32.mxu1 %vm6293_vm2, %v24010_v18  ;;  %v26493_v18 = vld [vmem:[#allocation47_spill] sm:$0xff] }
 0x95f   :  { %18154 = vmatmul.mubr.msk.f32.gmra.mrb[10].mxu1 %vm6293_vm2, %v24014_v32  ;;  %v26494_v32 = vld [vmem:[#allocation48_spill] sm:$0xff] }
 0x960   :  { %18156 = vmatprep.mubr.msk.f32.mxu1 %vm6293_vm2, %v24018_v36  ;;  %v26495_v36 = vld [vmem:[#allocation49_spill] sm:$0xff] }
 0x963   :  { %18157 = vmatmul.mubr.msk.f32.gmra.mrb[12].mxu1 %vm6293_vm2, %v24022_v52  ;;  %v11872_v52 = vld [vmem:[#allocation2 + $0x349] sm:$0xff] }
 0x964   :  { %18159 = vmatprep.mubr.msk.f32.mxu1 %vm6293_vm2, %v24026_v49  ;;  %v26496_v49 = vld [vmem:[#allocation72_spill] sm:$0xff] }
 0x967   :  { %18160 = vmatmul.mubr.msk.f32.gmra.mrb[14].mxu1 %vm6293_vm2, %v24030_v6  ;;  %v11873_v6 = vld [vmem:[#allocation2 + $0x351] sm:$0xff] }
 0x968   :  { %18162 = vmatprep.mubr.msk.f32.mxu1 %vm6293_vm2, %v24034_v0  ;;  %v12517_v0 = vld [vmem:[#allocation2 + $0x32] sm:$0xff] }
 0x96b   :  { %18163 = vmatmul.mubr.msk.f32.gmra.mrb[16].mxu1 %vm6293_vm2, %v24038_v13  ;;  %v12518_v13 = vld [vmem:[#allocation2 + $0x3a] sm:$0xff] }
 0x96c   :  { %18165 = vmatprep.mubr.msk.f32.mxu1 %vm6293_vm2, %v24042_v9  ;;  %v12519_v9 = vld [vmem:[#allocation2 + $0x4a] sm:$0xff] }
 0x96f   :  { %18166 = vmatmul.mubr.msk.f32.gmra.mrb[18].mxu1 %vm6293_vm2, %v24046_v26  ;;  %v12520_v26 = vld [vmem:[#allocation2 + $0x52] sm:$0xff] }
 0x970   :  { %18168 = vmatprep.mubr.msk.f32.mxu1 %vm6293_vm2, %v24050_v44  ;;  %v12521_v44 = vld [vmem:[#allocation2 + $0x62] sm:$0xff] }
 0x973   :  { %18169 = vmatmul.mubr.msk.f32.gmra.mrb[20].mxu1 %vm6293_vm2, %v24054_v4  ;;  %v12522_v4 = vld [vmem:[#allocation2 + $0x6a] sm:$0xff] }
 0x974   :  { %18171 = vmatprep.mubr.msk.f32.mxu1 %vm6293_vm2, %v24058_v1  ;;  %v12523_v1 = vld [vmem:[#allocation2 + $0x7a] sm:$0xff] }
 0x977   :  { %18172 = vmatmul.mubr.msk.f32.gmra.mrb[22].mxu1 %vm6293_vm2, %v24062_v19  ;;  %v12524_v19 = vld [vmem:[#allocation2 + $0x82] sm:$0xff] }
 0x978   :  { %18174 = vmatprep.mubr.msk.f32.mxu1 %vm6293_vm2, %v24066_v16  ;;  %v12525_v16 = vld [vmem:[#allocation2 + $0x92] sm:$0xff] }
 0x97b   :  { %18175 = vmatmul.mubr.msk.f32.gmra.mrb[24].mxu1 %vm6293_vm2, %v24070_v40  ;;  %v12526_v40 = vld [vmem:[#allocation2 + $0x9a] sm:$0xff] }
 0x97c   :  { %18177 = vmatprep.mubr.msk.f32.mxu1 %vm6293_vm2, %v24074_v34  ;;  %v12527_v34 = vld [vmem:[#allocation2 + $0xaa] sm:$0xff] }
 0x97f   :  { %18178 = vmatmul.mubr.msk.f32.gmra.mrb[26].mxu1 %vm6293_vm2, %v24078_v61  ;;  %v12528_v61 = vld [vmem:[#allocation2 + $0xb2] sm:$0xff] }
 0x980   :  { %18180 = vmatprep.mubr.msk.f32.mxu1 %vm6293_vm2, %v24082_v58  ;;  %v12529_v58 = vld [vmem:[#allocation2 + $0xc2] sm:$0xff] }
 0x983   :  { %18181 = vmatmul.mubr.msk.f32.gmra.mrb[28].mxu1 %vm6293_vm2, %v24086_v17  ;;  %v12530_v17 = vld [vmem:[#allocation2 + $0xca] sm:$0xff] }
 0x984   :  { %18183 = vmatprep.mubr.msk.f32.mxu1 %vm6293_vm2, %v11840_v46  ;;  %v12562_v46 = vld [vmem:[#allocation2 + $0x27a] sm:$0xff] }
 0x987   :  { %18184 = vmatmul.mubr.msk.f32.gmra.mrb[30].mxu1 %vm6293_vm2, %v11841_v57  ;;  %v12563_v57 = vld [vmem:[#allocation2 + $0x28a] sm:$0xff] }
 0x988   :  { %18186 = vmatprep.mubr.msk.f32.mxu1 %vm6293_vm2, %v24092_v42  ;;  %v12531_v42 = vld [vmem:[#allocation2 + $0xda] sm:$0xff] }
 0x98b   :  { %18187 = vmatmul.mubr.msk.f32.gmra.mrb[32].mxu1 %vm6293_vm2, %v24096_v37  ;;  %v12532_v37 = vld [vmem:[#allocation2 + $0xe2] sm:$0xff] }
 0x98c   :  { %18189 = vmatprep.mubr.msk.f32.mxu1 %vm6293_vm2, %v24100_v27  ;;  %v12533_v27 = vld [vmem:[#allocation2 + $0xf2] sm:$0xff] }
 0x98f   :  { %18190 = vmatmul.mubr.msk.f32.gmra.mrb[34].mxu1 %vm6293_vm2, %v24104_v38  ;;  %v12534_v38 = vld [vmem:[#allocation2 + $0xfa] sm:$0xff] }
 0x990   :  { %18192 = vmatprep.mubr.msk.f32.mxu1 %vm6293_vm2, %v24108_v3  ;;  %v12535_v3 = vld [vmem:[#allocation2 + $0x10a] sm:$0xff] }
 0x993   :  { %18193 = vmatmul.mubr.msk.f32.gmra.mrb[36].mxu1 %vm6293_vm2, %v24112_v31  ;;  %v12536_v31 = vld [vmem:[#allocation2 + $0x112] sm:$0xff] }
 0x994   :  { %18195 = vmatprep.mubr.msk.f32.mxu1 %vm6293_vm2, %v24116_v53  ;;  %v12537_v53 = vld [vmem:[#allocation2 + $0x122] sm:$0xff] }
 0x997   :  { %18196 = vmatmul.mubr.msk.f32.gmra.mrb[38].mxu1 %vm6293_vm2, %v24120_v56  ;;  %v12538_v56 = vld [vmem:[#allocation2 + $0x12a] sm:$0xff] }
 0x998   :  { %18198 = vmatprep.mubr.msk.f32.mxu1 %vm6293_vm2, %v24124_v54  ;;  %v12539_v54 = vld [vmem:[#allocation2 + $0x13a] sm:$0xff] }
 0x99b   :  { %18199 = vmatmul.mubr.msk.f32.gmra.mrb[40].mxu1 %vm6293_vm2, %v24128_v21  ;;  %v12540_v21 = vld [vmem:[#allocation2 + $0x142] sm:$0xff] }
 0x99c   :  { %18201 = vmatprep.mubr.msk.f32.mxu1 %vm6293_vm2, %v24132_v47  ;;  %v12541_v47 = vld [vmem:[#allocation2 + $0x152] sm:$0xff] }
 0x99f   :  { %18202 = vmatmul.mubr.msk.f32.gmra.mrb[42].mxu1 %vm6293_vm2, %v24136_v59  ;;  %v12542_v59 = vld [vmem:[#allocation2 + $0x15a] sm:$0xff] }
 0x9a0   :  { %18204 = vmatprep.mubr.msk.f32.mxu1 %vm6293_vm2, %v24140_v45  ;;  %v12543_v45 = vld [vmem:[#allocation2 + $0x16a] sm:$0xff] }
 0x9a3   :  { %18205 = vmatmul.mubr.msk.f32.gmra.mrb[44].mxu1 %vm6293_vm2, %v24144_v63  ;;  %v12544_v63 = vld [vmem:[#allocation2 + $0x172] sm:$0xff] }
 0x9a4   :  { %18207 = vmatprep.mubr.msk.f32.mxu1 %vm6293_vm2, %v24148_v5  ;;  %v12547_v5 = vld [vmem:[#allocation2 + $0x19a] sm:$0xff] }
 0x9a7   :  { %18208 = vmatmul.mubr.msk.f32.gmra.mrb[46].mxu1 %vm6293_vm2, %v24152_v29  ;;  %v26497_v29 = vld [vmem:[#allocation50_spill] sm:$0xff] }
 0x9a8   :  { %18210 = vmatprep.mubr.msk.f32.mxu1 %vm6293_vm2, %v26483_v43  ;;  %v12564_v43 = vld [vmem:[#allocation2 + $0x292] sm:$0xff] }
 0x9ab   :  { %18211 = vmatmul.mubr.msk.f32.gmra.mrb[48].mxu1 %vm6293_vm2, %v26484_v28  ;;  %v12565_v28 = vld [vmem:[#allocation2 + $0x2a2] sm:$0xff] }
 0x9ac   :  { %18213 = vmatprep.mubr.msk.f32.mxu1 %vm6293_vm2, %v26485_v39  ;;  %v12566_v39 = vld [vmem:[#allocation2 + $0x2aa] sm:$0xff] }
 0x9af   :  { %18214 = vmatmul.mubr.msk.f32.gmra.mrb[50].mxu1 %vm6293_vm2, %v26486_v35  ;;  %v12567_v35 = vld [vmem:[#allocation2 + $0x2ba] sm:$0xff] }
 0x9b0   :  { %18216 = vmatprep.mubr.msk.f32.mxu1 %vm6293_vm2, %v26487_v51  ;;  %v12568_v51 = vld [vmem:[#allocation2 + $0x2c2] sm:$0xff] }
 0x9b3   :  { %18217 = vmatmul.mubr.msk.f32.gmra.mrb[52].mxu1 %vm6293_vm2, %v26488_v48  ;;  %v12569_v48 = vld [vmem:[#allocation2 + $0x2d2] sm:$0xff] }
 0x9b4   :  { %18219 = vmatprep.mubr.msk.f32.mxu1 %vm6293_vm2, %v26489_v62  ;;  %v12570_v62 = vld [vmem:[#allocation2 + $0x2da] sm:$0xff] }
 0x9b7   :  { %18220 = vmatmul.mubr.msk.f32.gmra.mrb[54].mxu1 %vm6293_vm2, %v26490_v60  ;;  %v12571_v60 = vld [vmem:[#allocation2 + $0x2ea] sm:$0xff] }
 0x9b8   :  { %18222 = vmatprep.mubr.msk.f32.mxu1 %vm6293_vm2, %v26491_v7  ;;  %v12572_v7 = vld [vmem:[#allocation2 + $0x2f2] sm:$0xff] }
 0x9bb   :  { %18223 = vmatmul.mubr.msk.f32.gmra.mrb[56].mxu1 %vm6293_vm2, %v26492_v20  ;;  %v12573_v20 = vld [vmem:[#allocation2 + $0x302] sm:$0xff] }
 0x9bc   :  { %18225 = vmatprep.mubr.msk.f32.mxu1 %vm6293_vm2, %v26493_v18  ;;  %v12574_v18 = vld [vmem:[#allocation2 + $0x30a] sm:$0xff] }
 0x9bf   :  { %18226 = vmatmul.mubr.msk.f32.gmra.mrb[58].mxu1 %vm6293_vm2, %v26494_v32  ;;  %v12575_v32 = vld [vmem:[#allocation2 + $0x31a] sm:$0xff] }
 0x9c0   :  { %18228 = vmatprep.mubr.msk.f32.mxu1 %vm6293_vm2, %v26495_v36  ;;  %v12576_v36 = vld [vmem:[#allocation2 + $0x322] sm:$0xff] }
 0x9c3   :  { %18229 = vmatmul.mubr.msk.f32.gmra.mrb[60].mxu1 %vm6293_vm2, %v26496_v49  ;;  %v12580_v49 = vld [vmem:[#allocation2 + $0x352] sm:$0xff] }
 0x9c4   :  { %18231 = vmatprep.mubr.msk.f32.mxu1 %vm6293_vm2, %v11872_v52  ;;  %v12579_v52 = vld [vmem:[#allocation2 + $0x34a] sm:$0xff] }
 0x9c7   :  { %18232 = vmatmul.mubr.msk.f32.gmra.mrb[62].mxu1 %vm6293_vm2, %v11873_v6 }
 0x9c8   :  { %18236 = vmatprep.mubr.msk.f32.mxu1 %vm6293_vm2, %v12517_v0 }
 0x9cb   :  { %18237 = vmatmul.mubr.msk.f32.vlgmr.msra.gmra.mrb[0].mxu1 %vm6293_vm2, %v12518_v13 }
 0x9cc   :  { %18239 = vmatprep.mubr.msk.f32.mxu1 %vm6293_vm2, %v12519_v9 }
 0x9cf   :  { %18240 = vmatmul.mubr.msk.f32.gmra.mrb[2].mxu1 %vm6293_vm2, %v12520_v26 }
 0x9d0   :  { %18242 = vmatprep.mubr.msk.f32.mxu1 %vm6293_vm2, %v12521_v44 }
 0x9d3   :  { %18243 = vmatmul.mubr.msk.f32.gmra.mrb[4].mxu1 %vm6293_vm2, %v12522_v4 }
 0x9d4   :  { %18245 = vmatprep.mubr.msk.f32.mxu1 %vm6293_vm2, %v12523_v1 }
 0x9d7   :  { %18246 = vmatmul.mubr.msk.f32.gmra.mrb[6].mxu1 %vm6293_vm2, %v12524_v19 }
 0x9d8   :  { %18248 = vmatprep.mubr.msk.f32.mxu1 %vm6293_vm2, %v12525_v16 }
 0x9db   :  { %18249 = vmatmul.mubr.msk.f32.gmra.mrb[8].mxu1 %vm6293_vm2, %v12526_v40 }
 0x9dc   :  { %18251 = vmatprep.mubr.msk.f32.mxu1 %vm6293_vm2, %v12527_v34 }
 0x9df   :  { %18252 = vmatmul.mubr.msk.f32.gmra.mrb[10].mxu1 %vm6293_vm2, %v12528_v61 }
 0x9e0   :  { %18254 = vmatprep.mubr.msk.f32.mxu1 %vm6293_vm2, %v12529_v58 }
 0x9e3   :  { %18255 = vmatmul.mubr.msk.f32.gmra.mrb[12].mxu1 %vm6293_vm2, %v12530_v17 }
 0x9e4   :  { %18257 = vmatprep.mubr.msk.f32.mxu1 %vm6293_vm2, %v12531_v42 }
 0x9e7   :  { %18258 = vmatmul.mubr.msk.f32.gmra.mrb[14].mxu1 %vm6293_vm2, %v12532_v37 }
 0x9e8   :  { %18260 = vmatprep.mubr.msk.f32.mxu1 %vm6293_vm2, %v12533_v27 }
 0x9eb   :  { %18261 = vmatmul.mubr.msk.f32.gmra.mrb[16].mxu1 %vm6293_vm2, %v12534_v38 }
 0x9ec   :  { %18263 = vmatprep.mubr.msk.f32.mxu1 %vm6293_vm2, %v12535_v3 }
 0x9ef   :  { %18264 = vmatmul.mubr.msk.f32.gmra.mrb[18].mxu1 %vm6293_vm2, %v12536_v31 }
 0x9f0   :  { %18266 = vmatprep.mubr.msk.f32.mxu1 %vm6293_vm2, %v12537_v53 }
 0x9f3   :  { %18267 = vmatmul.mubr.msk.f32.gmra.mrb[20].mxu1 %vm6293_vm2, %v12538_v56 }
 0x9f4   :  { %18269 = vmatprep.mubr.msk.f32.mxu1 %vm6293_vm2, %v12539_v54 }
 0x9f7   :  { %18270 = vmatmul.mubr.msk.f32.gmra.mrb[22].mxu1 %vm6293_vm2, %v12540_v21 }
 0x9f8   :  { %18272 = vmatprep.mubr.msk.f32.mxu1 %vm6293_vm2, %v12541_v47 }
 0x9fb   :  { %18273 = vmatmul.mubr.msk.f32.gmra.mrb[24].mxu1 %vm6293_vm2, %v12542_v59 }
 0x9fc   :  { %18275 = vmatprep.mubr.msk.f32.mxu1 %vm6293_vm2, %v12543_v45 }
 0x9ff   :  { %18276 = vmatmul.mubr.msk.f32.gmra.mrb[26].mxu1 %vm6293_vm2, %v12544_v63 }
 0xa00   :  { %18278 = vmatprep.mubr.msk.f32.mxu1 %vm6293_vm2, %v24279_v33  ;;  %v12553_v33 = vld [vmem:[#allocation2 + $0x212] sm:$0xff] }
 0xa03   :  { %18279 = vmatmul.mubr.msk.f32.gmra.mrb[28].mxu1 %vm6293_vm2, %v26497_v29 }
 0xa04   :  { %18281 = vmatprep.mubr.msk.f32.mxu1 %vm6293_vm2, %v12547_v5 }
 0xa07   :  { %18282 = vmatmul.mubr.msk.f32.gmra.mrb[30].mxu1 %vm6293_vm2, %v12548_v50 }
 0xa08   :  { %18284 = vmatprep.mubr.msk.f32.mxu1 %vm6293_vm2, %v12549_v15 }
 0xa0b   :  { %18285 = vmatmul.mubr.msk.f32.gmra.mrb[32].mxu1 %vm6293_vm2, %v12550_v2 }
 0xa0c   :  { %18287 = vmatprep.mubr.msk.f32.mxu1 %vm6293_vm2, %v12551_v22 }
 0xa0f   :  { %18288 = vmatmul.mubr.msk.f32.gmra.mrb[34].mxu1 %vm6293_vm2, %v12552_v24 }
 0xa10   :  { %18290 = vmatprep.mubr.msk.f32.mxu1 %vm6293_vm2, %v12553_v33 }
 0xa13   :  { %18291 = vmatmul.mubr.msk.f32.gmra.mrb[36].mxu1 %vm6293_vm2, %v12554_v12 }
 0xa14   :  { %18293 = vmatprep.mubr.msk.f32.mxu1 %vm6293_vm2, %v12555_v10 }
 0xa17   :  { %18294 = vmatmul.mubr.msk.f32.gmra.mrb[38].mxu1 %vm6293_vm2, %v12556_v55 }
 0xa18   :  { %18296 = vmatprep.mubr.msk.f32.mxu1 %vm6293_vm2, %v12557_v23 }
 0xa1b   :  { %18297 = vmatmul.mubr.msk.f32.gmra.mrb[40].mxu1 %vm6293_vm2, %v12558_v14 }
 0xa1c   :  { %18299 = vmatprep.mubr.msk.f32.mxu1 %vm6293_vm2, %v12559_v8 }
 0xa1f   :  { %18300 = vmatmul.mubr.msk.f32.gmra.mrb[42].mxu1 %vm6293_vm2, %v12560_v25 }
 0xa20   :  { %18302 = vmatprep.mubr.msk.f32.mxu1 %vm6293_vm2, %v12561_v41 }
 0xa23   :  { %18303 = vmatmul.mubr.msk.f32.gmra.mrb[44].mxu1 %vm6293_vm2, %v12562_v46 }
 0xa24   :  { %18305 = vmatprep.mubr.msk.f32.mxu1 %vm6293_vm2, %v12563_v57 }
 0xa27   :  { %18306 = vmatmul.mubr.msk.f32.gmra.mrb[46].mxu1 %vm6293_vm2, %v12564_v43 }
 0xa28   :  { %18308 = vmatprep.mubr.msk.f32.mxu1 %vm6293_vm2, %v12565_v28 }
 0xa2b   :  { %18309 = vmatmul.mubr.msk.f32.gmra.mrb[48].mxu1 %vm6293_vm2, %v12566_v39 }
 0xa2c   :  { %18311 = vmatprep.mubr.msk.f32.mxu1 %vm6293_vm2, %v12567_v35 }
 0xa2f   :  { %18312 = vmatmul.mubr.msk.f32.gmra.mrb[50].mxu1 %vm6293_vm2, %v12568_v51 }
 0xa30   :  { %18314 = vmatprep.mubr.msk.f32.mxu1 %vm6293_vm2, %v12569_v48 }
 0xa33   :  { %18315 = vmatmul.mubr.msk.f32.gmra.mrb[52].mxu1 %vm6293_vm2, %v12570_v62 }
 0xa34   :  { %18317 = vmatprep.mubr.msk.f32.mxu1 %vm6293_vm2, %v12571_v60 }
 0xa37   :  { %18318 = vmatmul.mubr.msk.f32.gmra.mrb[54].mxu1 %vm6293_vm2, %v12572_v7 }
 0xa38   :  { %18320 = vmatprep.mubr.msk.f32.mxu1 %vm6293_vm2, %v12573_v20 }
 0xa3b   :  { %18321 = vmatmul.mubr.msk.f32.gmra.mrb[56].mxu1 %vm6293_vm2, %v12574_v18 }
 0xa3c   :  { %18323 = vmatprep.mubr.msk.f32.mxu1 %vm6293_vm2, %v12575_v32 }
 0xa3f   :  { %18324 = vmatmul.mubr.msk.f32.gmra.mrb[58].mxu1 %vm6293_vm2, %v12576_v36 }
 0xa40   :  { %18326 = vmatprep.mubr.msk.f32.mxu1 %vm6293_vm2, %v24347_v30 }
 0xa43   :  { %18327 = vmatmul.mubr.msk.f32.gmra.mrb[60].mxu1 %vm6293_vm2, %v24351_v11 }
 0xa44   :  { %18329 = vmatprep.mubr.msk.f32.mxu1 %vm6293_vm2, %v12579_v52 }
 0xa47   :  { %18330 = vmatmul.mubr.msk.f32.gmra.mrb[62].mxu1 %vm6293_vm2, %v12580_v49 }
 0xa9e   :  { %v24623_v6 = vpop.f32.mrb[0].mxu1 }
 0xa9f   :  { %v13227_v0 = vsel %vm6293_vm2, %v24623_v6, 0.0  ;;  %v13360_v13 = vmul.f32 %v24623_v6, %v24623_v6  ;;  %v24629_v9 = vpop.f32.mrb[1].mxu1 }
 0xaa0   :  { %v13226_v30 = vsel %vm6293_vm2, %v24629_v9, 0.0  ;;  %v13359_v11 = vmul.f32 %v24629_v9, %v24629_v9 }
 0xaa1   :  { %v13424_v26 = vsel %vm6293_vm2, %v13360_v13, 0.0  ;;  %v13228_v44 = vadd.f32 %v13227_v0, %v13226_v30 }
 0xaa2   :  { %v13423_v4 = vsel %vm6293_vm2, %v13359_v11, 0.0  ;;  %v24637_v1 = vpop.f32.mrb[2].mxu1 }
 0xaa3   :  { %v13425_v19 = vadd.f32 %v13424_v26, %v13423_v4  ;;  %v24639_v16 = vpop.f32.mrb[3].mxu1  ;;  %v13362_v40 = vmul.f32 %v24637_v1, %v24637_v1  ;;  %v13231_v17 = vsel %vm6293_vm2, %v24637_v1, 0.0 }
 0xaa4   :  { %v13229_v34 = vsel %vm6293_vm2, %v24639_v16, 0.0  ;;  %v13361_v61 = vmul.f32 %v24639_v16, %v24639_v16 }
 0xaa5   :  { %v13230_v58 = vadd.f32 %v13229_v34, %v13228_v44  ;;  %v13428_v31 = vsel %vm6293_vm2, %v13362_v40, 0.0 }
 0xaa6   :  { %v13426_v42 = vsel %vm6293_vm2, %v13361_v61, 0.0  ;;  %v24650_v37 = vpop.f32.mrb[4].mxu1 }
 0xaa7   :  { %v13232_v27 = vadd.f32 %v13231_v17, %v13230_v58  ;;  %v13427_v38 = vadd.f32 %v13426_v42, %v13425_v19  ;;  %v24652_v3 = vpop.f32.mrb[5].mxu1  ;;  %v13364_v53 = vmul.f32 %v24650_v37, %v24650_v37  ;;  %v13235_v59 = vsel %vm6293_vm2, %v24650_v37, 0.0 }
 0xaa8   :  { %v13233_v56 = vsel %vm6293_vm2, %v24652_v3, 0.0  ;;  %v13363_v54 = vmul.f32 %v24652_v3, %v24652_v3 }
 0xaa9   :  { %v13429_v21 = vadd.f32 %v13428_v31, %v13427_v38  ;;  %v13234_v47 = vadd.f32 %v13233_v56, %v13232_v27  ;;  %v13432_v15 = vsel %vm6293_vm2, %v13364_v53, 0.0 }
 0xaaa   :  { %v13430_v45 = vsel %vm6293_vm2, %v13363_v54, 0.0  ;;  %v24664_v63 = vpop.f32.mrb[6].mxu1 }
 0xaab   :  { %v13431_v5 = vadd.f32 %v13430_v45, %v13429_v21  ;;  %v24666_v29 = vpop.f32.mrb[7].mxu1  ;;  %v13236_v50 = vadd.f32 %v13235_v59, %v13234_v47  ;;  %v13366_v2 = vmul.f32 %v24664_v63, %v24664_v63  ;;  %v13239_v10 = vsel %vm6293_vm2, %v24664_v63, 0.0 }
 0xaac   :  { %v13237_v22 = vsel %vm6293_vm2, %v24666_v29, 0.0  ;;  %v13365_v24 = vmul.f32 %v24666_v29, %v24666_v29 }
 0xaad   :  { %v13238_v33 = vadd.f32 %v13237_v22, %v13236_v50  ;;  %v13433_v12 = vadd.f32 %v13432_v15, %v13431_v5  ;;  %v13436_v41 = vsel %vm6293_vm2, %v13366_v2, 0.0 }
 0xaae   :  { %v13434_v55 = vsel %vm6293_vm2, %v13365_v24, 0.0  ;;  %v24678_v23 = vpop.f32.mrb[8].mxu1 }
 0xaaf   :  { %v13435_v14 = vadd.f32 %v13434_v55, %v13433_v12  ;;  %v24680_v8 = vpop.f32.mrb[9].mxu1  ;;  %v13240_v25 = vadd.f32 %v13239_v10, %v13238_v33  ;;  %v13368_v46 = vmul.f32 %v24678_v23, %v24678_v23  ;;  %v13243_v35 = vsel %vm6293_vm2, %v24678_v23, 0.0 }
 0xab0   :  { %v13241_v57 = vsel %vm6293_vm2, %v24680_v8, 0.0  ;;  %v13367_v43 = vmul.f32 %v24680_v8, %v24680_v8 }
 0xab1   :  { %v13242_v28 = vadd.f32 %v13241_v57, %v13240_v25  ;;  %v13437_v39 = vadd.f32 %v13436_v41, %v13435_v14  ;;  %v13440_v20 = vsel %vm6293_vm2, %v13368_v46, 0.0 }
 0xab2   :  { %v13438_v51 = vsel %vm6293_vm2, %v13367_v43, 0.0  ;;  %v24692_v48 = vpop.f32.mrb[10].mxu1 }
 0xab3   :  { %v13439_v62 = vadd.f32 %v13438_v51, %v13437_v39  ;;  %v24694_v60 = vpop.f32.mrb[11].mxu1  ;;  %v13244_v7 = vadd.f32 %v13243_v35, %v13242_v28  ;;  %v13370_v18 = vmul.f32 %v24692_v48, %v24692_v48  ;;  %v13247_v0 = vsel %vm6293_vm2, %v24692_v48, 0.0 }
 0xab4   :  { %v13245_v32 = vsel %vm6293_vm2, %v24694_v60, 0.0  ;;  %v13369_v36 = vmul.f32 %v24694_v60, %v24694_v60 }
 0xab5   :  { %v13246_v52 = vadd.f32 %v13245_v32, %v13244_v7  ;;  %v13441_v49 = vadd.f32 %v13440_v20, %v13439_v62  ;;  %v13444_v4 = vsel %vm6293_vm2, %v13370_v18, 0.0 }
 0xab6   :  { %v13442_v13 = vsel %vm6293_vm2, %v13369_v36, 0.0  ;;  %v24706_v30 = vpop.f32.mrb[12].mxu1 }
 0xab7   :  { %v13443_v11 = vadd.f32 %v13442_v13, %v13441_v49  ;;  %v24708_v26 = vpop.f32.mrb[13].mxu1  ;;  %v13248_v44 = vadd.f32 %v13247_v0, %v13246_v52  ;;  %v13372_v19 = vmul.f32 %v24706_v30, %v24706_v30  ;;  %v13251_v17 = vsel %vm6293_vm2, %v24706_v30, 0.0 }
 0xab8   :  { %v13249_v40 = vsel %vm6293_vm2, %v24708_v26, 0.0  ;;  %v13371_v34 = vmul.f32 %v24708_v26, %v24708_v26 }
 0xab9   :  { %v13250_v61 = vadd.f32 %v13249_v40, %v13248_v44  ;;  %v13445_v58 = vadd.f32 %v13444_v4, %v13443_v11  ;;  %v13448_v56 = vsel %vm6293_vm2, %v13372_v19, 0.0 }
 0xaba   :  { %v13446_v42 = vsel %vm6293_vm2, %v13371_v34, 0.0  ;;  %v24720_v27 = vpop.f32.mrb[14].mxu1 }
 0xabb   :  { %v13447_v38 = vadd.f32 %v13446_v42, %v13445_v58  ;;  %v24722_v31 = vpop.f32.mrb[15].mxu1  ;;  %v13252_v53 = vadd.f32 %v13251_v17, %v13250_v61  ;;  %v13374_v54 = vmul.f32 %v24720_v27, %v24720_v27  ;;  %v13255_v5 = vsel %vm6293_vm2, %v24720_v27, 0.0 }
 0xabc   :  { %v13253_v21 = vsel %vm6293_vm2, %v24722_v31, 0.0  ;;  %v13373_v47 = vmul.f32 %v24722_v31, %v24722_v31 }
 0xabd   :  { %v13254_v59 = vadd.f32 %v13253_v21, %v13252_v53  ;;  %v13449_v45 = vadd.f32 %v13448_v56, %v13447_v38  ;;  %v13452_v33 = vsel %vm6293_vm2, %v13374_v54, 0.0 }
 0xabe   :  { %v13450_v50 = vsel %vm6293_vm2, %v13373_v47, 0.0  ;;  %v24734_v15 = vpop.f32.mrb[16].mxu1 }
 0xabf   :  { %v13451_v2 = vadd.f32 %v13450_v50, %v13449_v45  ;;  %v24736_v22 = vpop.f32.mrb[17].mxu1  ;;  %v13256_v24 = vadd.f32 %v13255_v5, %v13254_v59  ;;  %v13376_v12 = vmul.f32 %v24734_v15, %v24734_v15  ;;  %v13259_v41 = vsel %vm6293_vm2, %v24734_v15, 0.0 }
 0xac0   :  { %v13257_v10 = vsel %vm6293_vm2, %v24736_v22, 0.0  ;;  %v13375_v55 = vmul.f32 %v24736_v22, %v24736_v22 }
 0xac1   :  { %v13258_v14 = vadd.f32 %v13257_v10, %v13256_v24  ;;  %v13453_v25 = vadd.f32 %v13452_v33, %v13451_v2  ;;  %v13456_v35 = vsel %vm6293_vm2, %v13376_v12, 0.0 }
 0xac2   :  { %v13454_v46 = vsel %vm6293_vm2, %v13375_v55, 0.0  ;;  %v24748_v57 = vpop.f32.mrb[18].mxu1 }
 0xac3   :  { %v13455_v43 = vadd.f32 %v13454_v46, %v13453_v25  ;;  %v24750_v28 = vpop.f32.mrb[19].mxu1  ;;  %v13260_v39 = vadd.f32 %v13259_v41, %v13258_v14  ;;  %v13378_v51 = vmul.f32 %v24748_v57, %v24748_v57  ;;  %v13263_v32 = vsel %vm6293_vm2, %v24748_v57, 0.0 }
 0xac4   :  { %v13261_v62 = vsel %vm6293_vm2, %v24750_v28, 0.0  ;;  %v13377_v7 = vmul.f32 %v24750_v28, %v24750_v28 }
 0xac5   :  { %v13262_v20 = vadd.f32 %v13261_v62, %v13260_v39  ;;  %v13457_v18 = vadd.f32 %v13456_v35, %v13455_v43  ;;  %v13460_v11 = vsel %vm6293_vm2, %v13378_v51, 0.0 }
 0xac6   :  { %v13458_v36 = vsel %vm6293_vm2, %v13377_v7, 0.0  ;;  %v24762_v52 = vpop.f32.mrb[20].mxu1 }
 0xac7   :  { %v13459_v49 = vadd.f32 %v13458_v36, %v13457_v18  ;;  %v24764_v0 = vpop.f32.mrb[21].mxu1  ;;  %v13264_v13 = vadd.f32 %v13263_v32, %v13262_v20  ;;  %v13380_v44 = vmul.f32 %v24762_v52, %v24762_v52  ;;  %v13267_v61 = vsel %vm6293_vm2, %v24762_v52, 0.0 }
 0xac8   :  { %v13265_v4 = vsel %vm6293_vm2, %v24764_v0, 0.0  ;;  %v13379_v19 = vmul.f32 %v24764_v0, %v24764_v0 }
 0xac9   :  { %v13266_v40 = vadd.f32 %v13265_v4, %v13264_v13  ;;  %v13461_v34 = vadd.f32 %v13460_v11, %v13459_v49  ;;  %v13464_v56 = vsel %vm6293_vm2, %v13380_v44, 0.0 }
 0xaca   :  { %v13462_v58 = vsel %vm6293_vm2, %v13379_v19, 0.0  ;;  %v24776_v17 = vpop.f32.mrb[22].mxu1 }
 0xacb   :  { %v13463_v42 = vadd.f32 %v13462_v58, %v13461_v34  ;;  %v24778_v38 = vpop.f32.mrb[23].mxu1  ;;  %v13268_v53 = vadd.f32 %v13267_v61, %v13266_v40  ;;  %v13382_v54 = vmul.f32 %v24776_v17, %v24776_v17  ;;  %v13271_v5 = vsel %vm6293_vm2, %v24776_v17, 0.0 }
 0xacc   :  { %v13269_v21 = vsel %vm6293_vm2, %v24778_v38, 0.0  ;;  %v13381_v47 = vmul.f32 %v24778_v38, %v24778_v38 }
 0xacd   :  { %v13270_v59 = vadd.f32 %v13269_v21, %v13268_v53  ;;  %v13465_v45 = vadd.f32 %v13464_v56, %v13463_v42  ;;  %v13468_v10 = vsel %vm6293_vm2, %v13382_v54, 0.0 }
 0xace   :  { %v13466_v50 = vsel %vm6293_vm2, %v13381_v47, 0.0  ;;  %v24790_v2 = vpop.f32.mrb[24].mxu1 }
 0xacf   :  { %v13467_v24 = vadd.f32 %v13466_v50, %v13465_v45  ;;  %v24792_v33 = vpop.f32.mrb[25].mxu1  ;;  %v13272_v12 = vadd.f32 %v13271_v5, %v13270_v59  ;;  %v13384_v55 = vmul.f32 %v24790_v2, %v24790_v2  ;;  %v13275_v43 = vsel %vm6293_vm2, %v24790_v2, 0.0 }
 0xad0   :  { %v13273_v14 = vsel %vm6293_vm2, %v24792_v33, 0.0  ;;  %v13383_v25 = vmul.f32 %v24792_v33, %v24792_v33 }
 0xad1   :  { %v13274_v41 = vadd.f32 %v13273_v14, %v13272_v12  ;;  %v13469_v46 = vadd.f32 %v13468_v10, %v13467_v24  ;;  %v13472_v20 = vsel %vm6293_vm2, %v13384_v55, 0.0 }
 0xad2   :  { %v13470_v39 = vsel %vm6293_vm2, %v13383_v25, 0.0  ;;  %v24804_v35 = vpop.f32.mrb[26].mxu1 }
 0xad3   :  { %v13471_v51 = vadd.f32 %v13470_v39, %v13469_v46  ;;  %v24806_v62 = vpop.f32.mrb[27].mxu1  ;;  %v13276_v7 = vadd.f32 %v13275_v43, %v13274_v41  ;;  %v13386_v18 = vmul.f32 %v24804_v35, %v24804_v35  ;;  %v13279_v11 = vsel %vm6293_vm2, %v24804_v35, 0.0 }
 0xad4   :  { %v13277_v32 = vsel %vm6293_vm2, %v24806_v62, 0.0  ;;  %v13385_v36 = vmul.f32 %v24806_v62, %v24806_v62 }
 0xad5   :  { %v13278_v49 = vadd.f32 %v13277_v32, %v13276_v7  ;;  %v13473_v13 = vadd.f32 %v13472_v20, %v13471_v51  ;;  %v13476_v61 = vsel %vm6293_vm2, %v13386_v18, 0.0 }
 0xad6   :  { %v13474_v44 = vsel %vm6293_vm2, %v13385_v36, 0.0  ;;  %v24818_v4 = vpop.f32.mrb[28].mxu1 }
 0xad7   :  { %v13475_v19 = vadd.f32 %v13474_v44, %v13473_v13  ;;  %v24820_v40 = vpop.f32.mrb[29].mxu1  ;;  %v13280_v34 = vadd.f32 %v13279_v11, %v13278_v49  ;;  %v13388_v58 = vmul.f32 %v24818_v4, %v24818_v4  ;;  %v13283_v21 = vsel %vm6293_vm2, %v24818_v4, 0.0 }
 0xad8   :  { %v13281_v42 = vsel %vm6293_vm2, %v24820_v40, 0.0  ;;  %v13387_v53 = vmul.f32 %v24820_v40, %v24820_v40 }
 0xad9   :  { %v13282_v56 = vadd.f32 %v13281_v42, %v13280_v34  ;;  %v13477_v54 = vadd.f32 %v13476_v61, %v13475_v19  ;;  %v13480_v24 = vsel %vm6293_vm2, %v13388_v58, 0.0 }
 0xada   :  { %v13478_v47 = vsel %vm6293_vm2, %v13387_v53, 0.0  ;;  %v24832_v59 = vpop.f32.mrb[30].mxu1 }
 0xadb   :  { %v13479_v45 = vadd.f32 %v13478_v47, %v13477_v54  ;;  %v24834_v5 = vpop.f32.mrb[31].mxu1  ;;  %v13284_v50 = vadd.f32 %v13283_v21, %v13282_v56  ;;  %v13390_v12 = vmul.f32 %v24832_v59, %v24832_v59  ;;  %v13287_v41 = vsel %vm6293_vm2, %v24832_v59, 0.0 }
 0xadc   :  { %v13285_v10 = vsel %vm6293_vm2, %v24834_v5, 0.0  ;;  %v13389_v55 = vmul.f32 %v24834_v5, %v24834_v5 }
 0xadd   :  { %v13286_v14 = vadd.f32 %v13285_v10, %v13284_v50  ;;  %v13481_v25 = vadd.f32 %v13480_v24, %v13479_v45  ;;  %v13484_v20 = vsel %vm6293_vm2, %v13390_v12, 0.0 }
 0xade   :  { %v13482_v46 = vsel %vm6293_vm2, %v13389_v55, 0.0  ;;  %v24846_v43 = vpop.f32.mrb[32].mxu1 }
 0xadf   :  { %v13483_v39 = vadd.f32 %v13482_v46, %v13481_v25  ;;  %v24848_v51 = vpop.f32.mrb[33].mxu1  ;;  %v13288_v7 = vadd.f32 %v13287_v41, %v13286_v14  ;;  %v13392_v18 = vmul.f32 %v24846_v43, %v24846_v43  ;;  %v13291_v11 = vsel %vm6293_vm2, %v24846_v43, 0.0 }
 0xae0   :  { %v13289_v32 = vsel %vm6293_vm2, %v24848_v51, 0.0  ;;  %v13391_v36 = vmul.f32 %v24848_v51, %v24848_v51 }
 0xae1   :  { %v13290_v49 = vadd.f32 %v13289_v32, %v13288_v7  ;;  %v13485_v13 = vadd.f32 %v13484_v20, %v13483_v39  ;;  %v13488_v42 = vsel %vm6293_vm2, %v13392_v18, 0.0 }
 0xae2   :  { %v13486_v44 = vsel %vm6293_vm2, %v13391_v36, 0.0  ;;  %v24860_v19 = vpop.f32.mrb[34].mxu1 }
 0xae3   :  { %v13487_v34 = vadd.f32 %v13486_v44, %v13485_v13  ;;  %v24862_v61 = vpop.f32.mrb[35].mxu1  ;;  %v13292_v58 = vadd.f32 %v13291_v11, %v13290_v49  ;;  %v13394_v53 = vmul.f32 %v24860_v19, %v24860_v19  ;;  %v13295_v45 = vsel %vm6293_vm2, %v24860_v19, 0.0 }
 0xae4   :  { %v13293_v56 = vsel %vm6293_vm2, %v24862_v61, 0.0  ;;  %v13393_v54 = vmul.f32 %v24862_v61, %v24862_v61 }
 0xae5   :  { %v13294_v21 = vadd.f32 %v13293_v56, %v13292_v58  ;;  %v13489_v47 = vadd.f32 %v13488_v42, %v13487_v34  ;;  %v13492_v14 = vsel %vm6293_vm2, %v13394_v53, 0.0 }
 0xae6   :  { %v13490_v50 = vsel %vm6293_vm2, %v13393_v54, 0.0  ;;  %v24874_v24 = vpop.f32.mrb[36].mxu1 }
 0xae7   :  { %v13491_v12 = vadd.f32 %v13490_v50, %v13489_v47  ;;  %v24876_v10 = vpop.f32.mrb[37].mxu1  ;;  %v13296_v55 = vadd.f32 %v13295_v45, %v13294_v21  ;;  %v13396_v25 = vmul.f32 %v24874_v24, %v24874_v24  ;;  %v13299_v20 = vsel %vm6293_vm2, %v24874_v24, 0.0 }
 0xae8   :  { %v13297_v41 = vsel %vm6293_vm2, %v24876_v10, 0.0  ;;  %v13395_v46 = vmul.f32 %v24876_v10, %v24876_v10 }
 0xae9   :  { %v13298_v39 = vadd.f32 %v13297_v41, %v13296_v55  ;;  %v13493_v7 = vadd.f32 %v13492_v14, %v13491_v12  ;;  %v13496_v11 = vsel %vm6293_vm2, %v13396_v25, 0.0 }
 0xaea   :  { %v13494_v18 = vsel %vm6293_vm2, %v13395_v46, 0.0  ;;  %v24888_v32 = vpop.f32.mrb[38].mxu1 }
 0xaeb   :  { %v13495_v36 = vadd.f32 %v13494_v18, %v13493_v7  ;;  %v24890_v49 = vpop.f32.mrb[39].mxu1  ;;  %v13300_v13 = vadd.f32 %v13299_v20, %v13298_v39  ;;  %v13398_v44 = vmul.f32 %v24888_v32, %v24888_v32  ;;  %v13303_v56 = vsel %vm6293_vm2, %v24888_v32, 0.0 }
 0xaec   :  { %v13301_v34 = vsel %vm6293_vm2, %v24890_v49, 0.0  ;;  %v13397_v58 = vmul.f32 %v24890_v49, %v24890_v49 }
 0xaed   :  { %v13302_v42 = vadd.f32 %v13301_v34, %v13300_v13  ;;  %v13497_v53 = vadd.f32 %v13496_v11, %v13495_v36  ;;  %v13500_v12 = vsel %vm6293_vm2, %v13398_v44, 0.0 }
 0xaee   :  { %v13498_v54 = vsel %vm6293_vm2, %v13397_v58, 0.0  ;;  %v24902_v21 = vpop.f32.mrb[40].mxu1 }
 0xaef   :  { %26498 = vst [vmem:[#allocation51_spill] sm:$0xff] %v24902_v21  ;;  %v13499_v47 = vadd.f32 %v13498_v54, %v13497_v53  ;;  %v24904_v45 = vpop.f32.mrb[41].mxu1  ;;  %v13304_v50 = vadd.f32 %v13303_v56, %v13302_v42  ;;  %v13400_v55 = vmul.f32 %v24902_v21, %v24902_v21  ;;  %v13307_v39 = vsel %vm6293_vm2, %v24902_v21, 0.0 }
 0xaf0   :  { %26499 = vst [vmem:[#allocation52_spill] sm:$0xff] %v24904_v45  ;;  %v13305_v14 = vsel %vm6293_vm2, %v24904_v45, 0.0  ;;  %v13399_v25 = vmul.f32 %v24904_v45, %v24904_v45 }
 0xaf1   :  { %v13306_v41 = vadd.f32 %v13305_v14, %v13304_v50  ;;  %v13501_v46 = vadd.f32 %v13500_v12, %v13499_v47  ;;  %v13504_v11 = vsel %vm6293_vm2, %v13400_v55, 0.0 }
 0xaf2   :  { %v13502_v7 = vsel %vm6293_vm2, %v13399_v25, 0.0  ;;  %v24916_v20 = vpop.f32.mrb[42].mxu1 }
 0xaf3   :  { %26500 = vst [vmem:[#allocation53_spill] sm:$0xff] %v24916_v20  ;;  %v13503_v18 = vadd.f32 %v13502_v7, %v13501_v46  ;;  %v24918_v36 = vpop.f32.mrb[43].mxu1  ;;  %v13308_v13 = vadd.f32 %v13307_v39, %v13306_v41  ;;  %v13402_v44 = vmul.f32 %v24916_v20, %v24916_v20  ;;  %v13311_v56 = vsel %vm6293_vm2, %v24916_v20, 0.0 }
 0xaf4   :  { %26501 = vst [vmem:[#allocation54_spill] sm:$0xff] %v24918_v36  ;;  %v13309_v34 = vsel %vm6293_vm2, %v24918_v36, 0.0  ;;  %v13401_v58 = vmul.f32 %v24918_v36, %v24918_v36 }
 0xaf5   :  { %v13310_v42 = vadd.f32 %v13309_v34, %v13308_v13  ;;  %v13505_v53 = vadd.f32 %v13504_v11, %v13503_v18  ;;  %v13508_v14 = vsel %vm6293_vm2, %v13402_v44, 0.0 }
 0xaf6   :  { %v13506_v54 = vsel %vm6293_vm2, %v13401_v58, 0.0  ;;  %v24930_v47 = vpop.f32.mrb[44].mxu1 }
 0xaf7   :  { %26502 = vst [vmem:[#allocation55_spill] sm:$0xff] %v24930_v47  ;;  %v13507_v50 = vadd.f32 %v13506_v54, %v13505_v53  ;;  %v24932_v12 = vpop.f32.mrb[45].mxu1  ;;  %v13312_v55 = vadd.f32 %v13311_v56, %v13310_v42  ;;  %v13404_v25 = vmul.f32 %v24930_v47, %v24930_v47  ;;  %v13315_v18 = vsel %vm6293_vm2, %v24930_v47, 0.0 }
 0xaf8   :  { %26503 = vst [vmem:[#allocation56_spill] sm:$0xff] %v24932_v12  ;;  %v13313_v41 = vsel %vm6293_vm2, %v24932_v12, 0.0  ;;  %v13403_v46 = vmul.f32 %v24932_v12, %v24932_v12 }
 0xaf9   :  { %v13314_v39 = vadd.f32 %v13313_v41, %v13312_v55  ;;  %v13509_v7 = vadd.f32 %v13508_v14, %v13507_v50  ;;  %v13512_v42 = vsel %vm6293_vm2, %v13404_v25, 0.0 }
 0xafa   :  { %v13510_v13 = vsel %vm6293_vm2, %v13403_v46, 0.0  ;;  %v24944_v11 = vpop.f32.mrb[46].mxu1 }
 0xafb   :  { %26504 = vst [vmem:[#allocation57_spill] sm:$0xff] %v24944_v11  ;;  %v13511_v34 = vadd.f32 %v13510_v13, %v13509_v7  ;;  %v24946_v44 = vpop.f32.mrb[47].mxu1  ;;  %v13316_v58 = vadd.f32 %v13315_v18, %v13314_v39  ;;  %v13406_v53 = vmul.f32 %v24944_v11, %v24944_v11  ;;  %v13319_v14 = vsel %vm6293_vm2, %v24944_v11, 0.0 }
 0xafc   :  { %26505 = vst [vmem:[#allocation58_spill] sm:$0xff] %v24946_v44  ;;  %v13317_v56 = vsel %vm6293_vm2, %v24946_v44, 0.0  ;;  %v13405_v54 = vmul.f32 %v24946_v44, %v24946_v44 }
 0xafd   :  { %v13318_v50 = vadd.f32 %v13317_v56, %v13316_v58  ;;  %v13513_v55 = vadd.f32 %v13512_v42, %v13511_v34  ;;  %v13516_v18 = vsel %vm6293_vm2, %v13406_v53, 0.0 }
 0xafe   :  { %v13514_v41 = vsel %vm6293_vm2, %v13405_v54, 0.0  ;;  %v24958_v46 = vpop.f32.mrb[48].mxu1 }
 0xaff   :  { %26506 = vst [vmem:[#allocation59_spill] sm:$0xff] %v24958_v46  ;;  %v13515_v39 = vadd.f32 %v13514_v41, %v13513_v55  ;;  %v24960_v25 = vpop.f32.mrb[49].mxu1  ;;  %v13320_v7 = vadd.f32 %v13319_v14, %v13318_v50  ;;  %v13408_v13 = vmul.f32 %v24958_v46, %v24958_v46  ;;  %v13323_v54 = vsel %vm6293_vm2, %v24958_v46, 0.0 }
 0xb00   :  { %26507 = vst [vmem:[#allocation60_spill] sm:$0xff] %v24960_v25  ;;  %v13321_v58 = vsel %vm6293_vm2, %v24960_v25, 0.0  ;;  %v13407_v34 = vmul.f32 %v24960_v25, %v24960_v25 }
 0xb01   :  { %v13322_v42 = vadd.f32 %v13321_v58, %v13320_v7  ;;  %v13517_v56 = vadd.f32 %v13516_v18, %v13515_v39  ;;  %v13520_v11 = vsel %vm6293_vm2, %v13408_v13, 0.0 }
 0xb02   :  { %v13518_v55 = vsel %vm6293_vm2, %v13407_v34, 0.0  ;;  %v24972_v41 = vpop.f32.mrb[50].mxu1 }
 0xb03   :  { %26508 = vst [vmem:[#allocation3_spill] sm:$0xff] %v24972_v41  ;;  %v13519_v50 = vadd.f32 %v13518_v55, %v13517_v56  ;;  %v24974_v53 = vpop.f32.mrb[51].mxu1  ;;  %v13324_v14 = vadd.f32 %v13323_v54, %v13322_v42  ;;  %v13410_v44 = vmul.f32 %v24972_v41, %v24972_v41  ;;  %v13327_v34 = vsel %vm6293_vm2, %v24972_v41, 0.0 }
 0xb04   :  { %26509 = vst [vmem:[#allocation61_spill] sm:$0xff] %v24974_v53  ;;  %v13325_v7 = vsel %vm6293_vm2, %v24974_v53, 0.0  ;;  %v13409_v39 = vmul.f32 %v24974_v53, %v24974_v53 }
 0xb05   :  { %v13326_v18 = vadd.f32 %v13325_v7, %v13324_v14  ;;  %v13521_v58 = vadd.f32 %v13520_v11, %v13519_v50  ;;  %v13524_v46 = vsel %vm6293_vm2, %v13410_v44, 0.0 }
 0xb06   :  { %v13522_v56 = vsel %vm6293_vm2, %v13409_v39, 0.0  ;;  %v24986_v55 = vpop.f32.mrb[52].mxu1 }
 0xb07   :  { %26510 = vst [vmem:[#allocation62_spill] sm:$0xff] %v24986_v55  ;;  %v13523_v42 = vadd.f32 %v13522_v56, %v13521_v58  ;;  %v24988_v13 = vpop.f32.mrb[53].mxu1  ;;  %v13328_v54 = vadd.f32 %v13327_v34, %v13326_v18  ;;  %v13412_v25 = vmul.f32 %v24986_v55, %v24986_v55  ;;  %v13331_v39 = vsel %vm6293_vm2, %v24986_v55, 0.0 }
 0xb08   :  { %26511 = vst [vmem:[#allocation63_spill] sm:$0xff] %v24988_v13  ;;  %v13329_v14 = vsel %vm6293_vm2, %v24988_v13, 0.0  ;;  %v13411_v11 = vmul.f32 %v24988_v13, %v24988_v13 }
 0xb09   :  { %v13330_v50 = vadd.f32 %v13329_v14, %v13328_v54  ;;  %v13525_v7 = vadd.f32 %v13524_v46, %v13523_v42  ;;  %v13528_v41 = vsel %vm6293_vm2, %v13412_v25, 0.0 }
 0xb0a   :  { %v13526_v58 = vsel %vm6293_vm2, %v13411_v11, 0.0  ;;  %v25000_v56 = vpop.f32.mrb[54].mxu1 }
 0xb0b   :  { %26512 = vst [vmem:[#allocation64_spill] sm:$0xff] %v25000_v56  ;;  %v13527_v18 = vadd.f32 %v13526_v58, %v13525_v7  ;;  %v25002_v44 = vpop.f32.mrb[55].mxu1  ;;  %v13332_v34 = vadd.f32 %v13331_v39, %v13330_v50  ;;  %v13414_v53 = vmul.f32 %v25000_v56, %v25000_v56  ;;  %v13335_v11 = vsel %vm6293_vm2, %v25000_v56, 0.0 }
 0xb0c   :  { %26513 = vst [vmem:[#allocation65_spill] sm:$0xff] %v25002_v44  ;;  %v13333_v54 = vsel %vm6293_vm2, %v25002_v44, 0.0  ;;  %v13413_v46 = vmul.f32 %v25002_v44, %v25002_v44 }
 0xb0d   :  { %v13334_v42 = vadd.f32 %v13333_v54, %v13332_v34  ;;  %v13529_v14 = vadd.f32 %v13528_v41, %v13527_v18  ;;  %v13532_v55 = vsel %vm6293_vm2, %v13414_v53, 0.0 }
 0xb0e   :  { %v13530_v7 = vsel %vm6293_vm2, %v13413_v46, 0.0  ;;  %v25014_v58 = vpop.f32.mrb[56].mxu1 }
 0xb0f   :  { %26514 = vst [vmem:[#allocation66_spill] sm:$0xff] %v25014_v58  ;;  %v13531_v50 = vadd.f32 %v13530_v7, %v13529_v14  ;;  %v25016_v25 = vpop.f32.mrb[57].mxu1  ;;  %v13336_v39 = vadd.f32 %v13335_v11, %v13334_v42  ;;  %v13416_v13 = vmul.f32 %v25014_v58, %v25014_v58  ;;  %v13339_v46 = vsel %vm6293_vm2, %v25014_v58, 0.0 }
 0xb10   :  { %26515 = vst [vmem:[#allocation67_spill] sm:$0xff] %v25016_v25  ;;  %v13337_v34 = vsel %vm6293_vm2, %v25016_v25, 0.0  ;;  %v13415_v41 = vmul.f32 %v25016_v25, %v25016_v25 }
 0xb11   :  { %v13338_v18 = vadd.f32 %v13337_v34, %v13336_v39  ;;  %v13533_v54 = vadd.f32 %v13532_v55, %v13531_v50  ;;  %v13536_v56 = vsel %vm6293_vm2, %v13416_v13, 0.0 }
 0xb12   :  { %v13534_v14 = vsel %vm6293_vm2, %v13415_v41, 0.0  ;;  %v25028_v7 = vpop.f32.mrb[58].mxu1 }
 0xb13   :  { %26516 = vst [vmem:[#allocation68_spill] sm:$0xff] %v25028_v7  ;;  %v13535_v42 = vadd.f32 %v13534_v14, %v13533_v54  ;;  %v25030_v53 = vpop.f32.mrb[59].mxu1  ;;  %v13340_v11 = vadd.f32 %v13339_v46, %v13338_v18  ;;  %v13418_v44 = vmul.f32 %v25028_v7, %v25028_v7  ;;  %v13343_v41 = vsel %vm6293_vm2, %v25028_v7, 0.0 }
 0xb14   :  { %26517 = vst [vmem:[#allocation69_spill] sm:$0xff] %v25030_v53  ;;  %v13341_v39 = vsel %vm6293_vm2, %v25030_v53, 0.0  ;;  %v13417_v55 = vmul.f32 %v25030_v53, %v25030_v53 }
 0xb15   :  { %v13342_v50 = vadd.f32 %v13341_v39, %v13340_v11  ;;  %v13537_v34 = vadd.f32 %v13536_v56, %v13535_v42  ;;  %v13540_v58 = vsel %vm6293_vm2, %v13418_v44, 0.0 }
 0xb16   :  { %v13538_v54 = vsel %vm6293_vm2, %v13417_v55, 0.0  ;;  %v25042_v14 = vpop.f32.mrb[60].mxu1 }
 0xb17   :  { %26518 = vst [vmem:[#allocation70_spill] sm:$0xff] %v25042_v14  ;;  %v13539_v18 = vadd.f32 %v13538_v54, %v13537_v34  ;;  %v25044_v13 = vpop.f32.mrb[61].mxu1  ;;  %v13344_v46 = vadd.f32 %v13343_v41, %v13342_v50  ;;  %v13420_v25 = vmul.f32 %v25042_v14, %v25042_v14  ;;  %v13347_v55 = vsel %vm6293_vm2, %v25042_v14, 0.0 }
 0xb18   :  { %26519 = vst [vmem:[#allocation71_spill] sm:$0xff] %v25044_v13  ;;  %v13345_v11 = vsel %vm6293_vm2, %v25044_v13, 0.0  ;;  %v13419_v56 = vmul.f32 %v25044_v13, %v25044_v13 }
 0xb19   :  { %v13346_v42 = vadd.f32 %v13345_v11, %v13344_v46  ;;  %v13541_v39 = vadd.f32 %v13540_v58, %v13539_v18  ;;  %v13544_v7 = vsel %vm6293_vm2, %v13420_v25, 0.0 }
 0xb1a   :  { %v13542_v34 = vsel %vm6293_vm2, %v13419_v56, 0.0  ;;  %v25056_v54 = vpop.f32.mrb[62].mxu1 }
 0xb1b   :  { %26520 = vst [vmem:[#allocation4_spill] sm:$0xff] %v25056_v54  ;;  %v13543_v50 = vadd.f32 %v13542_v34, %v13541_v39  ;;  %v25058_v44 = vpop.f32.mrb[63].mxu1  ;;  %v13348_v41 = vadd.f32 %v13347_v55, %v13346_v42  ;;  %v13422_v53 = vmul.f32 %v25056_v54, %v25056_v54  ;;  %v13351_v56 = vsel %vm6293_vm2, %v25056_v54, 0.0 }
 0xb1c   :  { %26521 = vst [vmem:[#allocation5_spill] sm:$0xff] %v25058_v44  ;;  %v13349_v46 = vsel %vm6293_vm2, %v25058_v44, 0.0  ;;  %v13421_v58 = vmul.f32 %v25058_v44, %v25058_v44 }
 0xb1d   :  { %v13350_v18 = vadd.f32 %v13349_v46, %v13348_v41  ;;  %v13545_v11 = vadd.f32 %v13544_v7, %v13543_v50  ;;  %v13548_v25 = vsel %vm6293_vm2, %v13422_v53, 0.0  ;;  %v13224_v53 = vld [vmem:[%s25929_s5] sm:$0x1] }
 0xb1e   :  { %v13546_v39 = vsel %vm6293_vm2, %v13421_v58, 0.0 }
 0xb1f   :  { %v13352_v34 = vadd.f32 %v13351_v56, %v13350_v18  ;;  %v13547_v42 = vadd.f32 %v13546_v39, %v13545_v11 }
 0xb21   :  { %v13353_v55 = vrot.slane %v13352_v34, 4  ;;  %v13549_v14 = vadd.f32 %v13548_v25, %v13547_v42  ;;  %v26524_v42 = vld [vmem:[#allocation51_spill] sm:$0xff]  ;;  %v26525_v25 = vld [vmem:[#allocation54_spill] sm:$0xff] }
 0xb23   :  { %v13354_v13 = vadd.f32 %v13353_v55, %v13352_v34  ;;  %v13550_v47 = vrot.slane %v13549_v14, 4  ;;  %v26523_v34 = vld [vmem:[#allocation52_spill] sm:$0xff]  ;;  %v26526_v55 = vld [vmem:[#allocation53_spill] sm:$0xff] }
 0xb25   :  { %v13355_v12 = vrot.slane %v13354_v13, 2  ;;  %v13551_v20 = vadd.f32 %v13550_v47, %v13549_v14  ;;  %v25077_v47 = vld [vmem:[%s25930_s6] sm:$0x1] }
 0xb27   :  { %v13356_v36 = vadd.f32 %v13355_v12, %v13354_v13  ;;  %v13552_v21 = vrot.slane %v13551_v20, 2 }
 0xb29   :  { %v13357_v44 = vrot.slane %v13356_v36, 1  ;;  %v13553_v41 = vadd.f32 %v13552_v21, %v13551_v20  ;;  %v26522_v20 = vld [vmem:[#allocation30_spill] sm:$0xff] }
 0xb2b   :  { %v13358_v7 = vadd.f32 %v13357_v44, %v13356_v36  ;;  %v13554_v50 = vrot.slane %v13553_v41, 1 }
 0xb2d   :  { %v13555_v46 = vadd.f32 %v13554_v50, %v13553_v41  ;;  %v13556_v54 = vmul.f32 0.001953125, %v13358_v7  ;;  %v26527_v41 = vld [vmem:[#allocation56_spill] sm:$0xff]  ;;  %v26528_v7 = vld [vmem:[#allocation55_spill] sm:$0xff] }
 0xb2f   :  { %v13557_v45 = vmul.f32 0.001953125, %v13555_v46  ;;  %v13558_v58 = vmul.f32 %v13556_v54, %v13556_v54  ;;  %v26529_v46 = vld [vmem:[#allocation58_spill] sm:$0xff] }
 0xb31   :  { %v13559_v18 = vsub.f32 %v13557_v45, %v13558_v58  ;;  %v26542_v45 = vld [vmem:[#allocation65_spill] sm:$0xff] }
 0xb33   :  { %v13560_v11 = vadd.f32 1e-05, %v13559_v18  ;;  %v26530_v18 = vld [vmem:[#allocation57_spill] sm:$0xff] }
 0xb35   :  { %19359 = vrsqrt.f32 %v13560_v11 }
 0xb3f   :  { %v19360_v56 = vpop.eup %19359 }
 0xb40   :  { %v13562_v39 = vmul.f32 %v19360_v56, %v13224_v53  ;;  %v26531_v53 = vld [vmem:[#allocation60_spill] sm:$0xff] }
 0xb42   :  { %v25079_v21 = vmul.f32 %v13562_v39, %v13556_v54  ;;  %v25082_v36 = vrot.slane %v13562_v39, %v26522_v20  ;;  %v26532_v39 = vld [vmem:[#allocation59_spill] sm:$0xff] }
 0xb44   :  { %v25088_v12 = vmul.f32 %v25082_v36, %v24629_v9  ;;  %v25092_v14 = vmul.f32 %v24623_v6, %v25082_v36  ;;  %v25096_v13 = vmul.f32 %v25082_v36, %v24639_v16  ;;  %v25100_v54 = vmul.f32 %v24637_v1, %v25082_v36 }
 0xb45   :  { %v25104_v44 = vmul.f32 %v25082_v36, %v24652_v3  ;;  %v25108_v9 = vmul.f32 %v24650_v37, %v25082_v36  ;;  %v25112_v6 = vmul.f32 %v25082_v36, %v24666_v29  ;;  %v25116_v16 = vmul.f32 %v24664_v63, %v25082_v36 }
 0xb46   :  { %v25120_v1 = vmul.f32 %v25082_v36, %v24680_v8  ;;  %v25124_v3 = vmul.f32 %v24678_v23, %v25082_v36  ;;  %v25128_v37 = vmul.f32 %v25082_v36, %v24694_v60  ;;  %v25132_v29 = vmul.f32 %v24692_v48, %v25082_v36 }
 0xb47   :  { %v25136_v63 = vmul.f32 %v25082_v36, %v24708_v26  ;;  %v25140_v8 = vmul.f32 %v24706_v30, %v25082_v36  ;;  %v25144_v23 = vmul.f32 %v25082_v36, %v24722_v31  ;;  %v25148_v60 = vmul.f32 %v24720_v27, %v25082_v36 }
 0xb48   :  { %v25152_v48 = vmul.f32 %v25082_v36, %v24736_v22  ;;  %v25156_v26 = vmul.f32 %v24734_v15, %v25082_v36  ;;  %v25160_v30 = vmul.f32 %v25082_v36, %v24750_v28  ;;  %v25164_v31 = vmul.f32 %v24748_v57, %v25082_v36 }
 0xb49   :  { %v25168_v27 = vmul.f32 %v25082_v36, %v24764_v0  ;;  %v25172_v22 = vmul.f32 %v24762_v52, %v25082_v36  ;;  %v25176_v15 = vmul.f32 %v25082_v36, %v24778_v38  ;;  %v25180_v28 = vmul.f32 %v24776_v17, %v25082_v36 }
 0xb4a   :  { %v25184_v57 = vmul.f32 %v25082_v36, %v24792_v33  ;;  %v25188_v0 = vmul.f32 %v24790_v2, %v25082_v36  ;;  %v25192_v52 = vmul.f32 %v25082_v36, %v24806_v62  ;;  %v25196_v38 = vmul.f32 %v24804_v35, %v25082_v36 }
 0xb4b   :  { %v25200_v17 = vmul.f32 %v25082_v36, %v24820_v40  ;;  %v25204_v33 = vmul.f32 %v24818_v4, %v25082_v36  ;;  %v25208_v2 = vmul.f32 %v25082_v36, %v24834_v5  ;;  %v25212_v62 = vmul.f32 %v24832_v59, %v25082_v36 }
 0xb4c   :  { %v25216_v35 = vmul.f32 %v25082_v36, %v24848_v51  ;;  %v25220_v40 = vmul.f32 %v24846_v43, %v25082_v36  ;;  %v25224_v4 = vmul.f32 %v25082_v36, %v24862_v61  ;;  %v25228_v5 = vmul.f32 %v24860_v19, %v25082_v36 }
 0xb4d   :  { %v25232_v59 = vmul.f32 %v25082_v36, %v24876_v10  ;;  %v25236_v51 = vmul.f32 %v24874_v24, %v25082_v36  ;;  %v25240_v43 = vmul.f32 %v25082_v36, %v24890_v49  ;;  %v25244_v61 = vmul.f32 %v24888_v32, %v25082_v36 }
 0xb4e   :  { %v25248_v19 = vmul.f32 %v25082_v36, %v26523_v34  ;;  %v25252_v10 = vmul.f32 %v26524_v42, %v25082_v36  ;;  %v25256_v24 = vmul.f32 %v25082_v36, %v26525_v25  ;;  %v25260_v49 = vmul.f32 %v26526_v55, %v25082_v36  ;;  %v26534_v42 = vld [vmem:[#allocation61_spill] sm:$0xff]  ;;  %v26536_v55 = vld [vmem:[#allocation3_spill] sm:$0xff] }
 0xb4f   :  { %v25264_v32 = vmul.f32 %v25082_v36, %v26527_v41  ;;  %v25268_v50 = vmul.f32 %v26528_v7, %v25082_v36  ;;  %v25272_v58 = vmul.f32 %v25082_v36, %v26529_v46  ;;  %v25276_v11 = vmul.f32 %v26530_v18, %v25082_v36  ;;  %v26538_v7 = vld [vmem:[#allocation63_spill] sm:$0xff]  ;;  %v26540_v18 = vld [vmem:[#allocation62_spill] sm:$0xff] }
 0xb50   :  { %v25280_v56 = vmul.f32 %v25082_v36, %v26531_v53  ;;  %v25284_v34 = vmul.f32 %v26532_v39, %v25082_v36  ;;  %v25288_v25 = vmul.f32 %v25082_v36, %v26534_v42  ;;  %v25292_v41 = vmul.f32 %v26536_v55, %v25082_v36 }
 0xb51   :  { %v25296_v46 = vmul.f32 %v25082_v36, %v26538_v7  ;;  %v25300_v53 = vmul.f32 %v26540_v18, %v25082_v36  ;;  %v25304_v39 = vmul.f32 %v25082_v36, %v26542_v45 }
 0xb52   :  { %26533 = vst [vmem:[#allocation6_spill] sm:$0xff] %v25284_v34  ;;  %26535 = vst [vmem:[#allocation8_spill] sm:$0xff] %v25288_v25  ;;  %v26544_v34 = vld [vmem:[#allocation64_spill] sm:$0xff]  ;;  %v26546_v25 = vld [vmem:[#allocation67_spill] sm:$0xff] }
 0xb53   :  { %26537 = vst [vmem:[#allocation7_spill] sm:$0xff] %v25292_v41  ;;  %26539 = vst [vmem:[#allocation10_spill] sm:$0xff] %v25296_v46  ;;  %v25308_v42 = vmul.f32 %v26544_v34, %v25082_v36  ;;  %v25312_v55 = vmul.f32 %v25082_v36, %v26546_v25  ;;  %v26548_v41 = vld [vmem:[#allocation66_spill] sm:$0xff]  ;;  %v26550_v46 = vld [vmem:[#allocation69_spill] sm:$0xff] }
 0xb54   :  { %26541 = vst [vmem:[#allocation9_spill] sm:$0xff] %v25300_v53  ;;  %26543 = vst [vmem:[#allocation12_spill] sm:$0xff] %v25304_v39  ;;  %v25316_v7 = vmul.f32 %v26548_v41, %v25082_v36  ;;  %v25320_v18 = vmul.f32 %v25082_v36, %v26550_v46  ;;  %v26551_v53 = vld [vmem:[#allocation68_spill] sm:$0xff]  ;;  %v26553_v39 = vld [vmem:[#allocation71_spill] sm:$0xff] }
 0xb55   :  { %26545 = vst [vmem:[#allocation11_spill] sm:$0xff] %v25308_v42  ;;  %26547 = vst [vmem:[#allocation14_spill] sm:$0xff] %v25312_v55  ;;  %v25324_v45 = vmul.f32 %v26551_v53, %v25082_v36  ;;  %v25328_v34 = vmul.f32 %v25082_v36, %v26553_v39  ;;  %v26554_v42 = vld [vmem:[#allocation70_spill] sm:$0xff]  ;;  %v26555_v55 = vld [vmem:[#allocation5_spill] sm:$0xff]  ;;  %v26557_v53 = vsub.f32 %v25077_v47, %v25079_v21 }
 0xb56   :  { %26549 = vst [vmem:[#allocation13_spill] sm:$0xff] %v25316_v7  ;;  %v25332_v25 = vmul.f32 %v26554_v42, %v25082_v36  ;;  %v25336_v41 = vmul.f32 %v25082_v36, %v26555_v55  ;;  %v26556_v7 = vld [vmem:[#allocation4_spill] sm:$0xff] }
 0xb57   :  { %26552 = vst [vmem:[#allocation16_spill] sm:$0xff] %v25324_v45  ;;  %v25340_v46 = vmul.f32 %v26556_v7, %v25082_v36  ;;  %v25346_v45 = vrot.slane %v26557_v53, %v26522_v20 }
 0xb59   :  { %v25350_v39 = vadd.f32 %v25346_v45, %v25088_v12  ;;  %v25354_v42 = vadd.f32 %v25346_v45, %v25092_v14  ;;  %v25358_v55 = vadd.f32 %v25346_v45, %v25096_v13  ;;  %v25362_v36 = vadd.f32 %v25346_v45, %v25100_v54 }
 0xb5a   :  { %v25366_v47 = vadd.f32 %v25346_v45, %v25104_v44  ;;  %v25370_v21 = vadd.f32 %v25346_v45, %v25108_v9  ;;  %v25374_v20 = vadd.f32 %v25346_v45, %v25112_v6  ;;  %v25378_v12 = vadd.f32 %v25346_v45, %v25116_v16  ;;  %v26564_v7 = vld [vmem:[#allocation7_spill] sm:$0xff]  ;;  %v26566_v53 = vld [vmem:[#allocation10_spill] sm:$0xff] }
 0xb5b   :  { %v25382_v14 = vadd.f32 %v25346_v45, %v25120_v1  ;;  %v25386_v13 = vadd.f32 %v25346_v45, %v25124_v3  ;;  %v25390_v54 = vadd.f32 %v25346_v45, %v25128_v37  ;;  %v25394_v44 = vadd.f32 %v25346_v45, %v25132_v29 }
 0xb5c   :  { %v25398_v9 = vadd.f32 %v25346_v45, %v25136_v63  ;;  %v25402_v6 = vadd.f32 %v25346_v45, %v25140_v8  ;;  %v25406_v16 = vadd.f32 %v25346_v45, %v25144_v23  ;;  %v25410_v1 = vadd.f32 %v25346_v45, %v25148_v60 }
 0xb5d   :  { %v25414_v3 = vadd.f32 %v25346_v45, %v25152_v48  ;;  %v25418_v37 = vadd.f32 %v25346_v45, %v25156_v26  ;;  %v25422_v29 = vadd.f32 %v25346_v45, %v25160_v30  ;;  %v25426_v63 = vadd.f32 %v25346_v45, %v25164_v31 }
 0xb5e   :  { %v25430_v8 = vadd.f32 %v25346_v45, %v25168_v27  ;;  %v25434_v23 = vadd.f32 %v25346_v45, %v25172_v22  ;;  %v25438_v60 = vadd.f32 %v25346_v45, %v25176_v15  ;;  %v25442_v48 = vadd.f32 %v25346_v45, %v25180_v28 }
 0xb5f   :  { %v25446_v26 = vadd.f32 %v25346_v45, %v25184_v57  ;;  %v25450_v30 = vadd.f32 %v25346_v45, %v25188_v0  ;;  %v25454_v31 = vadd.f32 %v25346_v45, %v25192_v52  ;;  %v25458_v27 = vadd.f32 %v25346_v45, %v25196_v38 }
 0xb60   :  { %v25462_v22 = vadd.f32 %v25346_v45, %v25200_v17  ;;  %v25466_v15 = vadd.f32 %v25346_v45, %v25204_v33  ;;  %v25470_v28 = vadd.f32 %v25346_v45, %v25208_v2  ;;  %v25474_v57 = vadd.f32 %v25346_v45, %v25212_v62 }
 0xb61   :  { %v25478_v0 = vadd.f32 %v25346_v45, %v25216_v35  ;;  %v25482_v52 = vadd.f32 %v25346_v45, %v25220_v40  ;;  %v25486_v38 = vadd.f32 %v25346_v45, %v25224_v4  ;;  %v25490_v17 = vadd.f32 %v25346_v45, %v25228_v5 }
 0xb62   :  { %v25494_v33 = vadd.f32 %v25346_v45, %v25232_v59  ;;  %v25498_v2 = vadd.f32 %v25346_v45, %v25236_v51  ;;  %v25502_v62 = vadd.f32 %v25346_v45, %v25240_v43  ;;  %v25506_v35 = vadd.f32 %v25346_v45, %v25244_v61 }
 0xb63   :  { %v25510_v40 = vadd.f32 %v25346_v45, %v25248_v19  ;;  %v25514_v4 = vadd.f32 %v25346_v45, %v25252_v10  ;;  %v25518_v5 = vadd.f32 %v25346_v45, %v25256_v24  ;;  %v25522_v59 = vadd.f32 %v25346_v45, %v25260_v49  ;;  %v26560_v24 = vld [vmem:[#allocation6_spill] sm:$0xff] }
 0xb64   :  { %v25526_v51 = vadd.f32 %v25346_v45, %v25264_v32  ;;  %v25530_v43 = vadd.f32 %v25346_v45, %v25268_v50  ;;  %v25534_v61 = vadd.f32 %v25346_v45, %v25272_v58  ;;  %v25538_v19 = vadd.f32 %v25346_v45, %v25276_v11  ;;  %v26562_v32 = vld [vmem:[#allocation8_spill] sm:$0xff] }
 0xb65   :  { %v25542_v10 = vadd.f32 %v25346_v45, %v25280_v56  ;;  %v25546_v49 = vadd.f32 %v25346_v45, %v26560_v24  ;;  %v25550_v50 = vadd.f32 %v25346_v45, %v26562_v32  ;;  %v25554_v58 = vadd.f32 %v25346_v45, %v26564_v7 }
 0xb66   :  { %26558 = vst [vmem:[#allocation15_spill] sm:$0xff] %v25538_v19  ;;  %v25558_v11 = vadd.f32 %v25346_v45, %v26566_v53  ;;  %v26567_v19 = vld [vmem:[#allocation9_spill] sm:$0xff] }
 0xb67   :  { %26559 = vst [vmem:[#allocation18_spill] sm:$0xff] %v25542_v10  ;;  %26561 = vst [vmem:[#allocation17_spill] sm:$0xff] %v25546_v49  ;;  %v25562_v56 = vadd.f32 %v25346_v45, %v26567_v19  ;;  %v26569_v10 = vld [vmem:[#allocation12_spill] sm:$0xff]  ;;  %v26570_v49 = vld [vmem:[#allocation11_spill] sm:$0xff]  ;;  %v25582_v19 = vadd.f32 %v25346_v45, %v25320_v18  ;;  %v25602_v18 = vadd.f32 %v25346_v45, %v25340_v46  ;;  %v13715_v46 = vmax.f32 %v25390_v54, 0.0 }
 0xb68   :  { %26563 = vst [vmem:[#allocation20_spill] sm:$0xff] %v25550_v50  ;;  %26565 = vst [vmem:[#allocation19_spill] sm:$0xff] %v25554_v58  ;;  %v25566_v24 = vadd.f32 %v25346_v45, %v26569_v10  ;;  %v25570_v32 = vadd.f32 %v25346_v45, %v26570_v49  ;;  %v26571_v50 = vld [vmem:[#allocation14_spill] sm:$0xff]  ;;  %v26572_v58 = vld [vmem:[#allocation13_spill] sm:$0xff]  ;;  %v25590_v49 = vadd.f32 %v25346_v45, %v25328_v34  ;;  %v13708_v34 = vmax.f32 %v25362_v36, 0.0 }
 0xb69   :  { %26568 = vst [vmem:[#allocation22_spill] sm:$0xff] %v25562_v56  ;;  %v25574_v7 = vadd.f32 %v25346_v45, %v26571_v50  ;;  %v25578_v53 = vadd.f32 %v25346_v45, %v26572_v58  ;;  %26573 = vst [vmem:[#allocation21_spill] sm:$0xff] %v25582_v19  ;;  %v26574_v56 = vld [vmem:[#allocation16_spill] sm:$0xff]  ;;  %v25594_v50 = vadd.f32 %v25346_v45, %v25332_v25  ;;  %v13705_v19 = vmax.f32 %v25350_v39, 0.0 }
 0xb6a   :  { %v25586_v10 = vadd.f32 %v25346_v45, %v26574_v56  ;;  %26576 = vst [vmem:[#allocation23_spill] sm:$0xff] %v25590_v49  ;;  %v25598_v58 = vadd.f32 %v25346_v45, %v25336_v41  ;;  %v13706_v56 = vmax.f32 %v25354_v42, 0.0  ;;  %v13709_v49 = vmax.f32 %v25366_v47, 0.0  ;;  %13772 = vst.msk [vmem:[%s25931_s7 + $0x18] sm:$0xff] %vm6293_vm2, %v13708_v34 }
 0xb6b   :  { %26577 = vst [vmem:[#allocation26_spill] sm:$0xff] %v25594_v50  ;;  %v13710_v25 = vmax.f32 %v25370_v21, 0.0  ;;  %v13711_v50 = vmax.f32 %v25374_v20, 0.0  ;;  %v13712_v41 = vmax.f32 %v25378_v12, 0.0  ;;  %v13714_v45 = vmax.f32 %v25386_v13, 0.0  ;;  %13769 = vst.msk [vmem:[%s25931_s7] sm:$0xff] %vm6293_vm2, %v13705_v19 }
 0xb6c   :  { %26575 = vst [vmem:[#allocation24_spill] sm:$0xff] %v25586_v10  ;;  %26578 = vst [vmem:[#allocation25_spill] sm:$0xff] %v25598_v58  ;;  %v13707_v10 = vmax.f32 %v25358_v55, 0.0  ;;  %v13713_v58 = vmax.f32 %v25382_v14, 0.0  ;;  %v13716_v39 = vmax.f32 %v25394_v44, 0.0  ;;  %v13717_v42 = vmax.f32 %v25398_v9, 0.0 }
 0xb6d   :  { %13770 = vst.msk [vmem:[%s25931_s7 + $0x8] sm:$0xff] %vm6293_vm2, %v13706_v56  ;;  %v13718_v55 = vmax.f32 %v25402_v6, 0.0  ;;  %v13719_v36 = vmax.f32 %v25406_v16, 0.0  ;;  %v13720_v47 = vmax.f32 %v25410_v1, 0.0  ;;  %13773 = vst.msk [vmem:[%s25931_s7 + $0x20] sm:$0xff] %vm6293_vm2, %v13709_v49  ;;  %v13721_v21 = vmax.f32 %v25414_v3, 0.0 }
 0xb6e   :  { %13771 = vst.msk [vmem:[%s25931_s7 + $0x10] sm:$0xff] %vm6293_vm2, %v13707_v10  ;;  %13774 = vst.msk [vmem:[%s25931_s7 + $0x28] sm:$0xff] %vm6293_vm2, %v13710_v25  ;;  %v13722_v20 = vmax.f32 %v25418_v37, 0.0  ;;  %v13723_v12 = vmax.f32 %v25422_v29, 0.0  ;;  %v13724_v14 = vmax.f32 %v25426_v63, 0.0  ;;  %v13725_v13 = vmax.f32 %v25430_v8, 0.0 }
 0xb6f   :  { %13775 = vst.msk [vmem:[%s25931_s7 + $0x30] sm:$0xff] %vm6293_vm2, %v13711_v50  ;;  %13776 = vst.msk [vmem:[%s25931_s7 + $0x38] sm:$0xff] %vm6293_vm2, %v13712_v41  ;;  %v13726_v54 = vmax.f32 %v25434_v23, 0.0  ;;  %v13727_v44 = vmax.f32 %v25438_v60, 0.0  ;;  %v13728_v9 = vmax.f32 %v25442_v48, 0.0  ;;  %v13729_v6 = vmax.f32 %v25446_v26, 0.0 }
 0xb70   :  { %13777 = vst.msk [vmem:[%s25931_s7 + $0x40] sm:$0xff] %vm6293_vm2, %v13713_v58  ;;  %13778 = vst.msk [vmem:[%s25931_s7 + $0x48] sm:$0xff] %vm6293_vm2, %v13714_v45  ;;  %v13730_v16 = vmax.f32 %v25450_v30, 0.0  ;;  %v13731_v1 = vmax.f32 %v25454_v31, 0.0  ;;  %v13732_v3 = vmax.f32 %v25458_v27, 0.0  ;;  %v13733_v37 = vmax.f32 %v25462_v22, 0.0 }
 0xb71   :  { %13779 = vst.msk [vmem:[%s25931_s7 + $0x50] sm:$0xff] %vm6293_vm2, %v13715_v46  ;;  %13780 = vst.msk [vmem:[%s25931_s7 + $0x58] sm:$0xff] %vm6293_vm2, %v13716_v39  ;;  %v13734_v29 = vmax.f32 %v25466_v15, 0.0  ;;  %v13735_v63 = vmax.f32 %v25470_v28, 0.0  ;;  %v13736_v8 = vmax.f32 %v25474_v57, 0.0  ;;  %v13737_v23 = vmax.f32 %v25478_v0, 0.0 }
 0xb72   :  { %13781 = vst.msk [vmem:[%s25931_s7 + $0x60] sm:$0xff] %vm6293_vm2, %v13717_v42  ;;  %13782 = vst.msk [vmem:[%s25931_s7 + $0x68] sm:$0xff] %vm6293_vm2, %v13718_v55  ;;  %v13738_v60 = vmax.f32 %v25482_v52, 0.0  ;;  %v13739_v48 = vmax.f32 %v25486_v38, 0.0  ;;  %v13740_v26 = vmax.f32 %v25490_v17, 0.0  ;;  %v13741_v30 = vmax.f32 %v25494_v33, 0.0 }
 0xb73   :  { %13783 = vst.msk [vmem:[%s25931_s7 + $0x70] sm:$0xff] %vm6293_vm2, %v13719_v36  ;;  %13784 = vst.msk [vmem:[%s25931_s7 + $0x78] sm:$0xff] %vm6293_vm2, %v13720_v47  ;;  %v13742_v31 = vmax.f32 %v25498_v2, 0.0  ;;  %v13743_v27 = vmax.f32 %v25502_v62, 0.0  ;;  %v13744_v22 = vmax.f32 %v25506_v35, 0.0  ;;  %v13745_v15 = vmax.f32 %v25510_v40, 0.0 }
 0xb74   :  { %13785 = vst.msk [vmem:[%s25931_s7 + $0x80] sm:$0xff] %vm6293_vm2, %v13721_v21  ;;  %13786 = vst.msk [vmem:[%s25931_s7 + $0x88] sm:$0xff] %vm6293_vm2, %v13722_v20  ;;  %v13746_v28 = vmax.f32 %v25514_v4, 0.0  ;;  %v13747_v57 = vmax.f32 %v25518_v5, 0.0  ;;  %v13748_v0 = vmax.f32 %v25522_v59, 0.0  ;;  %v13749_v52 = vmax.f32 %v25526_v51, 0.0 }
 0xb75   :  { %13787 = vst.msk [vmem:[%s25931_s7 + $0x90] sm:$0xff] %vm6293_vm2, %v13723_v12  ;;  %13788 = vst.msk [vmem:[%s25931_s7 + $0x98] sm:$0xff] %vm6293_vm2, %v13724_v14  ;;  %v13750_v38 = vmax.f32 %v25530_v43, 0.0  ;;  %v13751_v17 = vmax.f32 %v25534_v61, 0.0  ;;  %v26579_v33 = vld [vmem:[#allocation15_spill] sm:$0xff]  ;;  %v26580_v62 = vld [vmem:[#allocation18_spill] sm:$0xff] }
 0xb76   :  { %13789 = vst.msk [vmem:[%s25931_s7 + $0xa0] sm:$0xff] %vm6293_vm2, %v13725_v13  ;;  %13790 = vst.msk [vmem:[%s25931_s7 + $0xa8] sm:$0xff] %vm6293_vm2, %v13726_v54  ;;  %v13752_v2 = vmax.f32 %v26579_v33, 0.0  ;;  %v13753_v35 = vmax.f32 %v26580_v62, 0.0  ;;  %v26581_v40 = vld [vmem:[#allocation17_spill] sm:$0xff]  ;;  %v26582_v5 = vld [vmem:[#allocation20_spill] sm:$0xff] }
 0xb77   :  { %13791 = vst.msk [vmem:[%s25931_s7 + $0xb0] sm:$0xff] %vm6293_vm2, %v13727_v44  ;;  %13792 = vst.msk [vmem:[%s25931_s7 + $0xb8] sm:$0xff] %vm6293_vm2, %v13728_v9  ;;  %v13754_v4 = vmax.f32 %v26581_v40, 0.0  ;;  %v13755_v59 = vmax.f32 %v26582_v5, 0.0  ;;  %v26583_v51 = vld [vmem:[#allocation19_spill] sm:$0xff]  ;;  %v13757_v61 = vmax.f32 %v25558_v11, 0.0 }
 0xb78   :  { %13793 = vst.msk [vmem:[%s25931_s7 + $0xc0] sm:$0xff] %vm6293_vm2, %v13729_v6  ;;  %13794 = vst.msk [vmem:[%s25931_s7 + $0xc8] sm:$0xff] %vm6293_vm2, %v13730_v16  ;;  %v13756_v43 = vmax.f32 %v26583_v51, 0.0  ;;  %v26584_v19 = vld [vmem:[#allocation22_spill] sm:$0xff]  ;;  %v13759_v49 = vmax.f32 %v25566_v24, 0.0  ;;  %v13760_v50 = vmax.f32 %v25570_v32, 0.0 }
 0xb79   :  { %13795 = vst.msk [vmem:[%s25931_s7 + $0xd0] sm:$0xff] %vm6293_vm2, %v13731_v1  ;;  %13796 = vst.msk [vmem:[%s25931_s7 + $0xd8] sm:$0xff] %vm6293_vm2, %v13732_v3  ;;  %v13758_v10 = vmax.f32 %v26584_v19, 0.0  ;;  %v13761_v11 = vmax.f32 %v25574_v7, 0.0  ;;  %v13762_v24 = vmax.f32 %v25578_v53, 0.0  ;;  %v26585_v32 = vld [vmem:[#allocation21_spill] sm:$0xff] }
 0xb7a   :  { %13797 = vst.msk [vmem:[%s25931_s7 + $0xe0] sm:$0xff] %vm6293_vm2, %v13733_v37  ;;  %13798 = vst.msk [vmem:[%s25931_s7 + $0xe8] sm:$0xff] %vm6293_vm2, %v13734_v29  ;;  %v13763_v58 = vmax.f32 %v26585_v32, 0.0  ;;  %v26586_v56 = vld [vmem:[#allocation24_spill] sm:$0xff]  ;;  %v26587_v7 = vld [vmem:[#allocation23_spill] sm:$0xff]  ;;  %v13768_v39 = vmax.f32 %v25602_v18, 0.0 }
 0xb7b   :  { %13799 = vst.msk [vmem:[%s25931_s7 + $0xf0] sm:$0xff] %vm6293_vm2, %v13735_v63  ;;  %13800 = vst.msk [vmem:[%s25931_s7 + $0xf8] sm:$0xff] %vm6293_vm2, %v13736_v8  ;;  %v13764_v34 = vmax.f32 %v26586_v56, 0.0  ;;  %v13765_v53 = vmax.f32 %v26587_v7, 0.0  ;;  %v26588_v25 = vld [vmem:[#allocation26_spill] sm:$0xff]  ;;  %v26589_v45 = vld [vmem:[#allocation25_spill] sm:$0xff] }
 0xb7c   :  { %13801 = vst.msk [vmem:[%s25931_s7 + $0x100] sm:$0xff] %vm6293_vm2, %v13737_v23  ;;  %13802 = vst.msk [vmem:[%s25931_s7 + $0x108] sm:$0xff] %vm6293_vm2, %v13738_v60  ;;  %v13766_v41 = vmax.f32 %v26588_v25, 0.0  ;;  %v13767_v46 = vmax.f32 %v26589_v45, 0.0 }
 0xb7d   :  { %13803 = vst.msk [vmem:[%s25931_s7 + $0x110] sm:$0xff] %vm6293_vm2, %v13739_v48  ;;  %13804 = vst.msk [vmem:[%s25931_s7 + $0x118] sm:$0xff] %vm6293_vm2, %v13740_v26 }
 0xb7e   :  { %13805 = vst.msk [vmem:[%s25931_s7 + $0x120] sm:$0xff] %vm6293_vm2, %v13741_v30  ;;  %13806 = vst.msk [vmem:[%s25931_s7 + $0x128] sm:$0xff] %vm6293_vm2, %v13742_v31 }
 0xb7f   :  { %13807 = vst.msk [vmem:[%s25931_s7 + $0x130] sm:$0xff] %vm6293_vm2, %v13743_v27  ;;  %13808 = vst.msk [vmem:[%s25931_s7 + $0x138] sm:$0xff] %vm6293_vm2, %v13744_v22 }
 0xb80   :  { %13809 = vst.msk [vmem:[%s25931_s7 + $0x140] sm:$0xff] %vm6293_vm2, %v13745_v15  ;;  %13810 = vst.msk [vmem:[%s25931_s7 + $0x148] sm:$0xff] %vm6293_vm2, %v13746_v28 }
 0xb81   :  { %13811 = vst.msk [vmem:[%s25931_s7 + $0x150] sm:$0xff] %vm6293_vm2, %v13747_v57  ;;  %13812 = vst.msk [vmem:[%s25931_s7 + $0x158] sm:$0xff] %vm6293_vm2, %v13748_v0 }
 0xb82   :  { %13813 = vst.msk [vmem:[%s25931_s7 + $0x160] sm:$0xff] %vm6293_vm2, %v13749_v52  ;;  %13814 = vst.msk [vmem:[%s25931_s7 + $0x168] sm:$0xff] %vm6293_vm2, %v13750_v38 }
 0xb83   :  { %13815 = vst.msk [vmem:[%s25931_s7 + $0x170] sm:$0xff] %vm6293_vm2, %v13751_v17  ;;  %13816 = vst.msk [vmem:[%s25931_s7 + $0x178] sm:$0xff] %vm6293_vm2, %v13752_v2 }
 0xb84   :  { %13817 = vst.msk [vmem:[%s25931_s7 + $0x180] sm:$0xff] %vm6293_vm2, %v13753_v35  ;;  %13818 = vst.msk [vmem:[%s25931_s7 + $0x188] sm:$0xff] %vm6293_vm2, %v13754_v4 }
 0xb85   :  { %13819 = vst.msk [vmem:[%s25931_s7 + $0x190] sm:$0xff] %vm6293_vm2, %v13755_v59  ;;  %13820 = vst.msk [vmem:[%s25931_s7 + $0x198] sm:$0xff] %vm6293_vm2, %v13756_v43 }
 0xb86   :  { %13821 = vst.msk [vmem:[%s25931_s7 + $0x1a0] sm:$0xff] %vm6293_vm2, %v13757_v61  ;;  %13822 = vst.msk [vmem:[%s25931_s7 + $0x1a8] sm:$0xff] %vm6293_vm2, %v13758_v10 }
 0xb87   :  { %13823 = vst.msk [vmem:[%s25931_s7 + $0x1b0] sm:$0xff] %vm6293_vm2, %v13759_v49  ;;  %13824 = vst.msk [vmem:[%s25931_s7 + $0x1b8] sm:$0xff] %vm6293_vm2, %v13760_v50 }
 0xb88   :  { %13825 = vst.msk [vmem:[%s25931_s7 + $0x1c0] sm:$0xff] %vm6293_vm2, %v13761_v11  ;;  %13826 = vst.msk [vmem:[%s25931_s7 + $0x1c8] sm:$0xff] %vm6293_vm2, %v13762_v24 }
 0xb89   :  { %13827 = vst.msk [vmem:[%s25931_s7 + $0x1d0] sm:$0xff] %vm6293_vm2, %v13763_v58  ;;  %13828 = vst.msk [vmem:[%s25931_s7 + $0x1d8] sm:$0xff] %vm6293_vm2, %v13764_v34 }
 0xb8a   :  { %13829 = vst.msk [vmem:[%s25931_s7 + $0x1e0] sm:$0xff] %vm6293_vm2, %v13765_v53  ;;  %13830 = vst.msk [vmem:[%s25931_s7 + $0x1e8] sm:$0xff] %vm6293_vm2, %v13766_v41 }
 0xb8b   :  { %13831 = vst.msk [vmem:[%s25931_s7 + $0x1f0] sm:$0xff] %vm6293_vm2, %v13767_v46  ;;  %13832 = vst.msk [vmem:[%s25931_s7 + $0x1f8] sm:$0xff] %vm6293_vm2, %v13768_v39 }

</bundles_post_ra>
